<compile_context>
chip_gen: v7x
topology: tpu7x:2x2x1
jax: 0.10.0
libtpu: 0.0.40
codegen_flags: <defaults>
</compile_context>

<pallas_src>
import jax
import jax.numpy as jnp
from jax.experimental import pallas as pl
from jax.experimental.pallas import tpu as pltpu


# ---------------------------------------------------------------------------
# Fused kernel: all VertexConvs + hyperedge concat + EdgeConv + Linear + ReLU
# ---------------------------------------------------------------------------
def _dhg_fused_kernel(
    regions_ref,      # (tn, t*k*d)   bf16  lane-dense region slab [clusters..., knn, struct]
    wbd_ref,          # (3, k*d, k*k) bf16  block-diag grouped-conv weights [c, n, s]
    mq_ref,           # (3, k*k, k*d) bf16  softmax -> convK1 folding matrices
    seg_ref,          # (k*k, k*k)    f32   segmented-ones (group softmax sums)
    coll_ref,         # (k*d, d)      bf16  shared group-collapse matrix
    place_ref,        # (t, d, t*d)   f32   per-hyperedge lane-slot placement
    w1bd_ref,         # (t*d, t*h)    bf16  block-diag EdgeConv fc1 weight
    seght_ref,        # (t*h, t)      f32   per-hyperedge score reduction (compact)
    expand_ref,       # (t, t*d)      f32   score -> d-lane replication
    cwf_ref,          # (t*d, d_pad)  bf16  final fc weight (zero-padded to 128 lanes)
    bias_ref,         # (8, bias_w)   f32   packed bias rows
    out_ref,          # (tn, d_pad)   f32   lane-dense padded output
):
    f32, bf16 = jnp.float32, jnp.bfloat16

    kd, d = coll_ref.shape
    kk = seg_ref.shape[0]
    t = place_ref.shape[0]
    td = place_ref.shape[2]
    th = seght_ref.shape[0]
    d_pad = out_ref.shape[1]
    n_center = t - 2

    # packed bias rows (single operand / single load for all of them)
    biases = bias_ref[...]
    bkk_rows = biases[0:3, :kk]        # per-branch convKK biases
    bias_cat = biases[3:4, :td]        # per-slot convK1 biases, replicated over d lanes
    b1t = biases[4:5, :th]             # EdgeConv fc1 bias, tiled per slot
    w2t = biases[5:6, :th]             # EdgeConv fc2 weight, tiled per slot
    bf_row = biases[6:7, :d_pad]       # final fc bias (zero-padded)

    # hoist all constant weight loads out of the unrolled hyperedge loop
    wbds = [wbd_ref[i] for i in range(3)]
    mqs = [mq_ref[i] for i in range(3)]
    seg = seg_ref[...]
    coll = coll_ref[...]

    def vertex_conv(region, widx):
        # region: (tn, k*d) bf16.  Heavy ops ride the MXU (bf16 in, f32 accumulate).
        mult = jnp.dot(region, wbds[widx], preferred_element_type=f32)      # (tn, k*k)
        mult = mult + bkk_rows[widx:widx + 1, :]
        # per-group softmax; subtracting the per-row global max is group-invariant
        mult = mult - jnp.max(mult, axis=-1, keepdims=True)
        e = jnp.exp(mult)
        srep = jnp.dot(e, seg, preferred_element_type=f32)                  # group sums, replicated
        p = e * pl.reciprocal(srep, approx=True)
        # q_rep[n, j*d+c] = sum_g wk1[g] * p[n, g*k+j]   (convK1 weight folded in)
        q_rep = jnp.dot(p.astype(bf16), mqs[widx], preferred_element_type=f32)
        prod = (q_rep * region.astype(f32)).astype(bf16)
        return jnp.dot(prod, coll, preferred_element_type=f32)              # (tn, d)

    # ----- VertexConv per hyperedge slot, placed into the lane-concatenated
    #       hyperedge tensor x_cat (tn, t*d); slots = [cluster_0..n_center-1, knn, struct]
    x_cat = None
    for slot in range(t):
        widx = 0 if slot < n_center else (1 if slot == n_center else 2)
        region = regions_ref[:, slot * kd:(slot + 1) * kd]
        contrib = vertex_conv(region, widx)                                  # (tn, d)
        placed = jnp.dot(contrib, place_ref[slot], preferred_element_type=f32)
        x_cat = placed if x_cat is None else x_cat + placed
    x_cat = x_cat + bias_cat                                                 # (tn, t*d)

    # ----- EdgeConv attention over the t hyperedges (compact t-lane softmax) -----
    hidden = jnp.maximum(
        jnp.dot(x_cat.astype(bf16), w1bd_ref[...], preferred_element_type=f32) + b1t,
        0.0)                                                                 # (tn, t*h)
    score = jnp.dot(hidden * w2t, seght_ref[...], preferred_element_type=f32)  # (tn, t)
    # (fc2 bias b2 omitted: adding the same constant to all t scores is a softmax no-op)
    score = score - jnp.max(score, axis=-1, keepdims=True)
    e = jnp.exp(score)
    w = e * pl.reciprocal(jnp.sum(e, axis=-1, keepdims=True), approx=True)   # (tn, t)
    w_rep = jnp.dot(w, expand_ref[...], preferred_element_type=f32)          # (tn, t*d)
    agg_wide = (w_rep * x_cat).astype(bf16)                                  # weighted hyperedges

    # final Linear + ReLU (lane-dense padded output)
    # TODO(synk): Dropout(p=0.5) train-mode mask omitted (eval = identity)
    out = jnp.dot(agg_wide, cwf_ref[...], preferred_element_type=f32) + bf_row
    out_ref[...] = jnp.maximum(out, 0.0)


# ---------------------------------------------------------------------------
# Host-side weight preprocessing (block-diag / segmented / collapse matrices)
# ---------------------------------------------------------------------------
def _prep_vertex_conv(wkk, bkk, wk1, k, d):
    # wkk: (k*k, d) grouped Conv1d weight (kernel==input length), wk1: (k,)
    del bkk  # biases travel separately in the packed bias slab
    w3 = wkk.reshape(k, k, d).astype(jnp.float32)
    eye_k = jnp.eye(k, dtype=jnp.float32)
    # block-diagonal grouped-conv weight: wbd[g*d+c, g*k+j] = w3[g, j, c]
    wbd = jnp.einsum('gjc,gh->gchj', w3, eye_k).reshape(k * d, k * k)
    # mq[g*k+j, j*d+c] = wk1[g]   (folds the convK1 weight into the softmax output)
    mq = jnp.kron(wk1.reshape(k, 1).astype(jnp.float32),
                  jnp.kron(eye_k, jnp.ones((1, d), jnp.float32)))
    return wbd, mq


def dhg_layer_forward(c_feat, n_feat, s_feat, p_vc_c, p_vc_n, p_vc_s, p_edge,
                      *, tile_n=256):
    f32, bf16 = jnp.float32, jnp.bfloat16
    N, n_center, kc, d = c_feat.shape
    kn, ks = n_feat.shape[1], s_feat.shape[1]
    t = n_center + 2
    assert kc == kn == ks, "shared collapse/softmax matrices assume equal k per branch"
    k = kc
    kd, kk, td = k * d, k * k, t * d
    assert N % tile_n == 0, "pad N to a multiple of tile_n in the caller"

    wkk_c, bkk_c, wk1_c, bk1_c = p_vc_c
    wkk_n, bkk_n, wk1_n, bk1_n = p_vc_n
    wkk_s, bkk_s, wk1_s, bk1_s = p_vc_s
    w1, b1, w2, b2, wf, bf = p_edge        # b2 unused: softmax is shift-invariant
    h = w1.shape[1]
    th = t * h
    d_out = wf.shape[1]
    d_pad = ((d_out + 127) // 128) * 128   # lane-dense padded output width (>=128)

    # ----- derived matmul constants (bf16 where they feed the MXU) -----
    wbd_c, mq_c = _prep_vertex_conv(wkk_c, bkk_c, wk1_c, k, d)
    wbd_n, mq_n = _prep_vertex_conv(wkk_n, bkk_n, wk1_n, k, d)
    wbd_s, mq_s = _prep_vertex_conv(wkk_s, bkk_s, wk1_s, k, d)
    wbd_all = jnp.stack([wbd_c, wbd_n, wbd_s]).astype(bf16)            # (3, k*d, k*k)
    mq_all = jnp.stack([mq_c, mq_n, mq_s]).astype(bf16)                # (3, k*k, k*d)

    eye_k = jnp.eye(k, dtype=f32)
    eye_d = jnp.eye(d, dtype=f32)
    eye_t = jnp.eye(t, dtype=f32)
    seg = jnp.kron(eye_k, jnp.ones((k, k), f32))                       # (k*k, k*k)
    coll = jnp.tile(eye_d, (k, 1)).astype(bf16)                        # (k*d, d)
    place = jnp.stack([jnp.zeros((d, td), f32).at[:, i * d:(i + 1) * d].set(eye_d)
                       for i in range(t)])                             # (t, d, t*d)

    w1bd = jnp.kron(eye_t, w1.astype(f32)).astype(bf16)                # (t*d, t*h)
    seght = jnp.kron(eye_t, jnp.ones((h, 1), f32))                     # (t*h, t)
    expand = jnp.kron(eye_t, jnp.ones((1, d), f32))                    # (t, t*d)
    cwf = jnp.zeros((td, d_pad), f32).at[:, :d_out].set(jnp.tile(wf.astype(f32), (t, 1)))
    cwf = cwf.astype(bf16)                                             # (t*d, d_pad)

    # packed (8, bias_w) bias slab
    bias_w = max(128, td, th, kk, d_pad)
    bias_cat = jnp.concatenate(
        [jnp.full((d,), bk1_c[0], f32)] * n_center
        + [jnp.full((d,), bk1_n[0], f32), jnp.full((d,), bk1_s[0], f32)])     # (t*d,)
    bias_pack = jnp.zeros((8, bias_w), f32)
    bias_pack = bias_pack.at[0, :kk].set(bkk_c.astype(f32))
    bias_pack = bias_pack.at[1, :kk].set(bkk_n.astype(f32))
    bias_pack = bias_pack.at[2, :kk].set(bkk_s.astype(f32))
    bias_pack = bias_pack.at[3, :td].set(bias_cat)
    bias_pack = bias_pack.at[4, :th].set(jnp.tile(b1.astype(f32), (t,)))
    bias_pack = bias_pack.at[5, :th].set(jnp.tile(w2.astype(f32), (t,)))
    bias_pack = bias_pack.at[6, :d_out].set(bf.astype(f32))

    # lane-dense bf16 region slab: [cluster_0 .. cluster_{n_center-1}, knn, struct]
    regions = jnp.concatenate(
        [c_feat.reshape(N, n_center * kd), n_feat.reshape(N, kd), s_feat.reshape(N, kd)],
        axis=1).astype(bf16)                                           # (N, t*k*d)

    const2 = lambda i: (0, 0)
    const3 = lambda i: (0, 0, 0)
    out_wide = pl.pallas_call(
        _dhg_fused_kernel,
        out_shape=jax.ShapeDtypeStruct((N, d_pad), f32),
        grid=(N // tile_n,),
        in_specs=[
            pl.BlockSpec((tile_n, t * kd), lambda i: (i, 0)),   # regions
            pl.BlockSpec((3, kd, kk), const3),                  # wbd_all
            pl.BlockSpec((3, kk, kd), const3),                  # mq_all
            pl.BlockSpec((kk, kk), const2),                     # seg
            pl.BlockSpec((kd, d), const2),                      # coll
            pl.BlockSpec((t, d, td), const3),                   # place
            pl.BlockSpec((td, th), const2),                     # w1bd
            pl.BlockSpec((th, t), const2),                      # seght
            pl.BlockSpec((t, td), const2),                      # expand
            pl.BlockSpec((td, d_pad), const2),                  # cwf (padded)
            pl.BlockSpec((8, bias_w), const2),                  # bias_pack
        ],
        out_specs=pl.BlockSpec((tile_n, d_pad), lambda i: (i, 0)),
        compiler_params=pltpu.CompilerParams(
            dimension_semantics=("parallel",)),   # 2 grid steps -> both v7x TensorCores
    )(regions, wbd_all, mq_all, seg, coll, place,
      w1bd, seght, expand, cwf, bias_pack)
    return out_wide[:, :d_out]


# ---------------------------------------------------------------------------
# Parameter init (deterministic, synthetic — no checkpoint load)
# ---------------------------------------------------------------------------
def init_vertex_conv_params(key, k, d):
    k1, k2, k3, k4 = jax.random.split(key, 4)
    # Conv1d(k, k*k, d, groups=k): weight (k*k, 1, d), bias (k*k,)
    wkk = jax.random.normal(k1, (k * k, d), jnp.float32) * 0.1
    bkk = jax.random.normal(k2, (k * k,), jnp.float32) * 0.1
    # Conv1d(k, 1, 1): weight (1, k, 1), bias (1,)
    wk1 = jax.random.normal(k3, (k,), jnp.float32) * 0.1
    bk1 = jax.random.normal(k4, (1,), jnp.float32) * 0.1
    return wkk, bkk, wk1, bk1


def init_edge_fc_params(key, d, h, d_out):
    kk = jax.random.split(key, 6)
    w1 = jax.random.normal(kk[0], (d, h), jnp.float32) * 0.1
    b1 = jax.random.normal(kk[1], (h,), jnp.float32) * 0.1
    w2 = jax.random.normal(kk[2], (h,), jnp.float32) * 0.1
    b2 = jax.random.normal(kk[3], (1,), jnp.float32) * 0.1
    wf = jax.random.normal(kk[4], (d, d_out), jnp.float32) * 0.1
    bf = jax.random.normal(kk[5], (d_out,), jnp.float32) * 0.1
    return w1, b1, w2, b2, wf, bf


# ---------------------------------------------------------------------------
# Pure-JAX references (sanity check for the fused kernel)
# ---------------------------------------------------------------------------
def vertex_conv_ref(region, wkk, bkk, wk1, bk1):
    N, k, d = region.shape
    w3 = wkk.reshape(k, k, d)
    mult = jnp.einsum('ngd,gjd->ngj', region, w3) + bkk.reshape(k, k)[None]
    mult = jax.nn.softmax(mult, axis=-1)
    trans = jnp.einsum('ngj,njd->ngd', mult, region)
    return jnp.einsum('ngd,g->nd', trans, wk1) + bk1[0]


def edge_conv_fc_ref(x, w1, b1, w2, b2, wf, bf):
    hh = jax.nn.relu(jnp.einsum('ntd,dh->nth', x, w1) + b1[None, None, :])
    s = jnp.einsum('nth,h->nt', hh, w2) + b2[0]
    s = jax.nn.softmax(s, axis=1)
    agg = jnp.einsum('nt,ntd->nd', s, x)
    return jax.nn.relu(agg @ wf + bf[None, :])


# ---------------------------------------------------------------------------
if __name__ == "__main__":
    key = jax.random.PRNGKey(0)

    # DHGLayer hyperparameters (small but structurally faithful)
    dim_in, dim_out = 32, 16
    ks_nb, kn_nb, kc_nb = 4, 4, 4          # structured / nearest / cluster neighbors
    n_cluster, n_center = 3, 2
    wu_knn = wu_kmeans = wu_struct = 0
    ite = 1
    hidden_ec = dim_in // 4                # EdgeConv hidden (= dim_in/4)
    t = n_center + 2

    total_N = 1024                         # total vertices in the graph
    ids = jnp.arange(512)                  # indices selected for this pass
    N = ids.shape[0]
    tile_n = 256                           # grid of 2 "parallel" steps (both v7x TCs)

    kf, kc1, kn1, ks1, ke1, kk1 = jax.random.split(key, 6)
    feats = jax.random.normal(kf, (total_N, dim_in), jnp.float32)

    # ----- selection glue (plain JAX; the index gather stays outside the kernel) -----
    idx_struct = (jnp.arange(total_N)[:, None] + jnp.arange(ks_nb)[None, :]) % total_N
    fnrm = feats / (jnp.linalg.norm(feats, axis=1, keepdims=True) + 1e-12)
    sim = fnrm @ fnrm.T
    _, idx_near = jax.lax.top_k(sim, kn_nb)
    # TODO(synk): sklearn KMeans / euclidean_distances have no Pallas equivalent;
    # cached cluster membership replaced by deterministic synthetic indices.
    idx_cluster = jax.random.randint(kk1, (total_N, n_center, kc_nb), 0, total_N)

    def gather(idx):
        return jnp.take(feats, idx.reshape(-1), axis=0).reshape(idx.shape + (dim_in,))

    c_feat = gather(idx_cluster[ids])      # (N, n_center, kc, d)
    n_feat = gather(idx_near[ids])         # (N, kn, d)
    s_feat = gather(idx_struct[ids])       # (N, ks, d)

    # ----- parameters -----
    p_vc_c = init_vertex_conv_params(kc1, kc_nb, dim_in)
    p_vc_n = init_vertex_conv_params(kn1, kn_nb, dim_in)
    p_vc_s = init_vertex_conv_params(ks1, ks_nb, dim_in)
    # (vc_sn from __init__ is never used in forward -> not instantiated)
    p_edge = init_edge_fc_params(ke1, dim_in, hidden_ec, dim_out)

    # all warm-up thresholds satisfied -> all hyperedge branches active
    assert ite >= wu_kmeans and ite >= wu_knn and ite >= wu_struct

    # ----- forward (single fused Pallas kernel) -----
    out = dhg_layer_forward(c_feat, n_feat, s_feat, p_vc_c, p_vc_n, p_vc_s,
                            p_edge, tile_n=tile_n)
    out = jax.block_until_ready(out)

    # ----- sanity check against pure-JAX f32 reference -----
    hyperedges_ref = [vertex_conv_ref(c_feat[:, ci], *p_vc_c)[:, None, :]
                      for ci in range(n_center)]
    hyperedges_ref.append(vertex_conv_ref(n_feat, *p_vc_n)[:, None, :])
    hyperedges_ref.append(vertex_conv_ref(s_feat, *p_vc_s)[:, None, :])
    x_ref = jnp.concatenate(hyperedges_ref, axis=1)
    out_ref = edge_conv_fc_ref(x_ref, *p_edge)

    assert out.shape == (N, dim_out)
    # bf16 inputs/weights + approx reciprocals -> slightly looser tolerance than f32
    max_err = float(jnp.max(jnp.abs(out - out_ref)))
    assert bool(jnp.allclose(out, out_ref, atol=2e-2, rtol=2e-2)), (
        f"mismatch vs reference (max abs err {max_err})")

    print("KERNEL_OK")
</pallas_src>

<mosaic_0001>
module attributes {stable_mosaic.version = 11 : i64} {
  func.func @_dhg_fused_kernel(%arg0: i32, %arg1: memref<256x512xbf16, #tpu.memory_space<vmem>>, %arg2: memref<3x128x16xbf16, #tpu.memory_space<vmem>>, %arg3: memref<3x16x128xbf16, #tpu.memory_space<vmem>>, %arg4: memref<16x16xf32, #tpu.memory_space<vmem>>, %arg5: memref<128x32xbf16, #tpu.memory_space<vmem>>, %arg6: memref<4x32x128xf32, #tpu.memory_space<vmem>>, %arg7: memref<128x32xbf16, #tpu.memory_space<vmem>>, %arg8: memref<32x4xf32, #tpu.memory_space<vmem>>, %arg9: memref<4x128xf32, #tpu.memory_space<vmem>>, %arg10: memref<128x128xbf16, #tpu.memory_space<vmem>>, %arg11: memref<8x128xf32, #tpu.memory_space<vmem>>, %arg12: memref<256x128xf32, #tpu.memory_space<vmem>>) attributes {dimension_semantics = [#tpu.dimension_semantics<parallel>], iteration_bounds = array<i64: 2>, scalar_prefetch = 0 : i64, scratch_operands = 0 : i64, tpu.core_type = #tpu.core_type<tc>, window_params = [{transform_indices = @transform_0, window_bounds = array<i64: 256, 512>}, {pipeline_mode = #tpu.pipeline_mode<synchronous>, transform_indices = @transform_1, window_bounds = array<i64: 3, 128, 16>}, {pipeline_mode = #tpu.pipeline_mode<synchronous>, transform_indices = @transform_2, window_bounds = array<i64: 3, 16, 128>}, {pipeline_mode = #tpu.pipeline_mode<synchronous>, transform_indices = @transform_3, window_bounds = array<i64: 16, 16>}, {pipeline_mode = #tpu.pipeline_mode<synchronous>, transform_indices = @transform_4, window_bounds = array<i64: 128, 32>}, {pipeline_mode = #tpu.pipeline_mode<synchronous>, transform_indices = @transform_5, window_bounds = array<i64: 4, 32, 128>}, {pipeline_mode = #tpu.pipeline_mode<synchronous>, transform_indices = @transform_6, window_bounds = array<i64: 128, 32>}, {pipeline_mode = #tpu.pipeline_mode<synchronous>, transform_indices = @transform_7, window_bounds = array<i64: 32, 4>}, {pipeline_mode = #tpu.pipeline_mode<synchronous>, transform_indices = @transform_8, window_bounds = array<i64: 4, 128>}, {pipeline_mode = #tpu.pipeline_mode<synchronous>, transform_indices = @transform_9, window_bounds = array<i64: 128, 128>}, {pipeline_mode = #tpu.pipeline_mode<synchronous>, transform_indices = @transform_10, window_bounds = array<i64: 8, 128>}, {transform_indices = @transform_11, window_bounds = array<i64: 256, 128>}]} {
    %c0 = arith.constant 0 : index
    %c0_0 = arith.constant 0 : index
    %0 = vector.load %arg11[%c0, %c0_0] : memref<8x128xf32, #tpu.memory_space<vmem>>, vector<8x128xf32>
    %1 = vector.extract_strided_slice %0 {offsets = [0, 0], sizes = [3, 16], strides = [1, 1]} : vector<8x128xf32> to vector<3x16xf32>
    %2 = vector.extract_strided_slice %0 {offsets = [3, 0], sizes = [1, 128], strides = [1, 1]} : vector<8x128xf32> to vector<1x128xf32>
    %3 = vector.extract_strided_slice %0 {offsets = [4, 0], sizes = [1, 32], strides = [1, 1]} : vector<8x128xf32> to vector<1x32xf32>
    %4 = vector.extract_strided_slice %0 {offsets = [5, 0], sizes = [1, 32], strides = [1, 1]} : vector<8x128xf32> to vector<1x32xf32>
    %5 = vector.extract_strided_slice %0 {offsets = [6, 0], sizes = [1, 128], strides = [1, 1]} : vector<8x128xf32> to vector<1x128xf32>
    %c0_1 = arith.constant 0 : index
    %c0_2 = arith.constant 0 : index
    %c0_3 = arith.constant 0 : index
    %6 = vector.load %arg2[%c0_1, %c0_2, %c0_3] : memref<3x128x16xbf16, #tpu.memory_space<vmem>>, vector<1x128x16xbf16>
    %7 = vector.shape_cast %6 : vector<1x128x16xbf16> to vector<128x16xbf16>
    %c1 = arith.constant 1 : index
    %c0_4 = arith.constant 0 : index
    %c0_5 = arith.constant 0 : index
    %8 = vector.load %arg2[%c1, %c0_4, %c0_5] : memref<3x128x16xbf16, #tpu.memory_space<vmem>>, vector<1x128x16xbf16>
    %9 = vector.shape_cast %8 : vector<1x128x16xbf16> to vector<128x16xbf16>
    %c2 = arith.constant 2 : index
    %c0_6 = arith.constant 0 : index
    %c0_7 = arith.constant 0 : index
    %10 = vector.load %arg2[%c2, %c0_6, %c0_7] : memref<3x128x16xbf16, #tpu.memory_space<vmem>>, vector<1x128x16xbf16>
    %11 = vector.shape_cast %10 : vector<1x128x16xbf16> to vector<128x16xbf16>
    %c0_8 = arith.constant 0 : index
    %c0_9 = arith.constant 0 : index
    %c0_10 = arith.constant 0 : index
    %12 = vector.load %arg3[%c0_8, %c0_9, %c0_10] : memref<3x16x128xbf16, #tpu.memory_space<vmem>>, vector<1x16x128xbf16>
    %13 = vector.shape_cast %12 : vector<1x16x128xbf16> to vector<16x128xbf16>
    %c1_11 = arith.constant 1 : index
    %c0_12 = arith.constant 0 : index
    %c0_13 = arith.constant 0 : index
    %14 = vector.load %arg3[%c1_11, %c0_12, %c0_13] : memref<3x16x128xbf16, #tpu.memory_space<vmem>>, vector<1x16x128xbf16>
    %15 = vector.shape_cast %14 : vector<1x16x128xbf16> to vector<16x128xbf16>
    %c2_14 = arith.constant 2 : index
    %c0_15 = arith.constant 0 : index
    %c0_16 = arith.constant 0 : index
    %16 = vector.load %arg3[%c2_14, %c0_15, %c0_16] : memref<3x16x128xbf16, #tpu.memory_space<vmem>>, vector<1x16x128xbf16>
    %17 = vector.shape_cast %16 : vector<1x16x128xbf16> to vector<16x128xbf16>
    %c0_17 = arith.constant 0 : index
    %c0_18 = arith.constant 0 : index
    %18 = vector.load %arg4[%c0_17, %c0_18] : memref<16x16xf32, #tpu.memory_space<vmem>>, vector<16x16xf32>
    %c0_19 = arith.constant 0 : index
    %c0_20 = arith.constant 0 : index
    %19 = vector.load %arg5[%c0_19, %c0_20] : memref<128x32xbf16, #tpu.memory_space<vmem>>, vector<128x32xbf16>
    %c0_21 = arith.constant 0 : index
    %c0_22 = arith.constant 0 : index
    %20 = vector.load %arg1[%c0_21, %c0_22] : memref<256x512xbf16, #tpu.memory_space<vmem>>, vector<256x128xbf16>
    %cst = arith.constant dense<0.000000e+00> : vector<256x16xf32>
    %21 = tpu.matmul %20, %7, %cst {dimension_numbers = #tpu.dot_dimension_numbers<[1], [0], [0], [1], [0, 0, 1, 1], [], []>} : vector<256x128xbf16>, vector<128x16xbf16>, vector<256x16xf32> -> vector<256x16xf32>
    %22 = vector.extract_strided_slice %1 {offsets = [0, 0], sizes = [1, 16], strides = [1, 1]} : vector<3x16xf32> to vector<1x16xf32>
    %23 = vector.broadcast %22 : vector<1x16xf32> to vector<256x16xf32>
    %24 = arith.addf %21, %23 : vector<256x16xf32>
    %cst_23 = arith.constant dense<0xFF800000> : vector<256xf32>
    %25 = vector.multi_reduction <maximumf>, %24, %cst_23 [1] : vector<256x16xf32> to vector<256xf32>
    %26 = vector.shape_cast %25 : vector<256xf32> to vector<256x1xf32>
    %27 = vector.broadcast %26 : vector<256x1xf32> to vector<256x16xf32>
    %28 = arith.subf %24, %27 : vector<256x16xf32>
    %29 = math.exp %28 : vector<256x16xf32>
    %cst_24 = arith.constant dense<0.000000e+00> : vector<256x16xf32>
    %30 = tpu.matmul %29, %18, %cst_24 {dimension_numbers = #tpu.dot_dimension_numbers<[1], [0], [0], [1], [0, 0, 1, 1], [], []>} : vector<256x16xf32>, vector<16x16xf32>, vector<256x16xf32> -> vector<256x16xf32>
    %31 = tpu.reciprocal %30 {approx = true} : vector<256x16xf32> -> vector<256x16xf32>
    %32 = arith.mulf %29, %31 : vector<256x16xf32>
    %33 = arith.truncf %32 : vector<256x16xf32> to vector<256x16xbf16>
    %cst_25 = arith.constant dense<0.000000e+00> : vector<256x128xf32>
    %34 = tpu.matmul %33, %13, %cst_25 {dimension_numbers = #tpu.dot_dimension_numbers<[1], [0], [0], [1], [0, 0, 1, 1], [], []>} : vector<256x16xbf16>, vector<16x128xbf16>, vector<256x128xf32> -> vector<256x128xf32>
    %35 = arith.extf %20 : vector<256x128xbf16> to vector<256x128xf32>
    %36 = arith.mulf %34, %35 : vector<256x128xf32>
    %37 = arith.truncf %36 : vector<256x128xf32> to vector<256x128xbf16>
    %cst_26 = arith.constant dense<0.000000e+00> : vector<256x32xf32>
    %38 = tpu.matmul %37, %19, %cst_26 {dimension_numbers = #tpu.dot_dimension_numbers<[1], [0], [0], [1], [0, 0, 1, 1], [], []>} : vector<256x128xbf16>, vector<128x32xbf16>, vector<256x32xf32> -> vector<256x32xf32>
    %c0_27 = arith.constant 0 : index
    %c0_28 = arith.constant 0 : index
    %c0_29 = arith.constant 0 : index
    %39 = vector.load %arg6[%c0_27, %c0_28, %c0_29] : memref<4x32x128xf32, #tpu.memory_space<vmem>>, vector<1x32x128xf32>
    %40 = vector.shape_cast %39 : vector<1x32x128xf32> to vector<32x128xf32>
    %cst_30 = arith.constant dense<0.000000e+00> : vector<256x128xf32>
    %41 = tpu.matmul %38, %40, %cst_30 {dimension_numbers = #tpu.dot_dimension_numbers<[1], [0], [0], [1], [0, 0, 1, 1], [], []>} : vector<256x32xf32>, vector<32x128xf32>, vector<256x128xf32> -> vector<256x128xf32>
    %c0_31 = arith.constant 0 : index
    %c128 = arith.constant 128 : index
    %42 = vector.load %arg1[%c0_31, %c128] : memref<256x512xbf16, #tpu.memory_space<vmem>>, vector<256x128xbf16>
    %cst_32 = arith.constant dense<0.000000e+00> : vector<256x16xf32>
    %43 = tpu.matmul %42, %7, %cst_32 {dimension_numbers = #tpu.dot_dimension_numbers<[1], [0], [0], [1], [0, 0, 1, 1], [], []>} : vector<256x128xbf16>, vector<128x16xbf16>, vector<256x16xf32> -> vector<256x16xf32>
    %44 = vector.extract_strided_slice %1 {offsets = [0, 0], sizes = [1, 16], strides = [1, 1]} : vector<3x16xf32> to vector<1x16xf32>
    %45 = vector.broadcast %44 : vector<1x16xf32> to vector<256x16xf32>
    %46 = arith.addf %43, %45 : vector<256x16xf32>
    %cst_33 = arith.constant dense<0xFF800000> : vector<256xf32>
    %47 = vector.multi_reduction <maximumf>, %46, %cst_33 [1] : vector<256x16xf32> to vector<256xf32>
    %48 = vector.shape_cast %47 : vector<256xf32> to vector<256x1xf32>
    %49 = vector.broadcast %48 : vector<256x1xf32> to vector<256x16xf32>
    %50 = arith.subf %46, %49 : vector<256x16xf32>
    %51 = math.exp %50 : vector<256x16xf32>
    %cst_34 = arith.constant dense<0.000000e+00> : vector<256x16xf32>
    %52 = tpu.matmul %51, %18, %cst_34 {dimension_numbers = #tpu.dot_dimension_numbers<[1], [0], [0], [1], [0, 0, 1, 1], [], []>} : vector<256x16xf32>, vector<16x16xf32>, vector<256x16xf32> -> vector<256x16xf32>
    %53 = tpu.reciprocal %52 {approx = true} : vector<256x16xf32> -> vector<256x16xf32>
    %54 = arith.mulf %51, %53 : vector<256x16xf32>
    %55 = arith.truncf %54 : vector<256x16xf32> to vector<256x16xbf16>
    %cst_35 = arith.constant dense<0.000000e+00> : vector<256x128xf32>
    %56 = tpu.matmul %55, %13, %cst_35 {dimension_numbers = #tpu.dot_dimension_numbers<[1], [0], [0], [1], [0, 0, 1, 1], [], []>} : vector<256x16xbf16>, vector<16x128xbf16>, vector<256x128xf32> -> vector<256x128xf32>
    %57 = arith.extf %42 : vector<256x128xbf16> to vector<256x128xf32>
    %58 = arith.mulf %56, %57 : vector<256x128xf32>
    %59 = arith.truncf %58 : vector<256x128xf32> to vector<256x128xbf16>
    %cst_36 = arith.constant dense<0.000000e+00> : vector<256x32xf32>
    %60 = tpu.matmul %59, %19, %cst_36 {dimension_numbers = #tpu.dot_dimension_numbers<[1], [0], [0], [1], [0, 0, 1, 1], [], []>} : vector<256x128xbf16>, vector<128x32xbf16>, vector<256x32xf32> -> vector<256x32xf32>
    %c1_37 = arith.constant 1 : index
    %c0_38 = arith.constant 0 : index
    %c0_39 = arith.constant 0 : index
    %61 = vector.load %arg6[%c1_37, %c0_38, %c0_39] : memref<4x32x128xf32, #tpu.memory_space<vmem>>, vector<1x32x128xf32>
    %62 = vector.shape_cast %61 : vector<1x32x128xf32> to vector<32x128xf32>
    %cst_40 = arith.constant dense<0.000000e+00> : vector<256x128xf32>
    %63 = tpu.matmul %60, %62, %cst_40 {dimension_numbers = #tpu.dot_dimension_numbers<[1], [0], [0], [1], [0, 0, 1, 1], [], []>} : vector<256x32xf32>, vector<32x128xf32>, vector<256x128xf32> -> vector<256x128xf32>
    %64 = arith.addf %41, %63 : vector<256x128xf32>
    %c0_41 = arith.constant 0 : index
    %c256 = arith.constant 256 : index
    %65 = vector.load %arg1[%c0_41, %c256] : memref<256x512xbf16, #tpu.memory_space<vmem>>, vector<256x128xbf16>
    %cst_42 = arith.constant dense<0.000000e+00> : vector<256x16xf32>
    %66 = tpu.matmul %65, %9, %cst_42 {dimension_numbers = #tpu.dot_dimension_numbers<[1], [0], [0], [1], [0, 0, 1, 1], [], []>} : vector<256x128xbf16>, vector<128x16xbf16>, vector<256x16xf32> -> vector<256x16xf32>
    %67 = vector.extract_strided_slice %1 {offsets = [1, 0], sizes = [1, 16], strides = [1, 1]} : vector<3x16xf32> to vector<1x16xf32>
    %68 = vector.broadcast %67 : vector<1x16xf32> to vector<256x16xf32>
    %69 = arith.addf %66, %68 : vector<256x16xf32>
    %cst_43 = arith.constant dense<0xFF800000> : vector<256xf32>
    %70 = vector.multi_reduction <maximumf>, %69, %cst_43 [1] : vector<256x16xf32> to vector<256xf32>
    %71 = vector.shape_cast %70 : vector<256xf32> to vector<256x1xf32>
    %72 = vector.broadcast %71 : vector<256x1xf32> to vector<256x16xf32>
    %73 = arith.subf %69, %72 : vector<256x16xf32>
    %74 = math.exp %73 : vector<256x16xf32>
    %cst_44 = arith.constant dense<0.000000e+00> : vector<256x16xf32>
    %75 = tpu.matmul %74, %18, %cst_44 {dimension_numbers = #tpu.dot_dimension_numbers<[1], [0], [0], [1], [0, 0, 1, 1], [], []>} : vector<256x16xf32>, vector<16x16xf32>, vector<256x16xf32> -> vector<256x16xf32>
    %76 = tpu.reciprocal %75 {approx = true} : vector<256x16xf32> -> vector<256x16xf32>
    %77 = arith.mulf %74, %76 : vector<256x16xf32>
    %78 = arith.truncf %77 : vector<256x16xf32> to vector<256x16xbf16>
    %cst_45 = arith.constant dense<0.000000e+00> : vector<256x128xf32>
    %79 = tpu.matmul %78, %15, %cst_45 {dimension_numbers = #tpu.dot_dimension_numbers<[1], [0], [0], [1], [0, 0, 1, 1], [], []>} : vector<256x16xbf16>, vector<16x128xbf16>, vector<256x128xf32> -> vector<256x128xf32>
    %80 = arith.extf %65 : vector<256x128xbf16> to vector<256x128xf32>
    %81 = arith.mulf %79, %80 : vector<256x128xf32>
    %82 = arith.truncf %81 : vector<256x128xf32> to vector<256x128xbf16>
    %cst_46 = arith.constant dense<0.000000e+00> : vector<256x32xf32>
    %83 = tpu.matmul %82, %19, %cst_46 {dimension_numbers = #tpu.dot_dimension_numbers<[1], [0], [0], [1], [0, 0, 1, 1], [], []>} : vector<256x128xbf16>, vector<128x32xbf16>, vector<256x32xf32> -> vector<256x32xf32>
    %c2_47 = arith.constant 2 : index
    %c0_48 = arith.constant 0 : index
    %c0_49 = arith.constant 0 : index
    %84 = vector.load %arg6[%c2_47, %c0_48, %c0_49] : memref<4x32x128xf32, #tpu.memory_space<vmem>>, vector<1x32x128xf32>
    %85 = vector.shape_cast %84 : vector<1x32x128xf32> to vector<32x128xf32>
    %cst_50 = arith.constant dense<0.000000e+00> : vector<256x128xf32>
    %86 = tpu.matmul %83, %85, %cst_50 {dimension_numbers = #tpu.dot_dimension_numbers<[1], [0], [0], [1], [0, 0, 1, 1], [], []>} : vector<256x32xf32>, vector<32x128xf32>, vector<256x128xf32> -> vector<256x128xf32>
    %87 = arith.addf %64, %86 : vector<256x128xf32>
    %c0_51 = arith.constant 0 : index
    %c384 = arith.constant 384 : index
    %88 = vector.load %arg1[%c0_51, %c384] : memref<256x512xbf16, #tpu.memory_space<vmem>>, vector<256x128xbf16>
    %cst_52 = arith.constant dense<0.000000e+00> : vector<256x16xf32>
    %89 = tpu.matmul %88, %11, %cst_52 {dimension_numbers = #tpu.dot_dimension_numbers<[1], [0], [0], [1], [0, 0, 1, 1], [], []>} : vector<256x128xbf16>, vector<128x16xbf16>, vector<256x16xf32> -> vector<256x16xf32>
    %90 = vector.extract_strided_slice %1 {offsets = [2, 0], sizes = [1, 16], strides = [1, 1]} : vector<3x16xf32> to vector<1x16xf32>
    %91 = vector.broadcast %90 : vector<1x16xf32> to vector<256x16xf32>
    %92 = arith.addf %89, %91 : vector<256x16xf32>
    %cst_53 = arith.constant dense<0xFF800000> : vector<256xf32>
    %93 = vector.multi_reduction <maximumf>, %92, %cst_53 [1] : vector<256x16xf32> to vector<256xf32>
    %94 = vector.shape_cast %93 : vector<256xf32> to vector<256x1xf32>
    %95 = vector.broadcast %94 : vector<256x1xf32> to vector<256x16xf32>
    %96 = arith.subf %92, %95 : vector<256x16xf32>
    %97 = math.exp %96 : vector<256x16xf32>
    %cst_54 = arith.constant dense<0.000000e+00> : vector<256x16xf32>
    %98 = tpu.matmul %97, %18, %cst_54 {dimension_numbers = #tpu.dot_dimension_numbers<[1], [0], [0], [1], [0, 0, 1, 1], [], []>} : vector<256x16xf32>, vector<16x16xf32>, vector<256x16xf32> -> vector<256x16xf32>
    %99 = tpu.reciprocal %98 {approx = true} : vector<256x16xf32> -> vector<256x16xf32>
    %100 = arith.mulf %97, %99 : vector<256x16xf32>
    %101 = arith.truncf %100 : vector<256x16xf32> to vector<256x16xbf16>
    %cst_55 = arith.constant dense<0.000000e+00> : vector<256x128xf32>
    %102 = tpu.matmul %101, %17, %cst_55 {dimension_numbers = #tpu.dot_dimension_numbers<[1], [0], [0], [1], [0, 0, 1, 1], [], []>} : vector<256x16xbf16>, vector<16x128xbf16>, vector<256x128xf32> -> vector<256x128xf32>
    %103 = arith.extf %88 : vector<256x128xbf16> to vector<256x128xf32>
    %104 = arith.mulf %102, %103 : vector<256x128xf32>
    %105 = arith.truncf %104 : vector<256x128xf32> to vector<256x128xbf16>
    %cst_56 = arith.constant dense<0.000000e+00> : vector<256x32xf32>
    %106 = tpu.matmul %105, %19, %cst_56 {dimension_numbers = #tpu.dot_dimension_numbers<[1], [0], [0], [1], [0, 0, 1, 1], [], []>} : vector<256x128xbf16>, vector<128x32xbf16>, vector<256x32xf32> -> vector<256x32xf32>
    %c3 = arith.constant 3 : index
    %c0_57 = arith.constant 0 : index
    %c0_58 = arith.constant 0 : index
    %107 = vector.load %arg6[%c3, %c0_57, %c0_58] : memref<4x32x128xf32, #tpu.memory_space<vmem>>, vector<1x32x128xf32>
    %108 = vector.shape_cast %107 : vector<1x32x128xf32> to vector<32x128xf32>
    %cst_59 = arith.constant dense<0.000000e+00> : vector<256x128xf32>
    %109 = tpu.matmul %106, %108, %cst_59 {dimension_numbers = #tpu.dot_dimension_numbers<[1], [0], [0], [1], [0, 0, 1, 1], [], []>} : vector<256x32xf32>, vector<32x128xf32>, vector<256x128xf32> -> vector<256x128xf32>
    %110 = arith.addf %87, %109 : vector<256x128xf32>
    %111 = vector.broadcast %2 : vector<1x128xf32> to vector<256x128xf32>
    %112 = arith.addf %110, %111 : vector<256x128xf32>
    %113 = arith.truncf %112 : vector<256x128xf32> to vector<256x128xbf16>
    %c0_60 = arith.constant 0 : index
    %c0_61 = arith.constant 0 : index
    %114 = vector.load %arg7[%c0_60, %c0_61] : memref<128x32xbf16, #tpu.memory_space<vmem>>, vector<128x32xbf16>
    %cst_62 = arith.constant dense<0.000000e+00> : vector<256x32xf32>
    %115 = tpu.matmul %113, %114, %cst_62 {dimension_numbers = #tpu.dot_dimension_numbers<[1], [0], [0], [1], [0, 0, 1, 1], [], []>} : vector<256x128xbf16>, vector<128x32xbf16>, vector<256x32xf32> -> vector<256x32xf32>
    %116 = vector.broadcast %3 : vector<1x32xf32> to vector<256x32xf32>
    %117 = arith.addf %115, %116 : vector<256x32xf32>
    %cst_63 = arith.constant 0.000000e+00 : f32
    %118 = vector.broadcast %cst_63 : f32 to vector<256x32xf32>
    %119 = arith.maximumf %117, %118 : vector<256x32xf32>
    %120 = vector.broadcast %4 : vector<1x32xf32> to vector<256x32xf32>
    %121 = arith.mulf %119, %120 : vector<256x32xf32>
    %c0_64 = arith.constant 0 : index
    %c0_65 = arith.constant 0 : index
    %122 = vector.load %arg8[%c0_64, %c0_65] : memref<32x4xf32, #tpu.memory_space<vmem>>, vector<32x4xf32>
    %cst_66 = arith.constant dense<0.000000e+00> : vector<256x4xf32>
    %123 = tpu.matmul %121, %122, %cst_66 {dimension_numbers = #tpu.dot_dimension_numbers<[1], [0], [0], [1], [0, 0, 1, 1], [], []>} : vector<256x32xf32>, vector<32x4xf32>, vector<256x4xf32> -> vector<256x4xf32>
    %cst_67 = arith.constant dense<0xFF800000> : vector<256xf32>
    %124 = vector.multi_reduction <maximumf>, %123, %cst_67 [1] : vector<256x4xf32> to vector<256xf32>
    %125 = vector.shape_cast %124 : vector<256xf32> to vector<256x1xf32>
    %126 = vector.broadcast %125 : vector<256x1xf32> to vector<256x4xf32>
    %127 = arith.subf %123, %126 : vector<256x4xf32>
    %128 = math.exp %127 : vector<256x4xf32>
    %cst_68 = arith.constant dense<0.000000e+00> : vector<256xf32>
    %129 = vector.multi_reduction <add>, %128, %cst_68 [1] : vector<256x4xf32> to vector<256xf32>
    %130 = vector.shape_cast %129 : vector<256xf32> to vector<256x1xf32>
    %131 = tpu.reciprocal %130 {approx = true} : vector<256x1xf32> -> vector<256x1xf32>
    %132 = vector.broadcast %131 : vector<256x1xf32> to vector<256x4xf32>
    %133 = arith.mulf %128, %132 : vector<256x4xf32>
    %c0_69 = arith.constant 0 : index
    %c0_70 = arith.constant 0 : index
    %134 = vector.load %arg9[%c0_69, %c0_70] : memref<4x128xf32, #tpu.memory_space<vmem>>, vector<4x128xf32>
    %cst_71 = arith.constant dense<0.000000e+00> : vector<256x128xf32>
    %135 = tpu.matmul %133, %134, %cst_71 {dimension_numbers = #tpu.dot_dimension_numbers<[1], [0], [0], [1], [0, 0, 1, 1], [], []>} : vector<256x4xf32>, vector<4x128xf32>, vector<256x128xf32> -> vector<256x128xf32>
    %136 = arith.mulf %135, %112 : vector<256x128xf32>
    %137 = arith.truncf %136 : vector<256x128xf32> to vector<256x128xbf16>
    %c0_72 = arith.constant 0 : index
    %c0_73 = arith.constant 0 : index
    %138 = vector.load %arg10[%c0_72, %c0_73] : memref<128x128xbf16, #tpu.memory_space<vmem>>, vector<128x128xbf16>
    %cst_74 = arith.constant dense<0.000000e+00> : vector<256x128xf32>
    %139 = tpu.matmul %137, %138, %cst_74 {dimension_numbers = #tpu.dot_dimension_numbers<[1], [0], [0], [1], [0, 0, 1, 1], [], []>} : vector<256x128xbf16>, vector<128x128xbf16>, vector<256x128xf32> -> vector<256x128xf32>
    %140 = vector.broadcast %5 : vector<1x128xf32> to vector<256x128xf32>
    %141 = arith.addf %139, %140 : vector<256x128xf32>
    %cst_75 = arith.constant 0.000000e+00 : f32
    %142 = vector.broadcast %cst_75 : f32 to vector<256x128xf32>
    %143 = arith.maximumf %141, %142 : vector<256x128xf32>
    %c0_76 = arith.constant 0 : index
    %c0_77 = arith.constant 0 : index
    %144 = vector.load %arg12[%c0_76, %c0_77] : memref<256x128xf32, #tpu.memory_space<vmem>>, vector<256x128xf32>
    tpu.vector_store %arg12[%c0_76, %c0_77], %143 {strides = array<i32>} : memref<256x128xf32, #tpu.memory_space<vmem>>, vector<256x128xf32>,
    return
  }
  func.func @transform_0(%arg0: i32) -> (i32, i32) {
    %c0_i32 = arith.constant 0 : i32
    %c0_i32_0 = arith.constant 0 : i32
    return %arg0, %c0_i32 : i32, i32
  }
  func.func @transform_1(%arg0: i32) -> (i32, i32, i32) {
    %c0_i32 = arith.constant 0 : i32
    %c0_i32_0 = arith.constant 0 : i32
    %c0_i32_1 = arith.constant 0 : i32
    %c0_i32_2 = arith.constant 0 : i32
    return %c0_i32, %c0_i32_0, %c0_i32_1 : i32, i32, i32
  }
  func.func @transform_2(%arg0: i32) -> (i32, i32, i32) {
    %c0_i32 = arith.constant 0 : i32
    %c0_i32_0 = arith.constant 0 : i32
    %c0_i32_1 = arith.constant 0 : i32
    %c0_i32_2 = arith.constant 0 : i32
    return %c0_i32, %c0_i32_0, %c0_i32_1 : i32, i32, i32
  }
  func.func @transform_3(%arg0: i32) -> (i32, i32) {
    %c0_i32 = arith.constant 0 : i32
    %c0_i32_0 = arith.constant 0 : i32
    %c0_i32_1 = arith.constant 0 : i32
    return %c0_i32, %c0_i32_0 : i32, i32
  }
  func.func @transform_4(%arg0: i32) -> (i32, i32) {
    %c0_i32 = arith.constant 0 : i32
    %c0_i32_0 = arith.constant 0 : i32
    %c0_i32_1 = arith.constant 0 : i32
    return %c0_i32, %c0_i32_0 : i32, i32
  }
  func.func @transform_5(%arg0: i32) -> (i32, i32, i32) {
    %c0_i32 = arith.constant 0 : i32
    %c0_i32_0 = arith.constant 0 : i32
    %c0_i32_1 = arith.constant 0 : i32
    %c0_i32_2 = arith.constant 0 : i32
    return %c0_i32, %c0_i32_0, %c0_i32_1 : i32, i32, i32
  }
  func.func @transform_6(%arg0: i32) -> (i32, i32) {
    %c0_i32 = arith.constant 0 : i32
    %c0_i32_0 = arith.constant 0 : i32
    %c0_i32_1 = arith.constant 0 : i32
    return %c0_i32, %c0_i32_0 : i32, i32
  }
  func.func @transform_7(%arg0: i32) -> (i32, i32) {
    %c0_i32 = arith.constant 0 : i32
    %c0_i32_0 = arith.constant 0 : i32
    %c0_i32_1 = arith.constant 0 : i32
    return %c0_i32, %c0_i32_0 : i32, i32
  }
  func.func @transform_8(%arg0: i32) -> (i32, i32) {
    %c0_i32 = arith.constant 0 : i32
    %c0_i32_0 = arith.constant 0 : i32
    %c0_i32_1 = arith.constant 0 : i32
    return %c0_i32, %c0_i32_0 : i32, i32
  }
  func.func @transform_9(%arg0: i32) -> (i32, i32) {
    %c0_i32 = arith.constant 0 : i32
    %c0_i32_0 = arith.constant 0 : i32
    %c0_i32_1 = arith.constant 0 : i32
    return %c0_i32, %c0_i32_0 : i32, i32
  }
  func.func @transform_10(%arg0: i32) -> (i32, i32) {
    %c0_i32 = arith.constant 0 : i32
    %c0_i32_0 = arith.constant 0 : i32
    %c0_i32_1 = arith.constant 0 : i32
    return %c0_i32, %c0_i32_0 : i32, i32
  }
  func.func @transform_11(%arg0: i32) -> (i32, i32) {
    %c0_i32 = arith.constant 0 : i32
    %c0_i32_0 = arith.constant 0 : i32
    return %arg0, %c0_i32 : i32, i32
  }
}

</mosaic_0001>

<bundles_post_ra>
// kernel: tpu_custom_call.1
= control target key start
LH: loop header
LB: loop body
LE: loop exit
PB: predicated region body
PF: predicated region fallthrough
CT: control target
= control target key end

     0   :  { %16 = vsyncpa [#allocation3], 0  ;;  %s16046_s0 = inlined_call_operand.hbm [shape: bf16[512,512], index: 0, kind: input, shape index: {}]   ;;  %s16047_s1 = inlined_call_operand.vmem [shape: bf16[3,128,16], index: 1, kind: input, shape index: {}]   ;;  %s16048_s2 = inlined_call_operand.vmem [shape: bf16[3,16,128], index: 2, kind: input, shape index: {}]   ;;  %s16049_s3 = inlined_call_operand.vmem [shape: f32[16,16], index: 3, kind: input, shape index: {}]   ;;  %s16050_s4 = inlined_call_operand.vmem [shape: bf16[128,32], index: 4, kind: input, shape index: {}]   ;;  %s16051_s5 = inlined_call_operand.vmem [shape: f32[4,32,128], index: 5, kind: input, shape index: {}]   ;;  %s16052_s6 = inlined_call_operand.vmem [shape: bf16[128,32], index: 6, kind: input, shape index: {}]   ;;  %s16053_s7 = inlined_call_operand.vmem [shape: f32[32,4], index: 7, kind: input, shape index: {}]   ;;  %s16054_s8 = inlined_call_operand.vmem [shape: f32[4,128], index: 8, kind: input, shape index: {}]   ;;  %s16055_s9 = inlined_call_operand.vmem [shape: bf16[128,128], index: 9, kind: input, shape index: {}]   ;;  %s16056_s10 = inlined_call_operand.vmem [shape: f32[8,128], index: 10, kind: input, shape index: {}]   ;;  %s16057_s11 = inlined_call_operand.hbm [shape: f32[512,128], index: 11, kind: output, shape index: {}]  }
   0x1   :  { %18 = vsyncpa [#allocation3 + $0x1], 0 }
   0x2   :  { %19 = vsyncpa [#allocation4], 0 }
   0x3   :  { %21 = vsyncpa [#allocation4 + $0x1], 0  ;;  %s12849_s17 = smov 0   ;;  %s12851_s18 = smov 0  }
   0x4   :  { %s12853_s19 = smov 0   ;;  %s12855_s20 = smov 0  }
   0x5 LB: > { %16075 = sst [smem:[#allocation8_spill]] %s12777_s19  ;;  %s12870_s21 = sadd.s32 4294967295, %s12781_s20   ;;  %s12781_s20 = sphi %s12855_s20, %s16151_s20   ;;  %s12777_s19 = sphi %s12853_s19, %s16148_s19   ;;  %s12773_s18 = sphi %s12851_s18, %s16150_s18   ;;  %s12769_s17 = sphi %s12849_s17, %s16149_s17  }
   0x6   : > { %s9186_s22 = sadd.s32 4294967294, %s12781_s20   ;;  %s12874_s23 = sadd.s32 1, %s12781_s20  }
   0x7   : > { %s34_s24 = sadd.s32 1, %s12777_s19  ;;  %s31_s25 = ssub.s32 %s12781_s20, %s12874_s23 }
   0x8   : > { %p41_p0 = scmp.ne.s32.totalorder %s12777_s19, %s12773_s18  ;;  %p32_p1 = scmp.eq.s32.totalorder %s31_s25, 0 }
   0x9   : > { %p42_p2 = scmp.eq.s32.totalorder %s12781_s20, 0  ;;  %p47_p3 = scmp.ne.s32.totalorder %s12773_s18, %s12769_s17 }
   0xa   : > { %p48_p4 = scmp.eq.s32.totalorder %s12870_s21, 0  ;;  %p281_p7 = scmp.eq.s32.totalorder %s12870_s21, 1 }
   0xb   : > { %s12886_s26 = scalar_select %p32_p1, %s12777_s19, %s34_s24  }
   0xc   : > { %p12888_p5 = por %p42_p2, %p41_p0  ;;  %p12892_p6 = por %p48_p4, %p47_p3 }
   0xd   : > { %16076 = sst [smem:[#allocation9_spill]] %s12886_s26  ;;  %p287_p8 = scmp.eq.s32.totalorder %s9186_s22, 1 }
   0xe   : > { %p11729_p10 = scmp.lt.s32.totalorder %s12781_s20, 2  ;;  %p12899_p11 = por %p281_p7, %p41_p0 }
   0xf   : > { %p12903_p12 = por %p287_p8, %p47_p3  ;;  %s337_s12 = sand.u32 1, %s12777_s19  }
  0x10   : > { %s16079_s29 = scalar_select %p12899_p11, 1, 0 }
  0x11   : > { %s16080_s30 = scalar_select %p12903_p12, 1, 0 }
  0x12   : > { %s9750_s13 = sshll.u32 %s12781_s20, 13  ;;  %s9189_s14 = sshll.u32 %s337_s12, 9 }
  0x13   : > { %s12912_s24 = scalar_lea.hbm %s16046_s0, %s9750_s13  ;;  %s341_s22 = scalar_lea.vmem [#allocation2], %s9189_s14 }
  0x14   : > { %s349_s25 = sshll.u32 %s341_s22, 4  ;;  %p12916_p13 = pnand %p11729_p10, %p12888_p5  ;;  %s12920_s25 = int_to_ptr.vmem [resolvable:$true] %s349_s25 }
  0x15   : > { %s12922_s19 = scalar_lea.sflag [#allocation3], %s337_s12  ;;  %s12685_s15 = scalar_lea.hbm %s12912_s24, 8192 }
  0x16   : > { %p12686_p0 = scmp.ne.s32.totalorder %s12912_s24, %s12685_s15  ;;  %p12687_p1 = pneg %p12916_p13 }
  0x17   : > { %s12690_s14 = scalar_lea.hbm %s16046_s0, 16384  ;;  %p12691_p4 = scmp.lt.u32.totalorder %s12912_s24, %s16046_s0 }
  0x18   : > { %p12688_p2 = pnand %p12687_p1, %p12686_p0  ;;  %p12692_p5 = scmp.lt.u32.totalorder %s12690_s14, %s12685_s15 }
  0x19   : > { %p12694_p8 = scmp.lt.u32.totalorder %s12685_s15, %s12912_s24 }
  0x1a   : > { %p12689_p3 = pneg %p12688_p2  ;;  %p12693_p7 = por %p12692_p5, %p12691_p4 }
  0x1c   : > { %p12695_p10 = por %p12694_p8, %p12693_p7 }
  0x1e   : > { %p12696_p9 = pnand %p12695_p10, %p12689_p3 }
  0x20   : > { %12699 = shalt.err (!%p12696_p9)
}
  0x21   : > { %s12700_s12 = scalar_lea.vmem %s12920_s25, 8192  ;;  %s12783_s13 = smov [#allocation2]  }
  0x22   : > { %p12701_p0 = scmp.ne.s32.totalorder %s12920_s25, %s12700_s12  ;;  %s12705_s27 = sshll.u32 %s12783_s13, 4  ;;  %s12706_s27 = int_to_ptr.vmem [resolvable:$false] %s12705_s27 }
  0x23   : > { %s12707_s16 = scalar_lea.vmem %s12706_s27, 16384  ;;  %p12708_p11 = scmp.lt.s32.totalorder %s12920_s25, %s12706_s27 }
  0x24   : > { %p12703_p2 = pnand %p12701_p0, %p12687_p1  ;;  %p12709_p4 = scmp.lt.s32.totalorder %s12707_s16, %s12700_s12 }
  0x26   : > { %p12704_p12 = pneg %p12703_p2  ;;  %p12710_p5 = por %p12709_p4, %p12708_p11 }
  0x28   : > { %p12711_p7 = pnand %p12710_p5, %p12704_p12 }
  0x2a   : > { %12714 = shalt.err (!%p12711_p7)
}
  0x2b   : > { %s12784_s15 = smov 256   ;;  %s12785_s14 = smov 16  }
  0x2c   : > { %11724 = dma.hbm_to_vmem [thread:$0]  (!%p12916_p13), %s12912_s24, 8192, %s12920_s25, %s12922_s19, %s12784_s15, %s12784_s15, %s12785_s14  }
  0x2d   : > { %p9193_p9 = scmp.ge.s32.totalorder %s12781_s20, 1  ;;  %p357_p1 = scmp.lt.s32.totalorder %s12781_s20, 3 }
  0x2f   : > { %p358_p3 = pnand %p9193_p9, %p357_p1 }
  0x31   : > { %361 = sbr.rel (%p358_p3) target bundleno = 5071 (0x13cf), region = 64 }
  0x38   : > { %s12953_s22 = sand.u32 1, %s12773_s18  }
  0x39   : > { %s9194_s12 = sshll.u32 %s12953_s22, 9  ;;  %s364_s13 = scalar_lea.sflag [#allocation3], %s12953_s22 }
  0x3a   : > { %s12957_s27 = scalar_lea.vmem [#allocation2], %s9194_s12 }
  0x3b   : > { %12760 = dma.done.wait (%p12892_p6), %s364_s13, 8192  }
  0x3c   : > { %12762 = vsyncadd (%p12892_p6), %s364_s13, 4294959104  ;;  %v12966_v0 = vld [vmem:[%s16047_s1] sm:$0xff]   ;;  %v11768_v1 = vld [vmem:[%s16047_s1 + $0x8] sm:$0xff]   ;;  %v518_v56 = vlaneseq  ;;  %vm827_vm0 = vcmask 130048   ;;  %vm3266_vm1 = vcmask 261120   ;;  %vm8079_vm2 = vcmask 31744  }
  0x3d   : > { %10409 = vmatprep.subr.bf16.mxu0 %v12966_v0  ;;  %v11769_v2 = vld [vmem:[%s16047_s1 + $0x10] sm:$0xff]   ;;  %v11770_v3 = vld [vmem:[%s16047_s1 + $0x18] sm:$0xff]   ;;  %v486_v4 = vld [vmem:[%s12957_s27] sm:$0xf]  ;;  %vm8529_vm3 = vcmask 1043456   ;;  %s9195_s28 = sshll.u32 %s12953_s22, 8 }
  0x3e   : > { %10410 = vmatpush3.bf16.msra.mxu0 %v12966_v0  ;;  %v487_v5 = vld [vmem:[%s12957_s27 + $0x10] sm:$0xf]  ;;  %v11771_v7 = vld [vmem:[%s16047_s1 + $0x20] sm:$0xff]   ;;  %v11772_v8 = vld [vmem:[%s16047_s1 + $0x28] sm:$0xff]   ;;  %v13023_v57 = vshrl.u32 %v518_v56, 7  ;;  %s15933_s14 = scalar_lea.vmem [#allocation5], %s9195_s28 }
  0x3f   : > { %10411 = vmatprep.subr.bf16.mxu0 %v11768_v1  ;;  %v9232_v6 = vcombine.low %v486_v4, %v487_v5  ;;  %v11773_v9 = vld [vmem:[%s16047_s1 + $0x30] sm:$0xff]   ;;  %v11774_v10 = vld [vmem:[%s16047_s1 + $0x38] sm:$0xff]   ;;  %v488_v11 = vld [vmem:[%s12957_s27 + $0x20] sm:$0xf]  ;;  %s9113_s12 = sshll.u32 %s15933_s14, 4  ;;  %p16144_p11 = scmp.ne.s32.totalorder %s16079_s29, 0  ;;  %s15999_s12 = int_to_ptr.vmem [resolvable:$true] %s9113_s12 }
  0x40   : > { %v489_v12 = vld [vmem:[%s12957_s27 + $0x30] sm:$0xf]  ;;  %v490_v13 = vld [vmem:[%s12957_s27 + $0x40] sm:$0xf]  ;;  %16082 = vst [vmem:[#allocation10_spill] sm:$0xff] %v13023_v57  ;;  %v520_v58 = vsub.s32 0, %v13023_v57 }
  0x41   : > { %10425 = vmatprep.mubr.bf16.mxu0 %v9232_v6  ;;  %v491_v14 = vld [vmem:[%s12957_s27 + $0x50] sm:$0xf]  ;;  %v9233_v15 = vcombine.low %v488_v11, %v489_v12  ;;  %v492_v17 = vld [vmem:[%s12957_s27 + $0x60] sm:$0xf]  ;;  %s12715_s24 = scalar_lea.vmem %s15999_s12, 4096  ;;  %s12786_s25 = smov [#allocation5]  }
  0x42   : > { %10412 = vmatpush3.bf16.msra.mxu0 %v11768_v1  ;;  %v9234_v16 = vcombine.low %v490_v13, %v491_v14  ;;  %v493_v18 = vld [vmem:[%s12957_s27 + $0x70] sm:$0xf]  ;;  %v494_v19 = vld [vmem:[%s12957_s27 + $0x80] sm:$0xf]  ;;  %p12716_p6 = scmp.ne.s32.totalorder %s15999_s12, %s12715_s24  ;;  %s12719_s16 = sshll.u32 %s12786_s25, 4  ;;  %s12720_s16 = int_to_ptr.vmem [resolvable:$false] %s12719_s16 }
  0x43   : > { %10413 = vmatprep.subr.bf16.mxu0 %v11769_v2  ;;  %v495_v20 = vld [vmem:[%s12957_s27 + $0x90] sm:$0xf]  ;;  %v9235_v21 = vcombine.low %v492_v17, %v493_v18  ;;  %v496_v23 = vld [vmem:[%s12957_s27 + $0xa0] sm:$0xf]  ;;  %s12721_s15 = scalar_lea.vmem %s12720_s16, 8192  ;;  %p12722_p8 = scmp.lt.s32.totalorder %s15999_s12, %s12720_s16 }
  0x44   : > { %v9236_v22 = vcombine.low %v494_v19, %v495_v20  ;;  %v497_v24 = vld [vmem:[%s12957_s27 + $0xb0] sm:$0xf]  ;;  %v498_v25 = vld [vmem:[%s12957_s27 + $0xc0] sm:$0xf]  ;;  %p12717_p12 = pnand %p12716_p6, %p16144_p11  ;;  %p12723_p10 = scmp.lt.s32.totalorder %s12721_s15, %s12715_s24 }
  0x45   : > { %v499_v26 = vld [vmem:[%s12957_s27 + $0xd0] sm:$0xf]  ;;  %v9237_v27 = vcombine.low %v496_v23, %v497_v24  ;;  %v500_v29 = vld [vmem:[%s12957_s27 + $0xe0] sm:$0xf] }
  0x46   : > { %10414 = vmatpush3.bf16.msra.mxu0 %v11769_v2  ;;  %v9238_v28 = vcombine.low %v498_v25, %v499_v26  ;;  %v501_v30 = vld [vmem:[%s12957_s27 + $0xf0] sm:$0xf]  ;;  %v502_v31 = vld [vmem:[%s12957_s27 + $0x100] sm:$0xf]  ;;  %p12718_p13 = pneg %p12717_p12  ;;  %p12724_p0 = por %p12723_p10, %p12722_p8 }
  0x47   : > { %10415 = vmatprep.subr.bf16.mxu0 %v11770_v3  ;;  %v503_v32 = vld [vmem:[%s12957_s27 + $0x110] sm:$0xf]  ;;  %v9239_v33 = vcombine.low %v500_v29, %v501_v30  ;;  %v504_v35 = vld [vmem:[%s12957_s27 + $0x120] sm:$0xf] }
  0x48   : > { %v9240_v34 = vcombine.low %v502_v31, %v503_v32  ;;  %v505_v36 = vld [vmem:[%s12957_s27 + $0x130] sm:$0xf]  ;;  %v506_v37 = vld [vmem:[%s12957_s27 + $0x140] sm:$0xf]  ;;  %p12725_p2 = pnand %p12724_p0, %p12718_p13 }
  0x49   : > { %v507_v38 = vld [vmem:[%s12957_s27 + $0x150] sm:$0xf]  ;;  %v9241_v39 = vcombine.low %v504_v35, %v505_v36  ;;  %v508_v41 = vld [vmem:[%s12957_s27 + $0x160] sm:$0xf] }
  0x4a   : > { %10416 = vmatpush3.bf16.msra.mxu0 %v11770_v3  ;;  %v9242_v40 = vcombine.low %v506_v37, %v507_v38  ;;  %v509_v42 = vld [vmem:[%s12957_s27 + $0x170] sm:$0xf]  ;;  %v510_v43 = vld [vmem:[%s12957_s27 + $0x180] sm:$0xf] }
  0x4b   : > { %10417 = vmatprep.subr.bf16.mxu0 %v11771_v7  ;;  %v511_v44 = vld [vmem:[%s12957_s27 + $0x190] sm:$0xf]  ;;  %v9243_v45 = vcombine.low %v508_v41, %v509_v42  ;;  %v512_v47 = vld [vmem:[%s12957_s27 + $0x1a0] sm:$0xf] }
  0x4c   : > { %v9244_v46 = vcombine.low %v510_v43, %v511_v44  ;;  %v513_v48 = vld [vmem:[%s12957_s27 + $0x1b0] sm:$0xf]  ;;  %v514_v49 = vld [vmem:[%s12957_s27 + $0x1c0] sm:$0xf] }
  0x4d   : > { %v515_v50 = vld [vmem:[%s12957_s27 + $0x1d0] sm:$0xf]  ;;  %v9245_v51 = vcombine.low %v512_v47, %v513_v48  ;;  %v516_v53 = vld [vmem:[%s12957_s27 + $0x1e0] sm:$0xf] }
  0x4e   : > { %10418 = vmatpush3.bf16.msra.mxu0 %v11771_v7  ;;  %v9246_v52 = vcombine.low %v514_v49, %v515_v50  ;;  %v517_v54 = vld [vmem:[%s12957_s27 + $0x1f0] sm:$0xf]  ;;  %v409_v59 = vld [vmem:[%s16056_s10] sm:$0xff] }
  0x4f   : > { %10419 = vmatprep.subr.bf16.mxu0 %v11772_v8  ;;  %v9247_v55 = vcombine.low %v516_v53, %v517_v54  ;;  %v13029_v60 = vrot.slane %v409_v59, %v520_v58  ;;  %v468_v44 = vld [vmem:[%s16049_s3] sm:$0xff] }
  0x52   : > { %10420 = vmatpush3.bf16.msra.mxu0 %v11772_v8 }
  0x53   : > { %10421 = vmatprep.subr.bf16.mxu0 %v11773_v9 }
  0x56   : > { %10422 = vmatpush3.bf16.msra.mxu0 %v11773_v9 }
  0x57   : > { %10423 = vmatprep.subr.bf16.mxu0 %v11774_v10 }
  0x5a   : > { %10424 = vmatpush3.bf16.msra.mxu0 %v11774_v10 }
  0x5d   : > { %10426 = vmatmul.mubr.bf16.vlgmr.msra.gmra.mrb[0].mxu0 %v9233_v15 }
  0x5e   : > { %10429 = vmatprep.mubr.bf16.mxu0 %v9234_v16 }
  0x65   : > { %10430 = vmatmul.mubr.bf16.gmra.mrb[4].mxu0 %v9235_v21 }
  0x66   : > { %10433 = vmatprep.mubr.bf16.mxu0 %v9236_v22 }
  0x6d   : > { %10434 = vmatmul.mubr.bf16.gmra.mrb[8].mxu0 %v9237_v27 }
  0x6e   : > { %10437 = vmatprep.mubr.bf16.mxu0 %v9238_v28 }
  0x75   : > { %10438 = vmatmul.mubr.bf16.gmra.mrb[12].mxu0 %v9239_v33 }
  0x76   : > { %10441 = vmatprep.mubr.bf16.mxu0 %v9240_v34 }
  0x7d   : > { %10442 = vmatmul.mubr.bf16.gmra.mrb[16].mxu0 %v9241_v39 }
  0x7e   : > { %10445 = vmatprep.mubr.bf16.mxu0 %v9242_v40 }
  0x85   : > { %10446 = vmatmul.mubr.bf16.gmra.mrb[20].mxu0 %v9243_v45  ;;  %v469_v45 = vld [vmem:[%s16049_s3 + $0x8] sm:$0xff] }
  0x86   : > { %10449 = vmatprep.mubr.bf16.mxu0 %v9244_v46  ;;  %v13115_v48 = vpack.c.bf16 %v469_v45, %v468_v44 }
  0x88   : > { %11564 = vmatprep.subr.bf16.mxu1 %v13115_v48 }
  0x89   : > { %11566 = vmatpush3.bf16.msra.mxu1 %v13115_v48 }
  0x8d   : > { %10450 = vmatmul.mubr.bf16.gmra.mrb[24].mxu0 %v9245_v51 }
  0x8e   : > { %10453 = vmatprep.mubr.bf16.mxu0 %v9246_v52 }
  0x95   : > { %10454 = vmatmul.mubr.bf16.gmra.mrb[28].mxu0 %v9247_v55 }
 0x130   : > { %v10427_v61 = vpop.f32.mrb[0].mxu0 }
 0x131   : > { %v700_v62 = vpop.f32.mrb[1].mxu0  ;;  %v13032_v63 = vadd.f32 %v10427_v61, %v13029_v60 }
 0x132   : > { %v10428_v1 = vpop.f32.mrb[2].mxu0  ;;  %v13035_v2 = vadd.f32 %v700_v62, %v13029_v60 }
 0x133   : > { %v703_v3 = vpop.f32.mrb[3].mxu0  ;;  %v834_v4 = vsel %vm827_vm0, %v13032_v63, -inf  ;;  %v13040_v5 = vadd.f32 %v10428_v1, %v13029_v60 }
 0x134   : > { %835 = vmax.xlane.f32.xlu1 %v834_v4  ;;  %v828_v6 = vsel %vm827_vm0, %v13035_v2, -inf  ;;  %v13045_v7 = vadd.f32 %v703_v3, %v13029_v60 }
 0x135   : > { %829 = vmax.xlane.f32.xlu0 %v828_v6  ;;  %v837_v8 = vsel %vm827_vm0, %v13040_v5, -inf }
 0x136   : > { %v831_v10 = vsel %vm827_vm0, %v13045_v7, -inf }
 0x138   : > { %v10431_v9 = vpop.f32.mrb[4].mxu0  ;;  %838 = vmax.xlane.f32.xlu1 %v837_v8 }
 0x139   : > { %v716_v11 = vpop.f32.mrb[5].mxu0  ;;  %832 = vmax.xlane.f32.xlu0 %v831_v10  ;;  %v13060_v17 = vadd.f32 %v10431_v9, %v13029_v60 }
 0x13a   : > { %v10432_v12 = vpop.f32.mrb[6].mxu0  ;;  %v13052_v13 = vadd.f32 %v716_v11, %v13029_v60 }
 0x13b   : > { %v719_v14 = vpop.f32.mrb[7].mxu0  ;;  %v13065_v19 = vadd.f32 %v10432_v12, %v13029_v60  ;;  %v846_v21 = vsel %vm827_vm0, %v13060_v17, -inf }
 0x13c   : > { %v840_v15 = vsel %vm827_vm0, %v13052_v13, -inf  ;;  %v13057_v16 = vadd.f32 %v719_v14, %v13029_v60 }
 0x13d   : > { %841 = vmax.xlane.f32.xlu0 %v840_v15  ;;  %v849_v24 = vsel %vm827_vm0, %v13065_v19, -inf }
 0x13e   : > { %v843_v18 = vsel %vm827_vm0, %v13057_v16, -inf }
 0x13f   : > { %844 = vmax.xlane.f32.xlu1 %v843_v18 }
 0x140   : > { %v10435_v20 = vpop.f32.mrb[8].mxu0 }
 0x141   : > { %v732_v22 = vpop.f32.mrb[9].mxu0  ;;  %847 = vmax.xlane.f32.xlu0 %v846_v21  ;;  %v13080_v29 = vadd.f32 %v10435_v20, %v13029_v60 }
 0x142   : > { %v10436_v23 = vpop.f32.mrb[10].mxu0  ;;  %v13072_v25 = vadd.f32 %v732_v22, %v13029_v60 }
 0x143   : > { %v735_v26 = vpop.f32.mrb[11].mxu0  ;;  %850 = vmax.xlane.f32.xlu1 %v849_v24  ;;  %v13085_v31 = vadd.f32 %v10436_v23, %v13029_v60  ;;  %v858_v33 = vsel %vm827_vm0, %v13080_v29, -inf }
 0x144   : > { %v852_v27 = vsel %vm827_vm0, %v13072_v25, -inf  ;;  %v13077_v28 = vadd.f32 %v735_v26, %v13029_v60 }
 0x145   : > { %853 = vmax.xlane.f32.xlu0 %v852_v27  ;;  %v861_v36 = vsel %vm827_vm0, %v13085_v31, -inf }
 0x146   : > { %v855_v30 = vsel %vm827_vm0, %v13077_v28, -inf }
 0x147   : > { %856 = vmax.xlane.f32.xlu1 %v855_v30 }
 0x148   : > { %v10439_v32 = vpop.f32.mrb[12].mxu0 }
 0x149   : > { %v748_v34 = vpop.f32.mrb[13].mxu0  ;;  %859 = vmax.xlane.f32.xlu0 %v858_v33  ;;  %v13100_v41 = vadd.f32 %v10439_v32, %v13029_v60 }
 0x14a   : > { %v10440_v35 = vpop.f32.mrb[14].mxu0  ;;  %v13092_v37 = vadd.f32 %v748_v34, %v13029_v60 }
 0x14b   : > { %v751_v38 = vpop.f32.mrb[15].mxu0  ;;  %862 = vmax.xlane.f32.xlu1 %v861_v36  ;;  %v13105_v43 = vadd.f32 %v10440_v35, %v13029_v60  ;;  %v870_v47 = vsel %vm827_vm0, %v13100_v41, -inf }
 0x14c   : > { %v864_v39 = vsel %vm827_vm0, %v13092_v37, -inf  ;;  %v13097_v40 = vadd.f32 %v751_v38, %v13029_v60 }
 0x14d   : > { %865 = vmax.xlane.f32.xlu0 %v864_v39  ;;  %v873_v51 = vsel %vm827_vm0, %v13105_v43, -inf }
 0x14e   : > { %v867_v42 = vsel %vm827_vm0, %v13097_v40, -inf }
 0x14f   : > { %868 = vmax.xlane.f32.xlu1 %v867_v42 }
 0x150   : > { %v10443_v46 = vpop.f32.mrb[16].mxu0 }
 0x151   : > { %v764_v49 = vpop.f32.mrb[17].mxu0  ;;  %871 = vmax.xlane.f32.xlu0 %v870_v47  ;;  %v13130_v56 = vadd.f32 %v10443_v46, %v13029_v60 }
 0x152   : > { %v10444_v50 = vpop.f32.mrb[18].mxu0  ;;  %v13120_v52 = vadd.f32 %v764_v49, %v13029_v60 }
 0x153   : > { %v767_v53 = vpop.f32.mrb[19].mxu0  ;;  %874 = vmax.xlane.f32.xlu1 %v873_v51  ;;  %v13135_v59 = vadd.f32 %v10444_v50, %v13029_v60  ;;  %v882_v62 = vsel %vm827_vm0, %v13130_v56, -inf }
 0x154   : > { %v876_v54 = vsel %vm827_vm0, %v13120_v52, -inf  ;;  %v13127_v55 = vadd.f32 %v767_v53, %v13029_v60 }
 0x155   : > { %877 = vmax.xlane.f32.xlu0 %v876_v54  ;;  %v885_v4 = vsel %vm827_vm0, %v13135_v59, -inf  ;;  %v13204_v54 = vld [vmem:[%s16048_s2] sm:$0xff]  }
 0x156   : > { %v879_v58 = vsel %vm827_vm0, %v13127_v55, -inf  ;;  %10509 = vmatprep.subr.bf16.mxu1 %v13204_v54 }
 0x157   : > { %880 = vmax.xlane.f32.xlu1 %v879_v58 }
 0x158   : > { %v10447_v61 = vpop.f32.mrb[20].mxu0 }
 0x159   : > { %v780_v1 = vpop.f32.mrb[21].mxu0  ;;  %883 = vmax.xlane.f32.xlu0 %v882_v62  ;;  %v13150_v11 = vadd.f32 %v10447_v61, %v13029_v60 }
 0x15a   : > { %v10448_v3 = vpop.f32.mrb[22].mxu0  ;;  %v13142_v6 = vadd.f32 %v780_v1, %v13029_v60 }
 0x15b   : > { %v783_v8 = vpop.f32.mrb[23].mxu0  ;;  %886 = vmax.xlane.f32.xlu1 %v885_v4  ;;  %v13155_v14 = vadd.f32 %v10448_v3, %v13029_v60  ;;  %v894_v18 = vsel %vm827_vm0, %v13150_v11, -inf }
 0x15c   : > { %v888_v9 = vsel %vm827_vm0, %v13142_v6, -inf  ;;  %v13147_v10 = vadd.f32 %v783_v8, %v13029_v60 }
 0x15d   : > { %889 = vmax.xlane.f32.xlu0 %v888_v9  ;;  %v897_v22 = vsel %vm827_vm0, %v13155_v14, -inf }
 0x15e   : > { %v891_v12 = vsel %vm827_vm0, %v13147_v10, -inf }
 0x15f   : > { %892 = vmax.xlane.f32.xlu1 %v891_v12 }
 0x160   : > { %v10451_v15 = vpop.f32.mrb[24].mxu0 }
 0x161   : > { %v796_v20 = vpop.f32.mrb[25].mxu0  ;;  %895 = vmax.xlane.f32.xlu0 %v894_v18  ;;  %v13170_v30 = vadd.f32 %v10451_v15, %v13029_v60 }
 0x162   : > { %v10452_v21 = vpop.f32.mrb[26].mxu0  ;;  %v13162_v23 = vadd.f32 %v796_v20, %v13029_v60 }
 0x163   : > { %v799_v24 = vpop.f32.mrb[27].mxu0  ;;  %898 = vmax.xlane.f32.xlu1 %v897_v22  ;;  %v13175_v33 = vadd.f32 %v10452_v21, %v13029_v60  ;;  %v906_v35 = vsel %vm827_vm0, %v13170_v30, -inf }
 0x164   : > { %v900_v26 = vsel %vm827_vm0, %v13162_v23, -inf  ;;  %v13167_v27 = vadd.f32 %v799_v24, %v13029_v60 }
 0x165   : > { %901 = vmax.xlane.f32.xlu0 %v900_v26  ;;  %v909_v39 = vsel %vm827_vm0, %v13175_v33, -inf }
 0x166   : > { %v903_v32 = vsel %vm827_vm0, %v13167_v27, -inf }
 0x167   : > { %904 = vmax.xlane.f32.xlu1 %v903_v32 }
 0x168   : > { %v10455_v34 = vpop.f32.mrb[28].mxu0 }
 0x169   : > { %v812_v36 = vpop.f32.mrb[29].mxu0  ;;  %907 = vmax.xlane.f32.xlu0 %v906_v35  ;;  %v13190_v47 = vadd.f32 %v10455_v34, %v13029_v60 }
 0x16a   : > { %v10456_v38 = vpop.f32.mrb[30].mxu0  ;;  %v13182_v42 = vadd.f32 %v812_v36, %v13029_v60 }
 0x16b   : > { %v815_v44 = vpop.f32.mrb[31].mxu0  ;;  %910 = vmax.xlane.f32.xlu1 %v909_v39  ;;  %v13195_v50 = vadd.f32 %v10456_v38, %v13029_v60  ;;  %v918_v51 = vsel %vm827_vm0, %v13190_v47, -inf }
 0x16c   : > { %v912_v45 = vsel %vm827_vm0, %v13182_v42, -inf  ;;  %v13187_v46 = vadd.f32 %v815_v44, %v13029_v60 }
 0x16d   : > { %913 = vmax.xlane.f32.xlu0 %v912_v45  ;;  %v921_v53 = vsel %vm827_vm0, %v13195_v50, -inf }
 0x16e   : > { %v915_v49 = vsel %vm827_vm0, %v13187_v46, -inf }
 0x16f   : > { %916 = vmax.xlane.f32.xlu1 %v915_v49 }
 0x171   : > { %919 = vmax.xlane.f32.xlu0 %v918_v51 }
 0x173   : > { %922 = vmax.xlane.f32.xlu1 %v921_v53 }
 0x1c1   : > { %v836_v58 = vpop.xlane.xlu1 %835 }
 0x1c2   : > { %v830_v61 = vpop.xlane.xlu0 %829  ;;  %v926_v1 = vsub.f32 %v13032_v63, %v836_v58 }
 0x1c3   : > { %v924_v62 = vsub.f32 %v13035_v2, %v830_v61 }
 0x1c4   : > { %v960_v15 = vmul.f32 1.442695, %v926_v1 }
 0x1c5   : > { %v956_v3 = vmul.f32 1.442695, %v924_v62  ;;  %v839_v4 = vpop.xlane.xlu1 %838 }
 0x1c6   : > { %v927_v8 = vsub.f32 %v13040_v5, %v839_v4  ;;  %v833_v9 = vpop.xlane.xlu0 %832 }
 0x1c7   : > { %11882 = vpow2.f32 %v956_v3  ;;  %v925_v12 = vsub.f32 %v13045_v7, %v833_v9 }
 0x1c8   : > { %v962_v20 = vmul.f32 1.442695, %v927_v8 }
 0x1c9   : > { %v958_v18 = vmul.f32 1.442695, %v925_v12 }
 0x1ca   : > { %v842_v21 = vpop.xlane.xlu0 %841 }
 0x1cb   : > { %11884 = vpow2.f32 %v958_v18  ;;  %v928_v22 = vsub.f32 %v13052_v13, %v842_v21 }
 0x1cc   : > { %11886 = vpow2.f32 %v960_v15  ;;  %v845_v24 = vpop.xlane.xlu1 %844 }
 0x1cd   : > { %v964_v2 = vmul.f32 1.442695, %v928_v22  ;;  %v929_v63 = vsub.f32 %v13057_v16, %v845_v24  ;;  %11888 = vpow2.f32 %v962_v20 }
 0x1ce   : > { %v848_v26 = vpop.xlane.xlu0 %847 }
 0x1cf   : > { %11890 = vpow2.f32 %v964_v2  ;;  %v966_v5 = vmul.f32 1.442695, %v929_v63  ;;  %v930_v32 = vsub.f32 %v13060_v17, %v848_v26 }
 0x1d0   : > { %v851_v34 = vpop.xlane.xlu1 %850 }
 0x1d1   : > { %v13214_v7 = vpop.eup %11882  ;;  %v968_v35 = vmul.f32 1.442695, %v930_v32  ;;  %v931_v36 = vsub.f32 %v13065_v19, %v851_v34  ;;  %11892 = vpow2.f32 %v966_v5 }
 0x1d2   : > { %10461 = vmatprep.mubr.msk.f32.mxu1 %vm827_vm0, %v13214_v7  ;;  %v854_v13 = vpop.xlane.xlu0 %853 }
 0x1d3   : > { %11894 = vpow2.f32 %v968_v35  ;;  %v970_v38 = vmul.f32 1.442695, %v931_v36  ;;  %v932_v16 = vsub.f32 %v13072_v25, %v854_v13 }
 0x1d4   : > { %v857_v39 = vpop.xlane.xlu1 %856 }
 0x1d5   : > { %v13220_v44 = vpop.eup %11884  ;;  %v972_v45 = vmul.f32 1.442695, %v932_v16  ;;  %v933_v17 = vsub.f32 %v13077_v28, %v857_v39  ;;  %11896 = vpow2.f32 %v970_v38 }
 0x1d6   : > { %v13223_v49 = vpop.eup %11886  ;;  %10462 = vmatmul.mubr.msk.f32.vlgmr.msra.gmra.mrb[0].mxu1 %vm827_vm0, %v13220_v44  ;;  %v860_v19 = vpop.xlane.xlu0 %859 }
 0x1d7   : > { %11898 = vpow2.f32 %v972_v45  ;;  %v974_v51 = vmul.f32 1.442695, %v933_v17  ;;  %v934_v53 = vsub.f32 %v13080_v29, %v860_v19  ;;  %10464 = vmatprep.mubr.msk.f32.mxu1 %vm827_vm0, %v13223_v49  ;;  %10510 = vmatpush3.bf16.msra.mxu1 %v13204_v54  ;;  %v13231_v25 = vpop.eup %11888 }
 0x1d8   : > { %v863_v58 = vpop.xlane.xlu1 %862  ;;  %10591 = vmatprep.subr.bf16.mxu1 %v12966_v0 }
 0x1d9   : > { %v13234_v28 = vpop.eup %11890  ;;  %v976_v61 = vmul.f32 1.442695, %v934_v53  ;;  %v935_v62 = vsub.f32 %v13085_v31, %v863_v58  ;;  %11900 = vpow2.f32 %v974_v51 }
 0x1da   : > { %10465 = vmatmul.mubr.msk.f32.gmra.mrb[2].mxu1 %vm827_vm0, %v13231_v25  ;;  %v866_v29 = vpop.xlane.xlu0 %865 }
 0x1db   : > { %11902 = vpow2.f32 %v976_v61  ;;  %v978_v1 = vmul.f32 1.442695, %v935_v62  ;;  %v936_v3 = vsub.f32 %v13092_v37, %v866_v29  ;;  %10467 = vmatprep.mubr.msk.f32.mxu1 %vm827_vm0, %v13234_v28  ;;  %v13242_v4 = vpop.eup %11892 }
 0x1dc   : > { %v869_v0 = vpop.xlane.xlu1 %868 }
 0x1dd   : > { %v13244_v8 = vpop.eup %11894  ;;  %v980_v9 = vmul.f32 1.442695, %v936_v3  ;;  %v937_v31 = vsub.f32 %v13097_v40, %v869_v0  ;;  %11904 = vpow2.f32 %v978_v1 }
 0x1de   : > { %10468 = vmatmul.mubr.msk.f32.gmra.mrb[4].mxu1 %vm827_vm0, %v13242_v4  ;;  %v872_v12 = vpop.xlane.xlu0 %871 }
 0x1df   : > { %11906 = vpow2.f32 %v980_v9  ;;  %v982_v15 = vmul.f32 1.442695, %v937_v31  ;;  %v938_v37 = vsub.f32 %v13100_v41, %v872_v12  ;;  %10470 = vmatprep.mubr.msk.f32.mxu1 %vm827_vm0, %v13244_v8  ;;  %v13252_v18 = vpop.eup %11896 }
 0x1e0   : > { %v875_v20 = vpop.xlane.xlu1 %874 }
 0x1e1   : > { %v13254_v21 = vpop.eup %11898  ;;  %v984_v22 = vmul.f32 1.442695, %v938_v37  ;;  %v939_v40 = vsub.f32 %v13105_v43, %v875_v20  ;;  %11908 = vpow2.f32 %v982_v15 }
 0x1e2   : > { %10471 = vmatmul.mubr.msk.f32.gmra.mrb[6].mxu1 %vm827_vm0, %v13252_v18  ;;  %v878_v24 = vpop.xlane.xlu0 %877 }
 0x1e3   : > { %11910 = vpow2.f32 %v984_v22  ;;  %v986_v2 = vmul.f32 1.442695, %v939_v40  ;;  %v940_v41 = vsub.f32 %v13120_v52, %v878_v24  ;;  %10473 = vmatprep.mubr.msk.f32.mxu1 %vm827_vm0, %v13254_v21  ;;  %v13262_v63 = vpop.eup %11900 }
 0x1e4   : > { %v881_v26 = vpop.xlane.xlu1 %880 }
 0x1e5   : > { %v13264_v5 = vpop.eup %11902  ;;  %v988_v32 = vmul.f32 1.442695, %v940_v41  ;;  %v941_v43 = vsub.f32 %v13127_v55, %v881_v26  ;;  %11912 = vpow2.f32 %v986_v2 }
 0x1e6   : > { %10474 = vmatmul.mubr.msk.f32.gmra.mrb[8].mxu1 %vm827_vm0, %v13262_v63  ;;  %v884_v34 = vpop.xlane.xlu0 %883 }
 0x1e7   : > { %11914 = vpow2.f32 %v988_v32  ;;  %v990_v35 = vmul.f32 1.442695, %v941_v43  ;;  %v942_v52 = vsub.f32 %v13130_v56, %v884_v34  ;;  %10476 = vmatprep.mubr.msk.f32.mxu1 %vm827_vm0, %v13264_v5  ;;  %v13272_v36 = vpop.eup %11904 }
 0x1e8   : > { %v887_v13 = vpop.xlane.xlu1 %886 }
 0x1e9   : > { %v13274_v38 = vpop.eup %11906  ;;  %v992_v16 = vmul.f32 1.442695, %v942_v52  ;;  %v943_v55 = vsub.f32 %v13135_v59, %v887_v13  ;;  %11916 = vpow2.f32 %v990_v35 }
 0x1ea   : > { %10477 = vmatmul.mubr.msk.f32.gmra.mrb[10].mxu1 %vm827_vm0, %v13272_v36  ;;  %v890_v39 = vpop.xlane.xlu0 %889 }
 0x1eb   : > { %11918 = vpow2.f32 %v992_v16  ;;  %v994_v45 = vmul.f32 1.442695, %v943_v55  ;;  %v944_v56 = vsub.f32 %v13142_v6, %v890_v39  ;;  %10479 = vmatprep.mubr.msk.f32.mxu1 %vm827_vm0, %v13274_v38  ;;  %v13282_v17 = vpop.eup %11908 }
 0x1ec   : > { %v893_v19 = vpop.xlane.xlu1 %892 }
 0x1ed   : > { %v13284_v51 = vpop.eup %11910  ;;  %v996_v53 = vmul.f32 1.442695, %v944_v56  ;;  %v945_v59 = vsub.f32 %v13147_v10, %v893_v19  ;;  %11920 = vpow2.f32 %v994_v45 }
 0x1ee   : > { %10480 = vmatmul.mubr.msk.f32.gmra.mrb[12].mxu1 %vm827_vm0, %v13282_v17  ;;  %v896_v58 = vpop.xlane.xlu0 %895 }
 0x1ef   : > { %11922 = vpow2.f32 %v996_v53  ;;  %v998_v61 = vmul.f32 1.442695, %v945_v59  ;;  %v946_v6 = vsub.f32 %v13150_v11, %v896_v58  ;;  %10482 = vmatprep.mubr.msk.f32.mxu1 %vm827_vm0, %v13284_v51  ;;  %v13292_v62 = vpop.eup %11912 }
 0x1f0   : > { %v899_v29 = vpop.xlane.xlu1 %898 }
 0x1f1   : > { %v13294_v1 = vpop.eup %11914  ;;  %v1000_v3 = vmul.f32 1.442695, %v946_v6  ;;  %v947_v10 = vsub.f32 %v13155_v14, %v899_v29  ;;  %11924 = vpow2.f32 %v998_v61 }
 0x1f2   : > { %10483 = vmatmul.mubr.msk.f32.gmra.mrb[14].mxu1 %vm827_vm0, %v13292_v62  ;;  %v902_v0 = vpop.xlane.xlu0 %901 }
 0x1f3   : > { %11926 = vpow2.f32 %v1000_v3  ;;  %v1002_v9 = vmul.f32 1.442695, %v947_v10  ;;  %v948_v11 = vsub.f32 %v13162_v23, %v902_v0  ;;  %10485 = vmatprep.mubr.msk.f32.mxu1 %vm827_vm0, %v13294_v1  ;;  %v13302_v31 = vpop.eup %11916 }
 0x1f4   : > { %v905_v12 = vpop.xlane.xlu1 %904 }
 0x1f5   : > { %v13304_v15 = vpop.eup %11918  ;;  %v1004_v37 = vmul.f32 1.442695, %v948_v11  ;;  %v949_v14 = vsub.f32 %v13167_v27, %v905_v12  ;;  %11928 = vpow2.f32 %v1002_v9 }
 0x1f6   : > { %10486 = vmatmul.mubr.msk.f32.gmra.mrb[16].mxu1 %vm827_vm0, %v13302_v31  ;;  %v908_v20 = vpop.xlane.xlu0 %907 }
 0x1f7   : > { %11930 = vpow2.f32 %v1004_v37  ;;  %v1006_v22 = vmul.f32 1.442695, %v949_v14  ;;  %v950_v23 = vsub.f32 %v13170_v30, %v908_v20  ;;  %10488 = vmatprep.mubr.msk.f32.mxu1 %vm827_vm0, %v13304_v15  ;;  %v13312_v40 = vpop.eup %11920 }
 0x1f8   : > { %v911_v24 = vpop.xlane.xlu1 %910 }
 0x1f9   : > { %v13314_v2 = vpop.eup %11922  ;;  %v1008_v41 = vmul.f32 1.442695, %v950_v23  ;;  %v951_v27 = vsub.f32 %v13175_v33, %v911_v24  ;;  %11932 = vpow2.f32 %v1006_v22  ;;  %v13374_v24 = vld [vmem:[%s16050_s4] sm:$0xff]  }
 0x1fa   : > { %10489 = vmatmul.mubr.msk.f32.gmra.mrb[18].mxu1 %vm827_vm0, %v13312_v40  ;;  %v914_v26 = vpop.xlane.xlu0 %913  ;;  %10543 = vmatprep.subr.bf16.mxu0 %v13374_v24 }
 0x1fb   : > { %11934 = vpow2.f32 %v1008_v41  ;;  %v1010_v32 = vmul.f32 1.442695, %v951_v27  ;;  %v952_v30 = vsub.f32 %v13182_v42, %v914_v26  ;;  %10491 = vmatprep.mubr.msk.f32.mxu1 %vm827_vm0, %v13314_v2  ;;  %v13322_v43 = vpop.eup %11924  ;;  %v11809_v41 = vld [vmem:[%s16050_s4 + $0x8] sm:$0xff]   ;;  %10544 = vmatpush3.bf16.msra.mxu0 %v13374_v24 }
 0x1fc   : > { %v917_v34 = vpop.xlane.xlu1 %916  ;;  %10545 = vmatprep.subr.bf16.mxu0 %v11809_v41 }
 0x1fd   : > { %v13324_v35 = vpop.eup %11926  ;;  %v1012_v52 = vmul.f32 1.442695, %v952_v30  ;;  %v953_v33 = vsub.f32 %v13187_v46, %v917_v34  ;;  %11936 = vpow2.f32 %v1010_v32 }
 0x1fe   : > { %10492 = vmatmul.mubr.msk.f32.gmra.mrb[20].mxu1 %vm827_vm0, %v13322_v43  ;;  %v920_v13 = vpop.xlane.xlu0 %919 }
 0x1ff   : > { %11938 = vpow2.f32 %v1012_v52  ;;  %v1014_v16 = vmul.f32 1.442695, %v953_v33  ;;  %v954_v42 = vsub.f32 %v13190_v47, %v920_v13  ;;  %10494 = vmatprep.mubr.msk.f32.mxu1 %vm827_vm0, %v13324_v35  ;;  %v13332_v55 = vpop.eup %11928  ;;  %v11810_v52 = vld [vmem:[%s16050_s4 + $0x10] sm:$0xff]   ;;  %10546 = vmatpush3.bf16.msra.mxu0 %v11809_v41  ;;  %v11813_v41 = vld [vmem:[%s16050_s4 + $0x28] sm:$0xff]  }
 0x200   : > { %v923_v39 = vpop.xlane.xlu1 %922  ;;  %10547 = vmatprep.subr.bf16.mxu0 %v11810_v52 }
 0x201   : > { %v13334_v45 = vpop.eup %11930  ;;  %v1016_v56 = vmul.f32 1.442695, %v954_v42  ;;  %v955_v46 = vsub.f32 %v13195_v50, %v923_v39  ;;  %11940 = vpow2.f32 %v1014_v16 }
 0x202   : > { %10495 = vmatmul.mubr.msk.f32.gmra.mrb[22].mxu1 %vm827_vm0, %v13332_v55 }
 0x203   : > { %11942 = vpow2.f32 %v1016_v56  ;;  %v1018_v19 = vmul.f32 1.442695, %v955_v46  ;;  %10497 = vmatprep.mubr.msk.f32.mxu1 %vm827_vm0, %v13334_v45  ;;  %v13341_v47 = vpop.eup %11932  ;;  %v11811_v56 = vld [vmem:[%s16050_s4 + $0x18] sm:$0xff]   ;;  %v12522_v46 = vld [vmem:[%s16047_s1] sm:$0xff]   ;;  %10548 = vmatpush3.bf16.msra.mxu0 %v11810_v52 }
 0x204   : > { %10549 = vmatprep.subr.bf16.mxu0 %v11811_v56 }
 0x205   : > { %v13343_v53 = vpop.eup %11934  ;;  %11944 = vpow2.f32 %v1018_v19 }
 0x206   : > { %10498 = vmatmul.mubr.msk.f32.gmra.mrb[24].mxu1 %vm827_vm0, %v13341_v47 }
 0x207   : > { %10500 = vmatprep.mubr.msk.f32.mxu1 %vm827_vm0, %v13343_v53  ;;  %v13349_v50 = vpop.eup %11936  ;;  %10550 = vmatpush3.bf16.msra.mxu0 %v11811_v56 }
 0x209   : > { %v13351_v59 = vpop.eup %11938 }
 0x20a   : > { %10501 = vmatmul.mubr.msk.f32.gmra.mrb[26].mxu1 %vm827_vm0, %v13349_v50 }
 0x20b   : > { %10503 = vmatprep.mubr.msk.f32.mxu1 %vm827_vm0, %v13351_v59  ;;  %v13357_v58 = vpop.eup %11940 }
 0x20d   : > { %v13359_v61 = vpop.eup %11942 }
 0x20e   : > { %10504 = vmatmul.mubr.msk.f32.gmra.mrb[28].mxu1 %vm827_vm0, %v13357_v58 }
 0x20f   : > { %10506 = vmatprep.mubr.msk.f32.mxu1 %vm827_vm0, %v13359_v61  ;;  %v13365_v6 = vpop.eup %11944 }
 0x212   : > { %10507 = vmatmul.mubr.msk.f32.gmra.mrb[30].mxu1 %vm827_vm0, %v13365_v6 }
 0x2a9   : > { %v10463_v29 = vpop.f32.mrb[0].mxu1 }
 0x2aa   : > { %11946 = vrcp.f32 %v10463_v29  ;;  %v1182_v3 = vpop.f32.mrb[1].mxu1  ;;  %v12523_v29 = vld [vmem:[%s16047_s1 + $0x8] sm:$0xff]  }
 0x2ab   : > { %11948 = vrcp.f32 %v1182_v3 }
 0x2ad   : > { %v10466_v10 = vpop.f32.mrb[2].mxu1 }
 0x2ae   : > { %11950 = vrcp.f32 %v10466_v10  ;;  %v1192_v0 = vpop.f32.mrb[3].mxu1 }
 0x2af   : > { %11952 = vrcp.f32 %v1192_v0 }
 0x2b1   : > { %v10469_v9 = vpop.f32.mrb[4].mxu1 }
 0x2b2   : > { %11954 = vrcp.f32 %v10469_v9  ;;  %v1202_v11 = vpop.f32.mrb[5].mxu1 }
 0x2b3   : > { %11956 = vrcp.f32 %v1202_v11  ;;  %v11812_v11 = vld [vmem:[%s16050_s4 + $0x20] sm:$0xff]  }
 0x2b4   : > { %v11947_v12 = vpop.eup %11946  ;;  %10551 = vmatprep.subr.bf16.mxu0 %v11812_v11 }
 0x2b5   : > { %v11949_v37 = vpop.eup %11948  ;;  %v10472_v14 = vpop.f32.mrb[6].mxu1  ;;  %v1374_v20 = vmul.f32 %v11947_v12, %v13220_v44  ;;  %10552 = vmatpush3.bf16.msra.mxu0 %v11812_v11 }
 0x2b6   : > { %11958 = vrcp.f32 %v10472_v14  ;;  %v1212_v22 = vpop.f32.mrb[7].mxu1  ;;  %v1373_v23 = vmul.f32 %v11949_v37, %v13214_v7  ;;  %10553 = vmatprep.subr.bf16.mxu0 %v11813_v41 }
 0x2b7   : > { %11960 = vrcp.f32 %v1212_v22 }
 0x2b8   : > { %v11951_v27 = vpop.eup %11950  ;;  %v1405_v26 = vpack.c.bf16 %v1374_v20, %v1373_v23 }
 0x2b9   : > { %v11953_v32 = vpop.eup %11952  ;;  %v1376_v44 = vmul.f32 %v11951_v27, %v13231_v25  ;;  %v10475_v30 = vpop.f32.mrb[8].mxu1  ;;  %10554 = vmatpush3.bf16.msra.mxu0 %v11813_v41 }
 0x2ba   : > { %v1375_v7 = vmul.f32 %v11953_v32, %v13223_v49  ;;  %11962 = vrcp.f32 %v10475_v30  ;;  %v1222_v34 = vpop.f32.mrb[9].mxu1  ;;  %10511 = vmatprep.mubr.msk.bf16.mxu1 %vm827_vm0, %v1405_v26 }
 0x2bb   : > { %11964 = vrcp.f32 %v1222_v34 }
 0x2bc   : > { %v11955_v33 = vpop.eup %11954  ;;  %v1406_v13 = vpack.c.bf16 %v1376_v44, %v1375_v7 }
 0x2bd   : > { %v11957_v16 = vpop.eup %11956  ;;  %v10478_v42 = vpop.f32.mrb[10].mxu1  ;;  %v1378_v25 = vmul.f32 %v11955_v33, %v13242_v4  ;;  %v12526_v33 = vld [vmem:[%s16047_s1 + $0x20] sm:$0xff]  }
 0x2be   : > { %11966 = vrcp.f32 %v10478_v42  ;;  %v1232_v39 = vpop.f32.mrb[11].mxu1  ;;  %10512 = vmatmul.mubr.msk.bf16.vlgmr.msra.gmra.mrb[32].mxu1 %vm827_vm0, %v1406_v13  ;;  %v1377_v49 = vmul.f32 %v11957_v16, %v13234_v28 }
 0x2bf   : > { %11968 = vrcp.f32 %v1232_v39  ;;  %10592 = vmatpush3.bf16.msra.mxu1 %v12522_v46 }
 0x2c0   : > { %v11959_v19 = vpop.eup %11958  ;;  %v1407_v4 = vpack.c.bf16 %v1378_v25, %v1377_v49  ;;  %10593 = vmatprep.subr.bf16.mxu1 %v12523_v29  ;;  %v12527_v49 = vld [vmem:[%s16047_s1 + $0x28] sm:$0xff]  }
 0x2c1   : > { %v11961_v3 = vpop.eup %11960  ;;  %v10481_v28 = vpop.f32.mrb[12].mxu1  ;;  %v1380_v10 = vmul.f32 %v11959_v19, %v13252_v18  ;;  %v12524_v18 = vld [vmem:[%s16047_s1 + $0x10] sm:$0xff]  }
 0x2c2   : > { %11970 = vrcp.f32 %v10481_v28  ;;  %v1242_v0 = vpop.f32.mrb[13].mxu1  ;;  %10515 = vmatprep.mubr.msk.bf16.mxu1 %vm827_vm0, %v1407_v4  ;;  %v1379_v9 = vmul.f32 %v11961_v3, %v13244_v8  ;;  %v12528_v3 = vld [vmem:[%s16047_s1 + $0x30] sm:$0xff]  }
 0x2c3   : > { %11972 = vrcp.f32 %v1242_v0  ;;  %10594 = vmatpush3.bf16.msra.mxu1 %v12523_v29 }
 0x2c4   : > { %v11963_v12 = vpop.eup %11962  ;;  %v1408_v37 = vpack.c.bf16 %v1380_v10, %v1379_v9  ;;  %10595 = vmatprep.subr.bf16.mxu1 %v12524_v18 }
 0x2c5   : > { %v11965_v14 = vpop.eup %11964  ;;  %v10484_v20 = vpop.f32.mrb[14].mxu1  ;;  %v1382_v22 = vmul.f32 %v11963_v12, %v13262_v63  ;;  %v12525_v63 = vld [vmem:[%s16047_s1 + $0x18] sm:$0xff]  }
 0x2c6   : > { %11974 = vrcp.f32 %v10484_v20  ;;  %v1252_v8 = vpop.f32.mrb[15].mxu1  ;;  %10516 = vmatmul.mubr.msk.bf16.gmra.mrb[36].mxu1 %vm827_vm0, %v1408_v37  ;;  %v1381_v23 = vmul.f32 %v11965_v14, %v13254_v21  ;;  %v12529_v12 = vld [vmem:[%s16047_s1 + $0x38] sm:$0xff]  }
 0x2c7   : > { %11976 = vrcp.f32 %v1252_v8  ;;  %10596 = vmatpush3.bf16.msra.mxu1 %v12524_v18 }
 0x2c8   : > { %v11967_v27 = vpop.eup %11966  ;;  %v1409_v26 = vpack.c.bf16 %v1382_v22, %v1381_v23  ;;  %10597 = vmatprep.subr.bf16.mxu1 %v12525_v63 }
 0x2c9   : > { %v11969_v32 = vpop.eup %11968  ;;  %v10487_v44 = vpop.f32.mrb[16].mxu1  ;;  %v1384_v30 = vmul.f32 %v11967_v27, %v13272_v36 }
 0x2ca   : > { %11978 = vrcp.f32 %v10487_v44  ;;  %v1262_v21 = vpop.f32.mrb[17].mxu1  ;;  %10519 = vmatprep.mubr.msk.bf16.mxu1 %vm827_vm0, %v1409_v26  ;;  %v1383_v7 = vmul.f32 %v11969_v32, %v13264_v5 }
 0x2cb   : > { %11980 = vrcp.f32 %v1262_v21  ;;  %10598 = vmatpush3.bf16.msra.mxu1 %v12525_v63 }
 0x2cc   : > { %v11971_v34 = vpop.eup %11970  ;;  %v1410_v52 = vpack.c.bf16 %v1384_v30, %v1383_v7  ;;  %10599 = vmatprep.subr.bf16.mxu1 %v12526_v33 }
 0x2cd   : > { %v11973_v13 = vpop.eup %11972  ;;  %v10490_v16 = vpop.f32.mrb[18].mxu1  ;;  %v1386_v36 = vmul.f32 %v11971_v34, %v13282_v17 }
 0x2ce   : > { %11982 = vrcp.f32 %v10490_v16  ;;  %v1272_v42 = vpop.f32.mrb[19].mxu1  ;;  %10520 = vmatmul.mubr.msk.bf16.gmra.mrb[40].mxu1 %vm827_vm0, %v1410_v52  ;;  %v1385_v5 = vmul.f32 %v11973_v13, %v13274_v38 }
 0x2cf   : > { %11984 = vrcp.f32 %v1272_v42  ;;  %10600 = vmatpush3.bf16.msra.mxu1 %v12526_v33 }
 0x2d0   : > { %v11975_v25 = vpop.eup %11974  ;;  %v1411_v39 = vpack.c.bf16 %v1386_v36, %v1385_v5  ;;  %10601 = vmatprep.subr.bf16.mxu1 %v12527_v49 }
 0x2d1   : > { %v11977_v56 = vpop.eup %11976  ;;  %v10493_v46 = vpop.f32.mrb[20].mxu1  ;;  %v1388_v17 = vmul.f32 %v11975_v25, %v13292_v62 }
 0x2d2   : > { %11986 = vrcp.f32 %v10493_v46  ;;  %v1282_v19 = vpop.f32.mrb[21].mxu1  ;;  %10523 = vmatprep.mubr.msk.bf16.mxu1 %vm827_vm0, %v1411_v39  ;;  %v1387_v4 = vmul.f32 %v11977_v56, %v13284_v51  ;;  %v1930_v46 = vld [vmem:[%s12957_s27 + $0x14] sm:$0xf] }
 0x2d3   : > { %11988 = vrcp.f32 %v1282_v19  ;;  %10602 = vmatpush3.bf16.msra.mxu1 %v12527_v49 }
 0x2d4   : > { %v11979_v38 = vpop.eup %11978  ;;  %v1412_v29 = vpack.c.bf16 %v1388_v17, %v1387_v4  ;;  %10603 = vmatprep.subr.bf16.mxu1 %v12528_v3 }
 0x2d5   : > { %v11981_v28 = vpop.eup %11980  ;;  %v10496_v10 = vpop.f32.mrb[22].mxu1  ;;  %v1390_v0 = vmul.f32 %v11979_v38, %v13302_v31  ;;  %v1932_v38 = vld [vmem:[%s12957_s27 + $0x34] sm:$0xf] }
 0x2d6   : > { %11990 = vrcp.f32 %v10496_v10  ;;  %v1292_v62 = vpop.f32.mrb[23].mxu1  ;;  %10524 = vmatmul.mubr.msk.bf16.gmra.mrb[44].mxu1 %vm827_vm0, %v1412_v29  ;;  %v1389_v9 = vmul.f32 %v11981_v28, %v13294_v1  ;;  %v1933_v29 = vld [vmem:[%s12957_s27 + $0x44] sm:$0xf]  ;;  %v1936_v10 = vld [vmem:[%s12957_s27 + $0x74] sm:$0xf] }
 0x2d7   : > { %11992 = vrcp.f32 %v1292_v62  ;;  %10604 = vmatpush3.bf16.msra.mxu1 %v12528_v3  ;;  %v1934_v3 = vld [vmem:[%s12957_s27 + $0x54] sm:$0xf] }
 0x2d8   : > { %v11983_v51 = vpop.eup %11982  ;;  %v1413_v11 = vpack.c.bf16 %v1390_v0, %v1389_v9  ;;  %10605 = vmatprep.subr.bf16.mxu1 %v12529_v12  ;;  %v1937_v0 = vld [vmem:[%s12957_s27 + $0x84] sm:$0xf]  ;;  %v1938_v62 = vld [vmem:[%s12957_s27 + $0x94] sm:$0xf] }
 0x2d9   : > { %v11985_v37 = vpop.eup %11984  ;;  %v10499_v18 = vpop.f32.mrb[24].mxu1  ;;  %v1392_v14 = vmul.f32 %v11983_v51, %v13312_v40  ;;  %v9317_v51 = vcombine.low %v1937_v0, %v1938_v62 }
 0x2da   : > { %11994 = vrcp.f32 %v10499_v18  ;;  %v1302_v31 = vpop.f32.mrb[25].mxu1  ;;  %10527 = vmatprep.mubr.msk.bf16.mxu1 %vm827_vm0, %v1413_v11  ;;  %v1391_v20 = vmul.f32 %v11985_v37, %v13304_v15  ;;  %v1939_v11 = vld [vmem:[%s12957_s27 + $0xa4] sm:$0xf]  ;;  %v1942_v18 = vld [vmem:[%s12957_s27 + $0xd4] sm:$0xf] }
 0x2db   : > { %11996 = vrcp.f32 %v1302_v31  ;;  %10606 = vmatpush3.bf16.msra.mxu1 %v12529_v12  ;;  %v1940_v12 = vld [vmem:[%s12957_s27 + $0xb4] sm:$0xf]  ;;  %v1941_v37 = vld [vmem:[%s12957_s27 + $0xc4] sm:$0xf] }
 0x2dc   : > { %v11987_v1 = vpop.eup %11986  ;;  %v1414_v22 = vpack.c.bf16 %v1392_v14, %v1391_v20  ;;  %11619 = vmatprep.subr.bf16.mxu1 %v13115_v48  ;;  %v9318_v14 = vcombine.low %v1939_v11, %v1940_v12  ;;  %v9319_v31 = vcombine.low %v1941_v37, %v1942_v18  ;;  %v1943_v20 = vld [vmem:[%s12957_s27 + $0xe4] sm:$0xf]  ;;  %v12537_v11 = vld [vmem:[%s12957_s27 + $0x50] sm:$0xf] }
 0x2dd   : > { %v11989_v8 = vpop.eup %11988  ;;  %v10502_v23 = vpop.f32.mrb[26].mxu1  ;;  %v1394_v41 = vmul.f32 %v11987_v1, %v13322_v43  ;;  %v1944_v1 = vld [vmem:[%s12957_s27 + $0xf4] sm:$0xf]  ;;  %v1641_v12 = vunpack.c.l.bf16 %v12537_v11 }
 0x2de   : > { %11998 = vrcp.f32 %v10502_v23  ;;  %v1312_v27 = vpop.f32.mrb[27].mxu1  ;;  %10528 = vmatmul.mubr.msk.bf16.gmra.mrb[48].mxu1 %vm827_vm0, %v1414_v22  ;;  %v1393_v40 = vmul.f32 %v11989_v8, %v13314_v2  ;;  %v1946_v22 = vld [vmem:[%s12957_s27 + $0x114] sm:$0xf]  ;;  %v9320_v23 = vcombine.low %v1943_v20, %v1944_v1 }
 0x2df   : > { %12000 = vrcp.f32 %v1312_v27  ;;  %v13487_v8 = vld [vmem:[%s16050_s4 + $0x30] sm:$0xff]   ;;  %v13494_v27 = vld [vmem:[%s16050_s4 + $0x38] sm:$0xff]  }
 0x2e0   : > { %v11991_v26 = vpop.eup %11990  ;;  %v1415_v63 = vpack.c.bf16 %v1394_v41, %v1393_v40  ;;  %10555 = vmatprep.subr.bf16.mxu0 %v13487_v8  ;;  %v1947_v40 = vld [vmem:[%s12957_s27 + $0x124] sm:$0xf] }
 0x2e1   : > { %v11993_v15 = vpop.eup %11992  ;;  %v10505_v32 = vpop.f32.mrb[28].mxu1  ;;  %v1396_v44 = vmul.f32 %v11991_v26, %v13332_v55  ;;  %10556 = vmatpush3.bf16.msra.mxu0 %v13487_v8  ;;  %v1948_v26 = vld [vmem:[%s12957_s27 + $0x134] sm:$0xf] }
 0x2e2   : > { %12002 = vrcp.f32 %v10505_v32  ;;  %v1322_v30 = vpop.f32.mrb[29].mxu1  ;;  %10531 = vmatprep.mubr.msk.bf16.mxu1 %vm827_vm0, %v1415_v63  ;;  %v1395_v21 = vmul.f32 %v11993_v15, %v13324_v35  ;;  %10557 = vmatprep.subr.bf16.mxu0 %v13494_v27  ;;  %v1949_v63 = vld [vmem:[%s12957_s27 + $0x144] sm:$0xf]  ;;  %v1950_v15 = vld [vmem:[%s12957_s27 + $0x154] sm:$0xf]  ;;  %v9322_v32 = vcombine.low %v1947_v40, %v1948_v26 }
 0x2e3   : > { %12004 = vrcp.f32 %v1322_v30  ;;  %v1951_v30 = vld [vmem:[%s12957_s27 + $0x164] sm:$0xf]  ;;  %v12539_v26 = vld [vmem:[%s12957_s27 + $0xb0] sm:$0xf] }
 0x2e4   : > { %v11995_v43 = vpop.eup %11994  ;;  %v1416_v7 = vpack.c.bf16 %v1396_v44, %v1395_v21  ;;  %v9323_v44 = vcombine.low %v1949_v63, %v1950_v15  ;;  %v1952_v21 = vld [vmem:[%s12957_s27 + $0x174] sm:$0xf]  ;;  %v1647_v63 = vunpack.c.l.bf16 %v12539_v26  ;;  %v12553_v26 = vld [vmem:[%s12957_s27 + $0x150] sm:$0xf] }
 0x2e5   : > { %v11997_v34 = vpop.eup %11996  ;;  %v10508_v52 = vpop.f32.mrb[30].mxu1  ;;  %v1398_v2 = vmul.f32 %v11995_v43, %v13341_v47  ;;  %10558 = vmatpush3.bf16.msra.mxu0 %v13494_v27  ;;  %v1953_v43 = vld [vmem:[%s12957_s27 + $0x184] sm:$0xf] }
 0x2e6   : > { %12006 = vrcp.f32 %v10508_v52  ;;  %v1332_v33 = vpop.f32.mrb[31].mxu1  ;;  %10532 = vmatmul.mubr.msk.bf16.gmra.mrb[52].mxu1 %vm827_vm0, %v1416_v7  ;;  %v1397_v13 = vmul.f32 %v11997_v34, %v13334_v45  ;;  %11568 = vmatprep.subr.bf16.mxu0 %v13115_v48  ;;  %v1954_v7 = vld [vmem:[%s12957_s27 + $0x194] sm:$0xf]  ;;  %v9324_v34 = vcombine.low %v1951_v30, %v1952_v21  ;;  %v12541_v30 = vld [vmem:[%s12957_s27 + $0x90] sm:$0xf] }
 0x2e7   : > { %12008 = vrcp.f32 %v1332_v33  ;;  %v9325_v52 = vcombine.low %v1953_v43, %v1954_v7  ;;  %v1956_v33 = vld [vmem:[%s12957_s27 + $0x1b4] sm:$0xf]  ;;  %v1645_v21 = vunpack.c.l.bf16 %v12541_v30 }
 0x2e8   : > { %v11999_v55 = vpop.eup %11998  ;;  %v1417_v16 = vpack.c.bf16 %v1398_v2, %v1397_v13  ;;  %v1955_v2 = vld [vmem:[%s12957_s27 + $0x1a4] sm:$0xf] }
 0x2e9   : > { %v12001_v36 = vpop.eup %12000  ;;  %v1400_v35 = vmul.f32 %v11999_v55, %v13349_v50  ;;  %v1929_v50 = vld [vmem:[%s12957_s27 + $0x4] sm:$0xf]  ;;  %v1958_v55 = vld [vmem:[%s12957_s27 + $0x1d4] sm:$0xf] }
 0x2ea   : > { %10535 = vmatprep.mubr.msk.bf16.mxu1 %vm827_vm0, %v1417_v16  ;;  %v1399_v42 = vmul.f32 %v12001_v36, %v13343_v53  ;;  %v9313_v19 = vcombine.low %v1929_v50, %v1930_v46  ;;  %v1957_v13 = vld [vmem:[%s12957_s27 + $0x1c4] sm:$0xf]  ;;  %v9326_v16 = vcombine.low %v1955_v2, %v1956_v33  ;;  %v12533_v50 = vld [vmem:[%s12957_s27 + $0x10] sm:$0xf] }
 0x2eb   : > { %v9327_v36 = vcombine.low %v1957_v13, %v1958_v55  ;;  %v1637_v46 = vunpack.c.l.bf16 %v12533_v50 }
 0x2ec   : > { %v12003_v5 = vpop.eup %12002  ;;  %v1418_v47 = vpack.c.bf16 %v1400_v35, %v1399_v42  ;;  %v1959_v35 = vld [vmem:[%s12957_s27 + $0x1e4] sm:$0xf]  ;;  %v1960_v42 = vld [vmem:[%s12957_s27 + $0x1f4] sm:$0xf] }
 0x2ed   : > { %v12005_v25 = vpop.eup %12004  ;;  %v1402_v39 = vmul.f32 %v12003_v5, %v13357_v58  ;;  %v9328_v5 = vcombine.low %v1959_v35, %v1960_v42  ;;  %v12543_v35 = vld [vmem:[%s12957_s27 + $0xf0] sm:$0xf] }
 0x2ee   : > { %10536 = vmatmul.mubr.msk.bf16.gmra.mrb[56].mxu1 %vm827_vm0, %v1418_v47  ;;  %v1401_v45 = vmul.f32 %v12005_v25, %v13351_v59  ;;  %v1931_v59 = vld [vmem:[%s12957_s27 + $0x24] sm:$0xf]  ;;  %v12530_v47 = vld [vmem:[%s12957_s27] sm:$0xf]  ;;  %v1651_v42 = vunpack.c.l.bf16 %v12543_v35  ;;  %v12557_v35 = vld [vmem:[%s12957_s27 + $0x190] sm:$0xf] }
 0x2ef   : > { %v9314_v28 = vcombine.low %v1931_v59, %v1932_v38  ;;  %v1636_v25 = vunpack.c.l.bf16 %v12530_v47  ;;  %v12544_v47 = vld [vmem:[%s12957_s27 + $0xc0] sm:$0xf] }
 0x2f0   : > { %v12007_v49 = vpop.eup %12006  ;;  %v1419_v56 = vpack.c.bf16 %v1402_v39, %v1401_v45  ;;  %v12531_v39 = vld [vmem:[%s12957_s27 + $0x20] sm:$0xf] }
 0x2f1   : > { %v12009_v17 = vpop.eup %12008  ;;  %v1404_v53 = vmul.f32 %v12007_v49, %v13365_v6  ;;  %v9315_v6 = vcombine.low %v1933_v29, %v1934_v3  ;;  %v1638_v45 = vunpack.c.l.bf16 %v12531_v39  ;;  %v12532_v49 = vld [vmem:[%s12957_s27 + $0x30] sm:$0xf] }
 0x2f2   : > { %10539 = vmatprep.mubr.msk.bf16.mxu1 %vm827_vm0, %v1419_v56  ;;  %v1403_v58 = vmul.f32 %v12009_v17, %v13359_v61  ;;  %v1935_v61 = vld [vmem:[%s12957_s27 + $0x64] sm:$0xf]  ;;  %v1639_v56 = vunpack.c.l.bf16 %v12532_v49  ;;  %v12545_v39 = vld [vmem:[%s12957_s27 + $0xd0] sm:$0xf] }
 0x2f3   : > { %v9316_v9 = vcombine.low %v1935_v61, %v1936_v10  ;;  %v12535_v10 = vld [vmem:[%s12957_s27 + $0x70] sm:$0xf] }
 0x2f4   : > { %v1420_v4 = vpack.c.bf16 %v1404_v53, %v1403_v58  ;;  %v1643_v0 = vunpack.c.l.bf16 %v12535_v10  ;;  %v12549_v10 = vld [vmem:[%s12957_s27 + $0x110] sm:$0xf] }
 0x2f6   : > { %10540 = vmatmul.mubr.msk.bf16.gmra.mrb[60].mxu1 %vm827_vm0, %v1420_v4 }
 0x2f7   : > { %10607 = vmatprep.mubr.bf16.mxu1 %v9313_v19 }
 0x2fe   : > { %10608 = vmatmul.mubr.bf16.vlgmr.msra.gmra.mrb[64].mxu1 %v9314_v28 }
 0x2ff   : > { %10611 = vmatprep.mubr.bf16.mxu1 %v9315_v6  ;;  %11620 = vmatpush3.bf16.msra.mxu1 %v13115_v48  ;;  %v12534_v6 = vld [vmem:[%s12957_s27 + $0x60] sm:$0xf] }
 0x300   : > { %10691 = vmatprep.subr.bf16.mxu1 %v13204_v54  ;;  %v1945_v54 = vld [vmem:[%s12957_s27 + $0x104] sm:$0xf]  ;;  %v1642_v61 = vunpack.c.l.bf16 %v12534_v6  ;;  %v12548_v6 = vld [vmem:[%s12957_s27 + $0x100] sm:$0xf] }
 0x301   : > { %v9321_v41 = vcombine.low %v1945_v54, %v1946_v22 }
 0x306   : > { %10612 = vmatmul.mubr.bf16.gmra.mrb[68].mxu1 %v9316_v9  ;;  %v12536_v9 = vld [vmem:[%s12957_s27 + $0x40] sm:$0xf] }
 0x307   : > { %10615 = vmatprep.mubr.bf16.mxu1 %v9317_v51  ;;  %v1640_v51 = vunpack.c.l.bf16 %v12536_v9 }
 0x30e   : > { %10616 = vmatmul.mubr.bf16.gmra.mrb[72].mxu1 %v9318_v14 }
 0x30f   : > { %10619 = vmatprep.mubr.bf16.mxu1 %v9319_v31 }
 0x316   : > { %10620 = vmatmul.mubr.bf16.gmra.mrb[76].mxu1 %v9320_v23 }
 0x317   : > { %10623 = vmatprep.mubr.bf16.mxu1 %v9321_v41  ;;  %v12538_v41 = vld [vmem:[%s12957_s27 + $0xa0] sm:$0xf] }
 0x318   : > { %v1646_v40 = vunpack.c.l.bf16 %v12538_v41  ;;  %v12552_v41 = vld [vmem:[%s12957_s27 + $0x140] sm:$0xf] }
 0x31e   : > { %10624 = vmatmul.mubr.bf16.gmra.mrb[80].mxu1 %v9322_v32  ;;  %v12540_v32 = vld [vmem:[%s12957_s27 + $0x80] sm:$0xf] }
 0x31f   : > { %10627 = vmatprep.mubr.bf16.mxu1 %v9323_v44  ;;  %v1644_v44 = vunpack.c.l.bf16 %v12540_v32 }
 0x326   : > { %10628 = vmatmul.mubr.bf16.gmra.mrb[84].mxu1 %v9324_v34 }
 0x327   : > { %10631 = vmatprep.mubr.bf16.mxu1 %v9325_v52 }
 0x32e   : > { %10632 = vmatmul.mubr.bf16.gmra.mrb[88].mxu1 %v9326_v16  ;;  %v12542_v16 = vld [vmem:[%s12957_s27 + $0xe0] sm:$0xf] }
 0x32f   : > { %10635 = vmatprep.mubr.bf16.mxu1 %v9327_v36  ;;  %v1650_v36 = vunpack.c.l.bf16 %v12542_v16  ;;  %v12556_v16 = vld [vmem:[%s12957_s27 + $0x180] sm:$0xf] }
 0x336   : > { %10636 = vmatmul.mubr.bf16.gmra.mrb[92].mxu1 %v9328_v5 }
 0x391   : > { %v10513_v17 = vpop.f32.mrb[32].mxu1 }
 0x392   : > { %v1509_v53 = vpop.f32.mrb[33].mxu1  ;;  %v1670_v4 = vmul.f32 %v10513_v17, %v1638_v45  ;;  %v1649_v45 = vunpack.c.l.bf16 %v12545_v39 }
 0x393   : > { %v1668_v58 = vmul.f32 %v1636_v25, %v1509_v53  ;;  %v10514_v19 = vpop.f32.mrb[34].mxu1  ;;  %v1648_v25 = vunpack.c.l.bf16 %v12544_v47 }
 0x394   : > { %v1671_v59 = vmul.f32 %v10514_v19, %v1639_v56  ;;  %v1512_v38 = vpop.f32.mrb[35].mxu1 }
 0x395   : > { %v1669_v29 = vmul.f32 %v1637_v46, %v1512_v38 }
 0x396   : > { %v1701_v3 = vpack.c.bf16 %v1671_v59, %v1670_v4  ;;  %v12546_v59 = vld [vmem:[%s12957_s27 + $0x120] sm:$0xf] }
 0x397   : > { %v1700_v28 = vpack.c.bf16 %v1669_v29, %v1668_v58  ;;  %v1654_v38 = vunpack.c.l.bf16 %v12546_v59  ;;  %v12547_v29 = vld [vmem:[%s12957_s27 + $0x130] sm:$0xf]  ;;  %v12560_v59 = vld [vmem:[%s12957_s27 + $0x1c0] sm:$0xf] }
 0x399   : > { %v10517_v62 = vpop.f32.mrb[36].mxu1  ;;  %10559 = vmatprep.mubr.bf16.mxu0 %v1700_v28 }
 0x39a   : > { %v1525_v37 = vpop.f32.mrb[37].mxu1  ;;  %10560 = vmatmul.mubr.bf16.vlgmr.msra.gmra.mrb[32].mxu0 %v1701_v3  ;;  %v1674_v14 = vmul.f32 %v10517_v62, %v1642_v61  ;;  %v1655_v3 = vunpack.c.l.bf16 %v12547_v29  ;;  %v1652_v61 = vunpack.c.l.bf16 %v12548_v6  ;;  %v12561_v29 = vld [vmem:[%s12957_s27 + $0x1d0] sm:$0xf] }
 0x39b   : > { %v10518_v18 = vpop.f32.mrb[38].mxu1  ;;  %11570 = vmatpush3.bf16.msra.mxu0 %v13115_v48  ;;  %v1672_v1 = vmul.f32 %v1640_v51, %v1525_v37 }
 0x39c   : > { %v1675_v31 = vmul.f32 %v10518_v18, %v1643_v0  ;;  %v1528_v20 = vpop.f32.mrb[39].mxu1  ;;  %10725 = vmatprep.subr.bf16.mxu0 %v13374_v24  ;;  %v1653_v0 = vunpack.c.l.bf16 %v12549_v10 }
 0x39d   : > { %v1673_v54 = vmul.f32 %v1641_v12, %v1528_v20  ;;  %v12550_v20 = vld [vmem:[%s12957_s27 + $0x160] sm:$0xf] }
 0x39e   : > { %v1703_v22 = vpack.c.bf16 %v1675_v31, %v1674_v14 }
 0x39f   : > { %v1702_v23 = vpack.c.bf16 %v1673_v54, %v1672_v1  ;;  %v1658_v1 = vunpack.c.l.bf16 %v12550_v20  ;;  %v12551_v54 = vld [vmem:[%s12957_s27 + $0x170] sm:$0xf] }
 0x3a1   : > { %v10521_v15 = vpop.f32.mrb[40].mxu1  ;;  %10563 = vmatprep.mubr.bf16.mxu0 %v1702_v23 }
 0x3a2   : > { %v1541_v43 = vpop.f32.mrb[41].mxu1  ;;  %10564 = vmatmul.mubr.bf16.gmra.mrb[36].mxu0 %v1703_v22  ;;  %v1678_v7 = vmul.f32 %v10521_v15, %v1646_v40  ;;  %v1659_v22 = vunpack.c.l.bf16 %v12551_v54  ;;  %v1656_v40 = vunpack.c.l.bf16 %v12552_v41 }
 0x3a3   : > { %v10522_v24 = vpop.f32.mrb[42].mxu1  ;;  %v1676_v2 = vmul.f32 %v1644_v44, %v1541_v43 }
 0x3a4   : > { %v1679_v34 = vmul.f32 %v10522_v24, %v1647_v63  ;;  %v1544_v52 = vpop.f32.mrb[43].mxu1  ;;  %v1657_v63 = vunpack.c.l.bf16 %v12553_v26 }
 0x3a5   : > { %v1677_v33 = vmul.f32 %v1645_v21, %v1544_v52  ;;  %v12554_v52 = vld [vmem:[%s12957_s27 + $0x1a0] sm:$0xf] }
 0x3a6   : > { %v1705_v13 = vpack.c.bf16 %v1679_v34, %v1678_v7 }
 0x3a7   : > { %v1704_v55 = vpack.c.bf16 %v1677_v33, %v1676_v2  ;;  %v1662_v2 = vunpack.c.l.bf16 %v12554_v52  ;;  %v12555_v33 = vld [vmem:[%s12957_s27 + $0x1b0] sm:$0xf] }
 0x3a9   : > { %v10525_v5 = vpop.f32.mrb[44].mxu1  ;;  %10567 = vmatprep.mubr.bf16.mxu0 %v1704_v55 }
 0x3aa   : > { %v1557_v49 = vpop.f32.mrb[45].mxu1  ;;  %10568 = vmatmul.mubr.bf16.gmra.mrb[40].mxu0 %v1705_v13  ;;  %v1682_v50 = vmul.f32 %v10525_v5, %v1650_v36  ;;  %v1663_v13 = vunpack.c.l.bf16 %v12555_v33  ;;  %v1660_v36 = vunpack.c.l.bf16 %v12556_v16 }
 0x3ab   : > { %v10526_v56 = vpop.f32.mrb[46].mxu1  ;;  %v1680_v53 = vmul.f32 %v1648_v25, %v1557_v49 }
 0x3ac   : > { %v1683_v46 = vmul.f32 %v10526_v56, %v1651_v42  ;;  %v1560_v17 = vpop.f32.mrb[47].mxu1  ;;  %v1661_v42 = vunpack.c.l.bf16 %v12557_v35 }
 0x3ad   : > { %v1681_v58 = vmul.f32 %v1649_v45, %v1560_v17  ;;  %v12558_v17 = vld [vmem:[%s12957_s27 + $0x1e0] sm:$0xf] }
 0x3ae   : > { %v1707_v19 = vpack.c.bf16 %v1683_v46, %v1682_v50 }
 0x3af   : > { %v1706_v4 = vpack.c.bf16 %v1681_v58, %v1680_v53  ;;  %v1666_v53 = vunpack.c.l.bf16 %v12558_v17  ;;  %v12559_v58 = vld [vmem:[%s12957_s27 + $0x1f0] sm:$0xf] }
 0x3b1   : > { %v10529_v28 = vpop.f32.mrb[48].mxu1  ;;  %10571 = vmatprep.mubr.bf16.mxu0 %v1706_v4 }
 0x3b2   : > { %v1573_v62 = vpop.f32.mrb[49].mxu1  ;;  %10572 = vmatmul.mubr.bf16.gmra.mrb[44].mxu0 %v1707_v19  ;;  %v1686_v51 = vmul.f32 %v10529_v28, %v1654_v38  ;;  %v1667_v19 = vunpack.c.l.bf16 %v12559_v58  ;;  %v1664_v38 = vunpack.c.l.bf16 %v12560_v59 }
 0x3b3   : > { %v10530_v9 = vpop.f32.mrb[50].mxu1  ;;  %v1684_v37 = vmul.f32 %v1652_v61, %v1573_v62 }
 0x3b4   : > { %v1687_v11 = vmul.f32 %v10530_v9, %v1655_v3  ;;  %v1576_v12 = vpop.f32.mrb[51].mxu1  ;;  %v1665_v3 = vunpack.c.l.bf16 %v12561_v29 }
 0x3b5   : > { %v1685_v18 = vmul.f32 %v1653_v0, %v1576_v12 }
 0x3b6   : > { %v1709_v14 = vpack.c.bf16 %v1687_v11, %v1686_v51 }
 0x3b7   : > { %v1708_v31 = vpack.c.bf16 %v1685_v18, %v1684_v37 }
 0x3b9   : > { %v10533_v23 = vpop.f32.mrb[52].mxu1  ;;  %10575 = vmatprep.mubr.bf16.mxu0 %v1708_v31 }
 0x3ba   : > { %v1589_v15 = vpop.f32.mrb[53].mxu1  ;;  %10576 = vmatmul.mubr.bf16.gmra.mrb[48].mxu0 %v1709_v14  ;;  %v1690_v44 = vmul.f32 %v10533_v23, %v1658_v1 }
 0x3bb   : > { %v10534_v32 = vpop.f32.mrb[54].mxu1  ;;  %v1688_v43 = vmul.f32 %v1656_v40, %v1589_v15 }
 0x3bc   : > { %v1691_v30 = vmul.f32 %v10534_v32, %v1659_v22  ;;  %v1592_v21 = vpop.f32.mrb[55].mxu1 }
 0x3bd   : > { %v1689_v24 = vmul.f32 %v1657_v63, %v1592_v21 }
 0x3be   : > { %v1711_v7 = vpack.c.bf16 %v1691_v30, %v1690_v44 }
 0x3bf   : > { %v1710_v34 = vpack.c.bf16 %v1689_v24, %v1688_v43 }
 0x3c1   : > { %v10537_v55 = vpop.f32.mrb[56].mxu1  ;;  %10579 = vmatprep.mubr.bf16.mxu0 %v1710_v34 }
 0x3c2   : > { %v1605_v5 = vpop.f32.mrb[57].mxu1  ;;  %10580 = vmatmul.mubr.bf16.gmra.mrb[52].mxu0 %v1711_v7  ;;  %v1694_v25 = vmul.f32 %v10537_v55, %v1662_v2 }
 0x3c3   : > { %v10538_v47 = vpop.f32.mrb[58].mxu1  ;;  %v1692_v49 = vmul.f32 %v1660_v36, %v1605_v5 }
 0x3c4   : > { %v1695_v39 = vmul.f32 %v10538_v47, %v1663_v13  ;;  %v1608_v45 = vpop.f32.mrb[59].mxu1 }
 0x3c5   : > { %v1693_v56 = vmul.f32 %v1661_v42, %v1608_v45 }
 0x3c6   : > { %v1713_v50 = vpack.c.bf16 %v1695_v39, %v1694_v25 }
 0x3c7   : > { %v1712_v46 = vpack.c.bf16 %v1693_v56, %v1692_v49 }
 0x3c9   : > { %v10541_v4 = vpop.f32.mrb[60].mxu1  ;;  %10583 = vmatprep.mubr.bf16.mxu0 %v1712_v46 }
 0x3ca   : > { %v1621_v28 = vpop.f32.mrb[61].mxu1  ;;  %10584 = vmatmul.mubr.bf16.gmra.mrb[56].mxu0 %v1713_v50  ;;  %v1698_v61 = vmul.f32 %v10541_v4, %v1666_v53 }
 0x3cb   : > { %v10542_v6 = vpop.f32.mrb[62].mxu1  ;;  %v1696_v62 = vmul.f32 %v1664_v38, %v1621_v28 }
 0x3cc   : > { %v1699_v10 = vmul.f32 %v10542_v6, %v1667_v19  ;;  %v1624_v0 = vpop.f32.mrb[63].mxu1 }
 0x3cd   : > { %v1697_v9 = vmul.f32 %v1665_v3, %v1624_v0 }
 0x3ce   : > { %v1715_v51 = vpack.c.bf16 %v1699_v10, %v1698_v61 }
 0x3cf   : > { %v1714_v11 = vpack.c.bf16 %v1697_v9, %v1696_v62 }
 0x3d1   : > { %10587 = vmatprep.mubr.bf16.mxu0 %v1714_v11  ;;  %v10609_v12 = vpop.f32.mrb[64].mxu1 }
 0x3d2   : > { %10588 = vmatmul.mubr.bf16.gmra.mrb[60].mxu0 %v1715_v51  ;;  %v2091_v37 = vpop.f32.mrb[65].mxu1  ;;  %v13551_v20 = vadd.f32 %v10609_v12, %v13029_v60 }
 0x3d3   : > { %v13548_v18 = vadd.f32 %v2091_v37, %v13029_v60  ;;  %v10610_v14 = vpop.f32.mrb[66].mxu1 }
 0x3d4   : > { %v2094_v31 = vpop.f32.mrb[67].mxu1  ;;  %v13559_v22 = vadd.f32 %v10610_v14, %v13029_v60  ;;  %v2224_v40 = vsel %vm827_vm0, %v13551_v20, -inf }
 0x3d5   : > { %v13554_v1 = vadd.f32 %v2094_v31, %v13029_v60  ;;  %v2218_v54 = vsel %vm827_vm0, %v13548_v18, -inf }
 0x3d6   : > { %2219 = vmax.xlane.f32.xlu0 %v2218_v54  ;;  %v2227_v32 = vsel %vm827_vm0, %v13559_v22, -inf }
 0x3d7   : > { %v2221_v23 = vsel %vm827_vm0, %v13554_v1, -inf }
 0x3d8   : > { %2222 = vmax.xlane.f32.xlu1 %v2221_v23 }
 0x3d9   : > { %v10613_v41 = vpop.f32.mrb[68].mxu1 }
 0x3da   : > { %v2107_v26 = vpop.f32.mrb[69].mxu1  ;;  %2225 = vmax.xlane.f32.xlu0 %v2224_v40  ;;  %v13571_v30 = vadd.f32 %v10613_v41, %v13029_v60 }
 0x3db   : > { %v13566_v63 = vadd.f32 %v2107_v26, %v13029_v60  ;;  %v10614_v15 = vpop.f32.mrb[70].mxu1 }
 0x3dc   : > { %v2110_v44 = vpop.f32.mrb[71].mxu1  ;;  %2228 = vmax.xlane.f32.xlu1 %v2227_v32  ;;  %v13579_v24 = vadd.f32 %v10614_v15, %v13029_v60  ;;  %v2236_v52 = vsel %vm827_vm0, %v13571_v30, -inf }
 0x3dd   : > { %v13574_v21 = vadd.f32 %v2110_v44, %v13029_v60  ;;  %v2230_v43 = vsel %vm827_vm0, %v13566_v63, -inf }
 0x3de   : > { %2231 = vmax.xlane.f32.xlu0 %v2230_v43  ;;  %v2239_v55 = vsel %vm827_vm0, %v13579_v24, -inf }
 0x3df   : > { %v2233_v7 = vsel %vm827_vm0, %v13574_v21, -inf }
 0x3e0   : > { %2234 = vmax.xlane.f32.xlu1 %v2233_v7 }
 0x3e1   : > { %v10617_v34 = vpop.f32.mrb[72].mxu1 }
 0x3e2   : > { %v2123_v2 = vpop.f32.mrb[73].mxu1  ;;  %2237 = vmax.xlane.f32.xlu0 %v2236_v52  ;;  %v13591_v36 = vadd.f32 %v10617_v34, %v13029_v60 }
 0x3e3   : > { %v13586_v33 = vadd.f32 %v2123_v2, %v13029_v60  ;;  %v10618_v13 = vpop.f32.mrb[74].mxu1 }
 0x3e4   : > { %v2126_v16 = vpop.f32.mrb[75].mxu1  ;;  %2240 = vmax.xlane.f32.xlu1 %v2239_v55  ;;  %v13599_v5 = vadd.f32 %v10618_v13, %v13029_v60  ;;  %v2248_v39 = vsel %vm827_vm0, %v13591_v36, -inf }
 0x3e5   : > { %v13594_v35 = vadd.f32 %v2126_v16, %v13029_v60  ;;  %v2242_v42 = vsel %vm827_vm0, %v13586_v33, -inf }
 0x3e6   : > { %2243 = vmax.xlane.f32.xlu0 %v2242_v42  ;;  %v2251_v50 = vsel %vm827_vm0, %v13599_v5, -inf }
 0x3e7   : > { %v2245_v47 = vsel %vm827_vm0, %v13594_v35, -inf }
 0x3e8   : > { %2246 = vmax.xlane.f32.xlu1 %v2245_v47 }
 0x3e9   : > { %v10621_v25 = vpop.f32.mrb[76].mxu1 }
 0x3ea   : > { %v2139_v45 = vpop.f32.mrb[77].mxu1  ;;  %2249 = vmax.xlane.f32.xlu0 %v2248_v39  ;;  %v13611_v17 = vadd.f32 %v10621_v25, %v13029_v60 }
 0x3eb   : > { %v13606_v49 = vadd.f32 %v2139_v45, %v13029_v60  ;;  %v10622_v56 = vpop.f32.mrb[78].mxu1 }
 0x3ec   : > { %v2142_v46 = vpop.f32.mrb[79].mxu1  ;;  %2252 = vmax.xlane.f32.xlu1 %v2251_v50  ;;  %v13619_v19 = vadd.f32 %v10622_v56, %v13029_v60  ;;  %v2260_v38 = vsel %vm827_vm0, %v13611_v17, -inf }
 0x3ed   : > { %v13614_v53 = vadd.f32 %v2142_v46, %v13029_v60  ;;  %v2254_v58 = vsel %vm827_vm0, %v13606_v49, -inf }
 0x3ee   : > { %2255 = vmax.xlane.f32.xlu0 %v2254_v58  ;;  %v2263_v6 = vsel %vm827_vm0, %v13619_v19, -inf }
 0x3ef   : > { %v2257_v4 = vsel %vm827_vm0, %v13614_v53, -inf }
 0x3f0   : > { %2258 = vmax.xlane.f32.xlu1 %v2257_v4 }
 0x3f1   : > { %v10625_v59 = vpop.f32.mrb[80].mxu1 }
 0x3f2   : > { %v2155_v29 = vpop.f32.mrb[81].mxu1  ;;  %2261 = vmax.xlane.f32.xlu0 %v2260_v38  ;;  %v13631_v10 = vadd.f32 %v10625_v59, %v13029_v60 }
 0x3f3   : > { %v13626_v3 = vadd.f32 %v2155_v29, %v13029_v60  ;;  %v10626_v28 = vpop.f32.mrb[82].mxu1 }
 0x3f4   : > { %v2158_v61 = vpop.f32.mrb[83].mxu1  ;;  %2264 = vmax.xlane.f32.xlu1 %v2263_v6  ;;  %v13639_v9 = vadd.f32 %v10626_v28, %v13029_v60  ;;  %v2272_v12 = vsel %vm827_vm0, %v13631_v10, -inf }
 0x3f5   : > { %v13634_v0 = vadd.f32 %v2158_v61, %v13029_v60  ;;  %v2266_v62 = vsel %vm827_vm0, %v13626_v3, -inf }
 0x3f6   : > { %2267 = vmax.xlane.f32.xlu0 %v2266_v62  ;;  %v2275_v54 = vsel %vm827_vm0, %v13639_v9, -inf }
 0x3f7   : > { %v2269_v51 = vsel %vm827_vm0, %v13634_v0, -inf }
 0x3f8   : > { %2270 = vmax.xlane.f32.xlu1 %v2269_v51 }
 0x3f9   : > { %v10629_v11 = vpop.f32.mrb[84].mxu1 }
 0x3fa   : > { %v2171_v37 = vpop.f32.mrb[85].mxu1  ;;  %2273 = vmax.xlane.f32.xlu0 %v2272_v12  ;;  %v13651_v41 = vadd.f32 %v10629_v11, %v13029_v60 }
 0x3fb   : > { %v13646_v14 = vadd.f32 %v2171_v37, %v13029_v60  ;;  %v10630_v31 = vpop.f32.mrb[86].mxu1 }
 0x3fc   : > { %v2174_v23 = vpop.f32.mrb[87].mxu1  ;;  %2276 = vmax.xlane.f32.xlu1 %v2275_v54  ;;  %v13659_v15 = vadd.f32 %v10630_v31, %v13029_v60  ;;  %v2284_v43 = vsel %vm827_vm0, %v13651_v41, -inf }
 0x3fd   : > { %v13654_v40 = vadd.f32 %v2174_v23, %v13029_v60  ;;  %v2278_v26 = vsel %vm827_vm0, %v13646_v14, -inf }
 0x3fe   : > { %2279 = vmax.xlane.f32.xlu0 %v2278_v26  ;;  %v2287_v2 = vsel %vm827_vm0, %v13659_v15, -inf }
 0x3ff   : > { %v2281_v32 = vsel %vm827_vm0, %v13654_v40, -inf }
 0x400   : > { %2282 = vmax.xlane.f32.xlu1 %v2281_v32 }
 0x401   : > { %v10633_v44 = vpop.f32.mrb[88].mxu1 }
 0x402   : > { %v2187_v7 = vpop.f32.mrb[89].mxu1  ;;  %2285 = vmax.xlane.f32.xlu0 %v2284_v43  ;;  %v13671_v55 = vadd.f32 %v10633_v44, %v13029_v60 }
 0x403   : > { %v13666_v34 = vadd.f32 %v2187_v7, %v13029_v60  ;;  %v10634_v52 = vpop.f32.mrb[90].mxu1 }
 0x404   : > { %v2190_v13 = vpop.f32.mrb[91].mxu1  ;;  %2288 = vmax.xlane.f32.xlu1 %v2287_v2  ;;  %v13679_v47 = vadd.f32 %v10634_v52, %v13029_v60  ;;  %v2296_v45 = vsel %vm827_vm0, %v13671_v55, -inf }
 0x405   : > { %v13674_v16 = vadd.f32 %v2190_v13, %v13029_v60  ;;  %v2290_v42 = vsel %vm827_vm0, %v13666_v34, -inf }
 0x406   : > { %2291 = vmax.xlane.f32.xlu0 %v2290_v42  ;;  %v2299_v58 = vsel %vm827_vm0, %v13679_v47, -inf }
 0x407   : > { %v2293_v25 = vsel %vm827_vm0, %v13674_v16, -inf }
 0x408   : > { %2294 = vmax.xlane.f32.xlu1 %v2293_v25 }
 0x409   : > { %v10637_v39 = vpop.f32.mrb[92].mxu1 }
 0x40a   : > { %v2203_v56 = vpop.f32.mrb[93].mxu1  ;;  %2297 = vmax.xlane.f32.xlu0 %v2296_v45  ;;  %v13691_v59 = vadd.f32 %v10637_v39, %v13029_v60 }
 0x40b   : > { %v13686_v50 = vadd.f32 %v2203_v56, %v13029_v60  ;;  %v10638_v46 = vpop.f32.mrb[94].mxu1 }
 0x40c   : > { %v2206_v4 = vpop.f32.mrb[95].mxu1  ;;  %2300 = vmax.xlane.f32.xlu1 %v2299_v58  ;;  %v13699_v28 = vadd.f32 %v10638_v46, %v13029_v60  ;;  %v2308_v61 = vsel %vm827_vm0, %v13691_v59, -inf }
 0x40d   : > { %v13694_v38 = vadd.f32 %v2206_v4, %v13029_v60  ;;  %v2302_v29 = vsel %vm827_vm0, %v13686_v50, -inf }
 0x40e   : > { %2303 = vmax.xlane.f32.xlu0 %v2302_v29  ;;  %v2311_v62 = vsel %vm827_vm0, %v13699_v28, -inf }
 0x40f   : > { %v2305_v6 = vsel %vm827_vm0, %v13694_v38, -inf }
 0x410   : > { %2306 = vmax.xlane.f32.xlu1 %v2305_v6 }
 0x412   : > { %2309 = vmax.xlane.f32.xlu0 %v2308_v61 }
 0x414   : > { %2312 = vmax.xlane.f32.xlu1 %v2311_v62 }
 0x463   : > { %v2220_v51 = vpop.xlane.xlu0 %2219 }
 0x464   : > { %v2314_v11 = vsub.f32 %v13548_v18, %v2220_v51 }
 0x465   : > { %v2223_v12 = vpop.xlane.xlu1 %2222 }
 0x466   : > { %v2346_v37 = vmul.f32 1.442695, %v2314_v11  ;;  %v2315_v60 = vsub.f32 %v13554_v1, %v2223_v12  ;;  %v12562_v12 = vld [vmem:[%s16050_s4] sm:$0xff]  }
 0x467   : > { %v2226_v31 = vpop.xlane.xlu0 %2225 }
 0x468   : > { %12010 = vpow2.f32 %v2346_v37  ;;  %v2348_v54 = vmul.f32 1.442695, %v2315_v60  ;;  %v2316_v23 = vsub.f32 %v13551_v20, %v2226_v31  ;;  %v12563_v60 = vld [vmem:[%s16050_s4 + $0x8] sm:$0xff]  }
 0x469   : > { %v2229_v26 = vpop.xlane.xlu1 %2228 }
 0x46a   : > { %12012 = vpow2.f32 %v2348_v54  ;;  %v2350_v32 = vmul.f32 1.442695, %v2316_v23  ;;  %v2317_v44 = vsub.f32 %v13559_v22, %v2229_v26 }
 0x46b   : > { %v2232_v43 = vpop.xlane.xlu0 %2231 }
 0x46c   : > { %12014 = vpow2.f32 %v2350_v32  ;;  %v2352_v7 = vmul.f32 1.442695, %v2317_v44  ;;  %v2318_v52 = vsub.f32 %v13566_v63, %v2232_v43 }
 0x46d   : > { %v13712_v18 = vpop.f32.mrb[32].mxu0  ;;  %v2235_v2 = vpop.xlane.xlu1 %2234 }
 0x46e   : > { %12016 = vpow2.f32 %v2352_v7  ;;  %v2354_v1 = vmul.f32 1.442695, %v2318_v52  ;;  %v2319_v13 = vsub.f32 %v13574_v21, %v2235_v2  ;;  %v13715_v42 = vpop.f32.mrb[33].mxu0 }
 0x46f   : > { %v13717_v20 = vpop.f32.mrb[34].mxu0  ;;  %v2238_v25 = vpop.xlane.xlu0 %2237 }
 0x470   : > { %12018 = vpow2.f32 %v2354_v1  ;;  %v2356_v39 = vmul.f32 1.442695, %v2319_v13  ;;  %v2320_v22 = vsub.f32 %v13571_v30, %v2238_v25  ;;  %v13720_v45 = vpop.f32.mrb[35].mxu0 }
 0x471   : > { %v2241_v56 = vpop.xlane.xlu1 %2240 }
 0x472   : > { %v13722_v63 = vpop.eup %12010  ;;  %12020 = vpow2.f32 %v2356_v39  ;;  %v2358_v46 = vmul.f32 1.442695, %v2320_v22  ;;  %v2321_v58 = vsub.f32 %v13579_v24, %v2241_v56 }
 0x473   : > { %v2244_v4 = vpop.xlane.xlu0 %2243  ;;  %10643 = vmatprep.mubr.msk.f32.mxu0 %vm827_vm0, %v13722_v63 }
 0x474   : > { %v13727_v21 = vpop.eup %12012  ;;  %12022 = vpow2.f32 %v2358_v46  ;;  %v2360_v29 = vmul.f32 1.442695, %v2321_v58  ;;  %v2322_v6 = vsub.f32 %v13586_v33, %v2244_v4 }
 0x475   : > { %v13730_v30 = vpop.f32.mrb[36].mxu0  ;;  %v2247_v61 = vpop.xlane.xlu1 %2246  ;;  %10644 = vmatmul.mubr.msk.f32.vlgmr.msra.gmra.mrb[64].mxu0 %vm827_vm0, %v13727_v21 }
 0x476   : > { %v13734_v62 = vpop.eup %12014  ;;  %12024 = vpow2.f32 %v2360_v29  ;;  %v2362_v24 = vmul.f32 1.442695, %v2322_v6  ;;  %v2323_v51 = vsub.f32 %v13594_v35, %v2247_v61  ;;  %v13737_v11 = vpop.f32.mrb[37].mxu0  ;;  %10726 = vmatpush3.bf16.msra.mxu0 %v12562_v12 }
 0x477   : > { %v13742_v33 = vpop.f32.mrb[38].mxu0  ;;  %v2250_v37 = vpop.xlane.xlu0 %2249  ;;  %10646 = vmatprep.mubr.msk.f32.mxu0 %vm827_vm0, %v13734_v62  ;;  %10727 = vmatprep.subr.bf16.mxu0 %v12563_v60 }
 0x478   : > { %v13749_v31 = vpop.eup %12016  ;;  %12026 = vpow2.f32 %v2362_v24  ;;  %v2364_v35 = vmul.f32 1.442695, %v2323_v51  ;;  %v2324_v54 = vsub.f32 %v13591_v36, %v2250_v37  ;;  %v13752_v23 = vpop.f32.mrb[39].mxu0  ;;  %v12564_v36 = vld [vmem:[%s16050_s4 + $0x10] sm:$0xff]  }
 0x479   : > { %v2253_v26 = vpop.xlane.xlu1 %2252  ;;  %10647 = vmatmul.mubr.msk.f32.gmra.mrb[66].mxu0 %vm827_vm0, %v13749_v31 }
 0x47a   : > { %v13756_v32 = vpop.eup %12018  ;;  %12028 = vpow2.f32 %v2364_v35  ;;  %v2366_v44 = vmul.f32 1.442695, %v2324_v54  ;;  %v2325_v43 = vsub.f32 %v13599_v5, %v2253_v26  ;;  %10728 = vmatpush3.bf16.msra.mxu0 %v12563_v60 }
 0x47b   : > { %v2256_v7 = vpop.xlane.xlu0 %2255  ;;  %10649 = vmatprep.mubr.msk.f32.mxu0 %vm827_vm0, %v13756_v32  ;;  %10729 = vmatprep.subr.bf16.mxu0 %v12564_v36 }
 0x47c   : > { %v13764_v52 = vpop.eup %12020  ;;  %12030 = vpow2.f32 %v2366_v44  ;;  %v2368_v2 = vmul.f32 1.442695, %v2325_v43  ;;  %v2326_v1 = vsub.f32 %v13606_v49, %v2256_v7  ;;  %v12565_v49 = vld [vmem:[%s16050_s4 + $0x18] sm:$0xff]  }
 0x47d   : > { %v13767_v13 = vpop.f32.mrb[40].mxu0  ;;  %v2259_v25 = vpop.xlane.xlu1 %2258  ;;  %10650 = vmatmul.mubr.msk.f32.gmra.mrb[68].mxu0 %vm827_vm0, %v13764_v52 }
 0x47e   : > { %v13771_v5 = vpop.eup %12022  ;;  %12032 = vpow2.f32 %v2368_v2  ;;  %v2370_v39 = vmul.f32 1.442695, %v2326_v1  ;;  %v2327_v22 = vsub.f32 %v13614_v53, %v2259_v25  ;;  %v13774_v56 = vpop.f32.mrb[41].mxu0  ;;  %10730 = vmatpush3.bf16.msra.mxu0 %v12564_v36 }
 0x47f   : > { %v13776_v46 = vpop.f32.mrb[42].mxu0  ;;  %v2262_v58 = vpop.xlane.xlu0 %2261  ;;  %10652 = vmatprep.mubr.msk.f32.mxu0 %vm827_vm0, %v13771_v5  ;;  %10731 = vmatprep.subr.bf16.mxu0 %v12565_v49 }
 0x480   : > { %v13783_v4 = vpop.eup %12024  ;;  %12034 = vpow2.f32 %v2370_v39  ;;  %v2372_v29 = vmul.f32 1.442695, %v2327_v22  ;;  %v2328_v53 = vsub.f32 %v13611_v17, %v2262_v58  ;;  %v13786_v6 = vpop.f32.mrb[43].mxu0  ;;  %v12566_v17 = vld [vmem:[%s16050_s4 + $0x20] sm:$0xff]  }
 0x481   : > { %v2265_v61 = vpop.xlane.xlu1 %2264  ;;  %10653 = vmatmul.mubr.msk.f32.gmra.mrb[70].mxu0 %vm827_vm0, %v13783_v4 }
 0x482   : > { %v13790_v24 = vpop.eup %12026  ;;  %12036 = vpow2.f32 %v2372_v29  ;;  %v2374_v51 = vmul.f32 1.442695, %v2328_v53  ;;  %v2329_v12 = vsub.f32 %v13619_v19, %v2265_v61  ;;  %10732 = vmatpush3.bf16.msra.mxu0 %v12565_v49 }
 0x483   : > { %v2268_v37 = vpop.xlane.xlu0 %2267  ;;  %10655 = vmatprep.mubr.msk.f32.mxu0 %vm827_vm0, %v13790_v24  ;;  %10733 = vmatprep.subr.bf16.mxu0 %v12566_v17 }
 0x484   : > { %v13798_v60 = vpop.eup %12028  ;;  %12038 = vpow2.f32 %v2374_v51  ;;  %v2376_v35 = vmul.f32 1.442695, %v2329_v12  ;;  %v2330_v54 = vsub.f32 %v13626_v3, %v2268_v37  ;;  %v12567_v3 = vld [vmem:[%s16050_s4 + $0x28] sm:$0xff]  }
 0x485   : > { %v13801_v26 = vpop.f32.mrb[44].mxu0  ;;  %v2271_v44 = vpop.xlane.xlu1 %2270  ;;  %10656 = vmatmul.mubr.msk.f32.gmra.mrb[72].mxu0 %vm827_vm0, %v13798_v60 }
 0x486   : > { %v13805_v19 = vpop.eup %12030  ;;  %12040 = vpow2.f32 %v2376_v35  ;;  %v2378_v43 = vmul.f32 1.442695, %v2330_v54  ;;  %v2331_v7 = vsub.f32 %v13634_v0, %v2271_v44  ;;  %v13808_v36 = vpop.f32.mrb[45].mxu0  ;;  %10734 = vmatpush3.bf16.msra.mxu0 %v12566_v17 }
 0x487   : > { %v13810_v2 = vpop.f32.mrb[46].mxu0  ;;  %v2274_v1 = vpop.xlane.xlu0 %2273  ;;  %10658 = vmatprep.mubr.msk.f32.mxu0 %vm827_vm0, %v13805_v19  ;;  %10735 = vmatprep.subr.bf16.mxu0 %v12567_v3 }
 0x488   : > { %v13817_v25 = vpop.eup %12032  ;;  %12042 = vpow2.f32 %v2378_v43  ;;  %v2380_v39 = vmul.f32 1.442695, %v2331_v7  ;;  %v2332_v0 = vsub.f32 %v13631_v10, %v2274_v1  ;;  %v13820_v22 = vpop.f32.mrb[47].mxu0 }
 0x489   : > { %v2277_v58 = vpop.xlane.xlu1 %2276  ;;  %10659 = vmatmul.mubr.msk.f32.gmra.mrb[74].mxu0 %vm827_vm0, %v13817_v25 }
 0x48a   : > { %v13824_v49 = vpop.eup %12034  ;;  %12044 = vpow2.f32 %v2380_v39  ;;  %v2382_v29 = vmul.f32 1.442695, %v2332_v0  ;;  %v2333_v53 = vsub.f32 %v13639_v9, %v2277_v58  ;;  %10736 = vmatpush3.bf16.msra.mxu0 %v12567_v3 }
 0x48b   : > { %v2280_v61 = vpop.xlane.xlu0 %2279  ;;  %10661 = vmatprep.mubr.msk.f32.mxu0 %vm827_vm0, %v13824_v49  ;;  %10737 = vmatprep.subr.bf16.mxu0 %v13487_v8 }
 0x48c   : > { %v13830_v10 = vpop.eup %12036  ;;  %12046 = vpow2.f32 %v2382_v29  ;;  %v2384_v51 = vmul.f32 1.442695, %v2333_v53  ;;  %v2334_v12 = vsub.f32 %v13646_v14, %v2280_v61 }
 0x48d   : > { %v13833_v37 = vpop.f32.mrb[48].mxu0  ;;  %v2283_v17 = vpop.xlane.xlu1 %2282  ;;  %10662 = vmatmul.mubr.msk.f32.gmra.mrb[76].mxu0 %vm827_vm0, %v13830_v10 }
 0x48e   : > { %16083 = vst [vmem:[#allocation11_spill] sm:$0xff] %v13833_v37  ;;  %v13837_v9 = vpop.eup %12038  ;;  %12048 = vpow2.f32 %v2384_v51  ;;  %v2386_v35 = vmul.f32 1.442695, %v2334_v12  ;;  %v2335_v54 = vsub.f32 %v13654_v40, %v2283_v17  ;;  %v13840_v44 = vpop.f32.mrb[49].mxu0  ;;  %10738 = vmatpush3.bf16.msra.mxu0 %v13487_v8 }
 0x48f   : > { %16084 = vst [vmem:[#allocation12_spill] sm:$0xff] %v13840_v44  ;;  %v13843_v43 = vpop.f32.mrb[50].mxu0  ;;  %v2286_v7 = vpop.xlane.xlu0 %2285  ;;  %10664 = vmatprep.mubr.msk.f32.mxu0 %vm827_vm0, %v13837_v9  ;;  %10739 = vmatprep.subr.bf16.mxu0 %v13494_v27 }
 0x490   : > { %16085 = vst [vmem:[#allocation13_spill] sm:$0xff] %v13843_v43  ;;  %v13848_v14 = vpop.eup %12040  ;;  %12050 = vpow2.f32 %v2386_v35  ;;  %v2388_v1 = vmul.f32 1.442695, %v2335_v54  ;;  %v2336_v3 = vsub.f32 %v13651_v41, %v2286_v7  ;;  %v13851_v39 = vpop.f32.mrb[51].mxu0 }
 0x491   : > { %16086 = vst [vmem:[#allocation14_spill] sm:$0xff] %v13851_v39  ;;  %v2289_v40 = vpop.xlane.xlu1 %2288  ;;  %10665 = vmatmul.mubr.msk.f32.gmra.mrb[78].mxu0 %vm827_vm0, %v13848_v14 }
 0x492   : > { %v13855_v8 = vpop.eup %12042  ;;  %12052 = vpow2.f32 %v2388_v1  ;;  %v2390_v0 = vmul.f32 1.442695, %v2336_v3  ;;  %v2337_v58 = vsub.f32 %v13659_v15, %v2289_v40  ;;  %10740 = vmatpush3.bf16.msra.mxu0 %v13494_v27 }
 0x493   : > { %v2292_v29 = vpop.xlane.xlu0 %2291  ;;  %10667 = vmatprep.mubr.msk.f32.mxu0 %vm827_vm0, %v13855_v8 }
 0x494   : > { %v13861_v53 = vpop.eup %12044  ;;  %12054 = vpow2.f32 %v2390_v0  ;;  %v2392_v41 = vmul.f32 1.442695, %v2337_v58  ;;  %v2338_v61 = vsub.f32 %v13666_v34, %v2292_v29 }
 0x495   : > { %v13864_v51 = vpop.f32.mrb[52].mxu0  ;;  %v2295_v12 = vpop.xlane.xlu1 %2294  ;;  %10668 = vmatmul.mubr.msk.f32.gmra.mrb[80].mxu0 %vm827_vm0, %v13861_v53 }
 0x496   : > { %16087 = vst [vmem:[#allocation15_spill] sm:$0xff] %v13864_v51  ;;  %v13868_v17 = vpop.eup %12046  ;;  %12056 = vpow2.f32 %v2392_v41  ;;  %v2394_v27 = vmul.f32 1.442695, %v2338_v61  ;;  %v2339_v15 = vsub.f32 %v13674_v16, %v2295_v12  ;;  %v13871_v35 = vpop.f32.mrb[53].mxu0 }
 0x497   : > { %16088 = vst [vmem:[#allocation16_spill] sm:$0xff] %v13871_v35  ;;  %v13873_v54 = vpop.f32.mrb[54].mxu0  ;;  %v2298_v7 = vpop.xlane.xlu0 %2297  ;;  %10670 = vmatprep.mubr.msk.f32.mxu0 %vm827_vm0, %v13868_v17 }
 0x498   : > { %16089 = vst [vmem:[#allocation17_spill] sm:$0xff] %v13873_v54  ;;  %v13877_v34 = vpop.eup %12048  ;;  %12058 = vpow2.f32 %v2394_v27  ;;  %v2396_v1 = vmul.f32 1.442695, %v2339_v15  ;;  %v2340_v3 = vsub.f32 %v13671_v55, %v2298_v7  ;;  %v13880_v40 = vpop.f32.mrb[55].mxu0 }
 0x499   : > { %16090 = vst [vmem:[#allocation18_spill] sm:$0xff] %v13880_v40  ;;  %v2301_v0 = vpop.xlane.xlu1 %2300  ;;  %10671 = vmatmul.mubr.msk.f32.gmra.mrb[82].mxu0 %vm827_vm0, %v13877_v34 }
 0x49a   : > { %v13884_v16 = vpop.eup %12050  ;;  %12060 = vpow2.f32 %v2396_v1  ;;  %v2398_v58 = vmul.f32 1.442695, %v2340_v3  ;;  %v2341_v29 = vsub.f32 %v13679_v47, %v2301_v0 }
 0x49b   : > { %v2304_v41 = vpop.xlane.xlu0 %2303  ;;  %10673 = vmatprep.mubr.msk.f32.mxu0 %vm827_vm0, %v13884_v16 }
 0x49c   : > { %v13889_v61 = vpop.eup %12052  ;;  %12062 = vpow2.f32 %v2398_v58  ;;  %v2400_v55 = vmul.f32 1.442695, %v2341_v29  ;;  %v2342_v12 = vsub.f32 %v13686_v50, %v2304_v41 }
 0x49d   : > { %v13892_v27 = vpop.f32.mrb[56].mxu0  ;;  %v2307_v15 = vpop.xlane.xlu1 %2306  ;;  %10674 = vmatmul.mubr.msk.f32.gmra.mrb[84].mxu0 %vm827_vm0, %v13889_v61 }
 0x49e   : > { %16091 = vst [vmem:[#allocation19_spill] sm:$0xff] %v13892_v27  ;;  %v13896_v7 = vpop.eup %12054  ;;  %12064 = vpow2.f32 %v2400_v55  ;;  %v2402_v47 = vmul.f32 1.442695, %v2342_v12  ;;  %v2343_v1 = vsub.f32 %v13694_v38, %v2307_v15  ;;  %v13899_v3 = vpop.f32.mrb[57].mxu0 }
 0x49f   : > { %16092 = vst [vmem:[#allocation20_spill] sm:$0xff] %v13899_v3  ;;  %v13901_v0 = vpop.f32.mrb[58].mxu0  ;;  %v2310_v58 = vpop.xlane.xlu0 %2309  ;;  %10676 = vmatprep.mubr.msk.f32.mxu0 %vm827_vm0, %v13896_v7 }
 0x4a0   : > { %16093 = vst [vmem:[#allocation21_spill] sm:$0xff] %v13901_v0  ;;  %v13905_v50 = vpop.eup %12056  ;;  %12066 = vpow2.f32 %v2402_v47  ;;  %v2404_v29 = vmul.f32 1.442695, %v2343_v1  ;;  %v2344_v41 = vsub.f32 %v13691_v59, %v2310_v58  ;;  %v13908_v27 = vpop.f32.mrb[59].mxu0 }
 0x4a1   : > { %16094 = vst [vmem:[#allocation22_spill] sm:$0xff] %v13908_v27  ;;  %v2313_v55 = vpop.xlane.xlu1 %2312  ;;  %10677 = vmatmul.mubr.msk.f32.gmra.mrb[86].mxu0 %vm827_vm0, %v13905_v50 }
 0x4a2   : > { %v13912_v38 = vpop.eup %12058  ;;  %12068 = vpow2.f32 %v2404_v29  ;;  %v2406_v12 = vmul.f32 1.442695, %v2344_v41  ;;  %v2345_v15 = vsub.f32 %v13699_v28, %v2313_v55 }
 0x4a3   : > { %10679 = vmatprep.mubr.msk.f32.mxu0 %vm827_vm0, %v13912_v38 }
 0x4a4   : > { %v13917_v0 = vpop.eup %12060  ;;  %12070 = vpow2.f32 %v2406_v12  ;;  %v2408_v47 = vmul.f32 1.442695, %v2345_v15  ;;  %v12568_v12 = vld [vmem:[%s16048_s2] sm:$0xff]  }
 0x4a5   : > { %v13919_v59 = vpop.f32.mrb[60].mxu0  ;;  %10680 = vmatmul.mubr.msk.f32.gmra.mrb[88].mxu0 %vm827_vm0, %v13917_v0 }
 0x4a6   : > { %16095 = vst [vmem:[#allocation23_spill] sm:$0xff] %v13919_v59  ;;  %v13923_v1 = vpop.eup %12062  ;;  %12072 = vpow2.f32 %v2408_v47  ;;  %v13925_v58 = vpop.f32.mrb[61].mxu0 }
 0x4a7   : > { %16096 = vst [vmem:[#allocation24_spill] sm:$0xff] %v13925_v58  ;;  %v13927_v29 = vpop.f32.mrb[62].mxu0  ;;  %10682 = vmatprep.mubr.msk.f32.mxu1 %vm827_vm0, %v13923_v1 }
 0x4a8   : > { %16097 = vst [vmem:[#allocation25_spill] sm:$0xff] %v13927_v29  ;;  %v13931_v28 = vpop.eup %12064  ;;  %v13933_v41 = vpop.f32.mrb[63].mxu0 }
 0x4a9   : > { %16098 = vst [vmem:[#allocation26_spill] sm:$0xff] %v13933_v41  ;;  %10683 = vmatmul.mubr.msk.f32.vlgmr.msra.gmra.mrb[96].mxu1 %vm827_vm0, %v13931_v28 }
 0x4aa   : > { %v13937_v55 = vpop.eup %12066  ;;  %10692 = vmatpush3.bf16.msra.mxu1 %v12568_v12 }
 0x4ab   : > { %10685 = vmatprep.mubr.msk.f32.mxu1 %vm827_vm0, %v13937_v55 }
 0x4ac   : > { %v13944_v15 = vpop.eup %12068 }
 0x4ad   : > { %10686 = vmatmul.mubr.msk.f32.gmra.mrb[98].mxu1 %vm827_vm0, %v13944_v15 }
 0x4ae   : > { %v13948_v47 = vpop.eup %12070 }
 0x4af   : > { %10688 = vmatprep.mubr.msk.f32.mxu1 %vm827_vm0, %v13948_v47 }
 0x4b0   : > { %v13952_v29 = vpop.eup %12072 }
 0x4b1   : > { %10689 = vmatmul.mubr.msk.f32.gmra.mrb[100].mxu1 %vm827_vm0, %v13952_v29 }
 0x548   : > { %v10645_v59 = vpop.f32.mrb[64].mxu0 }
 0x549   : > { %12074 = vrcp.f32 %v10645_v59  ;;  %v2572_v12 = vpop.f32.mrb[65].mxu0 }
 0x54a   : > { %12076 = vrcp.f32 %v2572_v12 }
 0x54c   : > { %v10648_v41 = vpop.f32.mrb[66].mxu0 }
 0x54d   : > { %12078 = vrcp.f32 %v10648_v41  ;;  %v2582_v58 = vpop.f32.mrb[67].mxu0 }
 0x54e   : > { %12080 = vrcp.f32 %v2582_v58 }
 0x550   : > { %v10651_v27 = vpop.f32.mrb[68].mxu0 }
 0x551   : > { %12082 = vrcp.f32 %v10651_v27  ;;  %v2592_v3 = vpop.f32.mrb[69].mxu0 }
 0x552   : > { %12084 = vrcp.f32 %v2592_v3 }
 0x553   : > { %v12075_v54 = vpop.eup %12074 }
 0x554   : > { %v12077_v51 = vpop.eup %12076  ;;  %v10654_v40 = vpop.f32.mrb[70].mxu0  ;;  %v2764_v35 = vmul.f32 %v12075_v54, %v13727_v21 }
 0x555   : > { %12086 = vrcp.f32 %v10654_v40  ;;  %v2602_v43 = vpop.f32.mrb[71].mxu0  ;;  %v2763_v37 = vmul.f32 %v12077_v51, %v13722_v63 }
 0x556   : > { %12088 = vrcp.f32 %v2602_v43 }
 0x557   : > { %v12079_v59 = vpop.eup %12078  ;;  %v2795_v12 = vpack.c.bf16 %v2764_v35, %v2763_v37 }
 0x558   : > { %v12081_v39 = vpop.eup %12080  ;;  %v2766_v41 = vmul.f32 %v12079_v59, %v13749_v31  ;;  %v10657_v58 = vpop.f32.mrb[72].mxu0 }
 0x559   : > { %v2765_v27 = vmul.f32 %v12081_v39, %v13734_v62  ;;  %12090 = vrcp.f32 %v10657_v58  ;;  %v2612_v3 = vpop.f32.mrb[73].mxu0  ;;  %10693 = vmatprep.mubr.msk.bf16.mxu1 %vm827_vm0, %v2795_v12 }
 0x55a   : > { %12092 = vrcp.f32 %v2612_v3 }
 0x55b   : > { %v12083_v44 = vpop.eup %12082  ;;  %v2796_v21 = vpack.c.bf16 %v2766_v41, %v2765_v27 }
 0x55c   : > { %v12085_v54 = vpop.eup %12084  ;;  %v10660_v40 = vpop.f32.mrb[74].mxu0  ;;  %v2768_v63 = vmul.f32 %v12083_v44, %v13764_v52 }
 0x55d   : > { %12094 = vrcp.f32 %v10660_v40  ;;  %v2622_v43 = vpop.f32.mrb[75].mxu0  ;;  %10694 = vmatmul.mubr.msk.bf16.vlgmr.msra.gmra.mrb[104].mxu1 %vm827_vm0, %v2796_v21  ;;  %v2767_v31 = vmul.f32 %v12085_v54, %v13756_v32 }
 0x55e   : > { %12096 = vrcp.f32 %v2622_v43 }
 0x55f   : > { %v12087_v37 = vpop.eup %12086  ;;  %v2797_v62 = vpack.c.bf16 %v2768_v63, %v2767_v31 }
 0x560   : > { %v12089_v39 = vpop.eup %12088  ;;  %v10663_v51 = vpop.f32.mrb[76].mxu0  ;;  %v2770_v35 = vmul.f32 %v12087_v37, %v13783_v4 }
 0x561   : > { %12098 = vrcp.f32 %v10663_v51  ;;  %v2632_v59 = vpop.f32.mrb[77].mxu0  ;;  %10697 = vmatprep.mubr.msk.bf16.mxu1 %vm827_vm0, %v2797_v62  ;;  %v2769_v12 = vmul.f32 %v12089_v39, %v13771_v5 }
 0x562   : > { %12100 = vrcp.f32 %v2632_v59 }
 0x563   : > { %v12091_v52 = vpop.eup %12090  ;;  %v2798_v44 = vpack.c.bf16 %v2770_v35, %v2769_v12 }
 0x564   : > { %v12093_v41 = vpop.eup %12092  ;;  %v10666_v58 = vpop.f32.mrb[78].mxu0  ;;  %v2772_v32 = vmul.f32 %v12091_v52, %v13798_v60 }
 0x565   : > { %12102 = vrcp.f32 %v10666_v58  ;;  %v2642_v27 = vpop.f32.mrb[79].mxu0  ;;  %10698 = vmatmul.mubr.msk.bf16.gmra.mrb[108].mxu1 %vm827_vm0, %v2798_v44  ;;  %v2771_v3 = vmul.f32 %v12093_v41, %v13790_v24 }
 0x566   : > { %12104 = vrcp.f32 %v2642_v27 }
 0x567   : > { %v12095_v4 = vpop.eup %12094  ;;  %v2799_v21 = vpack.c.bf16 %v2772_v32, %v2771_v3 }
 0x568   : > { %v12097_v54 = vpop.eup %12096  ;;  %v10669_v40 = vpop.f32.mrb[80].mxu0  ;;  %v2774_v5 = vmul.f32 %v12095_v4, %v13817_v25 }
 0x569   : > { %12106 = vrcp.f32 %v10669_v40  ;;  %v2652_v63 = vpop.f32.mrb[81].mxu0  ;;  %10701 = vmatprep.mubr.msk.bf16.mxu1 %vm827_vm0, %v2799_v21  ;;  %v2773_v43 = vmul.f32 %v12097_v54, %v13805_v19 }
 0x56a   : > { %12108 = vrcp.f32 %v2652_v63 }
 0x56b   : > { %v12099_v60 = vpop.eup %12098  ;;  %v2800_v31 = vpack.c.bf16 %v2774_v5, %v2773_v43 }
 0x56c   : > { %v12101_v37 = vpop.eup %12100  ;;  %v10672_v62 = vpop.f32.mrb[82].mxu0  ;;  %v2776_v24 = vmul.f32 %v12099_v60, %v13830_v10 }
 0x56d   : > { %12110 = vrcp.f32 %v10672_v62  ;;  %v2662_v39 = vpop.f32.mrb[83].mxu0  ;;  %10702 = vmatmul.mubr.msk.bf16.gmra.mrb[112].mxu1 %vm827_vm0, %v2800_v31  ;;  %v2775_v51 = vmul.f32 %v12101_v37, %v13824_v49 }
 0x56e   : > { %12112 = vrcp.f32 %v2662_v39 }
 0x56f   : > { %v12103_v25 = vpop.eup %12102  ;;  %v2801_v35 = vpack.c.bf16 %v2776_v24, %v2775_v51 }
 0x570   : > { %v12105_v59 = vpop.eup %12104  ;;  %v10675_v12 = vpop.f32.mrb[84].mxu0  ;;  %v2778_v19 = vmul.f32 %v12103_v25, %v13848_v14 }
 0x571   : > { %12114 = vrcp.f32 %v10675_v12  ;;  %v2672_v52 = vpop.f32.mrb[85].mxu0  ;;  %10705 = vmatprep.mubr.msk.bf16.mxu1 %vm827_vm0, %v2801_v35  ;;  %v2777_v44 = vmul.f32 %v12105_v59, %v13837_v9 }
 0x572   : > { %12116 = vrcp.f32 %v2672_v52 }
 0x573   : > { %v12107_v10 = vpop.eup %12106  ;;  %v2802_v41 = vpack.c.bf16 %v2778_v19, %v2777_v44 }
 0x574   : > { %v12109_v58 = vpop.eup %12108  ;;  %v10678_v32 = vpop.f32.mrb[86].mxu0  ;;  %v2780_v49 = vmul.f32 %v12107_v10, %v13861_v53 }
 0x575   : > { %12118 = vrcp.f32 %v10678_v32  ;;  %v2682_v27 = vpop.f32.mrb[87].mxu0  ;;  %10706 = vmatmul.mubr.msk.bf16.gmra.mrb[116].mxu1 %vm827_vm0, %v2802_v41  ;;  %v2779_v3 = vmul.f32 %v12109_v58, %v13855_v8 }
 0x576   : > { %12120 = vrcp.f32 %v2682_v27 }
 0x577   : > { %v12111_v14 = vpop.eup %12110  ;;  %v2803_v4 = vpack.c.bf16 %v2780_v49, %v2779_v3 }
 0x578   : > { %v12113_v21 = vpop.eup %12112  ;;  %v10681_v54 = vpop.f32.mrb[88].mxu0  ;;  %v2782_v9 = vmul.f32 %v12111_v14, %v13877_v34 }
 0x579   : > { %12122 = vrcp.f32 %v10681_v54  ;;  %v2692_v40 = vpop.f32.mrb[89].mxu0  ;;  %10709 = vmatprep.mubr.msk.bf16.mxu1 %vm827_vm0, %v2803_v4  ;;  %v2781_v5 = vmul.f32 %v12113_v21, %v13868_v17  ;;  %v12570_v54 = vld [vmem:[%s12957_s27 + $0x34] sm:$0xf] }
 0x57a   : > { %12124 = vrcp.f32 %v2692_v40 }
 0x57b   : > { %v12115_v53 = vpop.eup %12114  ;;  %v2804_v63 = vpack.c.bf16 %v2782_v9, %v2781_v5  ;;  %v3023_v9 = vunpack.c.l.bf16 %v12570_v54  ;;  %v12571_v5 = vld [vmem:[%s12957_s27 + $0x4] sm:$0xf] }
 0x57c   : > { %v12117_v43 = vpop.eup %12116  ;;  %v10684_v60 = vpop.f32.mrb[96].mxu1  ;;  %v2784_v8 = vmul.f32 %v12115_v53, %v13889_v61  ;;  %v3020_v53 = vunpack.c.l.bf16 %v12571_v5 }
 0x57d   : > { %12126 = vrcp.f32 %v10684_v60  ;;  %v2702_v31 = vpop.f32.mrb[97].mxu1  ;;  %10710 = vmatmul.mubr.msk.bf16.gmra.mrb[120].mxu1 %vm827_vm0, %v2804_v63  ;;  %v2783_v37 = vmul.f32 %v12117_v43, %v13884_v16  ;;  %v9378_v60 = vld [vmem:[%s16051_s5 + $0x28] sm:$0xff] }
 0x57e   : > { %12128 = vrcp.f32 %v2702_v31 }
 0x57f   : > { %v12119_v34 = vpop.eup %12118  ;;  %v2805_v62 = vpack.c.bf16 %v2784_v8, %v2783_v37 }
 0x580   : > { %v12121_v24 = vpop.eup %12120  ;;  %v10687_v39 = vpop.f32.mrb[98].mxu1  ;;  %v2786_v17 = vmul.f32 %v12119_v34, %v13905_v50 }
 0x581   : > { %12130 = vrcp.f32 %v10687_v39  ;;  %v2712_v51 = vpop.f32.mrb[99].mxu1  ;;  %10713 = vmatprep.mubr.msk.bf16.mxu1 %vm827_vm0, %v2805_v62  ;;  %v2785_v25 = vmul.f32 %v12121_v24, %v13896_v7 }
 0x582   : > { %12132 = vrcp.f32 %v2712_v51 }
 0x583   : > { %v12123_v61 = vpop.eup %12122  ;;  %v2806_v35 = vpack.c.bf16 %v2786_v17, %v2785_v25  ;;  %v12573_v25 = vld [vmem:[%s12957_s27 + $0x64] sm:$0xf] }
 0x584   : > { %v12125_v59 = vpop.eup %12124  ;;  %v10690_v12 = vpop.f32.mrb[100].mxu1  ;;  %v2788_v16 = vmul.f32 %v12123_v61, %v13917_v0  ;;  %v3026_v61 = vunpack.c.l.bf16 %v12573_v25  ;;  %v12583_v25 = vld [vmem:[%s12957_s27 + $0xc4] sm:$0xf] }
 0x585   : > { %12134 = vrcp.f32 %v10690_v12  ;;  %v2722_v19 = vpop.f32.mrb[101].mxu1  ;;  %10714 = vmatmul.mubr.msk.bf16.gmra.mrb[124].mxu1 %vm827_vm0, %v2806_v35  ;;  %v2787_v52 = vmul.f32 %v12125_v59, %v13912_v38  ;;  %v12574_v35 = vld [vmem:[%s12957_s27 + $0x74] sm:$0xf]  ;;  %v11817_v12 = vld [vmem:[%s16047_s1 + $0x48] sm:$0xff]  }
 0x586   : > { %12136 = vrcp.f32 %v2722_v19  ;;  %v3027_v59 = vunpack.c.l.bf16 %v12574_v35  ;;  %v12575_v19 = vld [vmem:[%s12957_s27 + $0x44] sm:$0xf]  ;;  %v12584_v35 = vld [vmem:[%s12957_s27 + $0xd4] sm:$0xf] }
 0x587   : > { %v12127_v50 = vpop.eup %12126  ;;  %v2807_v44 = vpack.c.bf16 %v2788_v16, %v2787_v52  ;;  %v3024_v52 = vunpack.c.l.bf16 %v12575_v19 }
 0x588   : > { %v12129_v10 = vpop.eup %12128  ;;  %v2790_v41 = vmul.f32 %v12127_v50, %v13931_v28  ;;  %v12576_v50 = vld [vmem:[%s12957_s27 + $0x54] sm:$0xf] }
 0x589   : > { %10717 = vmatprep.mubr.msk.bf16.mxu1 %vm827_vm0, %v2807_v44  ;;  %v2789_v7 = vmul.f32 %v12129_v10, %v13923_v1  ;;  %v3025_v44 = vunpack.c.l.bf16 %v12576_v50 }
 0x58b   : > { %v12131_v58 = vpop.eup %12130  ;;  %v2808_v32 = vpack.c.bf16 %v2790_v41, %v2789_v7 }
 0x58c   : > { %v12133_v0 = vpop.eup %12132  ;;  %v2792_v49 = vmul.f32 %v12131_v58, %v13944_v15  ;;  %v11816_v15 = vld [vmem:[%s16047_s1 + $0x40] sm:$0xff]  }
 0x58d   : > { %10718 = vmatmul.mubr.msk.bf16.gmra.mrb[128].mxu1 %vm827_vm0, %v2808_v32  ;;  %v2791_v38 = vmul.f32 %v12133_v0, %v13937_v55  ;;  %10885 = vmatprep.subr.bf16.mxu0 %v11816_v15  ;;  %v12569_v55 = vld [vmem:[%s12957_s27 + $0x24] sm:$0xf]  ;;  %v11818_v0 = vld [vmem:[%s16047_s1 + $0x50] sm:$0xff]  }
 0x58e   : > { %v3022_v21 = vunpack.c.l.bf16 %v12569_v55 }
 0x58f   : > { %v12135_v27 = vpop.eup %12134  ;;  %v2809_v3 = vpack.c.bf16 %v2792_v49, %v2791_v38 }
 0x590   : > { %v12137_v28 = vpop.eup %12136  ;;  %v2794_v14 = vmul.f32 %v12135_v27, %v13952_v29  ;;  %v12572_v29 = vld [vmem:[%s12957_s27 + $0x14] sm:$0xf] }
 0x591   : > { %10721 = vmatprep.mubr.msk.bf16.mxu1 %vm827_vm0, %v2809_v3  ;;  %v2793_v1 = vmul.f32 %v12137_v28, %v13948_v47  ;;  %v3021_v63 = vunpack.c.l.bf16 %v12572_v29  ;;  %v9377_v47 = vld [vmem:[%s16051_s5 + $0x20] sm:$0xff] }
 0x592   : > { %v11571_v31 = vpack.c.bf16 %v9378_v60, %v9377_v47  ;;  %v12577_v28 = vld [vmem:[%s12957_s27 + $0xa4] sm:$0xf] }
 0x593   : > { %v2810_v4 = vpack.c.bf16 %v2794_v14, %v2793_v1  ;;  %v3030_v14 = vunpack.c.l.bf16 %v12577_v28  ;;  %v12578_v1 = vld [vmem:[%s12957_s27 + $0xb4] sm:$0xf]  ;;  %v11820_v47 = vld [vmem:[%s16047_s1 + $0x60] sm:$0xff]  }
 0x594   : > { %11572 = vmatprep.subr.bf16.mxu1 %v11571_v31  ;;  %v12587_v28 = vld [vmem:[%s12957_s27 + $0x104] sm:$0xf] }
 0x595   : > { %10722 = vmatmul.mubr.msk.bf16.gmra.mrb[132].mxu1 %vm827_vm0, %v2810_v4  ;;  %v3031_v4 = vunpack.c.l.bf16 %v12578_v1  ;;  %v12588_v1 = vld [vmem:[%s12957_s27 + $0x114] sm:$0xf] }
 0x596   : > { %11574 = vmatpush3.bf16.msra.mxu1 %v11571_v31 }
 0x630   : > { %v10695_v40 = vpop.f32.mrb[104].mxu1 }
 0x631   : > { %v2893_v43 = vpop.f32.mrb[105].mxu1  ;;  %v3054_v37 = vmul.f32 %v10695_v40, %v3022_v21  ;;  %v12579_v21 = vld [vmem:[%s12957_s27 + $0x84] sm:$0xf] }
 0x632   : > { %v10696_v8 = vpop.f32.mrb[106].mxu1  ;;  %v3052_v24 = vmul.f32 %v3020_v53, %v2893_v43  ;;  %v3028_v54 = vunpack.c.l.bf16 %v12579_v21 }
 0x633   : > { %v3055_v34 = vmul.f32 %v10696_v8, %v3023_v9  ;;  %v2896_v62 = vpop.f32.mrb[107].mxu1  ;;  %v12580_v9 = vld [vmem:[%s12957_s27 + $0x94] sm:$0xf] }
 0x634   : > { %v3053_v39 = vmul.f32 %v3021_v63, %v2896_v62  ;;  %v3029_v40 = vunpack.c.l.bf16 %v12580_v9 }
 0x635   : > { %v3085_v17 = vpack.c.bf16 %v3055_v34, %v3054_v37  ;;  %v12581_v34 = vld [vmem:[%s12957_s27 + $0xe4] sm:$0xf] }
 0x636   : > { %v3084_v51 = vpack.c.bf16 %v3053_v39, %v3052_v24  ;;  %v3034_v62 = vunpack.c.l.bf16 %v12581_v34  ;;  %v12582_v24 = vld [vmem:[%s12957_s27 + $0xf4] sm:$0xf] }
 0x637   : > { %v3035_v39 = vunpack.c.l.bf16 %v12582_v24  ;;  %v12592_v34 = vld [vmem:[%s12957_s27 + $0x154] sm:$0xf] }
 0x638   : > { %v10699_v16 = vpop.f32.mrb[108].mxu1  ;;  %10741 = vmatprep.mubr.bf16.mxu0 %v3084_v51 }
 0x639   : > { %v2909_v10 = vpop.f32.mrb[109].mxu1  ;;  %10742 = vmatmul.mubr.bf16.vlgmr.msra.gmra.mrb[92].mxu0 %v3085_v17  ;;  %v3058_v7 = vmul.f32 %v10699_v16, %v3026_v61  ;;  %v11821_v17 = vld [vmem:[%s16047_s1 + $0x68] sm:$0xff]   ;;  %v3032_v61 = vunpack.c.l.bf16 %v12583_v25 }
 0x63a   : > { %10886 = vmatpush3.bf16.msra.mxu0 %v11816_v15  ;;  %v10700_v41 = vpop.f32.mrb[110].mxu1  ;;  %v3056_v49 = vmul.f32 %v3024_v52, %v2909_v10  ;;  %v11819_v15 = vld [vmem:[%s16047_s1 + $0x58] sm:$0xff]  }
 0x63b   : > { %v3059_v58 = vmul.f32 %v10700_v41, %v3027_v59  ;;  %v2912_v32 = vpop.f32.mrb[111].mxu1  ;;  %10887 = vmatprep.subr.bf16.mxu0 %v11817_v12  ;;  %v3033_v59 = vunpack.c.l.bf16 %v12584_v35 }
 0x63c   : > { %v3057_v38 = vmul.f32 %v3025_v44, %v2912_v32  ;;  %v11822_v44 = vld [vmem:[%s16047_s1 + $0x70] sm:$0xff]   ;;  %v12585_v32 = vld [vmem:[%s12957_s27 + $0x124] sm:$0xf] }
 0x63d   : > { %v3087_v27 = vpack.c.bf16 %v3059_v58, %v3058_v7 }
 0x63e   : > { %v3086_v3 = vpack.c.bf16 %v3057_v38, %v3056_v49  ;;  %10888 = vmatpush3.bf16.msra.mxu0 %v11817_v12  ;;  %v12586_v49 = vld [vmem:[%s12957_s27 + $0x134] sm:$0xf] }
 0x63f   : > { %10889 = vmatprep.subr.bf16.mxu0 %v11818_v0  ;;  %v3039_v38 = vunpack.c.l.bf16 %v12586_v49 }
 0x640   : > { %v10703_v55 = vpop.f32.mrb[112].mxu1  ;;  %10745 = vmatprep.mubr.bf16.mxu0 %v3086_v3 }
 0x641   : > { %v2925_v5 = vpop.f32.mrb[113].mxu1  ;;  %10746 = vmatmul.mubr.bf16.gmra.mrb[96].mxu0 %v3087_v27  ;;  %v3062_v29 = vmul.f32 %v10703_v55, %v3030_v14  ;;  %v11823_v27 = vld [vmem:[%s16047_s1 + $0x78] sm:$0xff]   ;;  %v3036_v14 = vunpack.c.l.bf16 %v12587_v28 }
 0x642   : > { %v10704_v53 = vpop.f32.mrb[114].mxu1  ;;  %10890 = vmatpush3.bf16.msra.mxu0 %v11818_v0  ;;  %v3060_v60 = vmul.f32 %v3028_v54, %v2925_v5  ;;  %v3038_v0 = vunpack.c.l.bf16 %v12585_v32 }
 0x643   : > { %v3063_v63 = vmul.f32 %v10704_v53, %v3031_v4  ;;  %v2928_v43 = vpop.f32.mrb[115].mxu1  ;;  %10891 = vmatprep.subr.bf16.mxu0 %v11819_v15  ;;  %v3037_v4 = vunpack.c.l.bf16 %v12588_v1 }
 0x644   : > { %v3061_v8 = vmul.f32 %v3029_v40, %v2928_v43 }
 0x645   : > { %v3089_v31 = vpack.c.bf16 %v3063_v63, %v3062_v29  ;;  %v12589_v63 = vld [vmem:[%s12957_s27 + $0x164] sm:$0xf] }
 0x646   : > { %v3088_v37 = vpack.c.bf16 %v3061_v8, %v3060_v60  ;;  %10892 = vmatpush3.bf16.msra.mxu0 %v11819_v15  ;;  %v3042_v43 = vunpack.c.l.bf16 %v12589_v63 }
 0x647   : > { %10893 = vmatprep.subr.bf16.mxu0 %v11820_v47 }
 0x648   : > { %v10707_v51 = vpop.f32.mrb[116].mxu1  ;;  %10749 = vmatprep.mubr.bf16.mxu0 %v3088_v37 }
 0x649   : > { %v2941_v12 = vpop.f32.mrb[117].mxu1  ;;  %10750 = vmatmul.mubr.bf16.gmra.mrb[100].mxu0 %v3089_v31  ;;  %v3066_v19 = vmul.f32 %v10707_v51, %v3034_v62  ;;  %v12591_v31 = vld [vmem:[%s12957_s27 + $0x144] sm:$0xf]  ;;  %v3041_v62 = vunpack.c.l.bf16 %v12592_v34 }
 0x64a   : > { %v10708_v16 = vpop.f32.mrb[118].mxu1  ;;  %10894 = vmatpush3.bf16.msra.mxu0 %v11820_v47  ;;  %v3064_v10 = vmul.f32 %v3032_v61, %v2941_v12  ;;  %v12590_v47 = vld [vmem:[%s12957_s27 + $0x174] sm:$0xf]  ;;  %v3040_v37 = vunpack.c.l.bf16 %v12591_v31  ;;  %v3910_v31 = vld [vmem:[%s12957_s27 + $0x18] sm:$0xf] }
 0x64b   : > { %v3067_v52 = vmul.f32 %v10708_v16, %v3035_v39  ;;  %v2944_v50 = vpop.f32.mrb[119].mxu1  ;;  %10895 = vmatprep.subr.bf16.mxu0 %v11821_v17  ;;  %v3043_v60 = vunpack.c.l.bf16 %v12590_v47  ;;  %v12593_v16 = vld [vmem:[%s12957_s27 + $0x1a4] sm:$0xf] }
 0x64c   : > { %v3065_v41 = vmul.f32 %v3033_v59, %v2944_v50 }
 0x64d   : > { %v3091_v7 = vpack.c.bf16 %v3067_v52, %v3066_v19  ;;  %v3046_v19 = vunpack.c.l.bf16 %v12593_v16  ;;  %v12594_v52 = vld [vmem:[%s12957_s27 + $0x1b4] sm:$0xf]  ;;  %v3916_v16 = vld [vmem:[%s12957_s27 + $0x78] sm:$0xf] }
 0x64e   : > { %v3090_v58 = vpack.c.bf16 %v3065_v41, %v3064_v10  ;;  %10896 = vmatpush3.bf16.msra.mxu0 %v11821_v17  ;;  %v3047_v50 = vunpack.c.l.bf16 %v12594_v52  ;;  %v12595_v10 = vld [vmem:[%s12957_s27 + $0x184] sm:$0xf]  ;;  %v3918_v52 = vld [vmem:[%s12957_s27 + $0x98] sm:$0xf] }
 0x64f   : > { %10897 = vmatprep.subr.bf16.mxu0 %v11822_v44  ;;  %v3044_v41 = vunpack.c.l.bf16 %v12595_v10 }
 0x650   : > { %v10711_v3 = vpop.f32.mrb[120].mxu1  ;;  %10753 = vmatprep.mubr.bf16.mxu0 %v3090_v58 }
 0x651   : > { %v2957_v15 = vpop.f32.mrb[121].mxu1  ;;  %10754 = vmatmul.mubr.bf16.gmra.mrb[104].mxu0 %v3091_v7  ;;  %v3070_v21 = vmul.f32 %v10711_v3, %v3038_v0  ;;  %v12596_v7 = vld [vmem:[%s12957_s27 + $0x194] sm:$0xf] }
 0x652   : > { %v10712_v55 = vpop.f32.mrb[122].mxu1  ;;  %10898 = vmatpush3.bf16.msra.mxu0 %v11822_v44  ;;  %v3068_v40 = vmul.f32 %v3036_v14, %v2957_v15  ;;  %v3045_v58 = vunpack.c.l.bf16 %v12596_v7  ;;  %v3920_v7 = vld [vmem:[%s12957_s27 + $0xb8] sm:$0xf] }
 0x653   : > { %v3071_v54 = vmul.f32 %v10712_v55, %v3039_v38  ;;  %v2960_v9 = vpop.f32.mrb[123].mxu1  ;;  %10899 = vmatprep.subr.bf16.mxu0 %v11823_v27  ;;  %v12598_v55 = vld [vmem:[%s12957_s27 + $0x1f4] sm:$0xf] }
 0x654   : > { %v3069_v5 = vmul.f32 %v3037_v4, %v2960_v9  ;;  %v12597_v4 = vld [vmem:[%s12957_s27 + $0x1e4] sm:$0xf] }
 0x655   : > { %v3093_v53 = vpack.c.bf16 %v3071_v54, %v3070_v21  ;;  %v3050_v15 = vunpack.c.l.bf16 %v12597_v4  ;;  %v3051_v21 = vunpack.c.l.bf16 %v12598_v55  ;;  %v12599_v9 = vld [vmem:[%s12957_s27 + $0x1c4] sm:$0xf]  ;;  %v3926_v4 = vld [vmem:[%s12957_s27 + $0x118] sm:$0xf] }
 0x656   : > { %v3092_v29 = vpack.c.bf16 %v3069_v5, %v3068_v40  ;;  %10900 = vmatpush3.bf16.msra.mxu0 %v11823_v27  ;;  %v3048_v40 = vunpack.c.l.bf16 %v12599_v9  ;;  %v12600_v5 = vld [vmem:[%s12957_s27 + $0x1d4] sm:$0xf]  ;;  %v3929_v9 = vld [vmem:[%s12957_s27 + $0x148] sm:$0xf] }
 0x657   : > { %11588 = vmatprep.subr.bf16.mxu0 %v13115_v48 }
 0x658   : > { %v10715_v8 = vpop.f32.mrb[124].mxu1  ;;  %10757 = vmatprep.mubr.bf16.mxu0 %v3092_v29 }
 0x659   : > { %v2973_v24 = vpop.f32.mrb[125].mxu1  ;;  %10758 = vmatmul.mubr.bf16.gmra.mrb[108].mxu0 %v3093_v53  ;;  %v3074_v17 = vmul.f32 %v10715_v8, %v3042_v43  ;;  %v3049_v53 = vunpack.c.l.bf16 %v12600_v5  ;;  %v3909_v8 = vld [vmem:[%s12957_s27 + $0x8] sm:$0xf] }
 0x65a   : > { %v10716_v39 = vpop.f32.mrb[126].mxu1  ;;  %v3072_v61 = vmul.f32 %v3040_v37, %v2973_v24 }
 0x65b   : > { %v3075_v51 = vmul.f32 %v10716_v39, %v3043_v60  ;;  %v2976_v25 = vpop.f32.mrb[127].mxu1  ;;  %v9445_v39 = vcombine.low %v3909_v8, %v3910_v31  ;;  %v3935_v31 = vld [vmem:[%s12957_s27 + $0x1a8] sm:$0xf] }
 0x65c   : > { %v3073_v35 = vmul.f32 %v3041_v62, %v2976_v25  ;;  %v3913_v25 = vld [vmem:[%s12957_s27 + $0x48] sm:$0xf] }
 0x65d   : > { %v3095_v59 = vpack.c.bf16 %v3075_v51, %v3074_v17  ;;  %v3911_v17 = vld [vmem:[%s12957_s27 + $0x28] sm:$0xf]  ;;  %v3912_v51 = vld [vmem:[%s12957_s27 + $0x38] sm:$0xf] }
 0x65e   : > { %v3094_v12 = vpack.c.bf16 %v3073_v35, %v3072_v61  ;;  %v3914_v61 = vld [vmem:[%s12957_s27 + $0x58] sm:$0xf]  ;;  %v9446_v35 = vcombine.low %v3911_v17, %v3912_v51  ;;  %v3939_v17 = vld [vmem:[%s12957_s27 + $0x1e8] sm:$0xf] }
 0x65f   : > { %v3940_v51 = vld [vmem:[%s12957_s27 + $0x1f8] sm:$0xf] }
 0x660   : > { %v10719_v44 = vpop.f32.mrb[128].mxu1  ;;  %10761 = vmatprep.mubr.bf16.mxu0 %v3094_v12  ;;  %v3915_v12 = vld [vmem:[%s12957_s27 + $0x68] sm:$0xf] }
 0x661   : > { %v2989_v32 = vpop.f32.mrb[129].mxu1  ;;  %10762 = vmatmul.mubr.bf16.gmra.mrb[112].mxu0 %v3095_v59  ;;  %v3078_v49 = vmul.f32 %v10719_v44, %v3046_v19  ;;  %v9447_v59 = vcombine.low %v3913_v25, %v3914_v61  ;;  %v3917_v19 = vld [vmem:[%s12957_s27 + $0x88] sm:$0xf]  ;;  %v9448_v44 = vcombine.low %v3915_v12, %v3916_v16  ;;  %v9460_v25 = vcombine.low %v3939_v17, %v3940_v51  ;;  %v1925_v61 = vld [vmem:[%s16051_s5] sm:$0xff]  ;;  %v1927_v12 = vld [vmem:[%s16051_s5 + $0x10] sm:$0xff] }
 0x662   : > { %v10720_v0 = vpop.f32.mrb[130].mxu1  ;;  %v3076_v3 = vmul.f32 %v3044_v41, %v2989_v32  ;;  %v9449_v10 = vcombine.low %v3917_v19, %v3918_v52  ;;  %v3919_v41 = vld [vmem:[%s12957_s27 + $0xa8] sm:$0xf]  ;;  %v3922_v32 = vld [vmem:[%s12957_s27 + $0xd8] sm:$0xf] }
 0x663   : > { %v3079_v38 = vmul.f32 %v10720_v0, %v3047_v50  ;;  %v2992_v27 = vpop.f32.mrb[131].mxu1  ;;  %v14081_v50 = vld [vmem:[%s16050_s4] sm:$0xff]   ;;  %v9450_v0 = vcombine.low %v3919_v41, %v3920_v7  ;;  %v1928_v16 = vld [vmem:[%s16051_s5 + $0x18] sm:$0xff] }
 0x664   : > { %v3077_v28 = vmul.f32 %v3045_v58, %v2992_v27  ;;  %v3921_v58 = vld [vmem:[%s12957_s27 + $0xc8] sm:$0xf]  ;;  %v9380_v27 = vld [vmem:[%s16051_s5 + $0x38] sm:$0xff] }
 0x665   : > { %v3097_v14 = vpack.c.bf16 %v3079_v38, %v3078_v49  ;;  %v9451_v49 = vcombine.low %v3921_v58, %v3922_v32  ;;  %v9379_v38 = vld [vmem:[%s16051_s5 + $0x30] sm:$0xff] }
 0x666   : > { %v3096_v1 = vpack.c.bf16 %v3077_v28, %v3076_v3  ;;  %v3923_v3 = vld [vmem:[%s12957_s27 + $0xe8] sm:$0xf]  ;;  %v3924_v28 = vld [vmem:[%s12957_s27 + $0xf8] sm:$0xf] }
 0x668   : > { %v10723_v54 = vpop.f32.mrb[132].mxu1  ;;  %10765 = vmatprep.mubr.bf16.mxu0 %v3096_v1  ;;  %v3925_v1 = vld [vmem:[%s12957_s27 + $0x108] sm:$0xf] }
 0x669   : > { %v3005_v29 = vpop.f32.mrb[133].mxu1  ;;  %10766 = vmatmul.mubr.bf16.gmra.mrb[116].mxu0 %v3097_v14  ;;  %v3082_v43 = vmul.f32 %v10723_v54, %v3050_v15  ;;  %v11575_v14 = vpack.c.bf16 %v9380_v27, %v9379_v38  ;;  %v9452_v15 = vcombine.low %v3923_v3, %v3924_v28  ;;  %v9453_v55 = vcombine.low %v3925_v1, %v3926_v4  ;;  %v3928_v54 = vld [vmem:[%s12957_s27 + $0x138] sm:$0xf] }
 0x66a   : > { %v10724_v63 = vpop.f32.mrb[134].mxu1  ;;  %v3080_v37 = vmul.f32 %v3048_v40, %v3005_v29  ;;  %v3930_v40 = vld [vmem:[%s12957_s27 + $0x158] sm:$0xf]  ;;  %v3931_v29 = vld [vmem:[%s12957_s27 + $0x168] sm:$0xf] }
 0x66b   : > { %v3083_v47 = vmul.f32 %v10724_v63, %v3051_v21  ;;  %v3008_v60 = vpop.f32.mrb[135].mxu1  ;;  %11576 = vmatprep.subr.bf16.mxu1 %v11575_v14  ;;  %v3927_v21 = vld [vmem:[%s12957_s27 + $0x128] sm:$0xf]  ;;  %v3932_v63 = vld [vmem:[%s12957_s27 + $0x178] sm:$0xf] }
 0x66c   : > { %v3081_v34 = vmul.f32 %v3049_v53, %v3008_v60  ;;  %11578 = vmatpush3.bf16.msra.mxu1 %v11575_v14  ;;  %v9454_v5 = vcombine.low %v3927_v21, %v3928_v54  ;;  %v9455_v53 = vcombine.low %v3929_v9, %v3930_v40  ;;  %v9456_v60 = vcombine.low %v3931_v29, %v3932_v63 }
 0x66d   : > { %v3099_v62 = vpack.c.bf16 %v3083_v47, %v3082_v43  ;;  %v3933_v43 = vld [vmem:[%s12957_s27 + $0x188] sm:$0xf]  ;;  %v3934_v47 = vld [vmem:[%s12957_s27 + $0x198] sm:$0xf] }
 0x66e   : > { %v3098_v24 = vpack.c.bf16 %v3081_v34, %v3080_v37  ;;  %v9457_v8 = vcombine.low %v3933_v43, %v3934_v47  ;;  %v3936_v37 = vld [vmem:[%s12957_s27 + $0x1b8] sm:$0xf]  ;;  %v3937_v34 = vld [vmem:[%s12957_s27 + $0x1c8] sm:$0xf] }
 0x670   : > { %10769 = vmatprep.mubr.bf16.mxu0 %v3098_v24  ;;  %v9458_v24 = vcombine.low %v3935_v31, %v3936_v37  ;;  %v3943_v37 = vsub.s32 1, %v13023_v57 }
 0x671   : > { %10770 = vmatmul.mubr.bf16.gmra.mrb[120].mxu0 %v3099_v62  ;;  %v3938_v62 = vld [vmem:[%s12957_s27 + $0x1d8] sm:$0xf] }
 0x672   : > { %10901 = vmatprep.mubr.bf16.mxu0 %v9445_v39  ;;  %v9459_v39 = vcombine.low %v3937_v34, %v3938_v62  ;;  %v12602_v62 = vld [vmem:[%s16056_s10] sm:$0xff] }
 0x679   : > { %10902 = vmatmul.mubr.bf16.vlgmr.msra.gmra.mrb[124].mxu0 %v9446_v35  ;;  %v1926_v35 = vld [vmem:[%s16051_s5 + $0x8] sm:$0xff] }
 0x67a   : > { %10905 = vmatprep.mubr.bf16.mxu0 %v9447_v59  ;;  %11590 = vmatpush3.bf16.msra.mxu0 %v13115_v48  ;;  %v11579_v59 = vpack.c.bf16 %v1926_v35, %v1925_v61 }
 0x67b   : > { %11019 = vmatprep.subr.bf16.mxu0 %v14081_v50 }
 0x67c   : > { %11580 = vmatprep.subr.bf16.mxu1 %v11579_v59 }
 0x681   : > { %10906 = vmatmul.mubr.bf16.gmra.mrb[128].mxu0 %v9448_v44 }
 0x682   : > { %10909 = vmatprep.mubr.bf16.mxu0 %v9449_v10  ;;  %v11583_v10 = vpack.c.bf16 %v1928_v16, %v1927_v12 }
 0x689   : > { %10910 = vmatmul.mubr.bf16.gmra.mrb[132].mxu0 %v9450_v0 }
 0x68a   : > { %10913 = vmatprep.mubr.bf16.mxu0 %v9451_v49 }
 0x691   : > { %10914 = vmatmul.mubr.bf16.gmra.mrb[136].mxu0 %v9452_v15 }
 0x692   : > { %10917 = vmatprep.mubr.bf16.mxu0 %v9453_v55 }
 0x699   : > { %10918 = vmatmul.mubr.bf16.gmra.mrb[140].mxu0 %v9454_v5 }
 0x69a   : > { %10921 = vmatprep.mubr.bf16.mxu0 %v9455_v53 }
 0x6a1   : > { %10922 = vmatmul.mubr.bf16.gmra.mrb[144].mxu0 %v9456_v60 }
 0x6a2   : > { %10925 = vmatprep.mubr.bf16.mxu0 %v9457_v8 }
 0x6a9   : > { %10926 = vmatmul.mubr.bf16.gmra.mrb[148].mxu0 %v9458_v24  ;;  %v14159_v24 = vrot.slane %v12602_v62, %v3943_v37 }
 0x6aa   : > { %10929 = vmatprep.mubr.bf16.mxu0 %v9459_v39 }
 0x6b1   : > { %10930 = vmatmul.mubr.bf16.gmra.mrb[152].mxu0 %v9460_v25 }
 0x70c   : > { %v10743_v19 = vpop.f32.mrb[92].mxu0 }
 0x70d   : > { %v3134_v52 = vpop.f32.mrb[93].mxu0 }
 0x70e   : > { %v10744_v44 = vpop.f32.mrb[94].mxu0  ;;  %10781 = vmatprep.mubr.msk.f32.mxu1 %vm3266_vm1, %v3134_v52 }
 0x70f   : > { %v3137_v41 = vpop.f32.mrb[95].mxu0 }
 0x710   : > { %10782 = vmatmul.mubr.msk.f32.vlgmr.msra.gmra.mrb[102].mxu1 %vm3266_vm1, %v3137_v41 }
 0x711   : > { %10784 = vmatprep.mubr.msk.f32.mxu1 %vm3266_vm1, %v10743_v19  ;;  %11582 = vmatpush3.bf16.msra.mxu1 %v11579_v59 }
 0x712   : > { %11584 = vmatprep.subr.bf16.mxu1 %v11583_v10 }
 0x714   : > { %v10747_v7 = vpop.f32.mrb[96].mxu0  ;;  %10785 = vmatmul.mubr.msk.f32.gmra.mrb[136].mxu1 %vm3266_vm1, %v10744_v44 }
 0x715   : > { %v3150_v58 = vpop.f32.mrb[97].mxu0  ;;  %11586 = vmatpush3.bf16.msra.mxu1 %v11583_v10 }
 0x716   : > { %v10748_v32 = vpop.f32.mrb[98].mxu0  ;;  %10787 = vmatprep.mubr.msk.f32.mxu1 %vm3266_vm1, %v3150_v58 }
 0x717   : > { %v3153_v0 = vpop.f32.mrb[99].mxu0 }
 0x718   : > { %10788 = vmatmul.mubr.msk.f32.gmra.mrb[138].mxu1 %vm3266_vm1, %v3153_v0 }
 0x719   : > { %10790 = vmatprep.mubr.msk.f32.mxu1 %vm3266_vm1, %v10747_v7 }
 0x71c   : > { %v10751_v49 = vpop.f32.mrb[100].mxu0  ;;  %10791 = vmatmul.mubr.msk.f32.gmra.mrb[140].mxu1 %vm3266_vm1, %v10748_v32 }
 0x71d   : > { %v3166_v38 = vpop.f32.mrb[101].mxu0 }
 0x71e   : > { %v10752_v27 = vpop.f32.mrb[102].mxu0  ;;  %10793 = vmatprep.mubr.msk.f32.mxu1 %vm3266_vm1, %v3166_v38 }
 0x71f   : > { %v3169_v3 = vpop.f32.mrb[103].mxu0 }
 0x720   : > { %10794 = vmatmul.mubr.msk.f32.gmra.mrb[142].mxu1 %vm3266_vm1, %v3169_v3 }
 0x721   : > { %10796 = vmatprep.mubr.msk.f32.mxu1 %vm3266_vm1, %v10751_v49 }
 0x724   : > { %v10755_v28 = vpop.f32.mrb[104].mxu0  ;;  %10797 = vmatmul.mubr.msk.f32.gmra.mrb[144].mxu1 %vm3266_vm1, %v10752_v27 }
 0x725   : > { %v3182_v14 = vpop.f32.mrb[105].mxu0 }
 0x726   : > { %v10756_v1 = vpop.f32.mrb[106].mxu0  ;;  %10799 = vmatprep.mubr.msk.f32.mxu1 %vm3266_vm1, %v3182_v14 }
 0x727   : > { %v3185_v4 = vpop.f32.mrb[107].mxu0 }
 0x728   : > { %10800 = vmatmul.mubr.msk.f32.gmra.mrb[146].mxu1 %vm3266_vm1, %v3185_v4 }
 0x729   : > { %10802 = vmatprep.mubr.msk.f32.mxu1 %vm3266_vm1, %v10755_v28 }
 0x72c   : > { %v10759_v15 = vpop.f32.mrb[108].mxu0  ;;  %10803 = vmatmul.mubr.msk.f32.gmra.mrb[148].mxu1 %vm3266_vm1, %v10756_v1 }
 0x72d   : > { %v3198_v55 = vpop.f32.mrb[109].mxu0 }
 0x72e   : > { %v10760_v21 = vpop.f32.mrb[110].mxu0  ;;  %10805 = vmatprep.mubr.msk.f32.mxu1 %vm3266_vm1, %v3198_v55 }
 0x72f   : > { %v3201_v54 = vpop.f32.mrb[111].mxu0 }
 0x730   : > { %10806 = vmatmul.mubr.msk.f32.gmra.mrb[150].mxu1 %vm3266_vm1, %v3201_v54 }
 0x731   : > { %10808 = vmatprep.mubr.msk.f32.mxu1 %vm3266_vm1, %v10759_v15 }
 0x734   : > { %v10763_v9 = vpop.f32.mrb[112].mxu0  ;;  %10809 = vmatmul.mubr.msk.f32.gmra.mrb[152].mxu1 %vm3266_vm1, %v10760_v21 }
 0x735   : > { %v3214_v40 = vpop.f32.mrb[113].mxu0 }
 0x736   : > { %v10764_v5 = vpop.f32.mrb[114].mxu0  ;;  %10811 = vmatprep.mubr.msk.f32.mxu1 %vm3266_vm1, %v3214_v40 }
 0x737   : > { %v3217_v53 = vpop.f32.mrb[115].mxu0 }
 0x738   : > { %10812 = vmatmul.mubr.msk.f32.gmra.mrb[154].mxu1 %vm3266_vm1, %v3217_v53 }
 0x739   : > { %10814 = vmatprep.mubr.msk.f32.mxu1 %vm3266_vm1, %v10763_v9 }
 0x73c   : > { %v10767_v29 = vpop.f32.mrb[116].mxu0  ;;  %10815 = vmatmul.mubr.msk.f32.gmra.mrb[156].mxu1 %vm3266_vm1, %v10764_v5 }
 0x73d   : > { %v3230_v63 = vpop.f32.mrb[117].mxu0 }
 0x73e   : > { %v10768_v43 = vpop.f32.mrb[118].mxu0  ;;  %10817 = vmatprep.mubr.msk.f32.mxu1 %vm3266_vm1, %v3230_v63  ;;  %v16099_v63 = vld [vmem:[#allocation12_spill] sm:$0xff] }
 0x73f   : > { %v3233_v47 = vpop.f32.mrb[119].mxu0 }
 0x740   : > { %10818 = vmatmul.mubr.msk.f32.gmra.mrb[158].mxu1 %vm3266_vm1, %v3233_v47 }
 0x741   : > { %10820 = vmatprep.mubr.msk.f32.mxu1 %vm3266_vm1, %v10767_v29 }
 0x744   : > { %v10771_v60 = vpop.f32.mrb[120].mxu0  ;;  %10821 = vmatmul.mubr.msk.f32.gmra.mrb[160].mxu1 %vm3266_vm1, %v10768_v43 }
 0x745   : > { %v3246_v8 = vpop.f32.mrb[121].mxu0 }
 0x746   : > { %v10772_v31 = vpop.f32.mrb[122].mxu0  ;;  %10823 = vmatprep.mubr.msk.f32.mxu1 %vm3266_vm1, %v3246_v8 }
 0x747   : > { %v3249_v34 = vpop.f32.mrb[123].mxu0 }
 0x748   : > { %10824 = vmatmul.mubr.msk.f32.gmra.mrb[162].mxu1 %vm3266_vm1, %v3249_v34  ;;  %v16101_v34 = vld [vmem:[#allocation11_spill] sm:$0xff] }
 0x749   : > { %10826 = vmatprep.mubr.msk.f32.mxu1 %vm3266_vm1, %v10771_v60 }
 0x74c   : > { %10827 = vmatmul.mubr.msk.f32.gmra.mrb[164].mxu1 %vm3266_vm1, %v10772_v31  ;;  %v10903_v39 = vpop.f32.mrb[124].mxu0  ;;  %v16100_v31 = vld [vmem:[#allocation14_spill] sm:$0xff] }
 0x74d   : > { %10837 = vmatprep.mubr.msk.f32.mxu1 %vm3266_vm1, %v13715_v42  ;;  %v4123_v17 = vpop.f32.mrb[125].mxu0  ;;  %v14168_v35 = vadd.f32 %v10903_v39, %v14159_v24 }
 0x74e   : > { %v14165_v51 = vadd.f32 %v4123_v17, %v14159_v24  ;;  %v10904_v25 = vpop.f32.mrb[126].mxu0  ;;  %v16102_v17 = vld [vmem:[#allocation13_spill] sm:$0xff] }
 0x74f   : > { %v4126_v61 = vpop.f32.mrb[127].mxu0  ;;  %v14180_v42 = vadd.f32 %v10904_v25, %v14159_v24 }
 0x750   : > { %v14171_v59 = vadd.f32 %v4126_v61, %v14159_v24  ;;  %10838 = vmatmul.mubr.msk.f32.vlgmr.msra.gmra.mrb[102].mxu1 %vm3266_vm1, %v13720_v45  ;;  %v4250_v12 = vsel %vm827_vm0, %v14165_v51, -inf  ;;  %v4256_v45 = vsel %vm827_vm0, %v14168_v35, -inf }
 0x751   : > { %4251 = vmax.xlane.f32.xlu0 %v4250_v12  ;;  %10840 = vmatprep.mubr.msk.f32.mxu1 %vm3266_vm1, %v13712_v18  ;;  %v4259_v10 = vsel %vm827_vm0, %v14180_v42, -inf }
 0x752   : > { %v4253_v16 = vsel %vm827_vm0, %v14171_v59, -inf }
 0x753   : > { %4254 = vmax.xlane.f32.xlu1 %v4253_v16  ;;  %v16103_v16 = vld [vmem:[#allocation16_spill] sm:$0xff] }
 0x754   : > { %10841 = vmatmul.mubr.msk.f32.gmra.mrb[136].mxu1 %vm3266_vm1, %v13717_v20  ;;  %v10907_v19 = vpop.f32.mrb[128].mxu0 }
 0x755   : > { %v4139_v52 = vpop.f32.mrb[129].mxu0  ;;  %4257 = vmax.xlane.f32.xlu0 %v4256_v45  ;;  %10843 = vmatprep.mubr.msk.f32.mxu1 %vm3266_vm1, %v13737_v11  ;;  %v14196_v20 = vadd.f32 %v10907_v19, %v14159_v24 }
 0x756   : > { %v14191_v18 = vadd.f32 %v4139_v52, %v14159_v24  ;;  %v10908_v44 = vpop.f32.mrb[130].mxu0 }
 0x757   : > { %v4142_v41 = vpop.f32.mrb[131].mxu0  ;;  %4260 = vmax.xlane.f32.xlu1 %v4259_v10  ;;  %v14208_v58 = vadd.f32 %v10908_v44, %v14159_v24 }
 0x758   : > { %v14199_v7 = vadd.f32 %v4142_v41, %v14159_v24  ;;  %10844 = vmatmul.mubr.msk.f32.gmra.mrb[138].mxu1 %vm3266_vm1, %v13752_v23  ;;  %v4262_v11 = vsel %vm827_vm0, %v14191_v18, -inf  ;;  %v4268_v23 = vsel %vm827_vm0, %v14196_v20, -inf }
 0x759   : > { %4263 = vmax.xlane.f32.xlu0 %v4262_v11  ;;  %10846 = vmatprep.mubr.msk.f32.mxu1 %vm3266_vm1, %v13730_v30  ;;  %v4271_v27 = vsel %vm827_vm0, %v14208_v58, -inf  ;;  %v16104_v11 = vld [vmem:[#allocation18_spill] sm:$0xff] }
 0x75a   : > { %v4265_v32 = vsel %vm827_vm0, %v14199_v7, -inf }
 0x75b   : > { %4266 = vmax.xlane.f32.xlu1 %v4265_v32 }
 0x75c   : > { %10847 = vmatmul.mubr.msk.f32.gmra.mrb[140].mxu1 %vm3266_vm1, %v13742_v33  ;;  %v10911_v0 = vpop.f32.mrb[132].mxu0 }
 0x75d   : > { %v4155_v49 = vpop.f32.mrb[133].mxu0  ;;  %4269 = vmax.xlane.f32.xlu0 %v4268_v23  ;;  %10849 = vmatprep.mubr.msk.f32.mxu1 %vm3266_vm1, %v13774_v56  ;;  %v14224_v33 = vadd.f32 %v10911_v0, %v14159_v24  ;;  %v16105_v0 = vld [vmem:[#allocation15_spill] sm:$0xff] }
 0x75e   : > { %v14219_v30 = vadd.f32 %v4155_v49, %v14159_v24  ;;  %v10912_v38 = vpop.f32.mrb[134].mxu0 }
 0x75f   : > { %v4158_v3 = vpop.f32.mrb[135].mxu0  ;;  %4272 = vmax.xlane.f32.xlu1 %v4271_v27  ;;  %v14236_v14 = vadd.f32 %v10912_v38, %v14159_v24  ;;  %v16106_v38 = vld [vmem:[#allocation17_spill] sm:$0xff] }
 0x760   : > { %v14227_v28 = vadd.f32 %v4158_v3, %v14159_v24  ;;  %10850 = vmatmul.mubr.msk.f32.gmra.mrb[142].mxu1 %vm3266_vm1, %v13786_v6  ;;  %v4274_v56 = vsel %vm827_vm0, %v14219_v30, -inf  ;;  %v4280_v6 = vsel %vm827_vm0, %v14224_v33, -inf }
 0x761   : > { %4275 = vmax.xlane.f32.xlu0 %v4274_v56  ;;  %10852 = vmatprep.mubr.msk.f32.mxu1 %vm3266_vm1, %v13767_v13  ;;  %v4283_v21 = vsel %vm827_vm0, %v14236_v14, -inf }
 0x762   : > { %v4277_v1 = vsel %vm827_vm0, %v14227_v28, -inf }
 0x763   : > { %4278 = vmax.xlane.f32.xlu1 %v4277_v1  ;;  %v16107_v1 = vld [vmem:[#allocation20_spill] sm:$0xff] }
 0x764   : > { %10853 = vmatmul.mubr.msk.f32.gmra.mrb[144].mxu1 %vm3266_vm1, %v13776_v46  ;;  %v10915_v4 = vpop.f32.mrb[136].mxu0 }
 0x765   : > { %v4171_v15 = vpop.f32.mrb[137].mxu0  ;;  %4281 = vmax.xlane.f32.xlu0 %v4280_v6  ;;  %10855 = vmatprep.mubr.msk.f32.mxu1 %vm3266_vm1, %v13808_v36  ;;  %v14252_v46 = vadd.f32 %v10915_v4, %v14159_v24 }
 0x766   : > { %v14247_v13 = vadd.f32 %v4171_v15, %v14159_v24  ;;  %v10916_v55 = vpop.f32.mrb[138].mxu0 }
 0x767   : > { %v4174_v54 = vpop.f32.mrb[139].mxu0  ;;  %4284 = vmax.xlane.f32.xlu1 %v4283_v21  ;;  %v14264_v40 = vadd.f32 %v10916_v55, %v14159_v24 }
 0x768   : > { %v14255_v9 = vadd.f32 %v4174_v54, %v14159_v24  ;;  %10856 = vmatmul.mubr.msk.f32.gmra.mrb[146].mxu1 %vm3266_vm1, %v13820_v22  ;;  %v4286_v36 = vsel %vm827_vm0, %v14247_v13, -inf  ;;  %v4292_v22 = vsel %vm827_vm0, %v14252_v46, -inf }
 0x769   : > { %4287 = vmax.xlane.f32.xlu0 %v4286_v36  ;;  %10858 = vmatprep.mubr.msk.f32.mxu1 %vm3266_vm1, %v13801_v26  ;;  %v4295_v47 = vsel %vm827_vm0, %v14264_v40, -inf  ;;  %v16108_v36 = vld [vmem:[#allocation22_spill] sm:$0xff] }
 0x76a   : > { %v4289_v5 = vsel %vm827_vm0, %v14255_v9, -inf }
 0x76b   : > { %4290 = vmax.xlane.f32.xlu1 %v4289_v5 }
 0x76c   : > { %10859 = vmatmul.mubr.msk.f32.gmra.mrb[148].mxu1 %vm3266_vm1, %v13810_v2  ;;  %v10919_v53 = vpop.f32.mrb[140].mxu0 }
 0x76d   : > { %v4187_v29 = vpop.f32.mrb[141].mxu0  ;;  %4293 = vmax.xlane.f32.xlu0 %v4292_v22  ;;  %10861 = vmatprep.mubr.msk.f32.mxu1 %vm3266_vm1, %v16099_v63  ;;  %v14280_v2 = vadd.f32 %v10919_v53, %v14159_v24  ;;  %v16109_v53 = vld [vmem:[#allocation19_spill] sm:$0xff]  ;;  %v16110_v63 = vld [vmem:[#allocation21_spill] sm:$0xff] }
 0x76e   : > { %v14275_v26 = vadd.f32 %v4187_v29, %v14159_v24  ;;  %v10920_v43 = vpop.f32.mrb[142].mxu0 }
 0x76f   : > { %v4190_v60 = vpop.f32.mrb[143].mxu0  ;;  %4296 = vmax.xlane.f32.xlu1 %v4295_v47  ;;  %v14292_v62 = vadd.f32 %v10920_v43, %v14159_v24  ;;  %v4304_v61 = vsel %vm827_vm0, %v14280_v2, -inf }
 0x770   : > { %v14283_v8 = vadd.f32 %v4190_v60, %v14159_v24  ;;  %10862 = vmatmul.mubr.msk.f32.gmra.mrb[150].mxu1 %vm3266_vm1, %v16100_v31  ;;  %v4298_v37 = vsel %vm827_vm0, %v14275_v26, -inf  ;;  %v16111_v31 = vld [vmem:[#allocation24_spill] sm:$0xff] }
 0x771   : > { %4299 = vmax.xlane.f32.xlu0 %v4298_v37  ;;  %10864 = vmatprep.mubr.msk.f32.mxu1 %vm3266_vm1, %v16101_v34  ;;  %v4307_v52 = vsel %vm827_vm0, %v14292_v62, -inf }
 0x772   : > { %v4301_v39 = vsel %vm827_vm0, %v14283_v8, -inf }
 0x773   : > { %4302 = vmax.xlane.f32.xlu1 %v4301_v39 }
 0x774   : > { %10865 = vmatmul.mubr.msk.f32.gmra.mrb[152].mxu1 %vm3266_vm1, %v16102_v17  ;;  %v10923_v25 = vpop.f32.mrb[144].mxu0 }
 0x775   : > { %v4203_v12 = vpop.f32.mrb[145].mxu0  ;;  %4305 = vmax.xlane.f32.xlu0 %v4304_v61  ;;  %10867 = vmatprep.mubr.msk.f32.mxu1 %vm3266_vm1, %v16103_v16  ;;  %v14308_v10 = vadd.f32 %v10923_v25, %v14159_v24 }
 0x776   : > { %v14303_v19 = vadd.f32 %v4203_v12, %v14159_v24  ;;  %v10924_v45 = vpop.f32.mrb[146].mxu0  ;;  %v16112_v12 = vld [vmem:[#allocation26_spill] sm:$0xff] }
 0x777   : > { %v4206_v44 = vpop.f32.mrb[147].mxu0  ;;  %4308 = vmax.xlane.f32.xlu1 %v4307_v52  ;;  %v14320_v23 = vadd.f32 %v10924_v45, %v14159_v24  ;;  %v4316_v3 = vsel %vm827_vm0, %v14308_v10, -inf  ;;  %v16113_v45 = vld [vmem:[#allocation23_spill] sm:$0xff] }
 0x778   : > { %v14311_v41 = vadd.f32 %v4206_v44, %v14159_v24  ;;  %10868 = vmatmul.mubr.msk.f32.gmra.mrb[154].mxu1 %vm3266_vm1, %v16104_v11  ;;  %v4310_v32 = vsel %vm827_vm0, %v14303_v19, -inf  ;;  %v16114_v11 = vld [vmem:[#allocation25_spill] sm:$0xff] }
 0x779   : > { %4311 = vmax.xlane.f32.xlu0 %v4310_v32  ;;  %10870 = vmatprep.mubr.msk.f32.mxu1 %vm3266_vm1, %v16105_v0  ;;  %v4319_v15 = vsel %vm827_vm0, %v14320_v23, -inf }
 0x77a   : > { %v4313_v49 = vsel %vm827_vm0, %v14311_v41, -inf }
 0x77b   : > { %4314 = vmax.xlane.f32.xlu1 %v4313_v49 }
 0x77c   : > { %10871 = vmatmul.mubr.msk.f32.gmra.mrb[156].mxu1 %vm3266_vm1, %v16106_v38  ;;  %v10927_v27 = vpop.f32.mrb[148].mxu0 }
 0x77d   : > { %v4219_v56 = vpop.f32.mrb[149].mxu0  ;;  %4317 = vmax.xlane.f32.xlu0 %v4316_v3  ;;  %10873 = vmatprep.mubr.msk.f32.mxu1 %vm3266_vm1, %v16107_v1  ;;  %v14336_v21 = vadd.f32 %v10927_v27, %v14159_v24 }
 0x77e   : > { %v14331_v4 = vadd.f32 %v4219_v56, %v14159_v24  ;;  %v10928_v6 = vpop.f32.mrb[150].mxu0 }
 0x77f   : > { %v4222_v55 = vpop.f32.mrb[151].mxu0  ;;  %4320 = vmax.xlane.f32.xlu1 %v4319_v15  ;;  %v14348_v22 = vadd.f32 %v10928_v6, %v14159_v24  ;;  %v4328_v47 = vsel %vm827_vm0, %v14336_v21, -inf }
 0x780   : > { %v14339_v54 = vadd.f32 %v4222_v55, %v14159_v24  ;;  %10874 = vmatmul.mubr.msk.f32.gmra.mrb[158].mxu1 %vm3266_vm1, %v16108_v36  ;;  %v4322_v5 = vsel %vm827_vm0, %v14331_v4, -inf }
 0x781   : > { %4323 = vmax.xlane.f32.xlu0 %v4322_v5  ;;  %10876 = vmatprep.mubr.msk.f32.mxu1 %vm3266_vm1, %v16109_v53  ;;  %v4331_v39 = vsel %vm827_vm0, %v14348_v22, -inf }
 0x782   : > { %v4325_v29 = vsel %vm827_vm0, %v14339_v54, -inf }
 0x783   : > { %4326 = vmax.xlane.f32.xlu1 %v4325_v29 }
 0x784   : > { %10877 = vmatmul.mubr.msk.f32.gmra.mrb[160].mxu1 %vm3266_vm1, %v16110_v63  ;;  %v10931_v43 = vpop.f32.mrb[152].mxu0 }
 0x785   : > { %v4235_v60 = vpop.f32.mrb[153].mxu0  ;;  %4329 = vmax.xlane.f32.xlu0 %v4328_v47  ;;  %10879 = vmatprep.mubr.msk.f32.mxu1 %vm3266_vm1, %v16111_v31  ;;  %v14364_v25 = vadd.f32 %v10931_v43, %v14159_v24 }
 0x786   : > { %v14359_v37 = vadd.f32 %v4235_v60, %v14159_v24  ;;  %v10932_v34 = vpop.f32.mrb[154].mxu0 }
 0x787   : > { %v4238_v17 = vpop.f32.mrb[155].mxu0  ;;  %4332 = vmax.xlane.f32.xlu1 %v4331_v39  ;;  %v14376_v52 = vadd.f32 %v10932_v34, %v14159_v24  ;;  %v4340_v32 = vsel %vm827_vm0, %v14364_v25, -inf }
 0x788   : > { %v14367_v61 = vadd.f32 %v4238_v17, %v14159_v24  ;;  %10880 = vmatmul.mubr.msk.f32.gmra.mrb[162].mxu1 %vm3266_vm1, %v16112_v12  ;;  %v4334_v16 = vsel %vm827_vm0, %v14359_v37, -inf  ;;  %v11840_v24 = vld [vmem:[%s16048_s2 + $0x8] sm:$0xff]  }
 0x789   : > { %4335 = vmax.xlane.f32.xlu0 %v4334_v16  ;;  %10882 = vmatprep.mubr.msk.f32.mxu1 %vm3266_vm1, %v16113_v45  ;;  %v4343_v0 = vsel %vm827_vm0, %v14376_v52, -inf }
 0x78a   : > { %v4337_v44 = vsel %vm827_vm0, %v14367_v61, -inf  ;;  %10985 = vmatprep.subr.bf16.mxu1 %v11840_v24 }
 0x78b   : > { %4338 = vmax.xlane.f32.xlu1 %v4337_v44  ;;  %10986 = vmatpush3.bf16.msra.mxu1 %v11840_v24 }
 0x78c   : > { %10883 = vmatmul.mubr.msk.f32.gmra.mrb[164].mxu1 %vm3266_vm1, %v16114_v11 }
 0x78d   : > { %4341 = vmax.xlane.f32.xlu0 %v4340_v32 }
 0x78f   : > { %4344 = vmax.xlane.f32.xlu1 %v4343_v0 }
 0x7de   : > { %v4252_v49 = vpop.xlane.xlu0 %4251 }
 0x7df   : > { %v4346_v38 = vsub.f32 %v14165_v51, %v4252_v49 }
 0x7e0   : > { %v4255_v27 = vpop.xlane.xlu1 %4254 }
 0x7e1   : > { %v4378_v3 = vmul.f32 1.442695, %v4346_v38  ;;  %v4347_v56 = vsub.f32 %v14171_v59, %v4255_v27  ;;  %v12604_v27 = vld [vmem:[%s16050_s4 + $0x10] sm:$0xff]  }
 0x7e2   : > { %v4258_v1 = vpop.xlane.xlu0 %4257 }
 0x7e3   : > { %12138 = vpow2.f32 %v4378_v3  ;;  %v4380_v6 = vmul.f32 1.442695, %v4347_v56  ;;  %v4348_v15 = vsub.f32 %v14168_v35, %v4258_v1 }
 0x7e4   : > { %v4261_v55 = vpop.xlane.xlu1 %4260 }
 0x7e5   : > { %12140 = vpow2.f32 %v4380_v6  ;;  %v4382_v36 = vmul.f32 1.442695, %v4348_v15  ;;  %v4349_v5 = vsub.f32 %v14180_v42, %v4261_v55 }
 0x7e6   : > { %v4264_v53 = vpop.xlane.xlu0 %4263 }
 0x7e7   : > { %12142 = vpow2.f32 %v4382_v36  ;;  %v4384_v29 = vmul.f32 1.442695, %v4349_v5  ;;  %v4350_v63 = vsub.f32 %v14191_v18, %v4264_v53  ;;  %v12605_v36 = vld [vmem:[%s16050_s4 + $0x18] sm:$0xff]  }
 0x7e8   : > { %v4267_v51 = vpop.xlane.xlu1 %4266 }
 0x7e9   : > { %12144 = vpow2.f32 %v4384_v29  ;;  %v4386_v43 = vmul.f32 1.442695, %v4350_v63  ;;  %v4351_v59 = vsub.f32 %v14199_v7, %v4267_v51 }
 0x7ea   : > { %v4270_v47 = vpop.xlane.xlu0 %4269 }
 0x7eb   : > { %12146 = vpow2.f32 %v4386_v43  ;;  %v4388_v60 = vmul.f32 1.442695, %v4351_v59  ;;  %v4352_v35 = vsub.f32 %v14196_v20, %v4270_v47  ;;  %v12606_v59 = vld [vmem:[%s16050_s4 + $0x20] sm:$0xff]  }
 0x7ec   : > { %v4273_v31 = vpop.xlane.xlu1 %4272 }
 0x7ed   : > { %v14396_v34 = vpop.eup %12138  ;;  %12148 = vpow2.f32 %v4388_v60  ;;  %v4390_v42 = vmul.f32 1.442695, %v4352_v35  ;;  %v4353_v39 = vsub.f32 %v14208_v58, %v4273_v31 }
 0x7ee   : > { %10937 = vmatprep.mubr.msk.f32.mxu0 %vm827_vm0, %v14396_v34  ;;  %v4276_v18 = vpop.xlane.xlu0 %4275 }
 0x7ef   : > { %v14401_v17 = vpop.eup %12140  ;;  %12150 = vpow2.f32 %v4390_v42  ;;  %v4392_v7 = vmul.f32 1.442695, %v4353_v39  ;;  %v4354_v12 = vsub.f32 %v14219_v30, %v4276_v18  ;;  %v12603_v30 = vld [vmem:[%s16050_s4 + $0x8] sm:$0xff]  }
 0x7f0   : > { %v4279_v16 = vpop.xlane.xlu1 %4278  ;;  %10938 = vmatmul.mubr.msk.f32.vlgmr.msra.gmra.mrb[90].mxu0 %vm827_vm0, %v14401_v17  ;;  %v12607_v18 = vld [vmem:[%s16050_s4 + $0x28] sm:$0xff]  }
 0x7f1   : > { %v14406_v20 = vpop.eup %12142  ;;  %12152 = vpow2.f32 %v4392_v7  ;;  %v4394_v45 = vmul.f32 1.442695, %v4354_v12  ;;  %v4355_v58 = vsub.f32 %v14227_v28, %v4279_v16  ;;  %11020 = vmatpush3.bf16.msra.mxu0 %v14081_v50 }
 0x7f2   : > { %10940 = vmatprep.mubr.msk.f32.mxu0 %vm827_vm0, %v14406_v20  ;;  %v4282_v44 = vpop.xlane.xlu0 %4281  ;;  %11021 = vmatprep.subr.bf16.mxu0 %v12603_v30 }
 0x7f3   : > { %v14415_v11 = vpop.eup %12144  ;;  %12154 = vpow2.f32 %v4394_v45  ;;  %v4396_v32 = vmul.f32 1.442695, %v4355_v58  ;;  %v4356_v0 = vsub.f32 %v14224_v33, %v4282_v44 }
 0x7f4   : > { %v4285_v24 = vpop.xlane.xlu1 %4284  ;;  %10941 = vmatmul.mubr.msk.f32.gmra.mrb[156].mxu0 %vm827_vm0, %v14415_v11 }
 0x7f5   : > { %v14420_v50 = vpop.eup %12146  ;;  %12156 = vpow2.f32 %v4396_v32  ;;  %v4398_v28 = vmul.f32 1.442695, %v4356_v0  ;;  %v4357_v49 = vsub.f32 %v14236_v14, %v4285_v24  ;;  %11022 = vmatpush3.bf16.msra.mxu0 %v12603_v30  ;;  %v12608_v30 = vld [vmem:[%s16050_s4 + $0x30] sm:$0xff]  }
 0x7f6   : > { %10943 = vmatprep.mubr.msk.f32.mxu0 %vm827_vm0, %v14420_v50  ;;  %v4288_v38 = vpop.xlane.xlu0 %4287  ;;  %11023 = vmatprep.subr.bf16.mxu0 %v12604_v27 }
 0x7f7   : > { %v14428_v33 = vpop.eup %12148  ;;  %12158 = vpow2.f32 %v4398_v28  ;;  %v4400_v3 = vmul.f32 1.442695, %v4357_v49  ;;  %v4358_v56 = vsub.f32 %v14247_v13, %v4288_v38 }
 0x7f8   : > { %v4291_v1 = vpop.xlane.xlu1 %4290  ;;  %10944 = vmatmul.mubr.msk.f32.gmra.mrb[158].mxu0 %vm827_vm0, %v14428_v33 }
 0x7f9   : > { %v14433_v14 = vpop.eup %12150  ;;  %12160 = vpow2.f32 %v4400_v3  ;;  %v4402_v6 = vmul.f32 1.442695, %v4358_v56  ;;  %v4359_v15 = vsub.f32 %v14255_v9, %v4291_v1  ;;  %11024 = vmatpush3.bf16.msra.mxu0 %v12604_v27  ;;  %v12609_v27 = vld [vmem:[%s16050_s4 + $0x38] sm:$0xff]  }
 0x7fa   : > { %10946 = vmatprep.mubr.msk.f32.mxu0 %vm827_vm0, %v14433_v14  ;;  %v4294_v55 = vpop.xlane.xlu0 %4293  ;;  %11025 = vmatprep.subr.bf16.mxu0 %v12605_v36 }
 0x7fb   : > { %v14441_v13 = vpop.eup %12152  ;;  %12162 = vpow2.f32 %v4402_v6  ;;  %v4404_v5 = vmul.f32 1.442695, %v4359_v15  ;;  %v4360_v53 = vsub.f32 %v14252_v46, %v4294_v55 }
 0x7fc   : > { %v4297_v29 = vpop.xlane.xlu1 %4296  ;;  %10947 = vmatmul.mubr.msk.f32.gmra.mrb[160].mxu0 %vm827_vm0, %v14441_v13 }
 0x7fd   : > { %v14446_v9 = vpop.eup %12154  ;;  %12164 = vpow2.f32 %v4404_v5  ;;  %v4406_v63 = vmul.f32 1.442695, %v4360_v53  ;;  %v4361_v51 = vsub.f32 %v14264_v40, %v4297_v29  ;;  %11026 = vmatpush3.bf16.msra.mxu0 %v12605_v36 }
 0x7fe   : > { %10949 = vmatprep.mubr.msk.f32.mxu0 %vm827_vm0, %v14446_v9  ;;  %v4300_v43 = vpop.xlane.xlu0 %4299  ;;  %11027 = vmatprep.subr.bf16.mxu0 %v12606_v59 }
 0x7ff   : > { %v14454_v46 = vpop.eup %12156  ;;  %12166 = vpow2.f32 %v4406_v63  ;;  %v4408_v47 = vmul.f32 1.442695, %v4361_v51  ;;  %v4362_v60 = vsub.f32 %v14275_v26, %v4300_v43 }
 0x800   : > { %v4303_v35 = vpop.xlane.xlu1 %4302  ;;  %10950 = vmatmul.mubr.msk.f32.gmra.mrb[162].mxu0 %vm827_vm0, %v14454_v46 }
 0x801   : > { %v14459_v40 = vpop.eup %12158  ;;  %12168 = vpow2.f32 %v4408_v47  ;;  %v4410_v31 = vmul.f32 1.442695, %v4362_v60  ;;  %v4363_v42 = vsub.f32 %v14283_v8, %v4303_v35  ;;  %11028 = vmatpush3.bf16.msra.mxu0 %v12606_v59 }
 0x802   : > { %10952 = vmatprep.mubr.msk.f32.mxu0 %vm827_vm0, %v14459_v40  ;;  %v4306_v39 = vpop.xlane.xlu0 %4305  ;;  %11029 = vmatprep.subr.bf16.mxu0 %v12607_v18 }
 0x803   : > { %v14467_v26 = vpop.eup %12160  ;;  %12170 = vpow2.f32 %v4410_v31  ;;  %v4412_v7 = vmul.f32 1.442695, %v4363_v42  ;;  %v4364_v12 = vsub.f32 %v14280_v2, %v4306_v39 }
 0x804   : > { %v4309_v16 = vpop.xlane.xlu1 %4308  ;;  %10953 = vmatmul.mubr.msk.f32.gmra.mrb[164].mxu0 %vm827_vm0, %v14467_v26 }
 0x805   : > { %v14472_v8 = vpop.eup %12162  ;;  %12172 = vpow2.f32 %v4412_v7  ;;  %v4414_v45 = vmul.f32 1.442695, %v4364_v12  ;;  %v4365_v58 = vsub.f32 %v14292_v62, %v4309_v16  ;;  %11030 = vmatpush3.bf16.msra.mxu0 %v12607_v18 }
 0x806   : > { %10955 = vmatprep.mubr.msk.f32.mxu0 %vm827_vm0, %v14472_v8  ;;  %v4312_v44 = vpop.xlane.xlu0 %4311  ;;  %11031 = vmatprep.subr.bf16.mxu0 %v12608_v30 }
 0x807   : > { %v14480_v2 = vpop.eup %12164  ;;  %12174 = vpow2.f32 %v4414_v45  ;;  %v4416_v32 = vmul.f32 1.442695, %v4365_v58  ;;  %v4366_v0 = vsub.f32 %v14303_v19, %v4312_v44 }
 0x808   : > { %v4315_v24 = vpop.xlane.xlu1 %4314  ;;  %10956 = vmatmul.mubr.msk.f32.gmra.mrb[166].mxu0 %vm827_vm0, %v14480_v2 }
 0x809   : > { %v14485_v62 = vpop.eup %12166  ;;  %12176 = vpow2.f32 %v4416_v32  ;;  %v4418_v28 = vmul.f32 1.442695, %v4366_v0  ;;  %v4367_v49 = vsub.f32 %v14311_v41, %v4315_v24  ;;  %11032 = vmatpush3.bf16.msra.mxu0 %v12608_v30 }
 0x80a   : > { %10958 = vmatprep.mubr.msk.f32.mxu0 %vm827_vm0, %v14485_v62  ;;  %v4318_v38 = vpop.xlane.xlu0 %4317  ;;  %11033 = vmatprep.subr.bf16.mxu0 %v12609_v27 }
 0x80b   : > { %v14493_v19 = vpop.eup %12168  ;;  %12178 = vpow2.f32 %v4418_v28  ;;  %v4420_v3 = vmul.f32 1.442695, %v4367_v49  ;;  %v4368_v56 = vsub.f32 %v14308_v10, %v4318_v38 }
 0x80c   : > { %v4321_v1 = vpop.xlane.xlu1 %4320  ;;  %10959 = vmatmul.mubr.msk.f32.gmra.mrb[168].mxu0 %vm827_vm0, %v14493_v19 }
 0x80d   : > { %v14498_v41 = vpop.eup %12170  ;;  %12180 = vpow2.f32 %v4420_v3  ;;  %v4422_v6 = vmul.f32 1.442695, %v4368_v56  ;;  %v4369_v15 = vsub.f32 %v14320_v23, %v4321_v1  ;;  %11034 = vmatpush3.bf16.msra.mxu0 %v12609_v27 }
 0x80e   : > { %10961 = vmatprep.mubr.msk.f32.mxu0 %vm827_vm0, %v14498_v41  ;;  %v4324_v55 = vpop.xlane.xlu0 %4323 }
 0x80f   : > { %v14503_v36 = vpop.eup %12172  ;;  %12182 = vpow2.f32 %v4422_v6  ;;  %v4424_v5 = vmul.f32 1.442695, %v4369_v15  ;;  %v4370_v10 = vsub.f32 %v14331_v4, %v4324_v55 }
 0x810   : > { %v4327_v53 = vpop.xlane.xlu1 %4326  ;;  %10962 = vmatmul.mubr.msk.f32.gmra.mrb[170].mxu0 %vm827_vm0, %v14503_v36 }
 0x811   : > { %v14508_v29 = vpop.eup %12174  ;;  %12184 = vpow2.f32 %v4424_v5  ;;  %v4426_v63 = vmul.f32 1.442695, %v4370_v10  ;;  %v4371_v23 = vsub.f32 %v14339_v54, %v4327_v53 }
 0x812   : > { %10964 = vmatprep.mubr.msk.f32.mxu0 %vm827_vm0, %v14508_v29  ;;  %v4330_v51 = vpop.xlane.xlu0 %4329 }
 0x813   : > { %v14513_v43 = vpop.eup %12176  ;;  %12186 = vpow2.f32 %v4426_v63  ;;  %v4428_v59 = vmul.f32 1.442695, %v4371_v23  ;;  %v4372_v4 = vsub.f32 %v14336_v21, %v4330_v51 }
 0x814   : > { %v4333_v47 = vpop.xlane.xlu1 %4332  ;;  %10965 = vmatmul.mubr.msk.f32.gmra.mrb[172].mxu0 %vm827_vm0, %v14513_v43 }
 0x815   : > { %v14518_v60 = vpop.eup %12178  ;;  %12188 = vpow2.f32 %v4428_v59  ;;  %v4430_v35 = vmul.f32 1.442695, %v4372_v4  ;;  %v4373_v54 = vsub.f32 %v14348_v22, %v4333_v47 }
 0x816   : > { %10967 = vmatprep.mubr.msk.f32.mxu0 %vm827_vm0, %v14518_v60  ;;  %v4336_v31 = vpop.xlane.xlu0 %4335 }
 0x817   : > { %v14523_v42 = vpop.eup %12180  ;;  %12190 = vpow2.f32 %v4430_v35  ;;  %v4432_v39 = vmul.f32 1.442695, %v4373_v54  ;;  %v4374_v21 = vsub.f32 %v14359_v37, %v4336_v31 }
 0x818   : > { %v4339_v18 = vpop.xlane.xlu1 %4338  ;;  %10968 = vmatmul.mubr.msk.f32.gmra.mrb[174].mxu0 %vm827_vm0, %v14523_v42 }
 0x819   : > { %v14528_v7 = vpop.eup %12182  ;;  %12192 = vpow2.f32 %v4432_v39  ;;  %v4434_v12 = vmul.f32 1.442695, %v4374_v21  ;;  %v4375_v22 = vsub.f32 %v14367_v61, %v4339_v18 }
 0x81a   : > { %10970 = vmatprep.mubr.msk.f32.mxu0 %vm827_vm0, %v14528_v7  ;;  %v4342_v16 = vpop.xlane.xlu0 %4341 }
 0x81b   : > { %v14533_v45 = vpop.eup %12184  ;;  %12194 = vpow2.f32 %v4434_v12  ;;  %v4436_v58 = vmul.f32 1.442695, %v4375_v22  ;;  %v4376_v37 = vsub.f32 %v14364_v25, %v4342_v16 }
 0x81c   : > { %v4345_v44 = vpop.xlane.xlu1 %4344  ;;  %10971 = vmatmul.mubr.msk.f32.gmra.mrb[176].mxu0 %vm827_vm0, %v14533_v45 }
 0x81d   : > { %v14538_v30 = vpop.eup %12186  ;;  %12196 = vpow2.f32 %v4436_v58  ;;  %v4438_v32 = vmul.f32 1.442695, %v4376_v37  ;;  %v4377_v61 = vsub.f32 %v14376_v52, %v4345_v44 }
 0x81e   : > { %10973 = vmatprep.mubr.msk.f32.mxu0 %vm827_vm0, %v14538_v30 }
 0x81f   : > { %v14543_v0 = vpop.eup %12188  ;;  %12198 = vpow2.f32 %v4438_v32  ;;  %v4440_v24 = vmul.f32 1.442695, %v4377_v61 }
 0x820   : > { %10974 = vmatmul.mubr.msk.f32.gmra.mrb[178].mxu0 %vm827_vm0, %v14543_v0 }
 0x821   : > { %v14547_v25 = vpop.eup %12190  ;;  %12200 = vpow2.f32 %v4440_v24 }
 0x822   : > { %10976 = vmatprep.mubr.msk.f32.mxu0 %vm827_vm0, %v14547_v25 }
 0x823   : > { %v14551_v28 = vpop.eup %12192 }
 0x824   : > { %10977 = vmatmul.mubr.msk.f32.gmra.mrb[180].mxu0 %vm827_vm0, %v14551_v28 }
 0x825   : > { %v14555_v52 = vpop.eup %12194 }
 0x826   : > { %10979 = vmatprep.mubr.msk.f32.mxu0 %vm827_vm0, %v14555_v52 }
 0x827   : > { %v14559_v49 = vpop.eup %12196 }
 0x828   : > { %10980 = vmatmul.mubr.msk.f32.gmra.mrb[182].mxu0 %vm827_vm0, %v14559_v49 }
 0x829   : > { %v14563_v38 = vpop.eup %12198 }
 0x82a   : > { %10982 = vmatprep.mubr.msk.f32.mxu0 %vm827_vm0, %v14563_v38 }
 0x82b   : > { %v14567_v27 = vpop.eup %12200 }
 0x82c   : > { %10983 = vmatmul.mubr.msk.f32.gmra.mrb[184].mxu0 %vm827_vm0, %v14567_v27 }
 0x8c3   : > { %v10939_v3 = vpop.f32.mrb[90].mxu0 }
 0x8c4   : > { %12202 = vrcp.f32 %v10939_v3  ;;  %v4604_v56 = vpop.f32.mrb[91].mxu0 }
 0x8c5   : > { %12204 = vrcp.f32 %v4604_v56 }
 0x8c7   : > { %v10942_v1 = vpop.f32.mrb[156].mxu0 }
 0x8c8   : > { %12206 = vrcp.f32 %v10942_v1  ;;  %v4614_v6 = vpop.f32.mrb[157].mxu0 }
 0x8c9   : > { %12208 = vrcp.f32 %v4614_v6 }
 0x8cb   : > { %v10945_v15 = vpop.f32.mrb[158].mxu0 }
 0x8cc   : > { %12210 = vrcp.f32 %v10945_v15  ;;  %v4624_v55 = vpop.f32.mrb[159].mxu0 }
 0x8cd   : > { %12212 = vrcp.f32 %v4624_v55 }
 0x8ce   : > { %v12203_v5 = vpop.eup %12202 }
 0x8cf   : > { %v12205_v10 = vpop.eup %12204  ;;  %v10948_v53 = vpop.f32.mrb[160].mxu0  ;;  %v4796_v63 = vmul.f32 %v12203_v5, %v14401_v17 }
 0x8d0   : > { %12214 = vrcp.f32 %v10948_v53  ;;  %v4634_v23 = vpop.f32.mrb[161].mxu0  ;;  %v4795_v51 = vmul.f32 %v12205_v10, %v14396_v34 }
 0x8d1   : > { %12216 = vrcp.f32 %v4634_v23 }
 0x8d2   : > { %v12207_v59 = vpop.eup %12206  ;;  %v4827_v4 = vpack.c.bf16 %v4796_v63, %v4795_v51 }
 0x8d3   : > { %v12209_v47 = vpop.eup %12208  ;;  %v4798_v35 = vmul.f32 %v12207_v59, %v14415_v11  ;;  %v10951_v54 = vpop.f32.mrb[162].mxu0 }
 0x8d4   : > { %v4797_v31 = vmul.f32 %v12209_v47, %v14406_v20  ;;  %12218 = vrcp.f32 %v10951_v54  ;;  %v4644_v39 = vpop.f32.mrb[163].mxu0  ;;  %10987 = vmatprep.mubr.msk.bf16.mxu1 %vm827_vm0, %v4827_v4 }
 0x8d5   : > { %12220 = vrcp.f32 %v4644_v39 }
 0x8d6   : > { %v12211_v21 = vpop.eup %12210  ;;  %v4828_v17 = vpack.c.bf16 %v4798_v35, %v4797_v31 }
 0x8d7   : > { %v12213_v18 = vpop.eup %12212  ;;  %v10954_v12 = vpop.f32.mrb[164].mxu0  ;;  %v4800_v34 = vmul.f32 %v12211_v21, %v14428_v33 }
 0x8d8   : > { %12222 = vrcp.f32 %v10954_v12  ;;  %v4654_v22 = vpop.f32.mrb[165].mxu0  ;;  %10988 = vmatmul.mubr.msk.bf16.vlgmr.msra.gmra.mrb[168].mxu1 %vm827_vm0, %v4828_v17  ;;  %v4799_v11 = vmul.f32 %v12213_v18, %v14420_v50 }
 0x8d9   : > { %12224 = vrcp.f32 %v4654_v22 }
 0x8da   : > { %v12215_v16 = vpop.eup %12214  ;;  %v4829_v20 = vpack.c.bf16 %v4800_v34, %v4799_v11 }
 0x8db   : > { %v12217_v58 = vpop.eup %12216  ;;  %v10957_v37 = vpop.f32.mrb[166].mxu0  ;;  %v4802_v44 = vmul.f32 %v12215_v16, %v14441_v13 }
 0x8dc   : > { %12226 = vrcp.f32 %v10957_v37  ;;  %v4664_v32 = vpop.f32.mrb[167].mxu0  ;;  %10991 = vmatprep.mubr.msk.bf16.mxu1 %vm827_vm0, %v4829_v20  ;;  %v4801_v61 = vmul.f32 %v12217_v58, %v14433_v14 }
 0x8dd   : > { %12228 = vrcp.f32 %v4664_v32 }
 0x8de   : > { %v12219_v33 = vpop.eup %12218  ;;  %v4830_v24 = vpack.c.bf16 %v4802_v44, %v4801_v61 }
 0x8df   : > { %v12221_v3 = vpop.eup %12220  ;;  %v10960_v56 = vpop.f32.mrb[168].mxu0  ;;  %v4804_v50 = vmul.f32 %v12219_v33, %v14454_v46 }
 0x8e0   : > { %12230 = vrcp.f32 %v10960_v56  ;;  %v4674_v1 = vpop.f32.mrb[169].mxu0  ;;  %10992 = vmatmul.mubr.msk.bf16.gmra.mrb[172].mxu1 %vm827_vm0, %v4830_v24  ;;  %v4803_v6 = vmul.f32 %v12221_v3, %v14446_v9 }
 0x8e1   : > { %12232 = vrcp.f32 %v4674_v1 }
 0x8e2   : > { %v12223_v13 = vpop.eup %12222  ;;  %v4831_v15 = vpack.c.bf16 %v4804_v50, %v4803_v6 }
 0x8e3   : > { %v12225_v55 = vpop.eup %12224  ;;  %v10963_v5 = vpop.f32.mrb[170].mxu0  ;;  %v4806_v14 = vmul.f32 %v12223_v13, %v14467_v26 }
 0x8e4   : > { %12234 = vrcp.f32 %v10963_v5  ;;  %v4684_v10 = vpop.f32.mrb[171].mxu0  ;;  %10995 = vmatprep.mubr.msk.bf16.mxu1 %vm827_vm0, %v4831_v15  ;;  %v4805_v53 = vmul.f32 %v12225_v55, %v14459_v40 }
 0x8e5   : > { %12236 = vrcp.f32 %v4684_v10 }
 0x8e6   : > { %v12227_v46 = vpop.eup %12226  ;;  %v4832_v63 = vpack.c.bf16 %v4806_v14, %v4805_v53 }
 0x8e7   : > { %v12229_v23 = vpop.eup %12228  ;;  %v10966_v51 = vpop.f32.mrb[172].mxu0  ;;  %v4808_v9 = vmul.f32 %v12227_v46, %v14480_v2 }
 0x8e8   : > { %12238 = vrcp.f32 %v10966_v51  ;;  %v4694_v59 = vpop.f32.mrb[173].mxu0  ;;  %10996 = vmatmul.mubr.msk.bf16.gmra.mrb[176].mxu1 %vm827_vm0, %v4832_v63  ;;  %v4807_v4 = vmul.f32 %v12229_v23, %v14472_v8 }
 0x8e9   : > { %12240 = vrcp.f32 %v4694_v59 }
 0x8ea   : > { %v12231_v26 = vpop.eup %12230  ;;  %v4833_v47 = vpack.c.bf16 %v4808_v9, %v4807_v4 }
 0x8eb   : > { %v12233_v35 = vpop.eup %12232  ;;  %v10969_v54 = vpop.f32.mrb[174].mxu0  ;;  %v4810_v40 = vmul.f32 %v12231_v26, %v14493_v19 }
 0x8ec   : > { %12242 = vrcp.f32 %v10969_v54  ;;  %v4704_v31 = vpop.f32.mrb[175].mxu0  ;;  %10999 = vmatprep.mubr.msk.bf16.mxu1 %vm827_vm0, %v4833_v47  ;;  %v4809_v39 = vmul.f32 %v12233_v35, %v14485_v62  ;;  %v12611_v47 = vld [vmem:[%s12957_s27 + $0x38] sm:$0xf] }
 0x8ed   : > { %12244 = vrcp.f32 %v4704_v31  ;;  %v5061_v35 = vunpack.c.l.bf16 %v12611_v47 }
 0x8ee   : > { %v12235_v2 = vpop.eup %12234  ;;  %v4834_v21 = vpack.c.bf16 %v4810_v40, %v4809_v39  ;;  %v12612_v40 = vld [vmem:[%s12957_s27 + $0x8] sm:$0xf] }
 0x8ef   : > { %v12237_v17 = vpop.eup %12236  ;;  %v10972_v18 = vpop.f32.mrb[176].mxu0  ;;  %v4812_v8 = vmul.f32 %v12235_v2, %v14503_v36  ;;  %v5058_v31 = vunpack.c.l.bf16 %v12612_v40  ;;  %v12624_v40 = vld [vmem:[%s12957_s27 + $0xc8] sm:$0xf] }
 0x8f0   : > { %12246 = vrcp.f32 %v10972_v18  ;;  %v4714_v12 = vpop.f32.mrb[177].mxu0  ;;  %11000 = vmatmul.mubr.msk.bf16.gmra.mrb[180].mxu1 %vm827_vm0, %v4834_v21  ;;  %v4811_v34 = vmul.f32 %v12237_v17, %v14498_v41  ;;  %v9519_v21 = vld [vmem:[%s16051_s5 + $0x48] sm:$0xff] }
 0x8f1   : > { %12248 = vrcp.f32 %v4714_v12 }
 0x8f2   : > { %v12239_v19 = vpop.eup %12238  ;;  %v4835_v22 = vpack.c.bf16 %v4812_v8, %v4811_v34 }
 0x8f3   : > { %v12241_v11 = vpop.eup %12240  ;;  %v10975_v16 = vpop.f32.mrb[178].mxu0  ;;  %v4814_v62 = vmul.f32 %v12239_v19, %v14513_v43 }
 0x8f4   : > { %12250 = vrcp.f32 %v10975_v16  ;;  %v4724_v20 = vpop.f32.mrb[179].mxu0  ;;  %11003 = vmatprep.mubr.msk.bf16.mxu1 %vm827_vm0, %v4835_v22  ;;  %v4813_v58 = vmul.f32 %v12241_v11, %v14508_v29 }
 0x8f5   : > { %12252 = vrcp.f32 %v4724_v20 }
 0x8f6   : > { %v12243_v36 = vpop.eup %12242  ;;  %v4836_v37 = vpack.c.bf16 %v4814_v62, %v4813_v58  ;;  %v12614_v62 = vld [vmem:[%s12957_s27 + $0x68] sm:$0xf]  ;;  %v12615_v58 = vld [vmem:[%s12957_s27 + $0x78] sm:$0xf] }
 0x8f7   : > { %v12245_v44 = vpop.eup %12244  ;;  %v10978_v32 = vpop.f32.mrb[180].mxu0  ;;  %v4816_v41 = vmul.f32 %v12243_v36, %v14523_v42  ;;  %v5064_v20 = vunpack.c.l.bf16 %v12614_v62  ;;  %v5065_v36 = vunpack.c.l.bf16 %v12615_v58  ;;  %v12627_v62 = vld [vmem:[%s12957_s27 + $0x138] sm:$0xf] }
 0x8f8   : > { %12254 = vrcp.f32 %v10978_v32  ;;  %v4734_v61 = vpop.f32.mrb[181].mxu0  ;;  %11004 = vmatmul.mubr.msk.bf16.gmra.mrb[184].mxu1 %vm827_vm0, %v4836_v37  ;;  %v4815_v33 = vmul.f32 %v12245_v44, %v14518_v60  ;;  %v11842_v37 = vld [vmem:[%s16047_s1 + $0x88] sm:$0xff]   ;;  %v11848_v58 = vld [vmem:[%s16047_s1 + $0xb8] sm:$0xff]  }
 0x8f9   : > { %12256 = vrcp.f32 %v4734_v61  ;;  %v12616_v32 = vld [vmem:[%s12957_s27 + $0x48] sm:$0xf]  ;;  %v12617_v61 = vld [vmem:[%s12957_s27 + $0x58] sm:$0xf] }
 0x8fa   : > { %v12247_v43 = vpop.eup %12246  ;;  %v4837_v24 = vpack.c.bf16 %v4816_v41, %v4815_v33  ;;  %v5062_v41 = vunpack.c.l.bf16 %v12616_v32  ;;  %v5063_v33 = vunpack.c.l.bf16 %v12617_v61  ;;  %v12629_v32 = vld [vmem:[%s12957_s27 + $0x118] sm:$0xf] }
 0x8fb   : > { %v12249_v3 = vpop.eup %12248  ;;  %v10981_v56 = vpop.f32.mrb[182].mxu0  ;;  %v4818_v29 = vmul.f32 %v12247_v43, %v14533_v45 }
 0x8fc   : > { %12258 = vrcp.f32 %v10981_v56  ;;  %v4744_v50 = vpop.f32.mrb[183].mxu0  ;;  %11007 = vmatprep.mubr.msk.bf16.mxu1 %vm827_vm0, %v4837_v24  ;;  %v4817_v1 = vmul.f32 %v12249_v3, %v14528_v7 }
 0x8fd   : > { %12260 = vrcp.f32 %v4744_v50  ;;  %v11843_v50 = vld [vmem:[%s16047_s1 + $0x90] sm:$0xff]  }
 0x8fe   : > { %v12251_v42 = vpop.eup %12250  ;;  %v4838_v6 = vpack.c.bf16 %v4818_v29, %v4817_v1 }
 0x8ff   : > { %v12253_v13 = vpop.eup %12252  ;;  %v10984_v15 = vpop.f32.mrb[184].mxu0  ;;  %v4820_v60 = vmul.f32 %v12251_v42, %v14543_v0 }
 0x900   : > { %12262 = vrcp.f32 %v10984_v15  ;;  %v4754_v55 = vpop.f32.mrb[185].mxu0  ;;  %11008 = vmatmul.mubr.msk.bf16.gmra.mrb[188].mxu1 %vm827_vm0, %v4838_v6  ;;  %v4819_v5 = vmul.f32 %v12253_v13, %v14538_v30  ;;  %v12618_v15 = vld [vmem:[%s12957_s27 + $0xa8] sm:$0xf] }
 0x901   : > { %12264 = vrcp.f32 %v4754_v55  ;;  %v12619_v55 = vld [vmem:[%s12957_s27 + $0xb8] sm:$0xf] }
 0x902   : > { %v12255_v45 = vpop.eup %12254  ;;  %v4839_v14 = vpack.c.bf16 %v4820_v60, %v4819_v5  ;;  %v5068_v60 = vunpack.c.l.bf16 %v12618_v15  ;;  %v5069_v5 = vunpack.c.l.bf16 %v12619_v55  ;;  %v12632_v55 = vld [vmem:[%s12957_s27 + $0x148] sm:$0xf] }
 0x903   : > { %v12257_v10 = vpop.eup %12256  ;;  %v4822_v53 = vmul.f32 %v12255_v45, %v14551_v28  ;;  %v11844_v45 = vld [vmem:[%s16047_s1 + $0x98] sm:$0xff]  }
 0x904   : > { %11011 = vmatprep.mubr.msk.bf16.mxu1 %vm827_vm0, %v4839_v14  ;;  %v4821_v7 = vmul.f32 %v12257_v10, %v14547_v25  ;;  %v12620_v10 = vld [vmem:[%s12957_s27 + $0x88] sm:$0xf] }
 0x906   : > { %v12259_v46 = vpop.eup %12258  ;;  %v4840_v63 = vpack.c.bf16 %v4822_v53, %v4821_v7  ;;  %v5066_v53 = vunpack.c.l.bf16 %v12620_v10  ;;  %v12621_v7 = vld [vmem:[%s12957_s27 + $0x98] sm:$0xf] }
 0x907   : > { %v12261_v0 = vpop.eup %12260  ;;  %v4824_v23 = vmul.f32 %v12259_v46, %v14559_v49  ;;  %v11841_v49 = vld [vmem:[%s16047_s1 + $0x80] sm:$0xff]   ;;  %v5067_v46 = vunpack.c.l.bf16 %v12621_v7 }
 0x908   : > { %11012 = vmatmul.mubr.msk.bf16.gmra.mrb[192].mxu1 %vm827_vm0, %v4840_v63  ;;  %v4823_v30 = vmul.f32 %v12261_v0, %v14555_v52  ;;  %11123 = vmatprep.subr.bf16.mxu0 %v11841_v49  ;;  %v12610_v52 = vld [vmem:[%s12957_s27 + $0x28] sm:$0xf] }
 0x909   : > { %v5060_v26 = vunpack.c.l.bf16 %v12610_v52 }
 0x90a   : > { %v12263_v51 = vpop.eup %12262  ;;  %v4841_v9 = vpack.c.bf16 %v4824_v23, %v4823_v30 }
 0x90b   : > { %v12265_v28 = vpop.eup %12264  ;;  %v4826_v59 = vmul.f32 %v12263_v51, %v14567_v27  ;;  %v12613_v27 = vld [vmem:[%s12957_s27 + $0x18] sm:$0xf] }
 0x90c   : > { %11015 = vmatprep.mubr.msk.bf16.mxu1 %vm827_vm0, %v4841_v9  ;;  %v4825_v25 = vmul.f32 %v12265_v28, %v14563_v38  ;;  %v5059_v39 = vunpack.c.l.bf16 %v12613_v27  ;;  %v9518_v38 = vld [vmem:[%s16051_s5 + $0x40] sm:$0xff]  ;;  %v12625_v27 = vld [vmem:[%s12957_s27 + $0xd8] sm:$0xf] }
 0x90d   : > { %v11591_v18 = vpack.c.bf16 %v9519_v21, %v9518_v38  ;;  %v11845_v9 = vld [vmem:[%s16047_s1 + $0xa0] sm:$0xff]  }
 0x90e   : > { %v4842_v4 = vpack.c.bf16 %v4826_v59, %v4825_v25 }
 0x90f   : > { %11592 = vmatprep.subr.bf16.mxu1 %v11591_v18 }
 0x910   : > { %11016 = vmatmul.mubr.msk.bf16.gmra.mrb[196].mxu1 %vm827_vm0, %v4842_v4 }
 0x911   : > { %11594 = vmatpush3.bf16.msra.mxu1 %v11591_v18 }
 0x9ab   : > { %v10989_v54 = vpop.f32.mrb[168].mxu1 }
 0x9ac   : > { %v4931_v2 = vpop.f32.mrb[169].mxu1  ;;  %v5092_v8 = vmul.f32 %v10989_v54, %v5060_v26  ;;  %v12623_v26 = vld [vmem:[%s12957_s27 + $0xf8] sm:$0xf] }
 0x9ad   : > { %v10990_v17 = vpop.f32.mrb[170].mxu1  ;;  %v5090_v19 = vmul.f32 %v5058_v31, %v4931_v2  ;;  %v5073_v47 = vunpack.c.l.bf16 %v12623_v26  ;;  %v5070_v31 = vunpack.c.l.bf16 %v12624_v40  ;;  %v12637_v26 = vld [vmem:[%s12957_s27 + $0x198] sm:$0xf] }
 0x9ae   : > { %v5093_v12 = vmul.f32 %v10990_v17, %v5061_v35  ;;  %v4934_v34 = vpop.f32.mrb[171].mxu1  ;;  %v11846_v35 = vld [vmem:[%s16047_s1 + $0xa8] sm:$0xff]  }
 0x9af   : > { %v5091_v22 = vmul.f32 %v5059_v39, %v4934_v34  ;;  %v5071_v39 = vunpack.c.l.bf16 %v12625_v27 }
 0x9b0   : > { %v5123_v11 = vpack.c.bf16 %v5093_v12, %v5092_v8  ;;  %v11847_v8 = vld [vmem:[%s16047_s1 + $0xb0] sm:$0xff]  }
 0x9b1   : > { %v5122_v16 = vpack.c.bf16 %v5091_v22, %v5090_v19 }
 0x9b3   : > { %v10993_v44 = vpop.f32.mrb[172].mxu1  ;;  %11035 = vmatprep.mubr.bf16.mxu0 %v5122_v16 }
 0x9b4   : > { %v4947_v43 = vpop.f32.mrb[173].mxu1  ;;  %11036 = vmatmul.mubr.bf16.vlgmr.msra.gmra.mrb[188].mxu0 %v5123_v11  ;;  %v5096_v3 = vmul.f32 %v10993_v44, %v5064_v20  ;;  %v12626_v11 = vld [vmem:[%s12957_s27 + $0x128] sm:$0xf]  ;;  %v5077_v20 = vunpack.c.l.bf16 %v12627_v62 }
 0x9b5   : > { %11124 = vmatpush3.bf16.msra.mxu0 %v11841_v49  ;;  %v10994_v24 = vpop.f32.mrb[174].mxu1  ;;  %v5094_v1 = vmul.f32 %v5062_v41, %v4947_v43  ;;  %v12622_v49 = vld [vmem:[%s12957_s27 + $0xe8] sm:$0xf]  ;;  %v5076_v16 = vunpack.c.l.bf16 %v12626_v11  ;;  %v5075_v41 = vunpack.c.l.bf16 %v12629_v32  ;;  %v12641_v11 = vld [vmem:[%s12957_s27 + $0x1d8] sm:$0xf] }
 0x9b6   : > { %v5097_v56 = vmul.f32 %v10994_v24, %v5065_v36  ;;  %v4950_v29 = vpop.f32.mrb[175].mxu1  ;;  %11125 = vmatprep.subr.bf16.mxu0 %v11842_v37  ;;  %v5072_v52 = vunpack.c.l.bf16 %v12622_v49  ;;  %v12636_v49 = vld [vmem:[%s12957_s27 + $0x188] sm:$0xf]  ;;  %v5658_v32 = vld [vmem:[%s12957_s27 + $0x1c] sm:$0xf] }
 0x9b7   : > { %v5095_v42 = vmul.f32 %v5063_v33, %v4950_v29 }
 0x9b8   : > { %v5125_v6 = vpack.c.bf16 %v5097_v56, %v5096_v3 }
 0x9b9   : > { %v5124_v13 = vpack.c.bf16 %v5095_v42, %v5094_v1  ;;  %11126 = vmatpush3.bf16.msra.mxu0 %v11842_v37  ;;  %v12628_v37 = vld [vmem:[%s12957_s27 + $0x108] sm:$0xf] }
 0x9ba   : > { %11127 = vmatprep.subr.bf16.mxu0 %v11843_v50  ;;  %v5074_v44 = vunpack.c.l.bf16 %v12628_v37  ;;  %v12630_v42 = vld [vmem:[%s12957_s27 + $0x168] sm:$0xf] }
 0x9bb   : > { %v10997_v14 = vpop.f32.mrb[176].mxu1  ;;  %11039 = vmatprep.mubr.bf16.mxu0 %v5124_v13  ;;  %v12631_v13 = vld [vmem:[%s12957_s27 + $0x178] sm:$0xf] }
 0x9bc   : > { %v4963_v63 = vpop.f32.mrb[177].mxu1  ;;  %11040 = vmatmul.mubr.bf16.gmra.mrb[192].mxu0 %v5125_v6  ;;  %v5100_v23 = vmul.f32 %v10997_v14, %v5068_v60  ;;  %v5080_v6 = vunpack.c.l.bf16 %v12630_v42  ;;  %v5081_v15 = vunpack.c.l.bf16 %v12631_v13  ;;  %v5664_v13 = vld [vmem:[%s12957_s27 + $0x7c] sm:$0xf] }
 0x9bd   : > { %v10998_v0 = vpop.f32.mrb[178].mxu1  ;;  %11128 = vmatpush3.bf16.msra.mxu0 %v11843_v50  ;;  %v5098_v28 = vmul.f32 %v5066_v53, %v4963_v63 }
 0x9be   : > { %v5101_v30 = vmul.f32 %v10998_v0, %v5069_v5  ;;  %v4966_v51 = vpop.f32.mrb[179].mxu1  ;;  %11129 = vmatprep.subr.bf16.mxu0 %v11844_v45  ;;  %v5078_v5 = vunpack.c.l.bf16 %v12632_v55 }
 0x9bf   : > { %v5099_v59 = vmul.f32 %v5067_v46, %v4966_v51 }
 0x9c0   : > { %v5127_v25 = vpack.c.bf16 %v5101_v30, %v5100_v23 }
 0x9c1   : > { %v5126_v4 = vpack.c.bf16 %v5099_v59, %v5098_v28  ;;  %11130 = vmatpush3.bf16.msra.mxu0 %v11844_v45  ;;  %v12633_v45 = vld [vmem:[%s12957_s27 + $0x158] sm:$0xf] }
 0x9c2   : > { %11131 = vmatprep.subr.bf16.mxu0 %v11845_v9  ;;  %v5079_v14 = vunpack.c.l.bf16 %v12633_v45  ;;  %v12635_v59 = vld [vmem:[%s12957_s27 + $0x1b8] sm:$0xf]  ;;  %v5667_v45 = vld [vmem:[%s12957_s27 + $0xac] sm:$0xf] }
 0x9c3   : > { %v11001_v54 = vpop.f32.mrb[180].mxu1  ;;  %11043 = vmatprep.mubr.bf16.mxu0 %v5126_v4 }
 0x9c4   : > { %v4979_v2 = vpop.f32.mrb[181].mxu1  ;;  %11044 = vmatmul.mubr.bf16.gmra.mrb[196].mxu0 %v5127_v25  ;;  %v5104_v21 = vmul.f32 %v11001_v54, %v5072_v52  ;;  %v5085_v25 = vunpack.c.l.bf16 %v12635_v59  ;;  %v5082_v52 = vunpack.c.l.bf16 %v12636_v49  ;;  %v5676_v49 = vld [vmem:[%s12957_s27 + $0x13c] sm:$0xf] }
 0x9c5   : > { %v11002_v38 = vpop.f32.mrb[182].mxu1  ;;  %11132 = vmatpush3.bf16.msra.mxu0 %v11845_v9  ;;  %v5102_v12 = vmul.f32 %v5070_v31, %v4979_v2  ;;  %v12634_v9 = vld [vmem:[%s12957_s27 + $0x1a8] sm:$0xf] }
 0x9c6   : > { %v5105_v17 = vmul.f32 %v11002_v38, %v5073_v47  ;;  %v4982_v18 = vpop.f32.mrb[183].mxu1  ;;  %11133 = vmatprep.subr.bf16.mxu0 %v11846_v35  ;;  %v5084_v28 = vunpack.c.l.bf16 %v12634_v9  ;;  %v5083_v47 = vunpack.c.l.bf16 %v12637_v26  ;;  %v5673_v9 = vld [vmem:[%s12957_s27 + $0x10c] sm:$0xf]  ;;  %v5678_v26 = vld [vmem:[%s12957_s27 + $0x15c] sm:$0xf] }
 0x9c7   : > { %v5103_v34 = vmul.f32 %v5071_v39, %v4982_v18 }
 0x9c8   : > { %v5129_v19 = vpack.c.bf16 %v5105_v17, %v5104_v21  ;;  %v12638_v17 = vld [vmem:[%s12957_s27 + $0x1e8] sm:$0xf] }
 0x9c9   : > { %v5128_v22 = vpack.c.bf16 %v5103_v34, %v5102_v12  ;;  %11134 = vmatpush3.bf16.msra.mxu0 %v11846_v35  ;;  %v5088_v18 = vunpack.c.l.bf16 %v12638_v17  ;;  %v5685_v17 = vld [vmem:[%s12957_s27 + $0x1cc] sm:$0xf] }
 0x9ca   : > { %11135 = vmatprep.subr.bf16.mxu0 %v11847_v8 }
 0x9cb   : > { %v11005_v36 = vpop.f32.mrb[184].mxu1  ;;  %11047 = vmatprep.mubr.bf16.mxu0 %v5128_v22 }
 0x9cc   : > { %v4995_v61 = vpop.f32.mrb[185].mxu1  ;;  %11048 = vmatmul.mubr.bf16.gmra.mrb[200].mxu0 %v5129_v19  ;;  %v5108_v43 = vmul.f32 %v11005_v36, %v5076_v16  ;;  %v12640_v19 = vld [vmem:[%s12957_s27 + $0x1c8] sm:$0xf]  ;;  %v5087_v16 = vunpack.c.l.bf16 %v12641_v11 }
 0x9cd   : > { %v11006_v33 = vpop.f32.mrb[186].mxu1  ;;  %11136 = vmatpush3.bf16.msra.mxu0 %v11847_v8  ;;  %v5106_v56 = vmul.f32 %v5074_v44, %v4995_v61  ;;  %v12639_v8 = vld [vmem:[%s12957_s27 + $0x1f8] sm:$0xf]  ;;  %v5086_v22 = vunpack.c.l.bf16 %v12640_v19  ;;  %v5657_v44 = vld [vmem:[%s12957_s27 + $0xc] sm:$0xf] }
 0x9ce   : > { %v5109_v24 = vmul.f32 %v11006_v33, %v5077_v20  ;;  %v4998_v3 = vpop.f32.mrb[187].mxu1  ;;  %11137 = vmatprep.subr.bf16.mxu0 %v11848_v58  ;;  %v5089_v12 = vunpack.c.l.bf16 %v12639_v8  ;;  %v5688_v19 = vld [vmem:[%s12957_s27 + $0x1fc] sm:$0xf] }
 0x9cf   : > { %v5107_v29 = vmul.f32 %v5075_v41, %v4998_v3  ;;  %v5659_v3 = vld [vmem:[%s12957_s27 + $0x2c] sm:$0xf] }
 0x9d0   : > { %v5131_v50 = vpack.c.bf16 %v5109_v24, %v5108_v43  ;;  %v9554_v24 = vcombine.low %v5657_v44, %v5658_v32 }
 0x9d1   : > { %v5130_v1 = vpack.c.bf16 %v5107_v29, %v5106_v56  ;;  %11138 = vmatpush3.bf16.msra.mxu0 %v11848_v58  ;;  %v5660_v56 = vld [vmem:[%s12957_s27 + $0x3c] sm:$0xf]  ;;  %v5661_v29 = vld [vmem:[%s12957_s27 + $0x4c] sm:$0xf] }
 0x9d3   : > { %v11009_v60 = vpop.f32.mrb[188].mxu1  ;;  %11051 = vmatprep.mubr.bf16.mxu0 %v5130_v1  ;;  %v9555_v1 = vcombine.low %v5659_v3, %v5660_v56 }
 0x9d4   : > { %v5011_v10 = vpop.f32.mrb[189].mxu1  ;;  %11052 = vmatmul.mubr.bf16.gmra.mrb[204].mxu0 %v5131_v50  ;;  %v5112_v7 = vmul.f32 %v11009_v60, %v5080_v6  ;;  %v5662_v50 = vld [vmem:[%s12957_s27 + $0x5c] sm:$0xf]  ;;  %v5663_v6 = vld [vmem:[%s12957_s27 + $0x6c] sm:$0xf] }
 0x9d5   : > { %v11010_v53 = vpop.f32.mrb[190].mxu1  ;;  %v5110_v0 = vmul.f32 %v5078_v5, %v5011_v10  ;;  %v9556_v42 = vcombine.low %v5661_v29, %v5662_v50  ;;  %v5666_v60 = vld [vmem:[%s12957_s27 + $0x9c] sm:$0xf]  ;;  %v9557_v55 = vcombine.low %v5663_v6, %v5664_v13  ;;  %v5669_v10 = vld [vmem:[%s12957_s27 + $0xcc] sm:$0xf] }
 0x9d6   : > { %v5113_v46 = vmul.f32 %v11010_v53, %v5081_v15  ;;  %v5014_v63 = vpop.f32.mrb[191].mxu1  ;;  %v5665_v15 = vld [vmem:[%s12957_s27 + $0x8c] sm:$0xf]  ;;  %v5670_v53 = vld [vmem:[%s12957_s27 + $0xdc] sm:$0xf] }
 0x9d7   : > { %v5111_v23 = vmul.f32 %v5079_v14, %v5014_v63  ;;  %v9558_v5 = vcombine.low %v5665_v15, %v5666_v60  ;;  %v5668_v14 = vld [vmem:[%s12957_s27 + $0xbc] sm:$0xf]  ;;  %v9520_v63 = vld [vmem:[%s16051_s5 + $0x50] sm:$0xff] }
 0x9d8   : > { %v5133_v30 = vpack.c.bf16 %v5113_v46, %v5112_v7  ;;  %v9559_v7 = vcombine.low %v5667_v45, %v5668_v14  ;;  %v9560_v46 = vcombine.low %v5669_v10, %v5670_v53 }
 0x9d9   : > { %v5132_v51 = vpack.c.bf16 %v5111_v23, %v5110_v0  ;;  %v9521_v0 = vld [vmem:[%s16051_s5 + $0x58] sm:$0xff]  ;;  %v5671_v23 = vld [vmem:[%s12957_s27 + $0xec] sm:$0xf] }
 0x9db   : > { %v11013_v4 = vpop.f32.mrb[192].mxu1  ;;  %11055 = vmatprep.mubr.bf16.mxu0 %v5132_v51  ;;  %v11595_v51 = vpack.c.bf16 %v9521_v0, %v9520_v63  ;;  %v12643_v0 = vld [vmem:[%s16056_s10] sm:$0xff] }
 0x9dc   : > { %v5027_v35 = vpop.f32.mrb[193].mxu1  ;;  %11056 = vmatmul.mubr.bf16.gmra.mrb[208].mxu0 %v5133_v30  ;;  %v5116_v40 = vmul.f32 %v11013_v4, %v5084_v28  ;;  %v5672_v30 = vld [vmem:[%s12957_s27 + $0xfc] sm:$0xf]  ;;  %v5675_v4 = vld [vmem:[%s12957_s27 + $0x12c] sm:$0xf] }
 0x9dd   : > { %v11014_v54 = vpop.f32.mrb[194].mxu1  ;;  %v5114_v39 = vmul.f32 %v5082_v52, %v5027_v35  ;;  %v5674_v28 = vld [vmem:[%s12957_s27 + $0x11c] sm:$0xf]  ;;  %11596 = vmatprep.subr.bf16.mxu1 %v11595_v51  ;;  %v9561_v59 = vcombine.low %v5671_v23, %v5672_v30  ;;  %v5677_v52 = vld [vmem:[%s12957_s27 + $0x14c] sm:$0xf] }
 0x9de   : > { %v5117_v31 = vmul.f32 %v11014_v54, %v5085_v25  ;;  %v5030_v27 = vpop.f32.mrb[195].mxu1  ;;  %11598 = vmatpush3.bf16.msra.mxu1 %v11595_v51  ;;  %v9562_v25 = vcombine.low %v5673_v9, %v5674_v28  ;;  %v9564_v35 = vcombine.low %v5677_v52, %v5678_v26  ;;  %v5679_v54 = vld [vmem:[%s12957_s27 + $0x16c] sm:$0xf] }
 0x9df   : > { %v5115_v2 = vmul.f32 %v5083_v47, %v5030_v27  ;;  %11600 = vmatprep.subr.bf16.mxu1 %v13115_v48  ;;  %v9563_v47 = vcombine.low %v5675_v4, %v5676_v49  ;;  %v5682_v27 = vld [vmem:[%s12957_s27 + $0x19c] sm:$0xf] }
 0x9e0   : > { %v5135_v38 = vpack.c.bf16 %v5117_v31, %v5116_v40  ;;  %v5680_v40 = vld [vmem:[%s12957_s27 + $0x17c] sm:$0xf]  ;;  %v5681_v31 = vld [vmem:[%s12957_s27 + $0x18c] sm:$0xf] }
 0x9e1   : > { %v5134_v21 = vpack.c.bf16 %v5115_v2, %v5114_v39  ;;  %v9565_v39 = vcombine.low %v5679_v54, %v5680_v40  ;;  %v9566_v2 = vcombine.low %v5681_v31, %v5682_v27 }
 0x9e3   : > { %v11017_v34 = vpop.f32.mrb[196].mxu1  ;;  %11059 = vmatprep.mubr.bf16.mxu0 %v5134_v21  ;;  %v5684_v21 = vld [vmem:[%s12957_s27 + $0x1bc] sm:$0xf] }
 0x9e4   : > { %v5043_v62 = vpop.f32.mrb[197].mxu1  ;;  %11060 = vmatmul.mubr.bf16.gmra.mrb[212].mxu0 %v5135_v38  ;;  %v5120_v58 = vmul.f32 %v11017_v34, %v5088_v18  ;;  %v5683_v38 = vld [vmem:[%s12957_s27 + $0x1ac] sm:$0xf]  ;;  %v5686_v18 = vld [vmem:[%s12957_s27 + $0x1dc] sm:$0xf] }
 0x9e5   : > { %v11018_v20 = vpop.f32.mrb[198].mxu1  ;;  %v5118_v41 = vmul.f32 %v5086_v22, %v5043_v62  ;;  %v9567_v8 = vcombine.low %v5683_v38, %v5684_v21  ;;  %v5687_v34 = vld [vmem:[%s12957_s27 + $0x1ec] sm:$0xf] }
 0x9e6   : > { %v5121_v36 = vmul.f32 %v11018_v20, %v5089_v12  ;;  %v5046_v37 = vpop.f32.mrb[199].mxu1  ;;  %v9568_v12 = vcombine.low %v5685_v17, %v5686_v18  ;;  %v9569_v22 = vcombine.low %v5687_v34, %v5688_v19 }
 0x9e7   : > { %v5119_v61 = vmul.f32 %v5087_v16, %v5046_v37 }
 0x9e8   : > { %v5137_v33 = vpack.c.bf16 %v5121_v36, %v5120_v58  ;;  %v14727_v58 = vld [vmem:[%s16050_s4] sm:$0xff]  }
 0x9e9   : > { %v5136_v43 = vpack.c.bf16 %v5119_v61, %v5118_v41 }
 0x9eb   : > { %11063 = vmatprep.mubr.bf16.mxu0 %v5136_v43 }
 0x9ec   : > { %11064 = vmatmul.mubr.bf16.gmra.mrb[216].mxu0 %v5137_v33 }
 0x9ed   : > { %11139 = vmatprep.mubr.bf16.mxu0 %v9554_v24 }
 0x9f4   : > { %11140 = vmatmul.mubr.bf16.vlgmr.msra.gmra.mrb[220].mxu0 %v9555_v1 }
 0x9f5   : > { %11143 = vmatprep.mubr.bf16.mxu0 %v9556_v42 }
 0x9fc   : > { %11144 = vmatmul.mubr.bf16.gmra.mrb[224].mxu0 %v9557_v55 }
 0x9fd   : > { %11147 = vmatprep.mubr.bf16.mxu0 %v9558_v5 }
 0xa04   : > { %11148 = vmatmul.mubr.bf16.gmra.mrb[228].mxu0 %v9559_v7 }
 0xa05   : > { %11151 = vmatprep.mubr.bf16.mxu0 %v9560_v46  ;;  %v5691_v46 = vsub.s32 2, %v13023_v57 }
 0xa07   : > { %v14762_v23 = vrot.slane %v12643_v0, %v5691_v46 }
 0xa0c   : > { %11152 = vmatmul.mubr.bf16.gmra.mrb[232].mxu0 %v9561_v59 }
 0xa0d   : > { %11155 = vmatprep.mubr.bf16.mxu0 %v9562_v25 }
 0xa14   : > { %11156 = vmatmul.mubr.bf16.gmra.mrb[236].mxu0 %v9563_v47 }
 0xa15   : > { %11159 = vmatprep.mubr.bf16.mxu0 %v9564_v35 }
 0xa1c   : > { %11160 = vmatmul.mubr.bf16.gmra.mrb[240].mxu0 %v9565_v39 }
 0xa1d   : > { %11163 = vmatprep.mubr.bf16.mxu0 %v9566_v2 }
 0xa24   : > { %11164 = vmatmul.mubr.bf16.gmra.mrb[244].mxu0 %v9567_v8 }
 0xa25   : > { %11167 = vmatprep.mubr.bf16.mxu0 %v9568_v12 }
 0xa2c   : > { %11168 = vmatmul.mubr.bf16.gmra.mrb[248].mxu0 %v9569_v22 }
 0xa87   : > { %v11037_v11 = vpop.f32.mrb[188].mxu0 }
 0xa88   : > { %v5172_v16 = vpop.f32.mrb[189].mxu0 }
 0xa89   : > { %v11038_v62 = vpop.f32.mrb[190].mxu0  ;;  %11075 = vmatprep.mubr.msk.f32.mxu1 %vm3266_vm1, %v5172_v16 }
 0xa8a   : > { %v5175_v20 = vpop.f32.mrb[191].mxu0 }
 0xa8b   : > { %11076 = vmatmul.mubr.msk.f32.vlgmr.msra.gmra.mrb[102].mxu1 %vm3266_vm1, %v5175_v20 }
 0xa8c   : > { %11078 = vmatprep.mubr.msk.f32.mxu1 %vm3266_vm1, %v11037_v11  ;;  %11602 = vmatpush3.bf16.msra.mxu1 %v13115_v48 }
 0xa8d   : > { %11257 = vmatprep.subr.bf16.mxu1 %v14727_v58 }
 0xa8f   : > { %v11041_v36 = vpop.f32.mrb[192].mxu0  ;;  %11079 = vmatmul.mubr.msk.f32.gmra.mrb[136].mxu1 %vm3266_vm1, %v11038_v62 }
 0xa90   : > { %v5188_v37 = vpop.f32.mrb[193].mxu0 }
 0xa91   : > { %v11042_v44 = vpop.f32.mrb[194].mxu0  ;;  %11081 = vmatprep.mubr.msk.f32.mxu1 %vm3266_vm1, %v5188_v37 }
 0xa92   : > { %v5191_v32 = vpop.f32.mrb[195].mxu0 }
 0xa93   : > { %11082 = vmatmul.mubr.msk.f32.gmra.mrb[138].mxu1 %vm3266_vm1, %v5191_v32 }
 0xa94   : > { %11084 = vmatprep.mubr.msk.f32.mxu1 %vm3266_vm1, %v11041_v36 }
 0xa97   : > { %v11045_v48 = vpop.f32.mrb[196].mxu0  ;;  %11085 = vmatmul.mubr.msk.f32.gmra.mrb[140].mxu1 %vm3266_vm1, %v11042_v44 }
 0xa98   : > { %v5204_v41 = vpop.f32.mrb[197].mxu0 }
 0xa99   : > { %v11046_v61 = vpop.f32.mrb[198].mxu0  ;;  %11087 = vmatprep.mubr.msk.f32.mxu1 %vm3266_vm1, %v5204_v41 }
 0xa9a   : > { %v5207_v33 = vpop.f32.mrb[199].mxu0 }
 0xa9b   : > { %11088 = vmatmul.mubr.msk.f32.gmra.mrb[142].mxu1 %vm3266_vm1, %v5207_v33 }
 0xa9c   : > { %11090 = vmatprep.mubr.msk.f32.mxu1 %vm3266_vm1, %v11045_v48 }
 0xa9f   : > { %v11049_v43 = vpop.f32.mrb[200].mxu0  ;;  %11091 = vmatmul.mubr.msk.f32.gmra.mrb[144].mxu1 %vm3266_vm1, %v11046_v61 }
 0xaa0   : > { %v5220_v24 = vpop.f32.mrb[201].mxu0 }
 0xaa1   : > { %v11050_v3 = vpop.f32.mrb[202].mxu0  ;;  %11093 = vmatprep.mubr.msk.f32.mxu1 %vm3266_vm1, %v5220_v24 }
 0xaa2   : > { %v5223_v56 = vpop.f32.mrb[203].mxu0 }
 0xaa3   : > { %11094 = vmatmul.mubr.msk.f32.gmra.mrb[146].mxu1 %vm3266_vm1, %v5223_v56 }
 0xaa4   : > { %11096 = vmatprep.mubr.msk.f32.mxu1 %vm3266_vm1, %v11049_v43 }
 0xaa7   : > { %v11053_v29 = vpop.f32.mrb[204].mxu0  ;;  %11097 = vmatmul.mubr.msk.f32.gmra.mrb[148].mxu1 %vm3266_vm1, %v11050_v3 }
 0xaa8   : > { %v5236_v50 = vpop.f32.mrb[205].mxu0 }
 0xaa9   : > { %v11054_v1 = vpop.f32.mrb[206].mxu0  ;;  %11099 = vmatprep.mubr.msk.f32.mxu1 %vm3266_vm1, %v5236_v50 }
 0xaaa   : > { %v5239_v42 = vpop.f32.mrb[207].mxu0 }
 0xaab   : > { %11100 = vmatmul.mubr.msk.f32.gmra.mrb[150].mxu1 %vm3266_vm1, %v5239_v42 }
 0xaac   : > { %11102 = vmatprep.mubr.msk.f32.mxu1 %vm3266_vm1, %v11053_v29 }
 0xaaf   : > { %v11057_v6 = vpop.f32.mrb[208].mxu0  ;;  %11103 = vmatmul.mubr.msk.f32.gmra.mrb[152].mxu1 %vm3266_vm1, %v11054_v1 }
 0xab0   : > { %v5252_v13 = vpop.f32.mrb[209].mxu0 }
 0xab1   : > { %v11058_v15 = vpop.f32.mrb[210].mxu0  ;;  %11105 = vmatprep.mubr.msk.f32.mxu1 %vm3266_vm1, %v5252_v13 }
 0xab2   : > { %v5255_v60 = vpop.f32.mrb[211].mxu0 }
 0xab3   : > { %11106 = vmatmul.mubr.msk.f32.gmra.mrb[154].mxu1 %vm3266_vm1, %v5255_v60 }
 0xab4   : > { %11108 = vmatprep.mubr.msk.f32.mxu1 %vm3266_vm1, %v11057_v6 }
 0xab7   : > { %v11061_v55 = vpop.f32.mrb[212].mxu0  ;;  %11109 = vmatmul.mubr.msk.f32.gmra.mrb[156].mxu1 %vm3266_vm1, %v11058_v15 }
 0xab8   : > { %v5268_v5 = vpop.f32.mrb[213].mxu0 }
 0xab9   : > { %v11062_v45 = vpop.f32.mrb[214].mxu0  ;;  %11111 = vmatprep.mubr.msk.f32.mxu1 %vm3266_vm1, %v5268_v5 }
 0xaba   : > { %v5271_v14 = vpop.f32.mrb[215].mxu0 }
 0xabb   : > { %11112 = vmatmul.mubr.msk.f32.gmra.mrb[158].mxu1 %vm3266_vm1, %v5271_v14 }
 0xabc   : > { %11114 = vmatprep.mubr.msk.f32.mxu1 %vm3266_vm1, %v11061_v55 }
 0xabf   : > { %v11065_v10 = vpop.f32.mrb[216].mxu0  ;;  %11115 = vmatmul.mubr.msk.f32.gmra.mrb[160].mxu1 %vm3266_vm1, %v11062_v45 }
 0xac0   : > { %v5284_v53 = vpop.f32.mrb[217].mxu0 }
 0xac1   : > { %v11066_v7 = vpop.f32.mrb[218].mxu0  ;;  %11117 = vmatprep.mubr.msk.f32.mxu1 %vm3266_vm1, %v5284_v53 }
 0xac2   : > { %v5287_v63 = vpop.f32.mrb[219].mxu0 }
 0xac3   : > { %11118 = vmatmul.mubr.msk.f32.gmra.mrb[162].mxu1 %vm3266_vm1, %v5287_v63 }
 0xac4   : > { %11120 = vmatprep.mubr.msk.f32.mxu1 %vm3266_vm1, %v11065_v10 }
 0xac7   : > { %11121 = vmatmul.mubr.msk.f32.gmra.mrb[164].mxu1 %vm3266_vm1, %v11066_v7  ;;  %v11141_v30 = vpop.f32.mrb[220].mxu0 }
 0xac8   : > { %v5871_v51 = vpop.f32.mrb[221].mxu0  ;;  %v14769_v25 = vadd.f32 %v11141_v30, %v14762_v23 }
 0xac9   : > { %v14766_v9 = vadd.f32 %v5871_v51, %v14762_v23  ;;  %v11142_v28 = vpop.f32.mrb[222].mxu0 }
 0xaca   : > { %v5874_v59 = vpop.f32.mrb[223].mxu0  ;;  %v14777_v52 = vadd.f32 %v11142_v28, %v14762_v23  ;;  %v6004_v35 = vsel %vm827_vm0, %v14769_v25, -inf }
 0xacb   : > { %v14772_v4 = vadd.f32 %v5874_v59, %v14762_v23  ;;  %v5998_v49 = vsel %vm827_vm0, %v14766_v9, -inf }
 0xacc   : > { %5999 = vmax.xlane.f32.xlu0 %v5998_v49  ;;  %v6007_v27 = vsel %vm827_vm0, %v14777_v52, -inf }
 0xacd   : > { %v6001_v26 = vsel %vm827_vm0, %v14772_v4, -inf }
 0xace   : > { %6002 = vmax.xlane.f32.xlu1 %v6001_v26 }
 0xacf   : > { %v11145_v47 = vpop.f32.mrb[224].mxu0 }
 0xad0   : > { %v5887_v54 = vpop.f32.mrb[225].mxu0  ;;  %6005 = vmax.xlane.f32.xlu0 %v6004_v35  ;;  %v14789_v2 = vadd.f32 %v11145_v47, %v14762_v23 }
 0xad1   : > { %v14784_v40 = vadd.f32 %v5887_v54, %v14762_v23  ;;  %v11146_v31 = vpop.f32.mrb[226].mxu0 }
 0xad2   : > { %v5890_v39 = vpop.f32.mrb[227].mxu0  ;;  %6008 = vmax.xlane.f32.xlu1 %v6007_v27  ;;  %v14797_v17 = vadd.f32 %v11146_v31, %v14762_v23  ;;  %v6016_v12 = vsel %vm827_vm0, %v14789_v2, -inf }
 0xad3   : > { %v14792_v38 = vadd.f32 %v5890_v39, %v14762_v23  ;;  %v6010_v21 = vsel %vm827_vm0, %v14784_v40, -inf }
 0xad4   : > { %6011 = vmax.xlane.f32.xlu0 %v6010_v21  ;;  %v6019_v11 = vsel %vm827_vm0, %v14797_v17, -inf }
 0xad5   : > { %v6013_v18 = vsel %vm827_vm0, %v14792_v38, -inf }
 0xad6   : > { %6014 = vmax.xlane.f32.xlu1 %v6013_v18 }
 0xad7   : > { %v11149_v8 = vpop.f32.mrb[228].mxu0 }
 0xad8   : > { %v5903_v34 = vpop.f32.mrb[229].mxu0  ;;  %6017 = vmax.xlane.f32.xlu0 %v6016_v12  ;;  %v14809_v62 = vadd.f32 %v11149_v8, %v14762_v23 }
 0xad9   : > { %v14804_v19 = vadd.f32 %v5903_v34, %v14762_v23  ;;  %v11150_v22 = vpop.f32.mrb[230].mxu0 }
 0xada   : > { %v5906_v16 = vpop.f32.mrb[231].mxu0  ;;  %6020 = vmax.xlane.f32.xlu1 %v6019_v11  ;;  %v14817_v37 = vadd.f32 %v11150_v22, %v14762_v23  ;;  %v6028_v48 = vsel %vm827_vm0, %v14809_v62, -inf }
 0xadb   : > { %v14812_v20 = vadd.f32 %v5906_v16, %v14762_v23  ;;  %v6022_v36 = vsel %vm827_vm0, %v14804_v19, -inf }
 0xadc   : > { %6023 = vmax.xlane.f32.xlu0 %v6022_v36  ;;  %v6031_v43 = vsel %vm827_vm0, %v14817_v37, -inf }
 0xadd   : > { %v6025_v44 = vsel %vm827_vm0, %v14812_v20, -inf }
 0xade   : > { %6026 = vmax.xlane.f32.xlu1 %v6025_v44 }
 0xadf   : > { %v11153_v32 = vpop.f32.mrb[232].mxu0 }
 0xae0   : > { %v5919_v41 = vpop.f32.mrb[233].mxu0  ;;  %6029 = vmax.xlane.f32.xlu0 %v6028_v48  ;;  %v14829_v3 = vadd.f32 %v11153_v32, %v14762_v23 }
 0xae1   : > { %v14824_v61 = vadd.f32 %v5919_v41, %v14762_v23  ;;  %v11154_v33 = vpop.f32.mrb[234].mxu0 }
 0xae2   : > { %v5922_v24 = vpop.f32.mrb[235].mxu0  ;;  %6032 = vmax.xlane.f32.xlu1 %v6031_v43  ;;  %v14837_v50 = vadd.f32 %v11154_v33, %v14762_v23  ;;  %v6040_v6 = vsel %vm827_vm0, %v14829_v3, -inf }
 0xae3   : > { %v14832_v56 = vadd.f32 %v5922_v24, %v14762_v23  ;;  %v6034_v29 = vsel %vm827_vm0, %v14824_v61, -inf }
 0xae4   : > { %6035 = vmax.xlane.f32.xlu0 %v6034_v29  ;;  %v6043_v55 = vsel %vm827_vm0, %v14837_v50, -inf }
 0xae5   : > { %v6037_v1 = vsel %vm827_vm0, %v14832_v56, -inf }
 0xae6   : > { %6038 = vmax.xlane.f32.xlu1 %v6037_v1 }
 0xae7   : > { %v11157_v42 = vpop.f32.mrb[236].mxu0 }
 0xae8   : > { %v5935_v13 = vpop.f32.mrb[237].mxu0  ;;  %6041 = vmax.xlane.f32.xlu0 %v6040_v6  ;;  %v14849_v45 = vadd.f32 %v11157_v42, %v14762_v23 }
 0xae9   : > { %v14844_v15 = vadd.f32 %v5935_v13, %v14762_v23  ;;  %v11158_v60 = vpop.f32.mrb[238].mxu0 }
 0xaea   : > { %v5938_v5 = vpop.f32.mrb[239].mxu0  ;;  %6044 = vmax.xlane.f32.xlu1 %v6043_v55  ;;  %v14857_v53 = vadd.f32 %v11158_v60, %v14762_v23  ;;  %v6052_v63 = vsel %vm827_vm0, %v14849_v45, -inf }
 0xaeb   : > { %v14852_v14 = vadd.f32 %v5938_v5, %v14762_v23  ;;  %v6046_v10 = vsel %vm827_vm0, %v14844_v15, -inf  ;;  %v11865_v5 = vld [vmem:[%s16048_s2 + $0x10] sm:$0xff]  }
 0xaec   : > { %6047 = vmax.xlane.f32.xlu0 %v6046_v10  ;;  %v6055_v28 = vsel %vm827_vm0, %v14857_v53, -inf  ;;  %11223 = vmatprep.subr.bf16.mxu0 %v11865_v5 }
 0xaed   : > { %v6049_v7 = vsel %vm827_vm0, %v14852_v14, -inf  ;;  %11224 = vmatpush3.bf16.msra.mxu0 %v11865_v5 }
 0xaee   : > { %6050 = vmax.xlane.f32.xlu1 %v6049_v7 }
 0xaef   : > { %v11161_v46 = vpop.f32.mrb[240].mxu0 }
 0xaf0   : > { %v5951_v0 = vpop.f32.mrb[241].mxu0  ;;  %6053 = vmax.xlane.f32.xlu0 %v6052_v63  ;;  %v14869_v49 = vadd.f32 %v11161_v46, %v14762_v23 }
 0xaf1   : > { %v14864_v30 = vadd.f32 %v5951_v0, %v14762_v23  ;;  %v11162_v51 = vpop.f32.mrb[242].mxu0 }
 0xaf2   : > { %v5954_v59 = vpop.f32.mrb[243].mxu0  ;;  %6056 = vmax.xlane.f32.xlu1 %v6055_v28  ;;  %v14877_v35 = vadd.f32 %v11162_v51, %v14762_v23  ;;  %v6064_v27 = vsel %vm827_vm0, %v14869_v49, -inf }
 0xaf3   : > { %v14872_v26 = vadd.f32 %v5954_v59, %v14762_v23  ;;  %v6058_v47 = vsel %vm827_vm0, %v14864_v30, -inf }
 0xaf4   : > { %6059 = vmax.xlane.f32.xlu0 %v6058_v47  ;;  %v6067_v8 = vsel %vm827_vm0, %v14877_v35, -inf }
 0xaf5   : > { %v6061_v54 = vsel %vm827_vm0, %v14872_v26, -inf }
 0xaf6   : > { %6062 = vmax.xlane.f32.xlu1 %v6061_v54 }
 0xaf7   : > { %v11165_v31 = vpop.f32.mrb[244].mxu0 }
 0xaf8   : > { %v5967_v39 = vpop.f32.mrb[245].mxu0  ;;  %6065 = vmax.xlane.f32.xlu0 %v6064_v27  ;;  %v14889_v34 = vadd.f32 %v11165_v31, %v14762_v23 }
 0xaf9   : > { %v14884_v21 = vadd.f32 %v5967_v39, %v14762_v23  ;;  %v11166_v18 = vpop.f32.mrb[246].mxu0 }
 0xafa   : > { %v5970_v12 = vpop.f32.mrb[247].mxu0  ;;  %6068 = vmax.xlane.f32.xlu1 %v6067_v8  ;;  %v14897_v16 = vadd.f32 %v11166_v18, %v14762_v23  ;;  %v6076_v32 = vsel %vm827_vm0, %v14889_v34, -inf }
 0xafb   : > { %v14892_v22 = vadd.f32 %v5970_v12, %v14762_v23  ;;  %v6070_v11 = vsel %vm827_vm0, %v14884_v21, -inf }
 0xafc   : > { %6071 = vmax.xlane.f32.xlu0 %v6070_v11  ;;  %v6079_v43 = vsel %vm827_vm0, %v14897_v16, -inf }
 0xafd   : > { %v6073_v36 = vsel %vm827_vm0, %v14892_v22, -inf }
 0xafe   : > { %6074 = vmax.xlane.f32.xlu1 %v6073_v36 }
 0xaff   : > { %v11169_v44 = vpop.f32.mrb[248].mxu0 }
 0xb00   : > { %v5983_v48 = vpop.f32.mrb[249].mxu0  ;;  %6077 = vmax.xlane.f32.xlu0 %v6076_v32  ;;  %v14909_v29 = vadd.f32 %v11169_v44, %v14762_v23 }
 0xb01   : > { %v14904_v41 = vadd.f32 %v5983_v48, %v14762_v23  ;;  %v11170_v33 = vpop.f32.mrb[250].mxu0 }
 0xb02   : > { %v5986_v24 = vpop.f32.mrb[251].mxu0  ;;  %6080 = vmax.xlane.f32.xlu1 %v6079_v43  ;;  %v14917_v6 = vadd.f32 %v11170_v33, %v14762_v23  ;;  %v6088_v60 = vsel %vm827_vm0, %v14909_v29, -inf }
 0xb03   : > { %v14912_v1 = vadd.f32 %v5986_v24, %v14762_v23  ;;  %v6082_v42 = vsel %vm827_vm0, %v14904_v41, -inf }
 0xb04   : > { %6083 = vmax.xlane.f32.xlu0 %v6082_v42  ;;  %v6091_v55 = vsel %vm827_vm0, %v14917_v6, -inf }
 0xb05   : > { %v6085_v13 = vsel %vm827_vm0, %v14912_v1, -inf }
 0xb06   : > { %6086 = vmax.xlane.f32.xlu1 %v6085_v13 }
 0xb08   : > { %6089 = vmax.xlane.f32.xlu0 %v6088_v60 }
 0xb0a   : > { %6092 = vmax.xlane.f32.xlu1 %v6091_v55 }
 0xb59   : > { %v6000_v23 = vpop.xlane.xlu0 %5999 }
 0xb5a   : > { %v6094_v10 = vsub.f32 %v14766_v9, %v6000_v23 }
 0xb5b   : > { %v6003_v7 = vpop.xlane.xlu1 %6002 }
 0xb5c   : > { %v6126_v46 = vmul.f32 1.442695, %v6094_v10  ;;  %v6095_v63 = vsub.f32 %v14772_v4, %v6003_v7  ;;  %v12645_v10 = vld [vmem:[%s16050_s4 + $0x10] sm:$0xff]  }
 0xb5d   : > { %v6006_v0 = vpop.xlane.xlu0 %6005 }
 0xb5e   : > { %12266 = vpow2.f32 %v6126_v46  ;;  %v6128_v51 = vmul.f32 1.442695, %v6095_v63  ;;  %v6096_v28 = vsub.f32 %v14769_v25, %v6006_v0 }
 0xb5f   : > { %v6009_v59 = vpop.xlane.xlu1 %6008 }
 0xb60   : > { %12268 = vpow2.f32 %v6128_v51  ;;  %v6130_v47 = vmul.f32 1.442695, %v6096_v28  ;;  %v6097_v54 = vsub.f32 %v14777_v52, %v6009_v59  ;;  %v12646_v59 = vld [vmem:[%s16050_s4 + $0x18] sm:$0xff]  }
 0xb61   : > { %v6012_v31 = vpop.xlane.xlu0 %6011 }
 0xb62   : > { %12270 = vpow2.f32 %v6130_v47  ;;  %v6132_v27 = vmul.f32 1.442695, %v6097_v54  ;;  %v6098_v39 = vsub.f32 %v14784_v40, %v6012_v31 }
 0xb63   : > { %v6015_v9 = vpop.xlane.xlu1 %6014 }
 0xb64   : > { %12272 = vpow2.f32 %v6132_v27  ;;  %v6134_v18 = vmul.f32 1.442695, %v6098_v39  ;;  %v6099_v4 = vsub.f32 %v14792_v38, %v6015_v9 }
 0xb65   : > { %v6018_v8 = vpop.xlane.xlu0 %6017 }
 0xb66   : > { %12274 = vpow2.f32 %v6134_v18  ;;  %v6136_v12 = vmul.f32 1.442695, %v6099_v4  ;;  %v6100_v25 = vsub.f32 %v14789_v2, %v6018_v8  ;;  %v12647_v18 = vld [vmem:[%s16050_s4 + $0x20] sm:$0xff]  }
 0xb67   : > { %v6021_v11 = vpop.xlane.xlu1 %6020 }
 0xb68   : > { %v14935_v36 = vpop.eup %12266  ;;  %12276 = vpow2.f32 %v6136_v12  ;;  %v6138_v52 = vmul.f32 1.442695, %v6100_v25  ;;  %v6101_v44 = vsub.f32 %v14797_v17, %v6021_v11 }
 0xb69   : > { %v6024_v32 = vpop.xlane.xlu0 %6023  ;;  %11175 = vmatprep.mubr.msk.f32.mxu1 %vm827_vm0, %v14935_v36 }
 0xb6a   : > { %v14940_v40 = vpop.eup %12268  ;;  %12278 = vpow2.f32 %v6138_v52  ;;  %v6140_v38 = vmul.f32 1.442695, %v6101_v44  ;;  %v6102_v48 = vsub.f32 %v14804_v19, %v6024_v32  ;;  %v12644_v19 = vld [vmem:[%s16050_s4 + $0x8] sm:$0xff]  }
 0xb6b   : > { %v6027_v33 = vpop.xlane.xlu1 %6026  ;;  %11176 = vmatmul.mubr.msk.f32.vlgmr.msra.gmra.mrb[166].mxu1 %vm827_vm0, %v14940_v40  ;;  %v12648_v44 = vld [vmem:[%s16050_s4 + $0x28] sm:$0xff]  }
 0xb6c   : > { %v14945_v2 = vpop.eup %12270  ;;  %12280 = vpow2.f32 %v6140_v38  ;;  %v6142_v43 = vmul.f32 1.442695, %v6102_v48  ;;  %v6103_v17 = vsub.f32 %v14812_v20, %v6027_v33  ;;  %11258 = vmatpush3.bf16.msra.mxu1 %v14727_v58 }
 0xb6d   : > { %v6030_v24 = vpop.xlane.xlu0 %6029  ;;  %11178 = vmatprep.mubr.msk.f32.mxu1 %vm827_vm0, %v14945_v2  ;;  %11259 = vmatprep.subr.bf16.mxu1 %v12644_v19 }
 0xb6e   : > { %v14954_v42 = vpop.eup %12272  ;;  %12282 = vpow2.f32 %v6142_v43  ;;  %v6144_v13 = vmul.f32 1.442695, %v6103_v17  ;;  %v6104_v60 = vsub.f32 %v14809_v62, %v6030_v24  ;;  %v12649_v24 = vld [vmem:[%s16050_s4 + $0x30] sm:$0xff]  }
 0xb6f   : > { %v6033_v55 = vpop.xlane.xlu1 %6032  ;;  %11179 = vmatmul.mubr.msk.f32.gmra.mrb[200].mxu1 %vm827_vm0, %v14954_v42 }
 0xb70   : > { %v14959_v58 = vpop.eup %12274  ;;  %12284 = vpow2.f32 %v6144_v13  ;;  %v6146_v20 = vmul.f32 1.442695, %v6104_v60  ;;  %v6105_v5 = vsub.f32 %v14817_v37, %v6033_v55  ;;  %11260 = vmatpush3.bf16.msra.mxu1 %v12644_v19 }
 0xb71   : > { %v6036_v23 = vpop.xlane.xlu0 %6035  ;;  %11181 = vmatprep.mubr.msk.f32.mxu1 %vm827_vm0, %v14959_v58  ;;  %11261 = vmatprep.subr.bf16.mxu1 %v12645_v10 }
 0xb72   : > { %v14967_v62 = vpop.eup %12276  ;;  %12286 = vpow2.f32 %v6146_v20  ;;  %v6148_v7 = vmul.f32 1.442695, %v6105_v5  ;;  %v6106_v46 = vsub.f32 %v14824_v61, %v6036_v23  ;;  %v12650_v23 = vld [vmem:[%s16050_s4 + $0x38] sm:$0xff]  }
 0xb73   : > { %v6039_v63 = vpop.xlane.xlu1 %6038  ;;  %11182 = vmatmul.mubr.msk.f32.gmra.mrb[202].mxu1 %vm827_vm0, %v14967_v62 }
 0xb74   : > { %v14972_v37 = vpop.eup %12278  ;;  %12288 = vpow2.f32 %v6148_v7  ;;  %v6150_v0 = vmul.f32 1.442695, %v6106_v46  ;;  %v6107_v51 = vsub.f32 %v14832_v56, %v6039_v63  ;;  %11262 = vmatpush3.bf16.msra.mxu1 %v12645_v10 }
 0xb75   : > { %v6042_v28 = vpop.xlane.xlu0 %6041  ;;  %11184 = vmatprep.mubr.msk.f32.mxu1 %vm827_vm0, %v14972_v37  ;;  %11263 = vmatprep.subr.bf16.mxu1 %v12646_v59 }
 0xb76   : > { %v14980_v61 = vpop.eup %12280  ;;  %12290 = vpow2.f32 %v6150_v0  ;;  %v6152_v47 = vmul.f32 1.442695, %v6107_v51  ;;  %v6108_v54 = vsub.f32 %v14829_v3, %v6042_v28 }
 0xb77   : > { %v6045_v31 = vpop.xlane.xlu1 %6044  ;;  %11185 = vmatmul.mubr.msk.f32.gmra.mrb[204].mxu1 %vm827_vm0, %v14980_v61 }
 0xb78   : > { %v14985_v56 = vpop.eup %12282  ;;  %12292 = vpow2.f32 %v6152_v47  ;;  %v6154_v27 = vmul.f32 1.442695, %v6108_v54  ;;  %v6109_v39 = vsub.f32 %v14837_v50, %v6045_v31  ;;  %11264 = vmatpush3.bf16.msra.mxu1 %v12646_v59 }
 0xb79   : > { %v6048_v9 = vpop.xlane.xlu0 %6047  ;;  %11187 = vmatprep.mubr.msk.f32.mxu1 %vm827_vm0, %v14985_v56  ;;  %11265 = vmatprep.subr.bf16.mxu1 %v12647_v18 }
 0xb7a   : > { %v14993_v3 = vpop.eup %12284  ;;  %12294 = vpow2.f32 %v6154_v27  ;;  %v6156_v4 = vmul.f32 1.442695, %v6109_v39  ;;  %v6110_v8 = vsub.f32 %v14844_v15, %v6048_v9 }
 0xb7b   : > { %v6051_v12 = vpop.xlane.xlu1 %6050  ;;  %11188 = vmatmul.mubr.msk.f32.gmra.mrb[206].mxu1 %vm827_vm0, %v14993_v3 }
 0xb7c   : > { %v14998_v50 = vpop.eup %12286  ;;  %12296 = vpow2.f32 %v6156_v4  ;;  %v6158_v25 = vmul.f32 1.442695, %v6110_v8  ;;  %v6111_v11 = vsub.f32 %v14852_v14, %v6051_v12  ;;  %11266 = vmatpush3.bf16.msra.mxu1 %v12647_v18 }
 0xb7d   : > { %v6054_v52 = vpop.xlane.xlu0 %6053  ;;  %11190 = vmatprep.mubr.msk.f32.mxu1 %vm827_vm0, %v14998_v50  ;;  %11267 = vmatprep.subr.bf16.mxu1 %v12648_v44 }
 0xb7e   : > { %v15006_v15 = vpop.eup %12288  ;;  %12298 = vpow2.f32 %v6158_v25  ;;  %v6160_v32 = vmul.f32 1.442695, %v6111_v11  ;;  %v6112_v38 = vsub.f32 %v14849_v45, %v6054_v52 }
 0xb7f   : > { %v6057_v48 = vpop.xlane.xlu1 %6056  ;;  %11191 = vmatmul.mubr.msk.f32.gmra.mrb[208].mxu1 %vm827_vm0, %v15006_v15 }
 0xb80   : > { %v15011_v14 = vpop.eup %12290  ;;  %12300 = vpow2.f32 %v6160_v32  ;;  %v6162_v33 = vmul.f32 1.442695, %v6112_v38  ;;  %v6113_v43 = vsub.f32 %v14857_v53, %v6057_v48  ;;  %11268 = vmatpush3.bf16.msra.mxu1 %v12648_v44 }
 0xb81   : > { %v6060_v17 = vpop.xlane.xlu0 %6059  ;;  %11193 = vmatprep.mubr.msk.f32.mxu1 %vm827_vm0, %v15011_v14  ;;  %11269 = vmatprep.subr.bf16.mxu1 %v12649_v24 }
 0xb82   : > { %v15019_v45 = vpop.eup %12292  ;;  %12302 = vpow2.f32 %v6162_v33  ;;  %v6164_v19 = vmul.f32 1.442695, %v6113_v43  ;;  %v6114_v13 = vsub.f32 %v14864_v30, %v6060_v17 }
 0xb83   : > { %v6063_v60 = vpop.xlane.xlu1 %6062  ;;  %11194 = vmatmul.mubr.msk.f32.gmra.mrb[210].mxu1 %vm827_vm0, %v15019_v45 }
 0xb84   : > { %v15024_v53 = vpop.eup %12294  ;;  %12304 = vpow2.f32 %v6164_v19  ;;  %v6166_v55 = vmul.f32 1.442695, %v6114_v13  ;;  %v6115_v20 = vsub.f32 %v14872_v26, %v6063_v60  ;;  %11270 = vmatpush3.bf16.msra.mxu1 %v12649_v24 }
 0xb85   : > { %v6066_v5 = vpop.xlane.xlu0 %6065  ;;  %11196 = vmatprep.mubr.msk.f32.mxu1 %vm827_vm0, %v15024_v53  ;;  %11271 = vmatprep.subr.bf16.mxu1 %v12650_v23 }
 0xb86   : > { %v15032_v30 = vpop.eup %12296  ;;  %12306 = vpow2.f32 %v6166_v55  ;;  %v6168_v10 = vmul.f32 1.442695, %v6115_v20  ;;  %v6116_v7 = vsub.f32 %v14869_v49, %v6066_v5 }
 0xb87   : > { %v6069_v46 = vpop.xlane.xlu1 %6068  ;;  %11197 = vmatmul.mubr.msk.f32.gmra.mrb[212].mxu1 %vm827_vm0, %v15032_v30 }
 0xb88   : > { %v15037_v26 = vpop.eup %12298  ;;  %12308 = vpow2.f32 %v6168_v10  ;;  %v6170_v63 = vmul.f32 1.442695, %v6116_v7  ;;  %v6117_v0 = vsub.f32 %v14877_v35, %v6069_v46  ;;  %11272 = vmatpush3.bf16.msra.mxu1 %v12650_v23 }
 0xb89   : > { %v6072_v51 = vpop.xlane.xlu0 %6071  ;;  %11199 = vmatprep.mubr.msk.f32.mxu1 %vm827_vm0, %v15037_v26 }
 0xb8a   : > { %v15042_v28 = vpop.eup %12300  ;;  %12310 = vpow2.f32 %v6170_v63  ;;  %v6172_v59 = vmul.f32 1.442695, %v6117_v0  ;;  %v6118_v49 = vsub.f32 %v14884_v21, %v6072_v51 }
 0xb8b   : > { %v6075_v47 = vpop.xlane.xlu1 %6074  ;;  %11200 = vmatmul.mubr.msk.f32.gmra.mrb[214].mxu1 %vm827_vm0, %v15042_v28 }
 0xb8c   : > { %v15047_v54 = vpop.eup %12302  ;;  %12312 = vpow2.f32 %v6172_v59  ;;  %v6174_v31 = vmul.f32 1.442695, %v6118_v49  ;;  %v6119_v35 = vsub.f32 %v14892_v22, %v6075_v47 }
 0xb8d   : > { %v6078_v27 = vpop.xlane.xlu0 %6077  ;;  %11202 = vmatprep.mubr.msk.f32.mxu1 %vm827_vm0, %v15047_v54 }
 0xb8e   : > { %v15052_v39 = vpop.eup %12304  ;;  %12314 = vpow2.f32 %v6174_v31  ;;  %v6176_v9 = vmul.f32 1.442695, %v6119_v35  ;;  %v6120_v21 = vsub.f32 %v14889_v34, %v6078_v27 }
 0xb8f   : > { %v6081_v18 = vpop.xlane.xlu1 %6080  ;;  %11203 = vmatmul.mubr.msk.f32.gmra.mrb[216].mxu1 %vm827_vm0, %v15052_v39 }
 0xb90   : > { %v15057_v4 = vpop.eup %12306  ;;  %12316 = vpow2.f32 %v6176_v9  ;;  %v6178_v8 = vmul.f32 1.442695, %v6120_v21  ;;  %v6121_v22 = vsub.f32 %v14897_v16, %v6081_v18 }
 0xb91   : > { %v6084_v12 = vpop.xlane.xlu0 %6083  ;;  %11205 = vmatprep.mubr.msk.f32.mxu1 %vm827_vm0, %v15057_v4 }
 0xb92   : > { %v15062_v25 = vpop.eup %12308  ;;  %12318 = vpow2.f32 %v6178_v8  ;;  %v6180_v11 = vmul.f32 1.442695, %v6121_v22  ;;  %v6122_v34 = vsub.f32 %v14904_v41, %v6084_v12 }
 0xb93   : > { %v6087_v52 = vpop.xlane.xlu1 %6086  ;;  %11206 = vmatmul.mubr.msk.f32.gmra.mrb[218].mxu1 %vm827_vm0, %v15062_v25 }
 0xb94   : > { %v15067_v44 = vpop.eup %12310  ;;  %12320 = vpow2.f32 %v6180_v11  ;;  %v6182_v32 = vmul.f32 1.442695, %v6122_v34  ;;  %v6123_v16 = vsub.f32 %v14912_v1, %v6087_v52 }
 0xb95   : > { %v6090_v38 = vpop.xlane.xlu0 %6089  ;;  %11208 = vmatprep.mubr.msk.f32.mxu1 %vm827_vm0, %v15067_v44 }
 0xb96   : > { %v15072_v48 = vpop.eup %12312  ;;  %12322 = vpow2.f32 %v6182_v32  ;;  %v6184_v33 = vmul.f32 1.442695, %v6123_v16  ;;  %v6124_v41 = vsub.f32 %v14909_v29, %v6090_v38 }
 0xb97   : > { %v6093_v43 = vpop.xlane.xlu1 %6092  ;;  %11209 = vmatmul.mubr.msk.f32.gmra.mrb[220].mxu1 %vm827_vm0, %v15072_v48 }
 0xb98   : > { %v15077_v17 = vpop.eup %12314  ;;  %12324 = vpow2.f32 %v6184_v33  ;;  %v6186_v24 = vmul.f32 1.442695, %v6124_v41  ;;  %v6125_v1 = vsub.f32 %v14917_v6, %v6093_v43 }
 0xb99   : > { %11211 = vmatprep.mubr.msk.f32.mxu1 %vm827_vm0, %v15077_v17 }
 0xb9a   : > { %v15082_v19 = vpop.eup %12316  ;;  %12326 = vpow2.f32 %v6186_v24  ;;  %v6188_v13 = vmul.f32 1.442695, %v6125_v1 }
 0xb9b   : > { %11212 = vmatmul.mubr.msk.f32.gmra.mrb[222].mxu1 %vm827_vm0, %v15082_v19 }
 0xb9c   : > { %v15086_v29 = vpop.eup %12318  ;;  %12328 = vpow2.f32 %v6188_v13 }
 0xb9d   : > { %11214 = vmatprep.mubr.msk.f32.mxu1 %vm827_vm0, %v15086_v29 }
 0xb9e   : > { %v15090_v60 = vpop.eup %12320 }
 0xb9f   : > { %11215 = vmatmul.mubr.msk.f32.gmra.mrb[224].mxu1 %vm827_vm0, %v15090_v60 }
 0xba0   : > { %v15094_v6 = vpop.eup %12322 }
 0xba1   : > { %11217 = vmatprep.mubr.msk.f32.mxu1 %vm827_vm0, %v15094_v6 }
 0xba2   : > { %v15098_v55 = vpop.eup %12324 }
 0xba3   : > { %11218 = vmatmul.mubr.msk.f32.gmra.mrb[226].mxu1 %vm827_vm0, %v15098_v55 }
 0xba4   : > { %v15102_v20 = vpop.eup %12326 }
 0xba5   : > { %11220 = vmatprep.mubr.msk.f32.mxu1 %vm827_vm0, %v15102_v20 }
 0xba6   : > { %v15106_v5 = vpop.eup %12328 }
 0xba7   : > { %11221 = vmatmul.mubr.msk.f32.gmra.mrb[228].mxu1 %vm827_vm0, %v15106_v5 }
 0xc3e   : > { %v11177_v23 = vpop.f32.mrb[166].mxu1 }
 0xc3f   : > { %12330 = vrcp.f32 %v11177_v23  ;;  %v6352_v10 = vpop.f32.mrb[167].mxu1 }
 0xc40   : > { %12332 = vrcp.f32 %v6352_v10 }
 0xc42   : > { %v11180_v7 = vpop.f32.mrb[200].mxu1 }
 0xc43   : > { %12334 = vrcp.f32 %v11180_v7  ;;  %v6362_v46 = vpop.f32.mrb[201].mxu1 }
 0xc44   : > { %12336 = vrcp.f32 %v6362_v46 }
 0xc46   : > { %v11183_v63 = vpop.f32.mrb[202].mxu1 }
 0xc47   : > { %12338 = vrcp.f32 %v11183_v63  ;;  %v6372_v0 = vpop.f32.mrb[203].mxu1 }
 0xc48   : > { %12340 = vrcp.f32 %v6372_v0 }
 0xc49   : > { %v12331_v51 = vpop.eup %12330 }
 0xc4a   : > { %v12333_v59 = vpop.eup %12332  ;;  %v11186_v49 = vpop.f32.mrb[204].mxu1  ;;  %v6544_v47 = vmul.f32 %v12331_v51, %v14940_v40 }
 0xc4b   : > { %12342 = vrcp.f32 %v11186_v49  ;;  %v6382_v31 = vpop.f32.mrb[205].mxu1  ;;  %v6543_v35 = vmul.f32 %v12333_v59, %v14935_v36 }
 0xc4c   : > { %12344 = vrcp.f32 %v6382_v31 }
 0xc4d   : > { %v12335_v27 = vpop.eup %12334  ;;  %v6575_v9 = vpack.c.bf16 %v6544_v47, %v6543_v35 }
 0xc4e   : > { %v12337_v21 = vpop.eup %12336  ;;  %v6546_v18 = vmul.f32 %v12335_v27, %v14954_v42  ;;  %v11189_v8 = vpop.f32.mrb[206].mxu1 }
 0xc4f   : > { %v6545_v22 = vmul.f32 %v12337_v21, %v14945_v2  ;;  %12346 = vrcp.f32 %v11189_v8  ;;  %v6392_v12 = vpop.f32.mrb[207].mxu1  ;;  %11225 = vmatprep.mubr.msk.bf16.mxu0 %vm827_vm0, %v6575_v9 }
 0xc50   : > { %12348 = vrcp.f32 %v6392_v12 }
 0xc51   : > { %v12339_v11 = vpop.eup %12338  ;;  %v6576_v40 = vpack.c.bf16 %v6546_v18, %v6545_v22 }
 0xc52   : > { %v12341_v34 = vpop.eup %12340  ;;  %v11192_v52 = vpop.f32.mrb[208].mxu1  ;;  %v6548_v36 = vmul.f32 %v12339_v11, %v14967_v62 }
 0xc53   : > { %12350 = vrcp.f32 %v11192_v52  ;;  %v6402_v32 = vpop.f32.mrb[209].mxu1  ;;  %11226 = vmatmul.mubr.msk.bf16.vlgmr.msra.gmra.mrb[252].mxu0 %vm827_vm0, %v6576_v40  ;;  %v6547_v42 = vmul.f32 %v12341_v34, %v14959_v58 }
 0xc54   : > { %12352 = vrcp.f32 %v6402_v32 }
 0xc55   : > { %v12343_v16 = vpop.eup %12342  ;;  %v6577_v2 = vpack.c.bf16 %v6548_v36, %v6547_v42 }
 0xc56   : > { %v12345_v38 = vpop.eup %12344  ;;  %v6550_v33 = vmul.f32 %v12343_v16, %v14980_v61  ;;  %v11195_v41 = vpop.f32.mrb[210].mxu1 }
 0xc57   : > { %v6549_v43 = vmul.f32 %v12345_v38, %v14972_v37  ;;  %12354 = vrcp.f32 %v11195_v41  ;;  %v6412_v24 = vpop.f32.mrb[211].mxu1  ;;  %11229 = vmatprep.mubr.msk.bf16.mxu0 %vm827_vm0, %v6577_v2 }
 0xc58   : > { %12356 = vrcp.f32 %v6412_v24 }
 0xc59   : > { %v12347_v62 = vpop.eup %12346  ;;  %v6578_v1 = vpack.c.bf16 %v6550_v33, %v6549_v43 }
 0xc5a   : > { %v12349_v13 = vpop.eup %12348  ;;  %v11198_v23 = vpop.f32.mrb[212].mxu1  ;;  %v6552_v58 = vmul.f32 %v12347_v62, %v14993_v3 }
 0xc5b   : > { %12358 = vrcp.f32 %v11198_v23  ;;  %v6422_v10 = vpop.f32.mrb[213].mxu1  ;;  %11230 = vmatmul.mubr.msk.bf16.gmra.mrb[0].mxu0 %vm827_vm0, %v6578_v1  ;;  %v6551_v61 = vmul.f32 %v12349_v13, %v14985_v56 }
 0xc5c   : > { %12360 = vrcp.f32 %v6422_v10 }
 0xc5d   : > { %v12351_v7 = vpop.eup %12350  ;;  %v6579_v37 = vpack.c.bf16 %v6552_v58, %v6551_v61 }
 0xc5e   : > { %v12353_v46 = vpop.eup %12352  ;;  %v6554_v63 = vmul.f32 %v12351_v7, %v15006_v15  ;;  %v11201_v0 = vpop.f32.mrb[214].mxu1 }
 0xc5f   : > { %v6553_v51 = vmul.f32 %v12353_v46, %v14998_v50  ;;  %12362 = vrcp.f32 %v11201_v0  ;;  %v6432_v59 = vpop.f32.mrb[215].mxu1  ;;  %11233 = vmatprep.mubr.msk.bf16.mxu0 %vm827_vm0, %v6579_v37 }
 0xc60   : > { %12364 = vrcp.f32 %v6432_v59 }
 0xc61   : > { %v12355_v3 = vpop.eup %12354  ;;  %v6580_v49 = vpack.c.bf16 %v6554_v63, %v6553_v51 }
 0xc62   : > { %v12357_v47 = vpop.eup %12356  ;;  %v11204_v31 = vpop.f32.mrb[216].mxu1  ;;  %v6556_v56 = vmul.f32 %v12355_v3, %v15019_v45 }
 0xc63   : > { %12366 = vrcp.f32 %v11204_v31  ;;  %v6442_v35 = vpop.f32.mrb[217].mxu1  ;;  %11234 = vmatmul.mubr.msk.bf16.gmra.mrb[4].mxu0 %vm827_vm0, %v6580_v49  ;;  %v6555_v15 = vmul.f32 %v12357_v47, %v15011_v14 }
 0xc64   : > { %12368 = vrcp.f32 %v6442_v35 }
 0xc65   : > { %v12359_v27 = vpop.eup %12358  ;;  %v6581_v50 = vpack.c.bf16 %v6556_v56, %v6555_v15 }
 0xc66   : > { %v12361_v9 = vpop.eup %12360  ;;  %v6558_v21 = vmul.f32 %v12359_v27, %v15032_v30  ;;  %v11207_v18 = vpop.f32.mrb[218].mxu1  ;;  %v12651_v27 = vld [vmem:[%s12957_s27 + $0x2c] sm:$0xf] }
 0xc67   : > { %v6557_v8 = vmul.f32 %v12361_v9, %v15024_v53  ;;  %12370 = vrcp.f32 %v11207_v18  ;;  %v6452_v22 = vpop.f32.mrb[219].mxu1  ;;  %11237 = vmatprep.mubr.msk.bf16.mxu0 %vm827_vm0, %v6581_v50  ;;  %v12652_v50 = vld [vmem:[%s12957_s27 + $0x3c] sm:$0xf] }
 0xc68   : > { %12372 = vrcp.f32 %v6452_v22  ;;  %v6809_v9 = vunpack.c.l.bf16 %v12652_v50 }
 0xc69   : > { %v12363_v45 = vpop.eup %12362  ;;  %v6582_v12 = vpack.c.bf16 %v6558_v21, %v6557_v8  ;;  %v12653_v21 = vld [vmem:[%s12957_s27 + $0xc] sm:$0xf]  ;;  %v12654_v8 = vld [vmem:[%s12957_s27 + $0x1c] sm:$0xf] }
 0xc6a   : > { %v12365_v11 = vpop.eup %12364  ;;  %v11210_v40 = vpop.f32.mrb[220].mxu1  ;;  %v6560_v14 = vmul.f32 %v12363_v45, %v15042_v28  ;;  %v6806_v18 = vunpack.c.l.bf16 %v12653_v21  ;;  %v6807_v22 = vunpack.c.l.bf16 %v12654_v8 }
 0xc6b   : > { %12374 = vrcp.f32 %v11210_v40  ;;  %v6462_v34 = vpop.f32.mrb[221].mxu1  ;;  %11238 = vmatmul.mubr.msk.bf16.gmra.mrb[8].mxu0 %vm827_vm0, %v6582_v12  ;;  %v6559_v30 = vmul.f32 %v12365_v11, %v15037_v26 }
 0xc6c   : > { %12376 = vrcp.f32 %v6462_v34 }
 0xc6d   : > { %v12367_v52 = vpop.eup %12366  ;;  %v6583_v53 = vpack.c.bf16 %v6560_v14, %v6559_v30 }
 0xc6e   : > { %v12369_v36 = vpop.eup %12368  ;;  %v6562_v32 = vmul.f32 %v12367_v52, %v15052_v39  ;;  %v11213_v42 = vpop.f32.mrb[222].mxu1  ;;  %v9629_v52 = vld [vmem:[%s16051_s5 + $0x70] sm:$0xff] }
 0xc6f   : > { %v6561_v16 = vmul.f32 %v12369_v36, %v15047_v54  ;;  %12378 = vrcp.f32 %v11213_v42  ;;  %v6472_v2 = vpop.f32.mrb[223].mxu1  ;;  %11241 = vmatprep.mubr.msk.bf16.mxu0 %vm827_vm0, %v6583_v53  ;;  %v9630_v53 = vld [vmem:[%s16051_s5 + $0x78] sm:$0xff]  ;;  %v12655_v42 = vld [vmem:[%s12957_s27 + $0x6c] sm:$0xf] }
 0xc70   : > { %12380 = vrcp.f32 %v6472_v2  ;;  %v12656_v2 = vld [vmem:[%s12957_s27 + $0x7c] sm:$0xf] }
 0xc71   : > { %v12371_v28 = vpop.eup %12370  ;;  %v6584_v38 = vpack.c.bf16 %v6562_v32, %v6561_v16  ;;  %v6812_v16 = vunpack.c.l.bf16 %v12655_v42 }
 0xc72   : > { %v12373_v33 = vpop.eup %12372  ;;  %v11216_v41 = vpop.f32.mrb[224].mxu1  ;;  %v6564_v26 = vmul.f32 %v12371_v28, %v15062_v25  ;;  %v6813_v28 = vunpack.c.l.bf16 %v12656_v2 }
 0xc73   : > { %12382 = vrcp.f32 %v11216_v41  ;;  %v6482_v43 = vpop.f32.mrb[225].mxu1  ;;  %11242 = vmatmul.mubr.msk.bf16.gmra.mrb[12].mxu0 %vm827_vm0, %v6584_v38  ;;  %v6563_v39 = vmul.f32 %v12373_v33, %v15057_v4  ;;  %v11607_v38 = vpack.c.bf16 %v9630_v53, %v9629_v52  ;;  %v12657_v41 = vld [vmem:[%s12957_s27 + $0x4c] sm:$0xf] }
 0xc74   : > { %12384 = vrcp.f32 %v6482_v43  ;;  %v12658_v43 = vld [vmem:[%s12957_s27 + $0x5c] sm:$0xf]  ;;  %v12669_v53 = vld [vmem:[%s12957_s27 + $0x10c] sm:$0xf] }
 0xc75   : > { %v12375_v24 = vpop.eup %12374  ;;  %v6585_v54 = vpack.c.bf16 %v6564_v26, %v6563_v39  ;;  %v6810_v26 = vunpack.c.l.bf16 %v12657_v41  ;;  %v6811_v39 = vunpack.c.l.bf16 %v12658_v43 }
 0xc76   : > { %v12377_v62 = vpop.eup %12376  ;;  %v6566_v1 = vmul.f32 %v12375_v24, %v15072_v48  ;;  %v11219_v13 = vpop.f32.mrb[226].mxu1 }
 0xc77   : > { %v6565_v23 = vmul.f32 %v12377_v62, %v15067_v44  ;;  %12386 = vrcp.f32 %v11219_v13  ;;  %v6492_v58 = vpop.f32.mrb[227].mxu1  ;;  %11245 = vmatprep.mubr.msk.bf16.mxu0 %vm827_vm0, %v6585_v54 }
 0xc78   : > { %12388 = vrcp.f32 %v6492_v58 }
 0xc79   : > { %v12379_v25 = vpop.eup %12378  ;;  %v6586_v10 = vpack.c.bf16 %v6566_v1, %v6565_v23 }
 0xc7a   : > { %v12381_v61 = vpop.eup %12380  ;;  %v11222_v7 = vpop.f32.mrb[228].mxu1  ;;  %v6568_v4 = vmul.f32 %v12379_v25, %v15082_v19 }
 0xc7b   : > { %12390 = vrcp.f32 %v11222_v7  ;;  %v6502_v37 = vpop.f32.mrb[229].mxu1  ;;  %11246 = vmatmul.mubr.msk.bf16.gmra.mrb[16].mxu0 %vm827_vm0, %v6586_v10  ;;  %v6567_v48 = vmul.f32 %v12381_v61, %v15077_v17  ;;  %v12659_v61 = vld [vmem:[%s12957_s27 + $0xac] sm:$0xf] }
 0xc7c   : > { %12392 = vrcp.f32 %v6502_v37  ;;  %v6816_v7 = vunpack.c.l.bf16 %v12659_v61 }
 0xc7d   : > { %v12383_v46 = vpop.eup %12382  ;;  %v6587_v44 = vpack.c.bf16 %v6568_v4, %v6567_v48  ;;  %v12660_v4 = vld [vmem:[%s12957_s27 + $0xbc] sm:$0xf] }
 0xc7e   : > { %v12385_v63 = vpop.eup %12384  ;;  %v6570_v0 = vmul.f32 %v12383_v46, %v15090_v60  ;;  %v6817_v37 = vunpack.c.l.bf16 %v12660_v4  ;;  %v12661_v46 = vld [vmem:[%s12957_s27 + $0x8c] sm:$0xf] }
 0xc7f   : > { %v6569_v51 = vmul.f32 %v12385_v63, %v15086_v29  ;;  %11249 = vmatprep.mubr.msk.bf16.mxu0 %vm827_vm0, %v6587_v44  ;;  %v6814_v44 = vunpack.c.l.bf16 %v12661_v46  ;;  %v12662_v63 = vld [vmem:[%s12957_s27 + $0x9c] sm:$0xf] }
 0xc81   : > { %v12387_v59 = vpop.eup %12386  ;;  %v6588_v3 = vpack.c.bf16 %v6570_v0, %v6569_v51  ;;  %v6815_v0 = vunpack.c.l.bf16 %v12662_v63 }
 0xc82   : > { %v12389_v49 = vpop.eup %12388  ;;  %v6572_v19 = vmul.f32 %v12387_v59, %v15098_v55  ;;  %v9627_v55 = vld [vmem:[%s16051_s5 + $0x60] sm:$0xff] }
 0xc83   : > { %11250 = vmatmul.mubr.msk.bf16.gmra.mrb[20].mxu0 %vm827_vm0, %v6588_v3  ;;  %v6571_v17 = vmul.f32 %v12389_v49, %v15094_v6  ;;  %v9628_v6 = vld [vmem:[%s16051_s5 + $0x68] sm:$0xff] }
 0xc84   : > { %v11603_v15 = vpack.c.bf16 %v9628_v6, %v9627_v55 }
 0xc85   : > { %v12391_v47 = vpop.eup %12390  ;;  %v6589_v31 = vpack.c.bf16 %v6572_v19, %v6571_v17 }
 0xc86   : > { %v12393_v56 = vpop.eup %12392  ;;  %v6574_v60 = vmul.f32 %v12391_v47, %v15106_v5  ;;  %11604 = vmatprep.subr.bf16.mxu1 %v11603_v15  ;;  %v6808_v5 = vunpack.c.l.bf16 %v12651_v27 }
 0xc87   : > { %v6573_v29 = vmul.f32 %v12393_v56, %v15102_v20  ;;  %11253 = vmatprep.mubr.msk.bf16.mxu0 %vm827_vm0, %v6589_v31 }
 0xc89   : > { %v6590_v35 = vpack.c.bf16 %v6574_v60, %v6573_v29  ;;  %v12663_v60 = vld [vmem:[%s12957_s27 + $0xec] sm:$0xf] }
 0xc8a   : > { %v6820_v29 = vunpack.c.l.bf16 %v12663_v60 }
 0xc8b   : > { %11254 = vmatmul.mubr.msk.bf16.gmra.mrb[24].mxu0 %vm827_vm0, %v6590_v35  ;;  %v12664_v35 = vld [vmem:[%s12957_s27 + $0xfc] sm:$0xf] }
 0xc8c   : > { %v6821_v55 = vunpack.c.l.bf16 %v12664_v35 }
 0xd26   : > { %v11227_v20 = vpop.f32.mrb[252].mxu0 }
 0xd27   : > { %v6679_v45 = vpop.f32.mrb[253].mxu0  ;;  %v6840_v11 = vmul.f32 %v11227_v20, %v6808_v5  ;;  %v12666_v5 = vld [vmem:[%s12957_s27 + $0xdc] sm:$0xf] }
 0xd28   : > { %v11228_v12 = vpop.f32.mrb[254].mxu0  ;;  %v6838_v34 = vmul.f32 %v6806_v18, %v6679_v45  ;;  %v6819_v50 = vunpack.c.l.bf16 %v12666_v5 }
 0xd29   : > { %v6841_v40 = vmul.f32 %v11228_v12, %v6809_v9  ;;  %v6682_v14 = vpop.f32.mrb[255].mxu0 }
 0xd2a   : > { %v6839_v30 = vmul.f32 %v6807_v22, %v6682_v14 }
 0xd2b   : > { %v6871_v36 = vpack.c.bf16 %v6841_v40, %v6840_v11  ;;  %v12667_v40 = vld [vmem:[%s12957_s27 + $0x12c] sm:$0xf] }
 0xd2c   : > { %v6870_v32 = vpack.c.bf16 %v6839_v30, %v6838_v34  ;;  %v6824_v14 = vunpack.c.l.bf16 %v12667_v40  ;;  %v12668_v34 = vld [vmem:[%s12957_s27 + $0x13c] sm:$0xf] }
 0xd2d   : > { %v6825_v30 = vunpack.c.l.bf16 %v12668_v34 }
 0xd2e   : > { %v11231_v33 = vpop.f32.mrb[0].mxu0  ;;  %11273 = vmatprep.mubr.bf16.mxu1 %v6870_v32  ;;  %v12670_v32 = vld [vmem:[%s12957_s27 + $0x11c] sm:$0xf] }
 0xd2f   : > { %v6695_v24 = vpop.f32.mrb[1].mxu0  ;;  %11274 = vmatmul.mubr.bf16.vlgmr.msra.gmra.mrb[232].mxu1 %v6871_v36  ;;  %v6844_v62 = vmul.f32 %v11231_v33, %v6812_v16  ;;  %v6822_v36 = vunpack.c.l.bf16 %v12669_v53  ;;  %v6823_v42 = vunpack.c.l.bf16 %v12670_v32 }
 0xd30   : > { %v11232_v54 = vpop.f32.mrb[2].mxu0  ;;  %11606 = vmatpush3.bf16.msra.mxu1 %v11603_v15  ;;  %v6842_v23 = vmul.f32 %v6810_v26, %v6695_v24  ;;  %v12665_v15 = vld [vmem:[%s12957_s27 + $0xcc] sm:$0xf] }
 0xd31   : > { %v6845_v1 = vmul.f32 %v11232_v54, %v6813_v28  ;;  %v6698_v13 = vpop.f32.mrb[3].mxu0  ;;  %11608 = vmatprep.subr.bf16.mxu1 %v11607_v38  ;;  %v6818_v27 = vunpack.c.l.bf16 %v12665_v15  ;;  %v12671_v24 = vld [vmem:[%s12957_s27 + $0x16c] sm:$0xf] }
 0xd32   : > { %v6843_v58 = vmul.f32 %v6811_v39, %v6698_v13  ;;  %v6828_v54 = vunpack.c.l.bf16 %v12671_v24 }
 0xd33   : > { %v6873_v25 = vpack.c.bf16 %v6845_v1, %v6844_v62  ;;  %v12672_v62 = vld [vmem:[%s12957_s27 + $0x17c] sm:$0xf] }
 0xd34   : > { %v6872_v10 = vpack.c.bf16 %v6843_v58, %v6842_v23  ;;  %11610 = vmatpush3.bf16.msra.mxu1 %v11607_v38  ;;  %v6829_v1 = vunpack.c.l.bf16 %v12672_v62  ;;  %v12673_v23 = vld [vmem:[%s12957_s27 + $0x14c] sm:$0xf] }
 0xd35   : > { %v6826_v58 = vunpack.c.l.bf16 %v12673_v23 }
 0xd36   : > { %v11235_v48 = vpop.f32.mrb[4].mxu0  ;;  %11277 = vmatprep.mubr.bf16.mxu1 %v6872_v10 }
 0xd37   : > { %v6711_v51 = vpop.f32.mrb[5].mxu0  ;;  %11278 = vmatmul.mubr.bf16.gmra.mrb[236].mxu1 %v6873_v25  ;;  %v6848_v3 = vmul.f32 %v11235_v48, %v6816_v7  ;;  %v12674_v25 = vld [vmem:[%s12957_s27 + $0x15c] sm:$0xf] }
 0xd38   : > { %v11236_v59 = vpop.f32.mrb[6].mxu0  ;;  %v6846_v17 = vmul.f32 %v6814_v44, %v6711_v51  ;;  %v6827_v10 = vunpack.c.l.bf16 %v12674_v25  ;;  %v12675_v51 = vld [vmem:[%s12957_s27 + $0x1ac] sm:$0xf] }
 0xd39   : > { %v6849_v49 = vmul.f32 %v11236_v59, %v6817_v37  ;;  %v6714_v19 = vpop.f32.mrb[7].mxu0  ;;  %v6832_v59 = vunpack.c.l.bf16 %v12675_v51 }
 0xd3a   : > { %v6847_v47 = vmul.f32 %v6815_v0, %v6714_v19 }
 0xd3b   : > { %v6875_v31 = vpack.c.bf16 %v6849_v49, %v6848_v3  ;;  %v12676_v3 = vld [vmem:[%s12957_s27 + $0x1bc] sm:$0xf] }
 0xd3c   : > { %v6874_v56 = vpack.c.bf16 %v6847_v47, %v6846_v17  ;;  %v6833_v49 = vunpack.c.l.bf16 %v12676_v3  ;;  %v12677_v17 = vld [vmem:[%s12957_s27 + $0x18c] sm:$0xf] }
 0xd3d   : > { %v6830_v47 = vunpack.c.l.bf16 %v12677_v17 }
 0xd3e   : > { %v11239_v6 = vpop.f32.mrb[8].mxu0  ;;  %11281 = vmatprep.mubr.bf16.mxu1 %v6874_v56 }
 0xd3f   : > { %v6727_v9 = vpop.f32.mrb[9].mxu0  ;;  %11282 = vmatmul.mubr.bf16.gmra.mrb[240].mxu1 %v6875_v31  ;;  %v6852_v21 = vmul.f32 %v11239_v6, %v6820_v29  ;;  %v12678_v31 = vld [vmem:[%s12957_s27 + $0x19c] sm:$0xf] }
 0xd40   : > { %v11240_v20 = vpop.f32.mrb[10].mxu0  ;;  %v6850_v22 = vmul.f32 %v6818_v27, %v6727_v9  ;;  %v6831_v56 = vunpack.c.l.bf16 %v12678_v31  ;;  %v12679_v9 = vld [vmem:[%s12957_s27 + $0x1ec] sm:$0xf] }
 0xd41   : > { %v6853_v18 = vmul.f32 %v11240_v20, %v6821_v55  ;;  %v6730_v8 = vpop.f32.mrb[11].mxu0  ;;  %v6836_v20 = vunpack.c.l.bf16 %v12679_v9 }
 0xd42   : > { %v6851_v45 = vmul.f32 %v6819_v50, %v6730_v8 }
 0xd43   : > { %v6877_v12 = vpack.c.bf16 %v6853_v18, %v6852_v21  ;;  %v12680_v21 = vld [vmem:[%s12957_s27 + $0x1fc] sm:$0xf] }
 0xd44   : > { %v6876_v11 = vpack.c.bf16 %v6851_v45, %v6850_v22  ;;  %v6837_v18 = vunpack.c.l.bf16 %v12680_v21  ;;  %v12681_v22 = vld [vmem:[%s12957_s27 + $0x1cc] sm:$0xf] }
 0xd45   : > { %v6834_v45 = vunpack.c.l.bf16 %v12681_v22 }
 0xd46   : > { %v11243_v52 = vpop.f32.mrb[12].mxu0  ;;  %11285 = vmatprep.mubr.bf16.mxu1 %v6876_v11 }
 0xd47   : > { %v6743_v16 = vpop.f32.mrb[13].mxu0  ;;  %11286 = vmatmul.mubr.bf16.gmra.mrb[244].mxu1 %v6877_v12  ;;  %v6856_v28 = vmul.f32 %v11243_v52, %v6824_v14  ;;  %v12682_v12 = vld [vmem:[%s12957_s27 + $0x1dc] sm:$0xf]  ;;  %s9751_s27 = sshll.u32 %s12870_s21, 12  ;;  %s9100_s21 = scalar_lea.sflag [#allocation4], %s12953_s22 }
 0xd48   : > { %v11244_v2 = vpop.f32.mrb[14].mxu0  ;;  %v6854_v41 = vmul.f32 %v6822_v36, %v6743_v16  ;;  %v6835_v11 = vunpack.c.l.bf16 %v12682_v12  ;;  %v11866_v16 = vld [vmem:[%s16052_s6] sm:$0xff]   ;;  %s15997_s26 = scalar_lea.hbm %s16057_s11, %s9751_s27 }
 0xd49   : > { %v6857_v38 = vmul.f32 %v11244_v2, %v6825_v30  ;;  %v6746_v33 = vpop.f32.mrb[15].mxu0  ;;  %v11867_v2 = vld [vmem:[%s16052_s6 + $0x8] sm:$0xff]   ;;  %11361 = vmatprep.subr.bf16.mxu0 %v11866_v16 }
 0xd4a   : > { %v6855_v26 = vmul.f32 %v6823_v42, %v6746_v33  ;;  %11362 = vmatpush3.bf16.msra.mxu0 %v11866_v16  ;;  %v11870_v33 = vld [vmem:[%s16052_s6 + $0x20] sm:$0xff]  }
 0xd4b   : > { %v6879_v43 = vpack.c.bf16 %v6857_v38, %v6856_v28  ;;  %11363 = vmatprep.subr.bf16.mxu0 %v11867_v2  ;;  %v11868_v28 = vld [vmem:[%s16052_s6 + $0x10] sm:$0xff]   ;;  %v11869_v38 = vld [vmem:[%s16052_s6 + $0x18] sm:$0xff]  }
 0xd4c   : > { %v6878_v39 = vpack.c.bf16 %v6855_v26, %v6854_v41  ;;  %v11871_v41 = vld [vmem:[%s16052_s6 + $0x28] sm:$0xff]   ;;  %v11872_v26 = vld [vmem:[%s16052_s6 + $0x30] sm:$0xff]  }
 0xd4e   : > { %v11247_v13 = vpop.f32.mrb[16].mxu0  ;;  %11289 = vmatprep.mubr.bf16.mxu1 %v6878_v39  ;;  %11364 = vmatpush3.bf16.msra.mxu0 %v11867_v2 }
 0xd4f   : > { %v6759_v61 = vpop.f32.mrb[17].mxu0  ;;  %11290 = vmatmul.mubr.bf16.gmra.mrb[248].mxu1 %v6879_v43  ;;  %v6860_v4 = vmul.f32 %v11247_v13, %v6828_v54  ;;  %11365 = vmatprep.subr.bf16.mxu0 %v11868_v28 }
 0xd50   : > { %v11248_v7 = vpop.f32.mrb[18].mxu0  ;;  %v6858_v46 = vmul.f32 %v6826_v58, %v6759_v61 }
 0xd51   : > { %v6861_v37 = vmul.f32 %v11248_v7, %v6829_v1  ;;  %v6762_v48 = vpop.f32.mrb[19].mxu0 }
 0xd52   : > { %v6859_v44 = vmul.f32 %v6827_v10, %v6762_v48  ;;  %11366 = vmatpush3.bf16.msra.mxu0 %v11868_v28 }
 0xd53   : > { %v6881_v63 = vpack.c.bf16 %v6861_v37, %v6860_v4  ;;  %11367 = vmatprep.subr.bf16.mxu0 %v11869_v38 }
 0xd54   : > { %v6880_v0 = vpack.c.bf16 %v6859_v44, %v6858_v46 }
 0xd56   : > { %v11251_v19 = vpop.f32.mrb[20].mxu0  ;;  %11293 = vmatprep.mubr.bf16.mxu1 %v6880_v0  ;;  %11368 = vmatpush3.bf16.msra.mxu0 %v11869_v38 }
 0xd57   : > { %v6775_v60 = vpop.f32.mrb[21].mxu0  ;;  %11294 = vmatmul.mubr.bf16.gmra.mrb[252].mxu1 %v6881_v63  ;;  %v6864_v35 = vmul.f32 %v11251_v19, %v6832_v59  ;;  %11369 = vmatprep.subr.bf16.mxu0 %v11870_v33 }
 0xd58   : > { %v11252_v29 = vpop.f32.mrb[22].mxu0  ;;  %v6862_v15 = vmul.f32 %v6830_v47, %v6775_v60 }
 0xd59   : > { %v6865_v55 = vmul.f32 %v11252_v29, %v6833_v49  ;;  %v6778_v6 = vpop.f32.mrb[23].mxu0 }
 0xd5a   : > { %v6863_v27 = vmul.f32 %v6831_v56, %v6778_v6  ;;  %11370 = vmatpush3.bf16.msra.mxu0 %v11870_v33  ;;  %v7754_v6 = vld [vmem:[%s16053_s7] sm:$0xff] }
 0xd5b   : > { %v6883_v5 = vpack.c.bf16 %v6865_v55, %v6864_v35  ;;  %11371 = vmatprep.subr.bf16.mxu0 %v11871_v41  ;;  %v11873_v55 = vld [vmem:[%s16052_s6 + $0x38] sm:$0xff]  }
 0xd5c   : > { %v6882_v50 = vpack.c.bf16 %v6863_v27, %v6862_v15  ;;  %v7755_v15 = vld [vmem:[%s16053_s7 + $0x8] sm:$0xff] }
 0xd5d   : > { %v11611_v27 = vpack.c.bf16 %v7755_v15, %v7754_v6 }
 0xd5e   : > { %v11255_v8 = vpop.f32.mrb[24].mxu0  ;;  %11297 = vmatprep.mubr.bf16.mxu1 %v6882_v50  ;;  %11372 = vmatpush3.bf16.msra.mxu0 %v11871_v41  ;;  %v15268_v50 = vld [vmem:[%s16056_s10] sm:$0xff] }
 0xd5f   : > { %v6791_v40 = vpop.f32.mrb[25].mxu0  ;;  %11298 = vmatmul.mubr.bf16.gmra.mrb[0].mxu1 %v6883_v5  ;;  %v6868_v34 = vmul.f32 %v11255_v8, %v6836_v20  ;;  %11373 = vmatprep.subr.bf16.mxu0 %v11872_v26  ;;  %v7407_v5 = vsub.s32 3, %v13023_v57 }
 0xd60   : > { %v11256_v14 = vpop.f32.mrb[26].mxu0  ;;  %v6866_v53 = vmul.f32 %v6834_v45, %v6791_v40  ;;  %v7756_v40 = vld [vmem:[%s16053_s7 + $0x10] sm:$0xff] }
 0xd61   : > { %v6869_v30 = vmul.f32 %v11256_v14, %v6837_v18  ;;  %v6794_v52 = vpop.f32.mrb[27].mxu0  ;;  %v15271_v9 = vrot.slane %v15268_v50, %v7407_v5  ;;  %v7757_v14 = vld [vmem:[%s16053_s7 + $0x18] sm:$0xff] }
 0xd62   : > { %v6867_v36 = vmul.f32 %v6835_v11, %v6794_v52  ;;  %11374 = vmatpush3.bf16.msra.mxu0 %v11872_v26 }
 0xd63   : > { %v6885_v32 = vpack.c.bf16 %v6869_v30, %v6868_v34  ;;  %11375 = vmatprep.subr.bf16.mxu0 %v11873_v55 }
 0xd64   : > { %v6884_v42 = vpack.c.bf16 %v6867_v36, %v6866_v53  ;;  %v11615_v53 = vpack.c.bf16 %v7757_v14, %v7756_v40 }
 0xd66   : > { %11301 = vmatprep.mubr.bf16.mxu1 %v6884_v42  ;;  %11376 = vmatpush3.bf16.msra.mxu0 %v11873_v55 }
 0xd67   : > { %11302 = vmatmul.mubr.bf16.gmra.mrb[4].mxu1 %v6885_v32  ;;  %11612 = vmatprep.subr.bf16.mxu0 %v11611_v27 }
 0xe02   : > { %v11275_v43 = vpop.f32.mrb[232].mxu1 }
 0xe03   : > { %v6920_v39 = vpop.f32.mrb[233].mxu1 }
 0xe04   : > { %v11276_v24 = vpop.f32.mrb[234].mxu1  ;;  %11313 = vmatprep.mubr.msk.f32.mxu1 %vm3266_vm1, %v6920_v39 }
 0xe05   : > { %v6923_v54 = vpop.f32.mrb[235].mxu1 }
 0xe06   : > { %11314 = vmatmul.mubr.msk.f32.vlgmr.msra.gmra.mrb[102].mxu1 %vm3266_vm1, %v6923_v54 }
 0xe07   : > { %11316 = vmatprep.mubr.msk.f32.mxu1 %vm3266_vm1, %v11275_v43 }
 0xe0a   : > { %v11279_v62 = vpop.f32.mrb[236].mxu1  ;;  %11317 = vmatmul.mubr.msk.f32.gmra.mrb[136].mxu1 %vm3266_vm1, %v11276_v24 }
 0xe0b   : > { %v6936_v1 = vpop.f32.mrb[237].mxu1 }
 0xe0c   : > { %v11280_v13 = vpop.f32.mrb[238].mxu1  ;;  %11319 = vmatprep.mubr.msk.f32.mxu1 %vm3266_vm1, %v6936_v1 }
 0xe0d   : > { %v6939_v23 = vpop.f32.mrb[239].mxu1 }
 0xe0e   : > { %11320 = vmatmul.mubr.msk.f32.gmra.mrb[138].mxu1 %vm3266_vm1, %v6939_v23 }
 0xe0f   : > { %11322 = vmatprep.mubr.msk.f32.mxu1 %vm3266_vm1, %v11279_v62 }
 0xe12   : > { %v11283_v58 = vpop.f32.mrb[240].mxu1  ;;  %11323 = vmatmul.mubr.msk.f32.gmra.mrb[140].mxu1 %vm3266_vm1, %v11280_v13 }
 0xe13   : > { %v6952_v25 = vpop.f32.mrb[241].mxu1 }
 0xe14   : > { %v11284_v10 = vpop.f32.mrb[242].mxu1  ;;  %11325 = vmatprep.mubr.msk.f32.mxu1 %vm3266_vm1, %v6952_v25 }
 0xe15   : > { %v6955_v61 = vpop.f32.mrb[243].mxu1 }
 0xe16   : > { %11326 = vmatmul.mubr.msk.f32.gmra.mrb[142].mxu1 %vm3266_vm1, %v6955_v61 }
 0xe17   : > { %11328 = vmatprep.mubr.msk.f32.mxu1 %vm3266_vm1, %v11283_v58 }
 0xe1a   : > { %v11287_v7 = vpop.f32.mrb[244].mxu1  ;;  %11329 = vmatmul.mubr.msk.f32.gmra.mrb[144].mxu1 %vm3266_vm1, %v11284_v10 }
 0xe1b   : > { %v6968_v4 = vpop.f32.mrb[245].mxu1 }
 0xe1c   : > { %v11288_v37 = vpop.f32.mrb[246].mxu1  ;;  %11331 = vmatprep.mubr.msk.f32.mxu1 %vm3266_vm1, %v6968_v4 }
 0xe1d   : > { %v6971_v48 = vpop.f32.mrb[247].mxu1 }
 0xe1e   : > { %11332 = vmatmul.mubr.msk.f32.gmra.mrb[146].mxu1 %vm3266_vm1, %v6971_v48 }
 0xe1f   : > { %11334 = vmatprep.mubr.msk.f32.mxu1 %vm3266_vm1, %v11287_v7 }
 0xe22   : > { %v11291_v46 = vpop.f32.mrb[248].mxu1  ;;  %11335 = vmatmul.mubr.msk.f32.gmra.mrb[148].mxu1 %vm3266_vm1, %v11288_v37 }
 0xe23   : > { %v6984_v44 = vpop.f32.mrb[249].mxu1 }
 0xe24   : > { %v11292_v63 = vpop.f32.mrb[250].mxu1  ;;  %11337 = vmatprep.mubr.msk.f32.mxu1 %vm3266_vm1, %v6984_v44 }
 0xe25   : > { %v6987_v0 = vpop.f32.mrb[251].mxu1 }
 0xe26   : > { %11338 = vmatmul.mubr.msk.f32.gmra.mrb[150].mxu1 %vm3266_vm1, %v6987_v0 }
 0xe27   : > { %11340 = vmatprep.mubr.msk.f32.mxu1 %vm3266_vm1, %v11291_v46 }
 0xe2a   : > { %v11295_v51 = vpop.f32.mrb[252].mxu1  ;;  %11341 = vmatmul.mubr.msk.f32.gmra.mrb[152].mxu1 %vm3266_vm1, %v11292_v63 }
 0xe2b   : > { %v7000_v59 = vpop.f32.mrb[253].mxu1 }
 0xe2c   : > { %v11296_v3 = vpop.f32.mrb[254].mxu1  ;;  %11343 = vmatprep.mubr.msk.f32.mxu1 %vm3266_vm1, %v7000_v59 }
 0xe2d   : > { %v7003_v49 = vpop.f32.mrb[255].mxu1 }
 0xe2e   : > { %11344 = vmatmul.mubr.msk.f32.gmra.mrb[154].mxu1 %vm3266_vm1, %v7003_v49 }
 0xe2f   : > { %11346 = vmatprep.mubr.msk.f32.mxu1 %vm3266_vm1, %v11295_v51 }
 0xe32   : > { %v11299_v19 = vpop.f32.mrb[0].mxu1  ;;  %11347 = vmatmul.mubr.msk.f32.gmra.mrb[156].mxu1 %vm3266_vm1, %v11296_v3 }
 0xe33   : > { %v7016_v17 = vpop.f32.mrb[1].mxu1 }
 0xe34   : > { %v11300_v47 = vpop.f32.mrb[2].mxu1  ;;  %11349 = vmatprep.mubr.msk.f32.mxu1 %vm3266_vm1, %v7016_v17 }
 0xe35   : > { %v7019_v31 = vpop.f32.mrb[3].mxu1 }
 0xe36   : > { %11350 = vmatmul.mubr.msk.f32.gmra.mrb[158].mxu1 %vm3266_vm1, %v7019_v31 }
 0xe37   : > { %11352 = vmatprep.mubr.msk.f32.mxu1 %vm3266_vm1, %v11299_v19 }
 0xe3a   : > { %v11303_v56 = vpop.f32.mrb[4].mxu1  ;;  %11353 = vmatmul.mubr.msk.f32.gmra.mrb[160].mxu1 %vm3266_vm1, %v11300_v47 }
 0xe3b   : > { %v7032_v60 = vpop.f32.mrb[5].mxu1 }
 0xe3c   : > { %v11304_v29 = vpop.f32.mrb[6].mxu1  ;;  %11355 = vmatprep.mubr.msk.f32.mxu1 %vm3266_vm1, %v7032_v60 }
 0xe3d   : > { %v7035_v35 = vpop.f32.mrb[7].mxu1 }
 0xe3e   : > { %11356 = vmatmul.mubr.msk.f32.gmra.mrb[162].mxu1 %vm3266_vm1, %v7035_v35 }
 0xe3f   : > { %11358 = vmatprep.mubr.msk.f32.mxu1 %vm3266_vm1, %v11303_v56 }
 0xe42   : > { %11359 = vmatmul.mubr.msk.f32.gmra.mrb[164].mxu1 %vm3266_vm1, %v11304_v29 }
 0xed9   : > { %v11315_v20 = vpop.f32.mrb[102].mxu1 }
 0xeda   : > { %v15274_v21 = vadd.f32 %v11315_v20, %v15271_v9  ;;  %v7214_v18 = vpop.f32.mrb[103].mxu1 }
 0xedb   : > { %v15277_v8 = vadd.f32 %v15271_v9, %v7214_v18 }
 0xedd   : > { %v7441_v22 = vpack.c.bf16 %v15274_v21, %v15277_v8  ;;  %v11318_v45 = vpop.f32.mrb[136].mxu1 }
 0xede   : > { %v15282_v12 = vadd.f32 %v11318_v45, %v15271_v9  ;;  %v7224_v11 = vpop.f32.mrb[137].mxu1 }
 0xedf   : > { %v15291_v34 = vadd.f32 %v15271_v9, %v7224_v11  ;;  %11377 = vmatprep.mubr.bf16.mxu0 %v7441_v22 }
 0xee1   : > { %v7442_v30 = vpack.c.bf16 %v15282_v12, %v15291_v34  ;;  %v11321_v52 = vpop.f32.mrb[138].mxu1 }
 0xee2   : > { %v15296_v36 = vadd.f32 %v11321_v52, %v15271_v9  ;;  %v7234_v32 = vpop.f32.mrb[139].mxu1 }
 0xee3   : > { %v15299_v42 = vadd.f32 %v15271_v9, %v7234_v32  ;;  %11378 = vmatmul.mubr.bf16.vlgmr.msra.gmra.mrb[28].mxu0 %v7442_v30 }
 0xee4   : > { %11614 = vmatpush3.bf16.msra.mxu0 %v11611_v27 }
 0xee5   : > { %v7443_v16 = vpack.c.bf16 %v15296_v36, %v15299_v42  ;;  %v11324_v2 = vpop.f32.mrb[140].mxu1  ;;  %11616 = vmatprep.subr.bf16.mxu0 %v11615_v53 }
 0xee6   : > { %v15304_v28 = vadd.f32 %v11324_v2, %v15271_v9  ;;  %v7244_v38 = vpop.f32.mrb[141].mxu1 }
 0xee7   : > { %v15307_v33 = vadd.f32 %v15271_v9, %v7244_v38  ;;  %11381 = vmatprep.mubr.bf16.mxu0 %v7443_v16 }
 0xee8   : > { %11618 = vmatpush3.bf16.msra.mxu0 %v11615_v53 }
 0xee9   : > { %v7444_v41 = vpack.c.bf16 %v15304_v28, %v15307_v33  ;;  %v11327_v26 = vpop.f32.mrb[142].mxu1 }
 0xeea   : > { %v15312_v43 = vadd.f32 %v11327_v26, %v15271_v9  ;;  %v7254_v39 = vpop.f32.mrb[143].mxu1 }
 0xeeb   : > { %v15315_v24 = vadd.f32 %v15271_v9, %v7254_v39  ;;  %11382 = vmatmul.mubr.bf16.gmra.mrb[32].mxu0 %v7444_v41 }
 0xeed   : > { %v7445_v54 = vpack.c.bf16 %v15312_v43, %v15315_v24  ;;  %v11330_v62 = vpop.f32.mrb[144].mxu1 }
 0xeee   : > { %v15320_v1 = vadd.f32 %v11330_v62, %v15271_v9  ;;  %v7264_v13 = vpop.f32.mrb[145].mxu1 }
 0xeef   : > { %v15323_v23 = vadd.f32 %v15271_v9, %v7264_v13  ;;  %11385 = vmatprep.mubr.bf16.mxu0 %v7445_v54 }
 0xef1   : > { %v7446_v58 = vpack.c.bf16 %v15320_v1, %v15323_v23  ;;  %v11333_v25 = vpop.f32.mrb[146].mxu1 }
 0xef2   : > { %v15328_v10 = vadd.f32 %v11333_v25, %v15271_v9  ;;  %v7274_v61 = vpop.f32.mrb[147].mxu1 }
 0xef3   : > { %v15331_v7 = vadd.f32 %v15271_v9, %v7274_v61  ;;  %11386 = vmatmul.mubr.bf16.gmra.mrb[36].mxu0 %v7446_v58  ;;  %v7475_v61 = vsub.s32 4, %v13023_v57 }
 0xef5   : > { %v7447_v4 = vpack.c.bf16 %v15328_v10, %v15331_v7  ;;  %v11336_v37 = vpop.f32.mrb[148].mxu1 }
 0xef6   : > { %v15336_v48 = vadd.f32 %v11336_v37, %v15271_v9  ;;  %v7284_v46 = vpop.f32.mrb[149].mxu1  ;;  %v7720_v37 = vsub.s32 5, %v13023_v57 }
 0xef7   : > { %v15339_v44 = vadd.f32 %v15271_v9, %v7284_v46  ;;  %11389 = vmatprep.mubr.bf16.mxu0 %v7447_v4  ;;  %v15409_v4 = vrot.slane %v15268_v50, %v7475_v61 }
 0xef9   : > { %v7448_v63 = vpack.c.bf16 %v15336_v48, %v15339_v44  ;;  %v11339_v0 = vpop.f32.mrb[150].mxu1 }
 0xefa   : > { %v15344_v51 = vadd.f32 %v11339_v0, %v15271_v9  ;;  %v7294_v59 = vpop.f32.mrb[151].mxu1 }
 0xefb   : > { %v15347_v3 = vadd.f32 %v15271_v9, %v7294_v59  ;;  %11390 = vmatmul.mubr.bf16.gmra.mrb[40].mxu0 %v7448_v63  ;;  %v15414_v59 = vrot.slane %v15268_v50, %v7720_v37 }
 0xefd   : > { %v7449_v49 = vpack.c.bf16 %v15344_v51, %v15347_v3  ;;  %v11342_v19 = vpop.f32.mrb[152].mxu1 }
 0xefe   : > { %v15352_v17 = vadd.f32 %v11342_v19, %v15271_v9  ;;  %v7304_v47 = vpop.f32.mrb[153].mxu1 }
 0xeff   : > { %v15355_v31 = vadd.f32 %v15271_v9, %v7304_v47  ;;  %11393 = vmatprep.mubr.bf16.mxu0 %v7449_v49 }
 0xf00   : > { %16115 = vst [vmem:[#allocation12_spill] sm:$0xff] %v15352_v17 }
 0xf01   : > { %16116 = vst [vmem:[#allocation14_spill] sm:$0xff] %v15355_v31  ;;  %v7450_v56 = vpack.c.bf16 %v15352_v17, %v15355_v31  ;;  %v11345_v60 = vpop.f32.mrb[154].mxu1 }
 0xf02   : > { %v15360_v29 = vadd.f32 %v11345_v60, %v15271_v9  ;;  %v7314_v35 = vpop.f32.mrb[155].mxu1 }
 0xf03   : > { %v15363_v55 = vadd.f32 %v15271_v9, %v7314_v35  ;;  %11394 = vmatmul.mubr.bf16.gmra.mrb[44].mxu0 %v7450_v56 }
 0xf04   : > { %16117 = vst [vmem:[#allocation11_spill] sm:$0xff] %v15360_v29 }
 0xf05   : > { %16118 = vst [vmem:[#allocation13_spill] sm:$0xff] %v15363_v55  ;;  %v7451_v6 = vpack.c.bf16 %v15360_v29, %v15363_v55  ;;  %v11348_v15 = vpop.f32.mrb[156].mxu1 }
 0xf06   : > { %v15368_v27 = vadd.f32 %v11348_v15, %v15271_v9  ;;  %v7324_v5 = vpop.f32.mrb[157].mxu1 }
 0xf07   : > { %v15371_v20 = vadd.f32 %v15271_v9, %v7324_v5  ;;  %11397 = vmatprep.mubr.bf16.mxu0 %v7451_v6 }
 0xf08   : > { %16119 = vst [vmem:[#allocation16_spill] sm:$0xff] %v15368_v27 }
 0xf09   : > { %16120 = vst [vmem:[#allocation18_spill] sm:$0xff] %v15371_v20  ;;  %v7452_v18 = vpack.c.bf16 %v15368_v27, %v15371_v20  ;;  %v11351_v22 = vpop.f32.mrb[158].mxu1 }
 0xf0a   : > { %v15376_v45 = vadd.f32 %v11351_v22, %v15271_v9  ;;  %v7334_v11 = vpop.f32.mrb[159].mxu1 }
 0xf0b   : > { %v15379_v40 = vadd.f32 %v15271_v9, %v7334_v11  ;;  %11398 = vmatmul.mubr.bf16.gmra.mrb[48].mxu0 %v7452_v18 }
 0xf0c   : > { %16121 = vst [vmem:[#allocation15_spill] sm:$0xff] %v15376_v45 }
 0xf0d   : > { %16122 = vst [vmem:[#allocation17_spill] sm:$0xff] %v15379_v40  ;;  %v7453_v14 = vpack.c.bf16 %v15376_v45, %v15379_v40  ;;  %v11354_v30 = vpop.f32.mrb[160].mxu1 }
 0xf0e   : > { %v15384_v52 = vadd.f32 %v11354_v30, %v15271_v9  ;;  %v7344_v53 = vpop.f32.mrb[161].mxu1 }
 0xf0f   : > { %v15387_v32 = vadd.f32 %v15271_v9, %v7344_v53  ;;  %11401 = vmatprep.mubr.bf16.mxu0 %v7453_v14 }
 0xf10   : > { %16123 = vst [vmem:[#allocation20_spill] sm:$0xff] %v15384_v52 }
 0xf11   : > { %16124 = vst [vmem:[#allocation22_spill] sm:$0xff] %v15387_v32  ;;  %v7454_v16 = vpack.c.bf16 %v15384_v52, %v15387_v32  ;;  %v11357_v2 = vpop.f32.mrb[162].mxu1 }
 0xf12   : > { %v15392_v38 = vadd.f32 %v11357_v2, %v15271_v9  ;;  %v7354_v41 = vpop.f32.mrb[163].mxu1 }
 0xf13   : > { %v15395_v26 = vadd.f32 %v15271_v9, %v7354_v41  ;;  %11402 = vmatmul.mubr.bf16.gmra.mrb[52].mxu0 %v7454_v16 }
 0xf14   : > { %16125 = vst [vmem:[#allocation19_spill] sm:$0xff] %v15392_v38 }
 0xf15   : > { %16126 = vst [vmem:[#allocation21_spill] sm:$0xff] %v15395_v26  ;;  %v7455_v39 = vpack.c.bf16 %v15392_v38, %v15395_v26  ;;  %v11360_v54 = vpop.f32.mrb[164].mxu1 }
 0xf16   : > { %v15400_v62 = vadd.f32 %v11360_v54, %v15271_v9  ;;  %v7364_v13 = vpop.f32.mrb[165].mxu1 }
 0xf17   : > { %v15403_v58 = vadd.f32 %v15271_v9, %v7364_v13  ;;  %11405 = vmatprep.mubr.bf16.mxu0 %v7455_v39 }
 0xf18   : > { %16127 = vst [vmem:[#allocation24_spill] sm:$0xff] %v15400_v62 }
 0xf19   : > { %16128 = vst [vmem:[#allocation26_spill] sm:$0xff] %v15403_v58  ;;  %v7456_v25 = vpack.c.bf16 %v15400_v62, %v15403_v58 }
 0xf1b   : > { %11406 = vmatmul.mubr.bf16.gmra.mrb[56].mxu0 %v7456_v25 }
 0xfb6   : > { %v11379_v46 = vpop.f32.mrb[28].mxu0 }
 0xfb7   : > { %v7568_v63 = vadd.f32 %v11379_v46, %v15409_v4  ;;  %v7559_v0 = vpop.f32.mrb[29].mxu0 }
 0xfb8   : > { %v7560_v9 = vadd.f32 %v7559_v0, %v15409_v4  ;;  %v11380_v49 = vpop.f32.mrb[30].mxu0 }
 0xfb9   : > { %v7562_v19 = vpop.f32.mrb[31].mxu0  ;;  %v7571_v56 = vadd.f32 %v11380_v49, %v15409_v4  ;;  %v7688_v35 = vmax.f32 %v7568_v63, 0.0 }
 0xfba   : > { %v7686_v47 = vmax.f32 %v7560_v9, 0.0  ;;  %v7563_v60 = vadd.f32 %v7562_v19, %v15409_v4 }
 0xfbb   : > { %v7689_v5 = vmax.f32 %v7571_v56, 0.0  ;;  %v7724_v50 = vmul.f32 %v15414_v59, %v7688_v35 }
 0xfbc   : > { %v7722_v6 = vmul.f32 %v15414_v59, %v7686_v47  ;;  %v7687_v15 = vmax.f32 %v7563_v60, 0.0 }
 0xfbd   : > { %v7725_v2 = vmul.f32 %v15414_v59, %v7689_v5 }
 0xfbe   : > { %v7723_v18 = vmul.f32 %v15414_v59, %v7687_v15  ;;  %v11383_v22 = vpop.f32.mrb[32].mxu0  ;;  %11417 = vmatprep.mubr.msk.f32.mxu0 %vm3266_vm1, %v7722_v6 }
 0xfbf   : > { %v7584_v11 = vadd.f32 %v11383_v22, %v15409_v4  ;;  %v7575_v14 = vpop.f32.mrb[33].mxu0 }
 0xfc0   : > { %v7576_v30 = vadd.f32 %v7575_v14, %v15409_v4  ;;  %v11384_v53 = vpop.f32.mrb[34].mxu0  ;;  %11418 = vmatmul.mubr.msk.f32.vlgmr.msra.gmra.mrb[186].mxu0 %vm3266_vm1, %v7723_v18 }
 0xfc1   : > { %v7578_v16 = vpop.f32.mrb[35].mxu0  ;;  %11420 = vmatprep.mubr.msk.f32.mxu0 %vm3266_vm1, %v7724_v50  ;;  %v7587_v39 = vadd.f32 %v11384_v53, %v15409_v4  ;;  %v7692_v13 = vmax.f32 %v7584_v11, 0.0 }
 0xfc2   : > { %v7690_v41 = vmax.f32 %v7576_v30, 0.0  ;;  %v7579_v54 = vadd.f32 %v7578_v16, %v15409_v4 }
 0xfc3   : > { %v7693_v37 = vmax.f32 %v7587_v39, 0.0  ;;  %v7728_v0 = vmul.f32 %v15414_v59, %v7692_v13 }
 0xfc4   : > { %v7726_v25 = vmul.f32 %v15414_v59, %v7690_v41  ;;  %v7691_v61 = vmax.f32 %v7579_v54, 0.0  ;;  %11421 = vmatmul.mubr.msk.f32.gmra.mrb[60].mxu0 %vm3266_vm1, %v7725_v2 }
 0xfc5   : > { %v7729_v60 = vmul.f32 %v15414_v59, %v7693_v37 }
 0xfc6   : > { %v7727_v46 = vmul.f32 %v15414_v59, %v7691_v61  ;;  %v11387_v63 = vpop.f32.mrb[36].mxu0  ;;  %11423 = vmatprep.mubr.msk.f32.mxu0 %vm3266_vm1, %v7726_v25 }
 0xfc7   : > { %v7600_v9 = vadd.f32 %v11387_v63, %v15409_v4  ;;  %v7591_v49 = vpop.f32.mrb[37].mxu0 }
 0xfc8   : > { %v7592_v19 = vadd.f32 %v7591_v49, %v15409_v4  ;;  %v11388_v47 = vpop.f32.mrb[38].mxu0  ;;  %11424 = vmatmul.mubr.msk.f32.gmra.mrb[62].mxu0 %vm3266_vm1, %v7727_v46 }
 0xfc9   : > { %v7594_v56 = vpop.f32.mrb[39].mxu0  ;;  %11426 = vmatprep.mubr.msk.f32.mxu0 %vm3266_vm1, %v7728_v0  ;;  %v7603_v6 = vadd.f32 %v11388_v47, %v15409_v4  ;;  %v7696_v5 = vmax.f32 %v7600_v9, 0.0 }
 0xfca   : > { %v7694_v35 = vmax.f32 %v7592_v19, 0.0  ;;  %v7595_v15 = vadd.f32 %v7594_v56, %v15409_v4 }
 0xfcb   : > { %v7697_v50 = vmax.f32 %v7603_v6, 0.0  ;;  %v7732_v30 = vmul.f32 %v15414_v59, %v7696_v5 }
 0xfcc   : > { %v7730_v18 = vmul.f32 %v15414_v59, %v7694_v35  ;;  %v7695_v22 = vmax.f32 %v7595_v15, 0.0  ;;  %11427 = vmatmul.mubr.msk.f32.gmra.mrb[64].mxu0 %vm3266_vm1, %v7729_v60 }
 0xfcd   : > { %v7733_v54 = vmul.f32 %v15414_v59, %v7697_v50 }
 0xfce   : > { %v7731_v11 = vmul.f32 %v15414_v59, %v7695_v22  ;;  %v11391_v14 = vpop.f32.mrb[40].mxu0  ;;  %11429 = vmatprep.mubr.msk.f32.mxu0 %vm3266_vm1, %v7730_v18 }
 0xfcf   : > { %v7616_v53 = vadd.f32 %v11391_v14, %v15409_v4  ;;  %v7607_v16 = vpop.f32.mrb[41].mxu0 }
 0xfd0   : > { %v7608_v2 = vadd.f32 %v7607_v16, %v15409_v4  ;;  %v11392_v41 = vpop.f32.mrb[42].mxu0  ;;  %11430 = vmatmul.mubr.msk.f32.gmra.mrb[66].mxu0 %vm3266_vm1, %v7731_v11 }
 0xfd1   : > { %v7610_v39 = vpop.f32.mrb[43].mxu0  ;;  %11432 = vmatprep.mubr.msk.f32.mxu0 %vm3266_vm1, %v7732_v30  ;;  %v7619_v25 = vadd.f32 %v11392_v41, %v15409_v4  ;;  %v7700_v37 = vmax.f32 %v7616_v53, 0.0 }
 0xfd2   : > { %v7698_v13 = vmax.f32 %v7608_v2, 0.0  ;;  %v7611_v61 = vadd.f32 %v7610_v39, %v15409_v4 }
 0xfd3   : > { %v7701_v0 = vmax.f32 %v7619_v25, 0.0  ;;  %v7736_v19 = vmul.f32 %v15414_v59, %v7700_v37 }
 0xfd4   : > { %v7734_v46 = vmul.f32 %v15414_v59, %v7698_v13  ;;  %v7699_v63 = vmax.f32 %v7611_v61, 0.0  ;;  %11433 = vmatmul.mubr.msk.f32.gmra.mrb[68].mxu0 %vm3266_vm1, %v7733_v54 }
 0xfd5   : > { %v7737_v15 = vmul.f32 %v15414_v59, %v7701_v0 }
 0xfd6   : > { %v7735_v9 = vmul.f32 %v15414_v59, %v7699_v63  ;;  %v11395_v49 = vpop.f32.mrb[44].mxu0  ;;  %11435 = vmatprep.mubr.msk.f32.mxu0 %vm3266_vm1, %v7734_v46 }
 0xfd7   : > { %v7632_v47 = vadd.f32 %v11395_v49, %v15409_v4  ;;  %v7623_v56 = vpop.f32.mrb[45].mxu0 }
 0xfd8   : > { %v7624_v60 = vadd.f32 %v7623_v56, %v15409_v4  ;;  %v11396_v35 = vpop.f32.mrb[46].mxu0  ;;  %11436 = vmatmul.mubr.msk.f32.gmra.mrb[70].mxu0 %vm3266_vm1, %v7735_v9 }
 0xfd9   : > { %v7626_v6 = vpop.f32.mrb[47].mxu0  ;;  %11438 = vmatprep.mubr.msk.f32.mxu0 %vm3266_vm1, %v7736_v19  ;;  %v7635_v18 = vadd.f32 %v11396_v35, %v15409_v4  ;;  %v7704_v50 = vmax.f32 %v7632_v47, 0.0 }
 0xfda   : > { %v7702_v5 = vmax.f32 %v7624_v60, 0.0  ;;  %v7627_v22 = vadd.f32 %v7626_v6, %v15409_v4 }
 0xfdb   : > { %v7705_v30 = vmax.f32 %v7635_v18, 0.0  ;;  %v7740_v2 = vmul.f32 %v15414_v59, %v7704_v50 }
 0xfdc   : > { %v7738_v11 = vmul.f32 %v15414_v59, %v7702_v5  ;;  %v7703_v14 = vmax.f32 %v7627_v22, 0.0  ;;  %11439 = vmatmul.mubr.msk.f32.gmra.mrb[72].mxu0 %vm3266_vm1, %v7737_v15 }
 0xfdd   : > { %v7741_v61 = vmul.f32 %v15414_v59, %v7705_v30 }
 0xfde   : > { %v7739_v53 = vmul.f32 %v15414_v59, %v7703_v14  ;;  %v11399_v16 = vpop.f32.mrb[48].mxu0  ;;  %11441 = vmatprep.mubr.msk.f32.mxu0 %vm3266_vm1, %v7738_v11 }
 0xfdf   : > { %v7648_v41 = vadd.f32 %v11399_v16, %v15409_v4  ;;  %v7639_v39 = vpop.f32.mrb[49].mxu0 }
 0xfe0   : > { %v7640_v54 = vadd.f32 %v7639_v39, %v15409_v4  ;;  %v11400_v13 = vpop.f32.mrb[50].mxu0  ;;  %11442 = vmatmul.mubr.msk.f32.gmra.mrb[74].mxu0 %vm3266_vm1, %v7739_v53 }
 0xfe1   : > { %v7642_v25 = vpop.f32.mrb[51].mxu0  ;;  %11444 = vmatprep.mubr.msk.f32.mxu0 %vm3266_vm1, %v7740_v2  ;;  %v7651_v46 = vadd.f32 %v11400_v13, %v15409_v4  ;;  %v7708_v0 = vmax.f32 %v7648_v41, 0.0 }
 0xfe2   : > { %v7706_v37 = vmax.f32 %v7640_v54, 0.0  ;;  %v7643_v63 = vadd.f32 %v7642_v25, %v15409_v4 }
 0xfe3   : > { %v7709_v19 = vmax.f32 %v7651_v46, 0.0  ;;  %v7744_v60 = vmul.f32 %v15414_v59, %v7708_v0 }
 0xfe4   : > { %v7742_v9 = vmul.f32 %v15414_v59, %v7706_v37  ;;  %v7707_v49 = vmax.f32 %v7643_v63, 0.0  ;;  %11445 = vmatmul.mubr.msk.f32.gmra.mrb[76].mxu0 %vm3266_vm1, %v7741_v61 }
 0xfe5   : > { %v7745_v22 = vmul.f32 %v15414_v59, %v7709_v19 }
 0xfe6   : > { %v7743_v47 = vmul.f32 %v15414_v59, %v7707_v49  ;;  %v11403_v56 = vpop.f32.mrb[52].mxu0  ;;  %11447 = vmatprep.mubr.msk.f32.mxu0 %vm3266_vm1, %v7742_v9 }
 0xfe7   : > { %v7664_v35 = vadd.f32 %v11403_v56, %v15409_v4  ;;  %v7655_v6 = vpop.f32.mrb[53].mxu0 }
 0xfe8   : > { %v7656_v15 = vadd.f32 %v7655_v6, %v15409_v4  ;;  %v11404_v5 = vpop.f32.mrb[54].mxu0  ;;  %11448 = vmatmul.mubr.msk.f32.gmra.mrb[78].mxu0 %vm3266_vm1, %v7743_v47 }
 0xfe9   : > { %v7658_v18 = vpop.f32.mrb[55].mxu0  ;;  %11450 = vmatprep.mubr.msk.f32.mxu0 %vm3266_vm1, %v7744_v60  ;;  %v7667_v11 = vadd.f32 %v11404_v5, %v15409_v4  ;;  %v7712_v30 = vmax.f32 %v7664_v35, 0.0 }
 0xfea   : > { %v7710_v50 = vmax.f32 %v7656_v15, 0.0  ;;  %v7659_v14 = vadd.f32 %v7658_v18, %v15409_v4 }
 0xfeb   : > { %v7713_v2 = vmax.f32 %v7667_v11, 0.0  ;;  %v7748_v54 = vmul.f32 %v15414_v59, %v7712_v30 }
 0xfec   : > { %v7746_v53 = vmul.f32 %v15414_v59, %v7710_v50  ;;  %v7711_v16 = vmax.f32 %v7659_v14, 0.0  ;;  %11451 = vmatmul.mubr.msk.f32.gmra.mrb[80].mxu0 %vm3266_vm1, %v7745_v22 }
 0xfed   : > { %v7749_v63 = vmul.f32 %v15414_v59, %v7713_v2 }
 0xfee   : > { %v7747_v41 = vmul.f32 %v15414_v59, %v7711_v16  ;;  %v11407_v39 = vpop.f32.mrb[56].mxu0  ;;  %11453 = vmatprep.mubr.msk.f32.mxu0 %vm3266_vm1, %v7746_v53 }
 0xfef   : > { %v7680_v13 = vadd.f32 %v11407_v39, %v15409_v4  ;;  %v7671_v25 = vpop.f32.mrb[57].mxu0 }
 0xff0   : > { %v7672_v61 = vadd.f32 %v7671_v25, %v15409_v4  ;;  %v11408_v37 = vpop.f32.mrb[58].mxu0  ;;  %11454 = vmatmul.mubr.msk.f32.gmra.mrb[82].mxu0 %vm3266_vm1, %v7747_v41 }
 0xff1   : > { %v7674_v46 = vpop.f32.mrb[59].mxu0  ;;  %11456 = vmatprep.mubr.msk.f32.mxu0 %vm3266_vm1, %v7748_v54  ;;  %v7683_v9 = vadd.f32 %v11408_v37, %v15409_v4  ;;  %v7716_v19 = vmax.f32 %v7680_v13, 0.0 }
 0xff2   : > { %v7714_v0 = vmax.f32 %v7672_v61, 0.0  ;;  %v7675_v49 = vadd.f32 %v7674_v46, %v15409_v4 }
 0xff3   : > { %v7717_v60 = vmax.f32 %v7683_v9, 0.0  ;;  %v7752_v6 = vmul.f32 %v15414_v59, %v7716_v19 }
 0xff4   : > { %v7750_v47 = vmul.f32 %v15414_v59, %v7714_v0  ;;  %v7715_v56 = vmax.f32 %v7675_v49, 0.0  ;;  %11457 = vmatmul.mubr.msk.f32.gmra.mrb[84].mxu0 %vm3266_vm1, %v7749_v63 }
 0xff5   : > { %v7753_v15 = vmul.f32 %v15414_v59, %v7717_v60 }
 0xff6   : > { %v7751_v35 = vmul.f32 %v15414_v59, %v7715_v56  ;;  %11459 = vmatprep.mubr.msk.f32.mxu0 %vm3266_vm1, %v7750_v47 }
 0xff8   : > { %11460 = vmatmul.mubr.msk.f32.gmra.mrb[86].mxu0 %vm3266_vm1, %v7751_v35 }
 0xff9   : > { %11462 = vmatprep.mubr.msk.f32.mxu0 %vm3266_vm1, %v7752_v6 }
 0xffc   : > { %11463 = vmatmul.mubr.msk.f32.gmra.mrb[88].mxu0 %vm3266_vm1, %v7753_v15 }
0x1093   : > { %v15511_v4 = vpop.f32.mrb[186].mxu0 }
0x1094   : > { %v15513_v5 = vpop.f32.mrb[187].mxu0  ;;  %v8083_v18 = vsel %vm8079_vm2, %v15511_v4, -inf }
0x1095   : > { %8084 = vmax.xlane.f32.xlu1 %v8083_v18  ;;  %v8080_v22 = vsel %vm8079_vm2, %v15513_v5, -inf }
0x1096   : > { %8081 = vmax.xlane.f32.xlu0 %v8080_v22 }
0x1097   : > { %v15519_v50 = vpop.f32.mrb[60].mxu0 }
0x1098   : > { %v15521_v11 = vpop.f32.mrb[61].mxu0  ;;  %v8089_v59 = vsel %vm8079_vm2, %v15519_v50, -inf }
0x1099   : > { %8090 = vmax.xlane.f32.xlu1 %v8089_v59  ;;  %v8086_v14 = vsel %vm8079_vm2, %v15521_v11, -inf }
0x109a   : > { %8087 = vmax.xlane.f32.xlu0 %v8086_v14 }
0x109b   : > { %v15527_v30 = vpop.f32.mrb[62].mxu0 }
0x109c   : > { %v15529_v53 = vpop.f32.mrb[63].mxu0  ;;  %v8095_v16 = vsel %vm8079_vm2, %v15527_v30, -inf }
0x109d   : > { %8096 = vmax.xlane.f32.xlu1 %v8095_v16  ;;  %v8092_v2 = vsel %vm8079_vm2, %v15529_v53, -inf }
0x109e   : > { %8093 = vmax.xlane.f32.xlu0 %v8092_v2 }
0x109f   : > { %v15535_v41 = vpop.f32.mrb[64].mxu0 }
0x10a0   : > { %v15537_v39 = vpop.f32.mrb[65].mxu0  ;;  %v8101_v54 = vsel %vm8079_vm2, %v15535_v41, -inf }
0x10a1   : > { %8102 = vmax.xlane.f32.xlu1 %v8101_v54  ;;  %v8098_v13 = vsel %vm8079_vm2, %v15537_v39, -inf }
0x10a2   : > { %8099 = vmax.xlane.f32.xlu0 %v8098_v13 }
0x10a3   : > { %v15543_v25 = vpop.f32.mrb[66].mxu0 }
0x10a4   : > { %v15545_v61 = vpop.f32.mrb[67].mxu0  ;;  %v8107_v37 = vsel %vm8079_vm2, %v15543_v25, -inf }
0x10a5   : > { %8108 = vmax.xlane.f32.xlu1 %v8107_v37  ;;  %v8104_v46 = vsel %vm8079_vm2, %v15545_v61, -inf }
0x10a6   : > { %8105 = vmax.xlane.f32.xlu0 %v8104_v46 }
0x10a7   : > { %v15551_v63 = vpop.f32.mrb[68].mxu0 }
0x10a8   : > { %v15553_v0 = vpop.f32.mrb[69].mxu0  ;;  %v8113_v9 = vsel %vm8079_vm2, %v15551_v63, -inf }
0x10a9   : > { %8114 = vmax.xlane.f32.xlu1 %v8113_v9  ;;  %v8110_v49 = vsel %vm8079_vm2, %v15553_v0, -inf }
0x10aa   : > { %8111 = vmax.xlane.f32.xlu0 %v8110_v49 }
0x10ab   : > { %v15559_v19 = vpop.f32.mrb[70].mxu0 }
0x10ac   : > { %v15561_v47 = vpop.f32.mrb[71].mxu0  ;;  %v8119_v56 = vsel %vm8079_vm2, %v15559_v19, -inf }
0x10ad   : > { %8120 = vmax.xlane.f32.xlu1 %v8119_v56  ;;  %v8116_v60 = vsel %vm8079_vm2, %v15561_v47, -inf }
0x10ae   : > { %8117 = vmax.xlane.f32.xlu0 %v8116_v60 }
0x10af   : > { %v15567_v35 = vpop.f32.mrb[72].mxu0 }
0x10b0   : > { %v15569_v6 = vpop.f32.mrb[73].mxu0  ;;  %v8125_v15 = vsel %vm8079_vm2, %v15567_v35, -inf }
0x10b1   : > { %8126 = vmax.xlane.f32.xlu1 %v8125_v15  ;;  %v8122_v18 = vsel %vm8079_vm2, %v15569_v6, -inf }
0x10b2   : > { %8123 = vmax.xlane.f32.xlu0 %v8122_v18 }
0x10b3   : > { %v15575_v22 = vpop.f32.mrb[74].mxu0 }
0x10b4   : > { %v15577_v59 = vpop.f32.mrb[75].mxu0  ;;  %v8131_v14 = vsel %vm8079_vm2, %v15575_v22, -inf }
0x10b5   : > { %8132 = vmax.xlane.f32.xlu1 %v8131_v14  ;;  %v8128_v16 = vsel %vm8079_vm2, %v15577_v59, -inf }
0x10b6   : > { %8129 = vmax.xlane.f32.xlu0 %v8128_v16 }
0x10b7   : > { %v15583_v2 = vpop.f32.mrb[76].mxu0 }
0x10b8   : > { %v15585_v54 = vpop.f32.mrb[77].mxu0  ;;  %v8137_v13 = vsel %vm8079_vm2, %v15583_v2, -inf }
0x10b9   : > { %8138 = vmax.xlane.f32.xlu1 %v8137_v13  ;;  %v8134_v37 = vsel %vm8079_vm2, %v15585_v54, -inf }
0x10ba   : > { %8135 = vmax.xlane.f32.xlu0 %v8134_v37 }
0x10bb   : > { %v15591_v46 = vpop.f32.mrb[78].mxu0 }
0x10bc   : > { %v15593_v9 = vpop.f32.mrb[79].mxu0  ;;  %v8143_v49 = vsel %vm8079_vm2, %v15591_v46, -inf }
0x10bd   : > { %8144 = vmax.xlane.f32.xlu1 %v8143_v49  ;;  %v8140_v56 = vsel %vm8079_vm2, %v15593_v9, -inf }
0x10be   : > { %8141 = vmax.xlane.f32.xlu0 %v8140_v56 }
0x10bf   : > { %v15599_v60 = vpop.f32.mrb[80].mxu0 }
0x10c0   : > { %v15601_v15 = vpop.f32.mrb[81].mxu0  ;;  %v8149_v18 = vsel %vm8079_vm2, %v15599_v60, -inf }
0x10c1   : > { %8150 = vmax.xlane.f32.xlu1 %v8149_v18  ;;  %v8146_v14 = vsel %vm8079_vm2, %v15601_v15, -inf }
0x10c2   : > { %8147 = vmax.xlane.f32.xlu0 %v8146_v14 }
0x10c3   : > { %v15607_v16 = vpop.f32.mrb[82].mxu0 }
0x10c4   : > { %v15609_v13 = vpop.f32.mrb[83].mxu0  ;;  %v8155_v37 = vsel %vm8079_vm2, %v15607_v16, -inf }
0x10c5   : > { %8156 = vmax.xlane.f32.xlu1 %v8155_v37  ;;  %v8152_v49 = vsel %vm8079_vm2, %v15609_v13, -inf }
0x10c6   : > { %8153 = vmax.xlane.f32.xlu0 %v8152_v49 }
0x10c7   : > { %v15615_v56 = vpop.f32.mrb[84].mxu0 }
0x10c8   : > { %v15617_v57 = vpop.f32.mrb[85].mxu0  ;;  %v8161_v18 = vsel %vm8079_vm2, %v15615_v56, -inf }
0x10c9   : > { %8162 = vmax.xlane.f32.xlu1 %v8161_v18  ;;  %v8158_v14 = vsel %vm8079_vm2, %v15617_v57, -inf }
0x10ca   : > { %8159 = vmax.xlane.f32.xlu0 %v8158_v14 }
0x10cb   : > { %v15623_v58 = vpop.f32.mrb[86].mxu0 }
0x10cc   : > { %v15625_v62 = vpop.f32.mrb[87].mxu0  ;;  %v8167_v37 = vsel %vm8079_vm2, %v15623_v58, -inf }
0x10cd   : > { %8168 = vmax.xlane.f32.xlu1 %v8167_v37  ;;  %v8164_v49 = vsel %vm8079_vm2, %v15625_v62, -inf  ;;  %v8432_v37 = vld [vmem:[%s16054_s8] sm:$0xf] }
0x10ce   : > { %8165 = vmax.xlane.f32.xlu0 %v8164_v49  ;;  %11465 = vmatprep.subr.msk.mxu1 %vm8529_vm3, %v8432_v37 }
0x10cf   : > { %v15631_v26 = vpop.f32.mrb[88].mxu0  ;;  %11466 = vmatpush3.msk.msra.mxu1 %vm8529_vm3, %v8432_v37 }
0x10d0   : > { %v15633_v38 = vpop.f32.mrb[89].mxu0  ;;  %v8173_v18 = vsel %vm8079_vm2, %v15631_v26, -inf }
0x10d1   : > { %8174 = vmax.xlane.f32.xlu1 %v8173_v18  ;;  %v8170_v14 = vsel %vm8079_vm2, %v15633_v38, -inf }
0x10d2   : > { %8171 = vmax.xlane.f32.xlu0 %v8170_v14 }
0x1122   : > { %v8085_v49 = vpop.xlane.xlu1 %8084 }
0x1123   : > { %v8177_v32 = vsub.f32 %v15511_v4, %v8085_v49  ;;  %v8082_v52 = vpop.xlane.xlu0 %8081 }
0x1124   : > { %v8176_v40 = vsub.f32 %v15513_v5, %v8082_v52 }
0x1125   : > { %v8210_v45 = vmul.f32 1.442695, %v8177_v32 }
0x1126   : > { %v8208_v20 = vmul.f32 1.442695, %v8176_v40  ;;  %v8091_v18 = vpop.xlane.xlu1 %8090 }
0x1127   : > { %12394 = vpow2.f32 %v8210_v45  ;;  %v8179_v27 = vsub.f32 %v15519_v50, %v8091_v18  ;;  %v8088_v14 = vpop.xlane.xlu0 %8087 }
0x1128   : > { %12396 = vpow2.f32 %v8208_v20  ;;  %v8178_v55 = vsub.f32 %v15521_v11, %v8088_v14 }
0x1129   : > { %v8214_v29 = vmul.f32 1.442695, %v8179_v27 }
0x112a   : > { %v8212_v31 = vmul.f32 1.442695, %v8178_v55  ;;  %v8097_v17 = vpop.xlane.xlu1 %8096 }
0x112b   : > { %12398 = vpow2.f32 %v8214_v29  ;;  %v8181_v37 = vsub.f32 %v15527_v30, %v8097_v17  ;;  %v8094_v4 = vpop.xlane.xlu0 %8093 }
0x112c   : > { %12400 = vpow2.f32 %v8212_v31  ;;  %v8180_v52 = vsub.f32 %v15529_v53, %v8094_v4 }
0x112d   : > { %v8218_v32 = vmul.f32 1.442695, %v8181_v37 }
0x112e   : > { %v8216_v40 = vmul.f32 1.442695, %v8180_v52  ;;  %v8103_v5 = vpop.xlane.xlu1 %8102 }
0x112f   : > { %12402 = vpow2.f32 %v8218_v32  ;;  %v8183_v45 = vsub.f32 %v15535_v41, %v8103_v5  ;;  %v8100_v50 = vpop.xlane.xlu0 %8099 }
0x1130   : > { %12404 = vpow2.f32 %v8216_v40  ;;  %v8182_v20 = vsub.f32 %v15537_v39, %v8100_v50 }
0x1131   : > { %v15650_v27 = vpop.eup %12394  ;;  %v8222_v55 = vmul.f32 1.442695, %v8183_v45 }
0x1132   : > { %v15652_v29 = vpop.eup %12396  ;;  %v8220_v17 = vmul.f32 1.442695, %v8182_v20  ;;  %v8109_v11 = vpop.xlane.xlu1 %8108  ;;  %v8275_v31 = vsel %vm8079_vm2, %v15650_v27, 0.0 }
0x1133   : > { %12406 = vpow2.f32 %v8222_v55  ;;  %v8185_v30 = vsub.f32 %v15543_v25, %v8109_v11  ;;  %v8106_v53 = vpop.xlane.xlu0 %8105  ;;  %8276 = vadd.xlane.f32.xlu1 %v8275_v31  ;;  %v8272_v41 = vsel %vm8079_vm2, %v15652_v29, 0.0 }
0x1134   : > { %12408 = vpow2.f32 %v8220_v17  ;;  %v8184_v39 = vsub.f32 %v15545_v61, %v8106_v53  ;;  %8273 = vadd.xlane.f32.xlu0 %v8272_v41 }
0x1135   : > { %v15660_v49 = vpop.eup %12398  ;;  %v8226_v18 = vmul.f32 1.442695, %v8185_v30 }
0x1136   : > { %v15662_v14 = vpop.eup %12400  ;;  %v8224_v37 = vmul.f32 1.442695, %v8184_v39  ;;  %v8115_v4 = vpop.xlane.xlu1 %8114  ;;  %v8281_v52 = vsel %vm8079_vm2, %v15660_v49, 0.0 }
0x1137   : > { %12410 = vpow2.f32 %v8226_v18  ;;  %v8187_v25 = vsub.f32 %v15551_v63, %v8115_v4  ;;  %v8112_v32 = vpop.xlane.xlu0 %8111  ;;  %8282 = vadd.xlane.f32.xlu1 %v8281_v52  ;;  %v8278_v40 = vsel %vm8079_vm2, %v15662_v14, 0.0 }
0x1138   : > { %12412 = vpow2.f32 %v8224_v37  ;;  %v8186_v61 = vsub.f32 %v15553_v0, %v8112_v32  ;;  %8279 = vadd.xlane.f32.xlu0 %v8278_v40 }
0x1139   : > { %v15670_v5 = vpop.eup %12402  ;;  %v8230_v45 = vmul.f32 1.442695, %v8187_v25 }
0x113a   : > { %v15672_v50 = vpop.eup %12404  ;;  %v8228_v20 = vmul.f32 1.442695, %v8186_v61  ;;  %v8121_v55 = vpop.xlane.xlu1 %8120  ;;  %v8287_v17 = vsel %vm8079_vm2, %v15670_v5, 0.0 }
0x113b   : > { %12414 = vpow2.f32 %v8230_v45  ;;  %v8189_v63 = vsub.f32 %v15559_v19, %v8121_v55  ;;  %v8118_v11 = vpop.xlane.xlu0 %8117  ;;  %8288 = vadd.xlane.f32.xlu1 %v8287_v17  ;;  %v8284_v31 = vsel %vm8079_vm2, %v15672_v50, 0.0 }
0x113c   : > { %12416 = vpow2.f32 %v8228_v20  ;;  %v8188_v0 = vsub.f32 %v15561_v47, %v8118_v11  ;;  %8285 = vadd.xlane.f32.xlu0 %v8284_v31 }
0x113d   : > { %v15680_v30 = vpop.eup %12406  ;;  %v8234_v53 = vmul.f32 1.442695, %v8189_v63 }
0x113e   : > { %v15682_v41 = vpop.eup %12408  ;;  %v8232_v39 = vmul.f32 1.442695, %v8188_v0  ;;  %v8127_v18 = vpop.xlane.xlu1 %8126  ;;  %v8293_v37 = vsel %vm8079_vm2, %v15680_v30, 0.0 }
0x113f   : > { %12418 = vpow2.f32 %v8234_v53  ;;  %v8191_v19 = vsub.f32 %v15567_v35, %v8127_v18  ;;  %v8124_v4 = vpop.xlane.xlu0 %8123  ;;  %8294 = vadd.xlane.f32.xlu1 %v8293_v37  ;;  %v8290_v52 = vsel %vm8079_vm2, %v15682_v41, 0.0 }
0x1140   : > { %12420 = vpow2.f32 %v8232_v39  ;;  %v8190_v47 = vsub.f32 %v15569_v6, %v8124_v4  ;;  %8291 = vadd.xlane.f32.xlu0 %v8290_v52 }
0x1141   : > { %v15690_v25 = vpop.eup %12410  ;;  %v8238_v32 = vmul.f32 1.442695, %v8191_v19 }
0x1142   : > { %v15692_v40 = vpop.eup %12412  ;;  %v8236_v61 = vmul.f32 1.442695, %v8190_v47  ;;  %v8133_v45 = vpop.xlane.xlu1 %8132  ;;  %v8299_v20 = vsel %vm8079_vm2, %v15690_v25, 0.0 }
0x1143   : > { %12422 = vpow2.f32 %v8238_v32  ;;  %v8193_v35 = vsub.f32 %v15575_v22, %v8133_v45  ;;  %v8130_v55 = vpop.xlane.xlu0 %8129  ;;  %8300 = vadd.xlane.f32.xlu1 %v8299_v20  ;;  %v8296_v17 = vsel %vm8079_vm2, %v15692_v40, 0.0 }
0x1144   : > { %12424 = vpow2.f32 %v8236_v61  ;;  %v8192_v6 = vsub.f32 %v15577_v59, %v8130_v55  ;;  %8297 = vadd.xlane.f32.xlu0 %v8296_v17 }
0x1145   : > { %v15700_v63 = vpop.eup %12414  ;;  %v8242_v11 = vmul.f32 1.442695, %v8193_v35 }
0x1146   : > { %v15702_v31 = vpop.eup %12416  ;;  %v8240_v0 = vmul.f32 1.442695, %v8192_v6  ;;  %v8139_v53 = vpop.xlane.xlu1 %8138  ;;  %v8305_v39 = vsel %vm8079_vm2, %v15700_v63, 0.0 }
0x1147   : > { %12426 = vpow2.f32 %v8242_v11  ;;  %v8195_v22 = vsub.f32 %v15583_v2, %v8139_v53  ;;  %v8136_v18 = vpop.xlane.xlu0 %8135  ;;  %8306 = vadd.xlane.f32.xlu1 %v8305_v39  ;;  %v8302_v37 = vsel %vm8079_vm2, %v15702_v31, 0.0 }
0x1148   : > { %12428 = vpow2.f32 %v8240_v0  ;;  %v8194_v59 = vsub.f32 %v15585_v54, %v8136_v18  ;;  %8303 = vadd.xlane.f32.xlu0 %v8302_v37 }
0x1149   : > { %v15710_v19 = vpop.eup %12418  ;;  %v8246_v4 = vmul.f32 1.442695, %v8195_v22 }
0x114a   : > { %v15712_v52 = vpop.eup %12420  ;;  %v8244_v47 = vmul.f32 1.442695, %v8194_v59  ;;  %v8145_v32 = vpop.xlane.xlu1 %8144  ;;  %v8311_v61 = vsel %vm8079_vm2, %v15710_v19, 0.0 }
0x114b   : > { %12430 = vpow2.f32 %v8246_v4  ;;  %v8197_v2 = vsub.f32 %v15591_v46, %v8145_v32  ;;  %v8142_v45 = vpop.xlane.xlu0 %8141  ;;  %8312 = vadd.xlane.f32.xlu1 %v8311_v61  ;;  %v8308_v20 = vsel %vm8079_vm2, %v15712_v52, 0.0 }
0x114c   : > { %12432 = vpow2.f32 %v8244_v47  ;;  %v8196_v54 = vsub.f32 %v15593_v9, %v8142_v45  ;;  %8309 = vadd.xlane.f32.xlu0 %v8308_v20 }
0x114d   : > { %v15720_v35 = vpop.eup %12422  ;;  %v8250_v55 = vmul.f32 1.442695, %v8197_v2 }
0x114e   : > { %v15722_v17 = vpop.eup %12424  ;;  %v8248_v6 = vmul.f32 1.442695, %v8196_v54  ;;  %v8151_v11 = vpop.xlane.xlu1 %8150  ;;  %v8317_v0 = vsel %vm8079_vm2, %v15720_v35, 0.0 }
0x114f   : > { %12434 = vpow2.f32 %v8250_v55  ;;  %v8199_v46 = vsub.f32 %v15599_v60, %v8151_v11  ;;  %v8148_v53 = vpop.xlane.xlu0 %8147  ;;  %8318 = vadd.xlane.f32.xlu1 %v8317_v0  ;;  %v8314_v39 = vsel %vm8079_vm2, %v15722_v17, 0.0 }
0x1150   : > { %12436 = vpow2.f32 %v8248_v6  ;;  %v8198_v9 = vsub.f32 %v15601_v15, %v8148_v53  ;;  %8315 = vadd.xlane.f32.xlu0 %v8314_v39 }
0x1151   : > { %v15730_v22 = vpop.eup %12426  ;;  %v8254_v18 = vmul.f32 1.442695, %v8199_v46 }
0x1152   : > { %v15732_v37 = vpop.eup %12428  ;;  %v8252_v59 = vmul.f32 1.442695, %v8198_v9  ;;  %v8157_v4 = vpop.xlane.xlu1 %8156  ;;  %v8323_v47 = vsel %vm8079_vm2, %v15730_v22, 0.0 }
0x1153   : > { %12438 = vpow2.f32 %v8254_v18  ;;  %v8201_v60 = vsub.f32 %v15607_v16, %v8157_v4  ;;  %v8154_v32 = vpop.xlane.xlu0 %8153  ;;  %8324 = vadd.xlane.f32.xlu1 %v8323_v47  ;;  %v8320_v61 = vsel %vm8079_vm2, %v15732_v37, 0.0 }
0x1154   : > { %12440 = vpow2.f32 %v8252_v59  ;;  %v8200_v15 = vsub.f32 %v15609_v13, %v8154_v32  ;;  %8321 = vadd.xlane.f32.xlu0 %v8320_v61 }
0x1155   : > { %v15740_v2 = vpop.eup %12430  ;;  %v8258_v45 = vmul.f32 1.442695, %v8201_v60 }
0x1156   : > { %v15742_v20 = vpop.eup %12432  ;;  %v8256_v54 = vmul.f32 1.442695, %v8200_v15  ;;  %v8163_v55 = vpop.xlane.xlu1 %8162  ;;  %v8329_v6 = vsel %vm8079_vm2, %v15740_v2, 0.0 }
0x1157   : > { %12442 = vpow2.f32 %v8258_v45  ;;  %v8203_v16 = vsub.f32 %v15615_v56, %v8163_v55  ;;  %v8160_v11 = vpop.xlane.xlu0 %8159  ;;  %8330 = vadd.xlane.f32.xlu1 %v8329_v6  ;;  %v8326_v0 = vsel %vm8079_vm2, %v15742_v20, 0.0 }
0x1158   : > { %12444 = vpow2.f32 %v8256_v54  ;;  %v8202_v13 = vsub.f32 %v15617_v57, %v8160_v11  ;;  %8327 = vadd.xlane.f32.xlu0 %v8326_v0 }
0x1159   : > { %v15750_v46 = vpop.eup %12434  ;;  %v8262_v53 = vmul.f32 1.442695, %v8203_v16 }
0x115a   : > { %v15752_v39 = vpop.eup %12436  ;;  %v8260_v9 = vmul.f32 1.442695, %v8202_v13  ;;  %v8169_v18 = vpop.xlane.xlu1 %8168  ;;  %v8335_v59 = vsel %vm8079_vm2, %v15750_v46, 0.0 }
0x115b   : > { %12446 = vpow2.f32 %v8262_v53  ;;  %v8205_v56 = vsub.f32 %v15623_v58, %v8169_v18  ;;  %v8166_v4 = vpop.xlane.xlu0 %8165  ;;  %8336 = vadd.xlane.f32.xlu1 %v8335_v59  ;;  %v8332_v47 = vsel %vm8079_vm2, %v15752_v39, 0.0 }
0x115c   : > { %12448 = vpow2.f32 %v8260_v9  ;;  %v8204_v57 = vsub.f32 %v15625_v62, %v8166_v4  ;;  %8333 = vadd.xlane.f32.xlu0 %v8332_v47 }
0x115d   : > { %v15760_v60 = vpop.eup %12438  ;;  %v8266_v32 = vmul.f32 1.442695, %v8205_v56 }
0x115e   : > { %v15762_v61 = vpop.eup %12440  ;;  %v8264_v15 = vmul.f32 1.442695, %v8204_v57  ;;  %v8175_v45 = vpop.xlane.xlu1 %8174  ;;  %v8341_v54 = vsel %vm8079_vm2, %v15760_v60, 0.0 }
0x115f   : > { %12450 = vpow2.f32 %v8266_v32  ;;  %v8207_v58 = vsub.f32 %v15631_v26, %v8175_v45  ;;  %8342 = vadd.xlane.f32.xlu1 %v8341_v54  ;;  %v8172_v55 = vpop.xlane.xlu0 %8171  ;;  %v8338_v6 = vsel %vm8079_vm2, %v15762_v61, 0.0 }
0x1160   : > { %12452 = vpow2.f32 %v8264_v15  ;;  %v8206_v62 = vsub.f32 %v15633_v38, %v8172_v55  ;;  %8339 = vadd.xlane.f32.xlu0 %v8338_v6  ;;  %v11875_v55 = vld [vmem:[%s16055_s9 + $0x8] sm:$0xff]   ;;  %v11876_v6 = vld [vmem:[%s16055_s9 + $0x10] sm:$0xff]  }
0x1161   : > { %v15770_v16 = vpop.eup %12442  ;;  %v8270_v11 = vmul.f32 1.442695, %v8207_v58  ;;  %v11874_v58 = vld [vmem:[%s16055_s9] sm:$0xff]  }
0x1162   : > { %v15772_v0 = vpop.eup %12444  ;;  %v8268_v13 = vmul.f32 1.442695, %v8206_v62  ;;  %v8347_v53 = vsel %vm8079_vm2, %v15770_v16, 0.0  ;;  %11515 = vmatprep.subr.bf16.mxu0 %v11874_v58  ;;  %v11877_v62 = vld [vmem:[%s16055_s9 + $0x18] sm:$0xff]  }
0x1163   : > { %12454 = vpow2.f32 %v8270_v11  ;;  %8348 = vadd.xlane.f32.xlu1 %v8347_v53  ;;  %v8344_v26 = vsel %vm8079_vm2, %v15772_v0, 0.0  ;;  %11516 = vmatpush3.bf16.msra.mxu0 %v11874_v58  ;;  %v11878_v11 = vld [vmem:[%s16055_s9 + $0x20] sm:$0xff]   ;;  %v11880_v53 = vld [vmem:[%s16055_s9 + $0x30] sm:$0xff]  }
0x1164   : > { %12456 = vpow2.f32 %v8268_v13  ;;  %8345 = vadd.xlane.f32.xlu0 %v8344_v26  ;;  %11517 = vmatprep.subr.bf16.mxu0 %v11875_v55  ;;  %v11879_v13 = vld [vmem:[%s16055_s9 + $0x28] sm:$0xff]  }
0x1165   : > { %v15778_v9 = vpop.eup %12446 }
0x1166   : > { %v15780_v38 = vpop.eup %12448  ;;  %v8353_v18 = vsel %vm8079_vm2, %v15778_v9, 0.0 }
0x1167   : > { %8354 = vadd.xlane.f32.xlu1 %v8353_v18  ;;  %v8350_v59 = vsel %vm8079_vm2, %v15780_v38, 0.0  ;;  %11518 = vmatpush3.bf16.msra.mxu0 %v11875_v55 }
0x1168   : > { %8351 = vadd.xlane.f32.xlu0 %v8350_v59  ;;  %11519 = vmatprep.subr.bf16.mxu0 %v11876_v6 }
0x1169   : > { %v15786_v56 = vpop.eup %12450 }
0x116a   : > { %v15788_v4 = vpop.eup %12452  ;;  %v8359_v47 = vsel %vm8079_vm2, %v15786_v56, 0.0 }
0x116b   : > { %8360 = vadd.xlane.f32.xlu1 %v8359_v47  ;;  %v8356_v57 = vsel %vm8079_vm2, %v15788_v4, 0.0  ;;  %11520 = vmatpush3.bf16.msra.mxu0 %v11876_v6 }
0x116c   : > { %8357 = vadd.xlane.f32.xlu0 %v8356_v57  ;;  %11521 = vmatprep.subr.bf16.mxu0 %v11877_v62 }
0x116d   : > { %v15794_v32 = vpop.eup %12454 }
0x116e   : > { %v15796_v15 = vpop.eup %12456  ;;  %v8365_v45 = vsel %vm8079_vm2, %v15794_v32, 0.0 }
0x116f   : > { %8366 = vadd.xlane.f32.xlu1 %v8365_v45  ;;  %v8362_v54 = vsel %vm8079_vm2, %v15796_v15, 0.0  ;;  %11522 = vmatpush3.bf16.msra.mxu0 %v11877_v62 }
0x1170   : > { %8363 = vadd.xlane.f32.xlu0 %v8362_v54  ;;  %11523 = vmatprep.subr.bf16.mxu0 %v11878_v11 }
0x1173   : > { %11524 = vmatpush3.bf16.msra.mxu0 %v11878_v11 }
0x1174   : > { %11525 = vmatprep.subr.bf16.mxu0 %v11879_v13 }
0x1177   : > { %11526 = vmatpush3.bf16.msra.mxu0 %v11879_v13 }
0x1178   : > { %11527 = vmatprep.subr.bf16.mxu0 %v11880_v53 }
0x117b   : > { %11528 = vmatpush3.bf16.msra.mxu0 %v11880_v53 }
0x11c0   : > { %v8277_v26 = vpop.xlane.xlu1 %8276 }
0x11c1   : > { %12458 = vrcp.f32 %v8277_v26  ;;  %v8274_v18 = vpop.xlane.xlu0 %8273 }
0x11c2   : > { %12460 = vrcp.f32 %v8274_v18 }
0x11c4   : > { %v8283_v59 = vpop.xlane.xlu1 %8282 }
0x11c5   : > { %12462 = vrcp.f32 %v8283_v59  ;;  %v8280_v47 = vpop.xlane.xlu0 %8279 }
0x11c6   : > { %12464 = vrcp.f32 %v8280_v47 }
0x11c8   : > { %v8289_v57 = vpop.xlane.xlu1 %8288 }
0x11c9   : > { %12466 = vrcp.f32 %v8289_v57  ;;  %v8286_v45 = vpop.xlane.xlu0 %8285 }
0x11ca   : > { %12468 = vrcp.f32 %v8286_v45 }
0x11cb   : > { %v12459_v54 = vpop.eup %12458 }
0x11cc   : > { %v12461_v58 = vpop.eup %12460  ;;  %v8295_v55 = vpop.xlane.xlu1 %8294  ;;  %v8401_v11 = vmul.f32 %v12459_v54, %v15650_v27 }
0x11cd   : > { %12470 = vrcp.f32 %v8295_v55  ;;  %v8292_v6 = vpop.xlane.xlu0 %8291  ;;  %v8400_v62 = vmul.f32 %v12461_v58, %v15652_v29 }
0x11ce   : > { %12472 = vrcp.f32 %v8292_v6 }
0x11cf   : > { %v12463_v13 = vpop.eup %12462  ;;  %11467 = vmatprep.mubr.msk.f32.mxu1 %vm8079_vm2, %v8400_v62 }
0x11d0   : > { %v12465_v53 = vpop.eup %12464  ;;  %v8301_v26 = vpop.xlane.xlu1 %8300  ;;  %11468 = vmatmul.mubr.msk.f32.vlgmr.msra.gmra.mrb[230].mxu1 %vm8079_vm2, %v8401_v11  ;;  %v8403_v47 = vmul.f32 %v12463_v13, %v15660_v49 }
0x11d1   : > { %12474 = vrcp.f32 %v8301_v26  ;;  %v8298_v18 = vpop.xlane.xlu0 %8297  ;;  %v8402_v59 = vmul.f32 %v12465_v53, %v15662_v14 }
0x11d2   : > { %12476 = vrcp.f32 %v8298_v18 }
0x11d3   : > { %v12467_v57 = vpop.eup %12466  ;;  %11470 = vmatprep.mubr.msk.f32.mxu1 %vm8079_vm2, %v8402_v59 }
0x11d4   : > { %v12469_v29 = vpop.eup %12468  ;;  %v8307_v27 = vpop.xlane.xlu1 %8306  ;;  %11471 = vmatmul.mubr.msk.f32.gmra.mrb[8].mxu1 %vm8079_vm2, %v8403_v47  ;;  %v8405_v58 = vmul.f32 %v12467_v57, %v15670_v5 }
0x11d5   : > { %12478 = vrcp.f32 %v8307_v27  ;;  %v8304_v45 = vpop.xlane.xlu0 %8303  ;;  %v8404_v54 = vmul.f32 %v12469_v29, %v15672_v50 }
0x11d6   : > { %12480 = vrcp.f32 %v8304_v45 }
0x11d7   : > { %v12471_v55 = vpop.eup %12470  ;;  %11473 = vmatprep.mubr.msk.f32.mxu1 %vm8079_vm2, %v8404_v54 }
0x11d8   : > { %v12473_v14 = vpop.eup %12472  ;;  %v8313_v49 = vpop.xlane.xlu1 %8312  ;;  %11474 = vmatmul.mubr.msk.f32.gmra.mrb[10].mxu1 %vm8079_vm2, %v8405_v58  ;;  %v8407_v11 = vmul.f32 %v12471_v55, %v15680_v30 }
0x11d9   : > { %12482 = vrcp.f32 %v8313_v49  ;;  %v8310_v6 = vpop.xlane.xlu0 %8309  ;;  %v8406_v62 = vmul.f32 %v12473_v14, %v15682_v41 }
0x11da   : > { %12484 = vrcp.f32 %v8310_v6 }
0x11db   : > { %v12475_v13 = vpop.eup %12474  ;;  %11476 = vmatprep.mubr.msk.f32.mxu1 %vm8079_vm2, %v8406_v62 }
0x11dc   : > { %v12477_v50 = vpop.eup %12476  ;;  %v8319_v5 = vpop.xlane.xlu1 %8318  ;;  %11477 = vmatmul.mubr.msk.f32.gmra.mrb[12].mxu1 %vm8079_vm2, %v8407_v11  ;;  %v8409_v18 = vmul.f32 %v12475_v13, %v15690_v25 }
0x11dd   : > { %12486 = vrcp.f32 %v8319_v5  ;;  %v8316_v53 = vpop.xlane.xlu0 %8315  ;;  %v8408_v26 = vmul.f32 %v12477_v50, %v15692_v40 }
0x11de   : > { %12488 = vrcp.f32 %v8316_v53 }
0x11df   : > { %v12479_v59 = vpop.eup %12478  ;;  %11479 = vmatprep.mubr.msk.f32.mxu1 %vm8079_vm2, %v8408_v26 }
0x11e0   : > { %v12481_v41 = vpop.eup %12480  ;;  %v8325_v30 = vpop.xlane.xlu1 %8324  ;;  %11480 = vmatmul.mubr.msk.f32.gmra.mrb[14].mxu1 %vm8079_vm2, %v8409_v18  ;;  %v8411_v29 = vmul.f32 %v12479_v59, %v15700_v63 }
0x11e1   : > { %12490 = vrcp.f32 %v8325_v30  ;;  %v8322_v47 = vpop.xlane.xlu0 %8321  ;;  %v8410_v57 = vmul.f32 %v12481_v41, %v15702_v31 }
0x11e2   : > { %12492 = vrcp.f32 %v8322_v47 }
0x11e3   : > { %v12483_v27 = vpop.eup %12482  ;;  %11482 = vmatprep.mubr.msk.f32.mxu1 %vm8079_vm2, %v8410_v57 }
0x11e4   : > { %v12485_v40 = vpop.eup %12484  ;;  %v8331_v25 = vpop.xlane.xlu1 %8330  ;;  %11483 = vmatmul.mubr.msk.f32.gmra.mrb[16].mxu1 %vm8079_vm2, %v8411_v29  ;;  %v8413_v58 = vmul.f32 %v12483_v27, %v15710_v19 }
0x11e5   : > { %12494 = vrcp.f32 %v8331_v25  ;;  %v8328_v45 = vpop.xlane.xlu0 %8327  ;;  %v8412_v54 = vmul.f32 %v12485_v40, %v15712_v52 }
0x11e6   : > { %12496 = vrcp.f32 %v8328_v45 }
0x11e7   : > { %v12487_v55 = vpop.eup %12486  ;;  %11485 = vmatprep.mubr.msk.f32.mxu1 %vm8079_vm2, %v8412_v54 }
0x11e8   : > { %v12489_v31 = vpop.eup %12488  ;;  %v8337_v63 = vpop.xlane.xlu1 %8336  ;;  %11486 = vmatmul.mubr.msk.f32.gmra.mrb[18].mxu1 %vm8079_vm2, %v8413_v58  ;;  %v8415_v6 = vmul.f32 %v12487_v55, %v15720_v35 }
0x11e9   : > { %12498 = vrcp.f32 %v8337_v63  ;;  %v8334_v14 = vpop.xlane.xlu0 %8333  ;;  %v8414_v49 = vmul.f32 %v12489_v31, %v15722_v17 }
0x11ea   : > { %12500 = vrcp.f32 %v8334_v14 }
0x11eb   : > { %v12491_v62 = vpop.eup %12490  ;;  %11488 = vmatprep.mubr.msk.f32.mxu1 %vm8079_vm2, %v8414_v49 }
0x11ec   : > { %v12493_v52 = vpop.eup %12492  ;;  %v8343_v19 = vpop.xlane.xlu1 %8342  ;;  %11489 = vmatmul.mubr.msk.f32.gmra.mrb[20].mxu1 %vm8079_vm2, %v8415_v6  ;;  %v8417_v50 = vmul.f32 %v12491_v62, %v15730_v22 }
0x11ed   : > { %12502 = vrcp.f32 %v8343_v19  ;;  %v8340_v11 = vpop.xlane.xlu0 %8339  ;;  %v8416_v13 = vmul.f32 %v12493_v52, %v15732_v37 }
0x11ee   : > { %12504 = vrcp.f32 %v8340_v11 }
0x11ef   : > { %v12495_v5 = vpop.eup %12494  ;;  %11491 = vmatprep.mubr.msk.f32.mxu1 %vm8079_vm2, %v8416_v13 }
0x11f0   : > { %v12497_v17 = vpop.eup %12496  ;;  %v8349_v35 = vpop.xlane.xlu1 %8348  ;;  %11492 = vmatmul.mubr.msk.f32.gmra.mrb[22].mxu1 %vm8079_vm2, %v8417_v50  ;;  %v8419_v18 = vmul.f32 %v12495_v5, %v15740_v2 }
0x11f1   : > { %12506 = vrcp.f32 %v8349_v35  ;;  %v8346_v53 = vpop.xlane.xlu0 %8345  ;;  %v8418_v26 = vmul.f32 %v12497_v17, %v15742_v20 }
0x11f2   : > { %12508 = vrcp.f32 %v8346_v53 }
0x11f3   : > { %v12499_v59 = vpop.eup %12498  ;;  %11494 = vmatprep.mubr.msk.f32.mxu1 %vm8079_vm2, %v8418_v26 }
0x11f4   : > { %v12501_v37 = vpop.eup %12500  ;;  %v8355_v22 = vpop.xlane.xlu1 %8354  ;;  %11495 = vmatmul.mubr.msk.f32.gmra.mrb[24].mxu1 %vm8079_vm2, %v8419_v18  ;;  %v8421_v47 = vmul.f32 %v12499_v59, %v15750_v46 }
0x11f5   : > { %12510 = vrcp.f32 %v8355_v22  ;;  %v8352_v41 = vpop.xlane.xlu0 %8351  ;;  %v8420_v30 = vmul.f32 %v12501_v37, %v15752_v39 }
0x11f6   : > { %12512 = vrcp.f32 %v8352_v41 }
0x11f7   : > { %v12503_v57 = vpop.eup %12502  ;;  %11497 = vmatprep.mubr.msk.f32.mxu1 %vm8079_vm2, %v8420_v30 }
0x11f8   : > { %v12505_v20 = vpop.eup %12504  ;;  %v8361_v2 = vpop.xlane.xlu1 %8360  ;;  %11498 = vmatmul.mubr.msk.f32.gmra.mrb[26].mxu1 %vm8079_vm2, %v8421_v47  ;;  %v8423_v40 = vmul.f32 %v12503_v57, %v15760_v60 }
0x11f9   : > { %12514 = vrcp.f32 %v8361_v2  ;;  %v8358_v29 = vpop.xlane.xlu0 %8357  ;;  %v8422_v27 = vmul.f32 %v12505_v20, %v15762_v61 }
0x11fa   : > { %12516 = vrcp.f32 %v8358_v29 }
0x11fb   : > { %v12507_v25 = vpop.eup %12506  ;;  %11500 = vmatprep.mubr.msk.f32.mxu1 %vm8079_vm2, %v8422_v27 }
0x11fc   : > { %v12509_v39 = vpop.eup %12508  ;;  %v8367_v46 = vpop.xlane.xlu1 %8366  ;;  %11501 = vmatmul.mubr.msk.f32.gmra.mrb[28].mxu1 %vm8079_vm2, %v8423_v40  ;;  %v8425_v58 = vmul.f32 %v12507_v25, %v15770_v16 }
0x11fd   : > { %12518 = vrcp.f32 %v8367_v46  ;;  %v8364_v45 = vpop.xlane.xlu0 %8363  ;;  %v8424_v54 = vmul.f32 %v12509_v39, %v15772_v0 }
0x11fe   : > { %12520 = vrcp.f32 %v8364_v45 }
0x11ff   : > { %v12511_v55 = vpop.eup %12510  ;;  %11503 = vmatprep.mubr.msk.f32.mxu1 %vm8079_vm2, %v8424_v54 }
0x1200   : > { %v12513_v61 = vpop.eup %12512  ;;  %11504 = vmatmul.mubr.msk.f32.gmra.mrb[30].mxu1 %vm8079_vm2, %v8425_v58  ;;  %v8427_v31 = vmul.f32 %v12511_v55, %v15778_v9 }
0x1201   : > { %v8426_v60 = vmul.f32 %v12513_v61, %v15780_v38 }
0x1203   : > { %v12515_v63 = vpop.eup %12514  ;;  %11506 = vmatprep.mubr.msk.f32.mxu1 %vm8079_vm2, %v8426_v60  ;;  %v16130_v60 = vld [vmem:[#allocation14_spill] sm:$0xff] }
0x1204   : > { %v12517_v14 = vpop.eup %12516  ;;  %11507 = vmatmul.mubr.msk.f32.gmra.mrb[32].mxu1 %vm8079_vm2, %v8427_v31  ;;  %v8429_v16 = vmul.f32 %v12515_v63, %v15786_v56 }
0x1205   : > { %v8428_v0 = vmul.f32 %v12517_v14, %v15788_v4  ;;  %v11881_v4 = vld [vmem:[%s16055_s9 + $0x38] sm:$0xff]  }
0x1206   : > { %11529 = vmatprep.subr.bf16.mxu0 %v11881_v4 }
0x1207   : > { %v12519_v49 = vpop.eup %12518  ;;  %11509 = vmatprep.mubr.msk.f32.mxu1 %vm8079_vm2, %v8428_v0  ;;  %11530 = vmatpush3.bf16.msra.mxu0 %v11881_v4  ;;  %v16134_v4 = vld [vmem:[#allocation18_spill] sm:$0xff] }
0x1208   : > { %v12521_v6 = vpop.eup %12520  ;;  %11510 = vmatmul.mubr.msk.f32.gmra.mrb[34].mxu1 %vm8079_vm2, %v8429_v16  ;;  %v8431_v9 = vmul.f32 %v12519_v49, %v15794_v32  ;;  %v16132_v16 = vld [vmem:[#allocation13_spill] sm:$0xff] }
0x1209   : > { %v8430_v38 = vmul.f32 %v12521_v6, %v15796_v15 }
0x120b   : > { %11512 = vmatprep.mubr.msk.f32.mxu1 %vm8079_vm2, %v8430_v38 }
0x120c   : > { %11513 = vmatmul.mubr.msk.f32.gmra.mrb[36].mxu1 %vm8079_vm2, %v8431_v9 }
0x12a3   : > { %v11469_v56 = vpop.f32.mrb[230].mxu1 }
0x12a4   : > { %v8759_v62 = vmul.f32 %v11469_v56, %v15274_v21  ;;  %v8599_v52 = vpop.f32.mrb[231].mxu1 }
0x12a5   : > { %v8758_v19 = vmul.f32 %v8599_v52, %v15277_v8 }
0x12a7   : > { %v8790_v11 = vpack.c.bf16 %v8759_v62, %v8758_v19  ;;  %v11472_v15 = vpop.f32.mrb[8].mxu1  ;;  %v16135_v19 = vld [vmem:[#allocation15_spill] sm:$0xff] }
0x12a8   : > { %v8761_v32 = vmul.f32 %v11472_v15, %v15282_v12  ;;  %v8609_v13 = vpop.f32.mrb[9].mxu1 }
0x12a9   : > { %v8760_v50 = vmul.f32 %v8609_v13, %v15291_v34  ;;  %11531 = vmatprep.mubr.bf16.mxu0 %v8790_v11 }
0x12ab   : > { %v8791_v5 = vpack.c.bf16 %v8761_v32, %v8760_v50  ;;  %v11475_v17 = vpop.f32.mrb[10].mxu1  ;;  %v16136_v32 = vld [vmem:[#allocation17_spill] sm:$0xff] }
0x12ac   : > { %v8763_v35 = vmul.f32 %v11475_v17, %v15296_v36  ;;  %v8619_v53 = vpop.f32.mrb[11].mxu1  ;;  %v16137_v17 = vld [vmem:[#allocation20_spill] sm:$0xff] }
0x12ad   : > { %v8762_v26 = vmul.f32 %v8619_v53, %v15299_v42  ;;  %11532 = vmatmul.mubr.bf16.vlgmr.msra.gmra.mrb[92].mxu0 %v8791_v5 }
0x12af   : > { %v8792_v21 = vpack.c.bf16 %v8763_v35, %v8762_v26  ;;  %v11478_v18 = vpop.f32.mrb[12].mxu1  ;;  %v16138_v26 = vld [vmem:[#allocation22_spill] sm:$0xff] }
0x12b0   : > { %v8765_v8 = vmul.f32 %v11478_v18, %v15304_v28  ;;  %v8629_v59 = vpop.f32.mrb[13].mxu1 }
0x12b1   : > { %v8764_v37 = vmul.f32 %v8629_v59, %v15307_v33  ;;  %11535 = vmatprep.mubr.bf16.mxu0 %v8792_v21  ;;  %v16139_v59 = vld [vmem:[#allocation19_spill] sm:$0xff] }
0x12b3   : > { %v8793_v12 = vpack.c.bf16 %v8765_v8, %v8764_v37  ;;  %v11481_v22 = vpop.f32.mrb[14].mxu1 }
0x12b4   : > { %v8767_v34 = vmul.f32 %v11481_v22, %v15312_v43  ;;  %v8639_v41 = vpop.f32.mrb[15].mxu1  ;;  %v16140_v22 = vld [vmem:[#allocation21_spill] sm:$0xff] }
0x12b5   : > { %v8766_v30 = vmul.f32 %v8639_v41, %v15315_v24  ;;  %11536 = vmatmul.mubr.bf16.gmra.mrb[96].mxu0 %v8793_v12 }
0x12b7   : > { %v8794_v36 = vpack.c.bf16 %v8767_v34, %v8766_v30  ;;  %v11484_v47 = vpop.f32.mrb[16].mxu1 }
0x12b8   : > { %v8769_v42 = vmul.f32 %v11484_v47, %v15320_v1  ;;  %v8649_v57 = vpop.f32.mrb[17].mxu1 }
0x12b9   : > { %v8768_v20 = vmul.f32 %v8649_v57, %v15323_v23  ;;  %11539 = vmatprep.mubr.bf16.mxu0 %v8794_v36  ;;  %v16141_v36 = vld [vmem:[#allocation24_spill] sm:$0xff]  ;;  %v16142_v57 = vld [vmem:[#allocation26_spill] sm:$0xff] }
0x12bb   : > { %v8795_v28 = vpack.c.bf16 %v8769_v42, %v8768_v20  ;;  %v11487_v2 = vpop.f32.mrb[18].mxu1 }
0x12bc   : > { %v8771_v33 = vmul.f32 %v11487_v2, %v15328_v10  ;;  %v8659_v29 = vpop.f32.mrb[19].mxu1  ;;  %v16143_v2 = vld [vmem:[#allocation10_spill] sm:$0xff] }
0x12bd   : > { %v8770_v27 = vmul.f32 %v8659_v29, %v15331_v7  ;;  %11540 = vmatmul.mubr.bf16.gmra.mrb[100].mxu0 %v8795_v28  ;;  %v16129_v7 = vld [vmem:[#allocation12_spill] sm:$0xff]  ;;  %v12684_v29 = vld [vmem:[%s16056_s10] sm:$0xff] }
0x12bf   : > { %v8796_v43 = vpack.c.bf16 %v8771_v33, %v8770_v27  ;;  %v11490_v40 = vpop.f32.mrb[20].mxu1  ;;  %v8824_v33 = vsub.s32 6, %v16143_v2 }
0x12c0   : > { %v8773_v24 = vmul.f32 %v11490_v40, %v15336_v48  ;;  %v8669_v25 = vpop.f32.mrb[21].mxu1 }
0x12c1   : > { %v8772_v39 = vmul.f32 %v8669_v25, %v15339_v44  ;;  %11543 = vmatprep.mubr.bf16.mxu0 %v8796_v43  ;;  %v16131_v44 = vld [vmem:[#allocation11_spill] sm:$0xff]  ;;  %v15926_v27 = vrot.slane %v12684_v29, %v8824_v33 }
0x12c3   : > { %v8797_v1 = vpack.c.bf16 %v8773_v24, %v8772_v39  ;;  %v11493_v46 = vpop.f32.mrb[22].mxu1 }
0x12c4   : > { %v8775_v23 = vmul.f32 %v11493_v46, %v15344_v51  ;;  %v8679_v45 = vpop.f32.mrb[23].mxu1 }
0x12c5   : > { %v8774_v54 = vmul.f32 %v8679_v45, %v15347_v3  ;;  %11544 = vmatmul.mubr.bf16.gmra.mrb[104].mxu0 %v8797_v1  ;;  %v16133_v3 = vld [vmem:[#allocation16_spill] sm:$0xff] }
0x12c7   : > { %v8798_v10 = vpack.c.bf16 %v8775_v23, %v8774_v54  ;;  %v11496_v58 = vpop.f32.mrb[24].mxu1 }
0x12c8   : > { %v8777_v55 = vmul.f32 %v11496_v58, %v16129_v7  ;;  %v8689_v61 = vpop.f32.mrb[25].mxu1 }
0x12c9   : > { %v8776_v31 = vmul.f32 %v8689_v61, %v16130_v60  ;;  %11547 = vmatprep.mubr.bf16.mxu0 %v8798_v10 }
0x12cb   : > { %v8799_v48 = vpack.c.bf16 %v8777_v55, %v8776_v31  ;;  %v11499_v63 = vpop.f32.mrb[26].mxu1 }
0x12cc   : > { %v8779_v14 = vmul.f32 %v11499_v63, %v16131_v44  ;;  %v8699_v0 = vpop.f32.mrb[27].mxu1 }
0x12cd   : > { %v8778_v49 = vmul.f32 %v8699_v0, %v16132_v16  ;;  %11548 = vmatmul.mubr.bf16.gmra.mrb[108].mxu0 %v8799_v48 }
0x12cf   : > { %v8800_v51 = vpack.c.bf16 %v8779_v14, %v8778_v49  ;;  %v11502_v6 = vpop.f32.mrb[28].mxu1 }
0x12d0   : > { %v8781_v38 = vmul.f32 %v11502_v6, %v16133_v3  ;;  %v8709_v9 = vpop.f32.mrb[29].mxu1 }
0x12d1   : > { %v8780_v56 = vmul.f32 %v8709_v9, %v16134_v4  ;;  %11551 = vmatprep.mubr.bf16.mxu0 %v8800_v51 }
0x12d3   : > { %v8801_v62 = vpack.c.bf16 %v8781_v38, %v8780_v56  ;;  %v11505_v52 = vpop.f32.mrb[30].mxu1 }
0x12d4   : > { %v8783_v11 = vmul.f32 %v11505_v52, %v16135_v19  ;;  %v8719_v15 = vpop.f32.mrb[31].mxu1 }
0x12d5   : > { %v8782_v13 = vmul.f32 %v8719_v15, %v16136_v32  ;;  %11552 = vmatmul.mubr.bf16.gmra.mrb[112].mxu0 %v8801_v62 }
0x12d7   : > { %v8802_v50 = vpack.c.bf16 %v8783_v11, %v8782_v13  ;;  %v11508_v5 = vpop.f32.mrb[32].mxu1 }
0x12d8   : > { %v8785_v35 = vmul.f32 %v11508_v5, %v16137_v17  ;;  %v8729_v53 = vpop.f32.mrb[33].mxu1 }
0x12d9   : > { %v8784_v21 = vmul.f32 %v8729_v53, %v16138_v26  ;;  %11555 = vmatprep.mubr.bf16.mxu0 %v8802_v50 }
0x12db   : > { %v8803_v18 = vpack.c.bf16 %v8785_v35, %v8784_v21  ;;  %v11511_v8 = vpop.f32.mrb[34].mxu1 }
0x12dc   : > { %v8787_v37 = vmul.f32 %v11511_v8, %v16139_v59  ;;  %v8739_v12 = vpop.f32.mrb[35].mxu1 }
0x12dd   : > { %v8786_v34 = vmul.f32 %v8739_v12, %v16140_v22  ;;  %11556 = vmatmul.mubr.bf16.gmra.mrb[116].mxu0 %v8803_v18 }
0x12df   : > { %v8804_v41 = vpack.c.bf16 %v8787_v37, %v8786_v34  ;;  %v11514_v30 = vpop.f32.mrb[36].mxu1 }
0x12e0   : > { %v8789_v47 = vmul.f32 %v11514_v30, %v16141_v36  ;;  %v8749_v42 = vpop.f32.mrb[37].mxu1 }
0x12e1   : > { %v8788_v20 = vmul.f32 %v8749_v42, %v16142_v57  ;;  %11559 = vmatprep.mubr.bf16.mxu0 %v8804_v41 }
0x12e3   : > { %v8805_v28 = vpack.c.bf16 %v8789_v47, %v8788_v20 }
0x12e5   : > { %11560 = vmatmul.mubr.bf16.gmra.mrb[120].mxu0 %v8805_v28 }
0x1380   : > { %v11533_v43 = vpop.f32.mrb[92].mxu0 }
0x1381   : > { %v8917_v40 = vadd.f32 %v11533_v43, %v15926_v27  ;;  %v8908_v24 = vpop.f32.mrb[93].mxu0 }
0x1382   : > { %v8909_v25 = vadd.f32 %v8908_v24, %v15926_v27  ;;  %v11534_v39 = vpop.f32.mrb[94].mxu0 }
0x1383   : > { %v9037_v1 = vmax.f32 %v8917_v40, 0.0  ;;  %v8920_v46 = vadd.f32 %v11534_v39, %v15926_v27  ;;  %v8911_v23 = vpop.f32.mrb[95].mxu0 }
0x1384   : > { %v9035_v45 = vmax.f32 %v8909_v25, 0.0  ;;  %v8912_v54 = vadd.f32 %v8911_v23, %v15926_v27 }
0x1385   : > { %9069 = vst [vmem:[%s15933_s14 + $0x10] sm:$0xff] %v9037_v1  ;;  %v9038_v10 = vmax.f32 %v8920_v46, 0.0 }
0x1386   : > { %9067 = vst [vmem:[%s15933_s14] sm:$0xff] %v9035_v45  ;;  %v9036_v58 = vmax.f32 %v8912_v54, 0.0 }
0x1387   : > { %9070 = vst [vmem:[%s15933_s14 + $0x18] sm:$0xff] %v9038_v10 }
0x1388   : > { %9068 = vst [vmem:[%s15933_s14 + $0x8] sm:$0xff] %v9036_v58  ;;  %v11537_v7 = vpop.f32.mrb[96].mxu0 }
0x1389   : > { %v8933_v55 = vadd.f32 %v11537_v7, %v15926_v27  ;;  %v8924_v61 = vpop.f32.mrb[97].mxu0 }
0x138a   : > { %v8925_v60 = vadd.f32 %v8924_v61, %v15926_v27  ;;  %v11538_v31 = vpop.f32.mrb[98].mxu0 }
0x138b   : > { %v9041_v48 = vmax.f32 %v8933_v55, 0.0  ;;  %v8936_v63 = vadd.f32 %v11538_v31, %v15926_v27  ;;  %v8927_v44 = vpop.f32.mrb[99].mxu0 }
0x138c   : > { %v9039_v14 = vmax.f32 %v8925_v60, 0.0  ;;  %v8928_v0 = vadd.f32 %v8927_v44, %v15926_v27 }
0x138d   : > { %9073 = vst [vmem:[%s15933_s14 + $0x30] sm:$0xff] %v9041_v48  ;;  %v9042_v16 = vmax.f32 %v8936_v63, 0.0 }
0x138e   : > { %9071 = vst [vmem:[%s15933_s14 + $0x20] sm:$0xff] %v9039_v14  ;;  %v9040_v49 = vmax.f32 %v8928_v0, 0.0 }
0x138f   : > { %9074 = vst [vmem:[%s15933_s14 + $0x38] sm:$0xff] %v9042_v16 }
0x1390   : > { %9072 = vst [vmem:[%s15933_s14 + $0x28] sm:$0xff] %v9040_v49  ;;  %v11541_v51 = vpop.f32.mrb[100].mxu0 }
0x1391   : > { %v8949_v6 = vadd.f32 %v11541_v51, %v15926_v27  ;;  %v8940_v3 = vpop.f32.mrb[101].mxu0 }
0x1392   : > { %v8941_v38 = vadd.f32 %v8940_v3, %v15926_v27  ;;  %v11542_v9 = vpop.f32.mrb[102].mxu0 }
0x1393   : > { %v9045_v4 = vmax.f32 %v8949_v6, 0.0  ;;  %v8952_v56 = vadd.f32 %v11542_v9, %v15926_v27  ;;  %v8943_v62 = vpop.f32.mrb[103].mxu0 }
0x1394   : > { %v9043_v52 = vmax.f32 %v8941_v38, 0.0  ;;  %v8944_v19 = vadd.f32 %v8943_v62, %v15926_v27 }
0x1395   : > { %9077 = vst [vmem:[%s15933_s14 + $0x50] sm:$0xff] %v9045_v4  ;;  %v9046_v11 = vmax.f32 %v8952_v56, 0.0 }
0x1396   : > { %9075 = vst [vmem:[%s15933_s14 + $0x40] sm:$0xff] %v9043_v52  ;;  %v9044_v15 = vmax.f32 %v8944_v19, 0.0 }
0x1397   : > { %9078 = vst [vmem:[%s15933_s14 + $0x58] sm:$0xff] %v9046_v11 }
0x1398   : > { %9076 = vst [vmem:[%s15933_s14 + $0x48] sm:$0xff] %v9044_v15  ;;  %v11545_v32 = vpop.f32.mrb[104].mxu0 }
0x1399   : > { %v8965_v13 = vadd.f32 %v11545_v32, %v15926_v27  ;;  %v8956_v50 = vpop.f32.mrb[105].mxu0 }
0x139a   : > { %v8957_v5 = vadd.f32 %v8956_v50, %v15926_v27  ;;  %v11546_v17 = vpop.f32.mrb[106].mxu0 }
0x139b   : > { %v9049_v35 = vmax.f32 %v8965_v13, 0.0  ;;  %v8968_v53 = vadd.f32 %v11546_v17, %v15926_v27  ;;  %v8959_v26 = vpop.f32.mrb[107].mxu0 }
0x139c   : > { %v9047_v21 = vmax.f32 %v8957_v5, 0.0  ;;  %v8960_v18 = vadd.f32 %v8959_v26, %v15926_v27 }
0x139d   : > { %9081 = vst [vmem:[%s15933_s14 + $0x70] sm:$0xff] %v9049_v35  ;;  %v9050_v8 = vmax.f32 %v8968_v53, 0.0 }
0x139e   : > { %9079 = vst [vmem:[%s15933_s14 + $0x60] sm:$0xff] %v9047_v21  ;;  %v9048_v59 = vmax.f32 %v8960_v18, 0.0 }
0x139f   : > { %9082 = vst [vmem:[%s15933_s14 + $0x78] sm:$0xff] %v9050_v8 }
0x13a0   : > { %9080 = vst [vmem:[%s15933_s14 + $0x68] sm:$0xff] %v9048_v59  ;;  %v11549_v37 = vpop.f32.mrb[108].mxu0 }
0x13a1   : > { %v8981_v12 = vadd.f32 %v11549_v37, %v15926_v27  ;;  %v8972_v22 = vpop.f32.mrb[109].mxu0 }
0x13a2   : > { %v8973_v34 = vadd.f32 %v8972_v22, %v15926_v27  ;;  %v11550_v41 = vpop.f32.mrb[110].mxu0 }
0x13a3   : > { %v9053_v30 = vmax.f32 %v8981_v12, 0.0  ;;  %v8984_v36 = vadd.f32 %v11550_v41, %v15926_v27  ;;  %v8975_v47 = vpop.f32.mrb[111].mxu0 }
0x13a4   : > { %v9051_v42 = vmax.f32 %v8973_v34, 0.0  ;;  %v8976_v57 = vadd.f32 %v8975_v47, %v15926_v27 }
0x13a5   : > { %9085 = vst [vmem:[%s15933_s14 + $0x90] sm:$0xff] %v9053_v30  ;;  %v9054_v20 = vmax.f32 %v8984_v36, 0.0 }
0x13a6   : > { %9083 = vst [vmem:[%s15933_s14 + $0x80] sm:$0xff] %v9051_v42  ;;  %v9052_v28 = vmax.f32 %v8976_v57, 0.0 }
0x13a7   : > { %9086 = vst [vmem:[%s15933_s14 + $0x98] sm:$0xff] %v9054_v20 }
0x13a8   : > { %9084 = vst [vmem:[%s15933_s14 + $0x88] sm:$0xff] %v9052_v28  ;;  %v11553_v2 = vpop.f32.mrb[112].mxu0 }
0x13a9   : > { %v8997_v33 = vadd.f32 %v11553_v2, %v15926_v27  ;;  %v8988_v29 = vpop.f32.mrb[113].mxu0 }
0x13aa   : > { %v8989_v43 = vadd.f32 %v8988_v29, %v15926_v27  ;;  %v11554_v40 = vpop.f32.mrb[114].mxu0 }
0x13ab   : > { %v9057_v24 = vmax.f32 %v8997_v33, 0.0  ;;  %v9000_v25 = vadd.f32 %v11554_v40, %v15926_v27  ;;  %v8991_v39 = vpop.f32.mrb[115].mxu0 }
0x13ac   : > { %v9055_v1 = vmax.f32 %v8989_v43, 0.0  ;;  %v8992_v46 = vadd.f32 %v8991_v39, %v15926_v27 }
0x13ad   : > { %9089 = vst [vmem:[%s15933_s14 + $0xb0] sm:$0xff] %v9057_v24  ;;  %v9058_v23 = vmax.f32 %v9000_v25, 0.0 }
0x13ae   : > { %9087 = vst [vmem:[%s15933_s14 + $0xa0] sm:$0xff] %v9055_v1  ;;  %v9056_v45 = vmax.f32 %v8992_v46, 0.0 }
0x13af   : > { %9090 = vst [vmem:[%s15933_s14 + $0xb8] sm:$0xff] %v9058_v23 }
0x13b0   : > { %9088 = vst [vmem:[%s15933_s14 + $0xa8] sm:$0xff] %v9056_v45  ;;  %v11557_v54 = vpop.f32.mrb[116].mxu0 }
0x13b1   : > { %v9013_v10 = vadd.f32 %v11557_v54, %v15926_v27  ;;  %v9004_v58 = vpop.f32.mrb[117].mxu0 }
0x13b2   : > { %v9005_v7 = vadd.f32 %v9004_v58, %v15926_v27  ;;  %v11558_v55 = vpop.f32.mrb[118].mxu0 }
0x13b3   : > { %v9061_v61 = vmax.f32 %v9013_v10, 0.0  ;;  %v9016_v60 = vadd.f32 %v11558_v55, %v15926_v27  ;;  %v9007_v31 = vpop.f32.mrb[119].mxu0 }
0x13b4   : > { %v9059_v48 = vmax.f32 %v9005_v7, 0.0  ;;  %v9008_v63 = vadd.f32 %v9007_v31, %v15926_v27 }
0x13b5   : > { %9093 = vst [vmem:[%s15933_s14 + $0xd0] sm:$0xff] %v9061_v61  ;;  %v9062_v44 = vmax.f32 %v9016_v60, 0.0 }
0x13b6   : > { %9091 = vst [vmem:[%s15933_s14 + $0xc0] sm:$0xff] %v9059_v48  ;;  %v9060_v14 = vmax.f32 %v9008_v63, 0.0 }
0x13b7   : > { %9094 = vst [vmem:[%s15933_s14 + $0xd8] sm:$0xff] %v9062_v44 }
0x13b8   : > { %9092 = vst [vmem:[%s15933_s14 + $0xc8] sm:$0xff] %v9060_v14  ;;  %v11561_v0 = vpop.f32.mrb[120].mxu0 }
0x13b9   : > { %v9029_v16 = vadd.f32 %v11561_v0, %v15926_v27  ;;  %v9020_v49 = vpop.f32.mrb[121].mxu0 }
0x13ba   : > { %v9021_v51 = vadd.f32 %v9020_v49, %v15926_v27  ;;  %v11562_v6 = vpop.f32.mrb[122].mxu0 }
0x13bb   : > { %v9065_v3 = vmax.f32 %v9029_v16, 0.0  ;;  %v9032_v38 = vadd.f32 %v11562_v6, %v15926_v27  ;;  %v9023_v9 = vpop.f32.mrb[123].mxu0 }
0x13bc   : > { %v9063_v4 = vmax.f32 %v9021_v51, 0.0  ;;  %v9024_v56 = vadd.f32 %v9023_v9, %v15926_v27 }
0x13bd   : > { %9097 = vst [vmem:[%s15933_s14 + $0xf0] sm:$0xff] %v9065_v3  ;;  %v9066_v62 = vmax.f32 %v9032_v38, 0.0 }
0x13be   : > { %9095 = vst [vmem:[%s15933_s14 + $0xe0] sm:$0xff] %v9063_v4  ;;  %v9064_v52 = vmax.f32 %v9024_v56, 0.0 }
0x13bf   : > { %9098 = vst [vmem:[%s15933_s14 + $0xf8] sm:$0xff] %v9066_v62 }
0x13c0   : > { %9096 = vst [vmem:[%s15933_s14 + $0xe8] sm:$0xff] %v9064_v52 }
0x13c1   : > { %12728 = shalt.err (!%p12725_p2)
}
0x13c2   : > { %s12729_s28 = scalar_lea.hbm %s15997_s26, 4096  ;;  %s12733_s13 = scalar_lea.hbm %s16057_s11, 8192 }
0x13c3   : > { %p12730_p4 = scmp.ne.s32.totalorder %s15997_s26, %s12729_s28  ;;  %p12734_p9 = scmp.lt.u32.totalorder %s15997_s26, %s16057_s11 }
0x13c4   : > { %p12735_p1 = scmp.lt.u32.totalorder %s12733_s13, %s12729_s28  ;;  %p12737_p6 = scmp.lt.u32.totalorder %s12729_s28, %s15997_s26 }
0x13c5   : > { %p12731_p5 = pnand %p12730_p4, %p16144_p11 }
0x13c6   : > { %p12736_p3 = por %p12735_p1, %p12734_p9 }
0x13c7   : > { %p12732_p7 = pneg %p12731_p5 }
0x13c8   : > { %p12738_p12 = por %p12737_p6, %p12736_p3 }
0x13ca   : > { %p12739_p13 = pnand %p12738_p12, %p12732_p7 }
0x13cc   : > { %12742 = shalt.err (!%p12739_p13)
}
0x13cd   : > { %s12787_s24 = smov 128   ;;  %s12788_s16 = smov 8  }
0x13ce   : > { %11719 = dma.vmem_to_hbm [thread:$0]  (%p16144_p11), %s15999_s12, 4096, %s15997_s26, %s9100_s21, %s12787_s24, %s12787_s24, %s12788_s16  }
0x13cf PF: > { %s9128_s15 = sand.u32 1, %s12769_s17   ;;  %p16145_p8 = scmp.ne.s32.totalorder %s16080_s30, 0 }
0x13d0   : > { %p16146_p10 = scmp.ge.s32.totalorder %s12781_s20, 2  ;;  %s9129_s28 = scalar_lea.sflag [#allocation4], %s9128_s15 }
0x13d2   : > { %p11726_p0 = pnand %p16146_p10, %p16145_p8 }
0x13d4   : > { %12764 = dma.done.wait (!%p11726_p0), %s9129_s28, 4096  }
0x13d5   : > { %12766 = vsyncadd (!%p11726_p0), %s9129_s28, 4294963200  ;;  %s16147_s14 = sld [smem:[#allocation8_spill]]  ;;  %s16148_s19 = sld [smem:[#allocation9_spill]] }
0x13d6   : > { %p24_p2 = scmp.ge.s32.totalorder %s12874_s23, 4   ;;  %s16149_s17 = smov %s12773_s18 }
0x13d7   : > { %s16151_s20 = smov %s12874_s23 }
0x13d8   :  { %26 = sbr.rel (!%p24_p2) target bundleno = 5 (0x5), region = 116 }
0x13db   : > { %s16150_s18 = smov %s16147_s14 }
0x13df   :  { %9134 = vsyncpa [#allocation3], 1 }
0x13e0   :  { %9136 = vsyncpa [#allocation3 + $0x1], 1 }
0x13e1   :  { %9137 = vsyncpa [#allocation4], 1 }
0x13e2   :  { %9139 = vsyncpa [#allocation4 + $0x1], 1 }

</bundles_post_ra>
